<compile_context>
chip_gen: v7x
topology: tpu7x:2x2x1
jax: 0.10.0
libtpu: 0.0.40
codegen_flags: <defaults>
</compile_context>

<pallas_src>
import functools

import numpy as np
import jax
import jax.numpy as jnp
from jax.experimental import pallas as pl
from jax.experimental.pallas import tpu as pltpu


HEAD_HIDDEN = 256
HEAD_NAMES = ("action_type", "matrix_pos", "matrix_value", "param", "value")
N_HIDDEN_SPLIT = 2            # hidden-dim split / v7x megacore parallel axis

_VMEM = pl.BlockSpec(memory_space=pltpu.MemorySpace.VMEM)


def head_dims(matrix_size):
    return (4, matrix_size * matrix_size, 2, 2, 1)


# ----------------------------------------------------------------------------
# Small dense kernel used by the (tiny) conv path
# ----------------------------------------------------------------------------
def _matmul_bias_relu_kernel(x_ref, w_ref, b_ref, o_ref):
    """o = relu(x @ w + b).  Single full-array VMEM block (conv path is tiny)."""
    y = jnp.dot(x_ref[...], w_ref[...], preferred_element_type=jnp.float32)
    y = jnp.maximum(y + b_ref[...], 0.0)
    o_ref[...] = y.astype(o_ref.dtype)


def pallas_matmul_bias_relu(x, w, b, out_dtype=jnp.float32):
    m = x.shape[0]
    n = w.shape[1]
    return pl.pallas_call(
        _matmul_bias_relu_kernel,
        out_shape=jax.ShapeDtypeStruct((m, n), out_dtype),
        in_specs=[_VMEM, _VMEM, _VMEM],
        out_specs=_VMEM,
    )(x, w, b)


# ----------------------------------------------------------------------------
# Fused five-head kernel
#   x:(M,K) bf16 resident, w1:(K,1280) bf16 streamed in (tk, 640) blocks,
#   b1:(1,1280) f32, w2:(1280,128) bf16 block-diagonal, out:(M, 2*128) f32
#   (two partial hidden-half results, combined + b2 in the wrapper).
# Grid = (hidden_split [parallel], K_steps [arbitrary, innermost]).
# ----------------------------------------------------------------------------
def _fused_heads_kernel(x_ref, w1_ref, b1_ref, w2_ref, o_ref, acc_ref, *, tk):
    k = pl.program_id(1)

    @pl.when(k == 0)
    def _():
        acc_ref[...] = jnp.zeros_like(acc_ref)

    start = pl.multiple_of(k * tk, 128)
    acc_ref[...] += jnp.dot(x_ref[:, pl.ds(start, tk)], w1_ref[...],
                            preferred_element_type=jnp.float32)

    @pl.when(k == pl.num_programs(1) - 1)
    def _():
        h = jnp.maximum(acc_ref[...] + b1_ref[...], 0.0).astype(jnp.bfloat16)
        o_ref[...] = jnp.dot(h, w2_ref[...],
                             preferred_element_type=jnp.float32)


def _pick_k_tile(k_total, n_cols, bytes_per_elem=2, budget=12 * 1024 * 1024):
    """Largest multiple-of-128 divisor of k_total whose double-buffered
    (tk, n_cols) weight block stays under `budget` bytes."""
    assert k_total % 128 == 0, "contraction dim must be 128-aligned"
    best = 128
    for t in range(128, k_total + 1, 128):
        if k_total % t == 0 and 2 * t * n_cols * bytes_per_elem <= budget:
            best = t
    return best


def fused_heads(feats_bf16, w1, b1, w2, b2):
    m, k_total = feats_bf16.shape
    n_hidden = w1.shape[1]
    n_out = w2.shape[1]
    assert n_hidden % (N_HIDDEN_SPLIT * 128) == 0
    nh = n_hidden // N_HIDDEN_SPLIT                 # 640
    tk = _pick_k_tile(k_total, nh)                  # 3200 for K=6400
    k_steps = k_total // tk

    out = pl.pallas_call(
        functools.partial(_fused_heads_kernel, tk=tk),
        out_shape=jax.ShapeDtypeStruct((m, N_HIDDEN_SPLIT * n_out), jnp.float32),
        grid_spec=pltpu.PrefetchScalarGridSpec(
            num_scalar_prefetch=0,
            grid=(N_HIDDEN_SPLIT, k_steps),
            in_specs=[
                # feats: constant index_map -> fetched once, VMEM-resident.
                pl.BlockSpec((m, k_total), lambda p, k: (0, 0)),
                # w1 stream: (tk, nh) bf16 blocks, double-buffered.
                pl.BlockSpec((tk, nh), lambda p, k: (k, p)),
                pl.BlockSpec((1, nh), lambda p, k: (0, p)),
                pl.BlockSpec((nh, n_out), lambda p, k: (p, 0)),
            ],
            out_specs=pl.BlockSpec((m, n_out), lambda p, k: (0, p)),
            scratch_shapes=[pltpu.VMEM((m, nh), jnp.float32)],
        ),
        compiler_params=pltpu.CompilerParams(
            dimension_semantics=("parallel", "arbitrary"),
            vmem_limit_bytes=32 * 1024 * 1024),
    )(feats_bf16, w1, b1, w2)

    # Combine the two hidden-half partial sums and add the packed bias.
    logits = out.reshape(m, N_HIDDEN_SPLIT, n_out).sum(axis=1) + b2
    return logits


# ----------------------------------------------------------------------------
# Conv2d (3x3, stride 1, valid) via NHWC im2col (transpose-free) + Pallas matmul
# ----------------------------------------------------------------------------
def conv3x3_relu_nhwc(x_nhwc, w_mat, b, out_dtype=jnp.float32):
    """x:(N,H,W,C)  w_mat:(9*C,OC) rows ordered [kh,kw,c]  b:(1,OC)."""
    n, h, w, c = x_nhwc.shape
    oc = w_mat.shape[1]
    oh, ow = h - 2, w - 2
    patches = [x_nhwc[:, kh:kh + oh, kw:kw + ow, :]
               for kh in range(3) for kw in range(3)]
    p = jnp.concatenate(patches, axis=-1).reshape(n * oh * ow, 9 * c)
    y = pallas_matmul_bias_relu(p, w_mat, b, out_dtype=out_dtype)
    return y.reshape(n, oh, ow, oc)


# ----------------------------------------------------------------------------
# Parameter construction (canonical PyTorch-layout, deterministic synthetic)
# ----------------------------------------------------------------------------
def _init_linear(key, fan_in, fan_out, w_dtype=jnp.float32):
    kw, kb = jax.random.split(key)
    scale = 1.0 / np.sqrt(fan_in)
    w = jax.random.uniform(kw, (fan_in, fan_out), jnp.float32, -scale, scale)
    b = jax.random.uniform(kb, (1, fan_out), jnp.float32, -scale, scale)
    return w.astype(w_dtype), b


def _init_conv(key, in_c, out_c):
    kw, kb = jax.random.split(key)
    fan_in = in_c * 9
    scale = 1.0 / np.sqrt(fan_in)
    w = jax.random.uniform(kw, (out_c, in_c, 3, 3), jnp.float32, -scale, scale)
    b = jax.random.uniform(kb, (1, out_c), jnp.float32, -scale, scale)
    return w, b


def init_params(key, input_shape, matrix_size):
    c, h, w = input_shape
    conv_out = 64 * (h - 6) * (w - 6)
    keys = jax.random.split(key, 8)
    params = {
        "conv1": _init_conv(keys[0], c, 32),
        "conv2": _init_conv(keys[1], 32, 64),
        "conv3": _init_conv(keys[2], 64, 64),
    }
    for i, (name, od) in enumerate(zip(HEAD_NAMES, head_dims(matrix_size))):
        k1, k2 = jax.random.split(keys[3 + i])
        # Head weights stored in bf16 (weight-bandwidth bound path).
        w1, b1 = _init_linear(k1, conv_out, HEAD_HIDDEN, w_dtype=jnp.bfloat16)
        w2, b2 = _init_linear(k2, HEAD_HIDDEN, od, w_dtype=jnp.bfloat16)
        params[name] = (w1, b1, w2, b2)
    return params


def prepare_params(params, input_shape, matrix_size):
    """One-time conversion from PyTorch layout to kernel layout."""
    c, h, w = input_shape
    oh3, ow3, oc3 = h - 6, w - 6, 64

    def conv_mat(wb):
        wc, bc = wb
        # OIHW -> (KH,KW,IC,OC) -> (9*IC, OC): row order [kh,kw,c] matches the
        # NHWC im2col concat order.
        wm = jnp.transpose(wc, (2, 3, 1, 0)).reshape(-1, wc.shape[0])
        return wm.astype(jnp.float32), bc.astype(jnp.float32)

    kp = {
        "conv1": conv_mat(params["conv1"]),
        "conv2": conv_mat(params["conv2"]),
        "conv3": conv_mat(params["conv3"]),
    }

    # Fold torch .view(N,-1) (NCHW) flatten order into the head w1 rows:
    # NHWC flat index (h,w,c) must pick the torch row c*(OH*OW) + h*OW + w.
    hh, ww, cc = np.meshgrid(np.arange(oh3), np.arange(ow3), np.arange(oc3),
                             indexing="ij")
    perm = (cc * (oh3 * ow3) + hh * ow3 + ww).reshape(-1)

    dims = head_dims(matrix_size)
    total = sum(dims)
    n_hidden = HEAD_HIDDEN * len(dims)
    n_out = max(128, ((total + 127) // 128) * 128)   # lane-dense padded output

    w1s, b1s = [], []
    w2_blk = np.zeros((n_hidden, n_out), dtype=np.float32)
    b2_blk = np.zeros((1, n_out), dtype=np.float32)
    off = 0
    for i, (name, od) in enumerate(zip(HEAD_NAMES, dims)):
        w1, b1, w2, b2 = params[name]
        w1s.append(np.asarray(w1.astype(jnp.float32))[perm])       # permute rows
        b1s.append(np.asarray(b1, dtype=np.float32))
        w2_blk[i * HEAD_HIDDEN:(i + 1) * HEAD_HIDDEN, off:off + od] = \
            np.asarray(w2.astype(jnp.float32))
        b2_blk[:, off:off + od] = np.asarray(b2, dtype=np.float32)
        off += od

    kp["head_w1"] = jnp.asarray(np.concatenate(w1s, axis=1), dtype=jnp.bfloat16)
    kp["head_b1"] = jnp.asarray(np.concatenate(b1s, axis=1), dtype=jnp.float32)
    kp["head_w2"] = jnp.asarray(w2_blk, dtype=jnp.bfloat16)
    kp["head_b2"] = jnp.asarray(b2_blk, dtype=jnp.float32)
    return kp


# ----------------------------------------------------------------------------
# Forward pass (matches PPONetwork.forward)
# ----------------------------------------------------------------------------
@functools.partial(jax.jit, static_argnums=(2,))
def ppo_forward(kparams, x, matrix_size):
    # TODO(synk): for real throughput, batch observations so M >= 128 before
    #             calling this (amortizes the 16 MB head-weight stream).
    n = x.shape[0]
    xh = jnp.transpose(x, (0, 2, 3, 1))            # NCHW -> NHWC once (tiny)
    f = conv3x3_relu_nhwc(xh, *kparams["conv1"])
    f = conv3x3_relu_nhwc(f, *kparams["conv2"])
    f = conv3x3_relu_nhwc(f, *kparams["conv3"], out_dtype=jnp.bfloat16)
    # NHWC flatten; the NCHW (.view) permutation is already folded into head_w1.
    feats = f.reshape(n, -1)

    out = fused_heads(feats, kparams["head_w1"], kparams["head_b1"],
                      kparams["head_w2"], kparams["head_b2"])

    dims = head_dims(matrix_size)
    o = np.cumsum((0,) + dims)
    action_type_probs = jax.nn.softmax(out[:, o[0]:o[1]], axis=1)
    matrix_pos_probs = jax.nn.softmax(out[:, o[1]:o[2]], axis=1)
    matrix_value_probs = jax.nn.softmax(out[:, o[2]:o[3]], axis=1)
    param_mean = out[:, o[3]:o[3] + 1]
    param_std = jnp.exp(out[:, o[3] + 1:o[4]])
    state_value = out[:, o[4]:o[5]]
    return (action_type_probs, matrix_pos_probs, matrix_value_probs,
            param_mean, param_std, state_value)


# ----------------------------------------------------------------------------
# Pure-JAX reference for verification (PyTorch semantics, bf16 head weights)
# ----------------------------------------------------------------------------
def _ref_forward(params, x, matrix_size):
    def conv(a, wb):
        wc, bc = wb
        y = jax.lax.conv_general_dilated(
            a, wc, (1, 1), "VALID",
            dimension_numbers=("NCHW", "OIHW", "NCHW"))
        return jax.nn.relu(y + bc.reshape(1, -1, 1, 1))

    f = conv(x, params["conv1"])
    f = conv(f, params["conv2"])
    f = conv(f, params["conv3"])
    feats = f.reshape(x.shape[0], -1)
    feats_q = feats.astype(jnp.bfloat16).astype(jnp.float32)

    def head(name, softmax):
        w1, b1, w2, b2 = params[name]
        h = jax.nn.relu(feats_q @ w1.astype(jnp.float32) + b1)
        h_q = h.astype(jnp.bfloat16).astype(jnp.float32)
        y = h_q @ w2.astype(jnp.float32) + b2
        return jax.nn.softmax(y, axis=1) if softmax else y

    at = head("action_type", True)
    mp = head("matrix_pos", True)
    mv = head("matrix_value", True)
    po = head("param", False)
    pm, pls = jnp.split(po, 2, axis=1)
    sv = head("value", False)
    return at, mp, mv, pm, jnp.exp(pls), sv


if __name__ == "__main__":
    key = jax.random.PRNGKey(0)
    k_param, k_x = jax.random.split(key)

    input_shape = (4, 16, 16)   # (C, H, W)
    matrix_size = 4
    batch = 2

    params = init_params(k_param, input_shape, matrix_size)
    kparams = prepare_params(params, input_shape, matrix_size)
    x = jax.random.normal(k_x, (batch,) + input_shape, dtype=jnp.float32)

    outs = ppo_forward(kparams, x, matrix_size)
    outs = jax.block_until_ready(outs)

    refs = _ref_forward(params, x, matrix_size)
    for o, r in zip(outs, refs):
        assert o.shape == r.shape, (o.shape, r.shape)
        assert jnp.allclose(o, r, atol=3e-3, rtol=3e-3), "mismatch vs reference"

    print("KERNEL_OK")
</pallas_src>

<mosaic_0001>
module attributes {stable_mosaic.version = 11 : i64} {
  func.func @_matmul_bias_relu_kernel(%arg0: memref<392x36xf32, #tpu.memory_space<vmem>>, %arg1: memref<36x32xf32, #tpu.memory_space<vmem>>, %arg2: memref<1x32xf32, #tpu.memory_space<vmem>>, %arg3: memref<392x32xf32, #tpu.memory_space<vmem>>) attributes {dimension_semantics = [], scalar_prefetch = 0 : i64, scratch_operands = 0 : i64, tpu.core_type = #tpu.core_type<tc>} {
    %c0 = arith.constant 0 : index
    %c0_0 = arith.constant 0 : index
    %0 = vector.load %arg0[%c0, %c0_0] : memref<392x36xf32, #tpu.memory_space<vmem>>, vector<392x36xf32>
    %c0_1 = arith.constant 0 : index
    %c0_2 = arith.constant 0 : index
    %1 = vector.load %arg1[%c0_1, %c0_2] : memref<36x32xf32, #tpu.memory_space<vmem>>, vector<36x32xf32>
    %cst = arith.constant dense<0.000000e+00> : vector<392x32xf32>
    %2 = tpu.matmul %0, %1, %cst {dimension_numbers = #tpu.dot_dimension_numbers<[1], [0], [0], [1], [0, 0, 1, 1], [], []>} : vector<392x36xf32>, vector<36x32xf32>, vector<392x32xf32> -> vector<392x32xf32>
    %c0_3 = arith.constant 0 : index
    %c0_4 = arith.constant 0 : index
    %3 = vector.load %arg2[%c0_3, %c0_4] : memref<1x32xf32, #tpu.memory_space<vmem>>, vector<1x32xf32>
    %4 = vector.broadcast %3 : vector<1x32xf32> to vector<392x32xf32>
    %5 = arith.addf %2, %4 : vector<392x32xf32>
    %cst_5 = arith.constant 0.000000e+00 : f32
    %6 = vector.broadcast %cst_5 : f32 to vector<392x32xf32>
    %7 = arith.maximumf %5, %6 : vector<392x32xf32>
    %c0_6 = arith.constant 0 : index
    %c0_7 = arith.constant 0 : index
    %8 = vector.load %arg3[%c0_6, %c0_7] : memref<392x32xf32, #tpu.memory_space<vmem>>, vector<392x32xf32>
    tpu.vector_store %arg3[%c0_6, %c0_7], %7 {strides = array<i32>} : memref<392x32xf32, #tpu.memory_space<vmem>>, vector<392x32xf32>,
    return
  }
}

module attributes {stable_mosaic.version = 11 : i64} {
  func.func @_matmul_bias_relu_kernel(%arg0: memref<288x288xf32, #tpu.memory_space<vmem>>, %arg1: memref<288x64xf32, #tpu.memory_space<vmem>>, %arg2: memref<1x64xf32, #tpu.memory_space<vmem>>, %arg3: memref<288x64xf32, #tpu.memory_space<vmem>>) attributes {dimension_semantics = [], scalar_prefetch = 0 : i64, scratch_operands = 0 : i64, tpu.core_type = #tpu.core_type<tc>} {
    %c0 = arith.constant 0 : index
    %c0_0 = arith.constant 0 : index
    %0 = vector.load %arg0[%c0, %c0_0] : memref<288x288xf32, #tpu.memory_space<vmem>>, vector<288x288xf32>
    %c0_1 = arith.constant 0 : index
    %c0_2 = arith.constant 0 : index
    %1 = vector.load %arg1[%c0_1, %c0_2] : memref<288x64xf32, #tpu.memory_space<vmem>>, vector<288x64xf32>
    %cst = arith.constant dense<0.000000e+00> : vector<288x64xf32>
    %2 = tpu.matmul %0, %1, %cst {dimension_numbers = #tpu.dot_dimension_numbers<[1], [0], [0], [1], [0, 0, 1, 1], [], []>} : vector<288x288xf32>, vector<288x64xf32>, vector<288x64xf32> -> vector<288x64xf32>
    %c0_3 = arith.constant 0 : index
    %c0_4 = arith.constant 0 : index
    %3 = vector.load %arg2[%c0_3, %c0_4] : memref<1x64xf32, #tpu.memory_space<vmem>>, vector<1x64xf32>
    %4 = vector.broadcast %3 : vector<1x64xf32> to vector<288x64xf32>
    %5 = arith.addf %2, %4 : vector<288x64xf32>
    %cst_5 = arith.constant 0.000000e+00 : f32
    %6 = vector.broadcast %cst_5 : f32 to vector<288x64xf32>
    %7 = arith.maximumf %5, %6 : vector<288x64xf32>
    %c0_6 = arith.constant 0 : index
    %c0_7 = arith.constant 0 : index
    %8 = vector.load %arg3[%c0_6, %c0_7] : memref<288x64xf32, #tpu.memory_space<vmem>>, vector<288x64xf32>
    tpu.vector_store %arg3[%c0_6, %c0_7], %7 {strides = array<i32>} : memref<288x64xf32, #tpu.memory_space<vmem>>, vector<288x64xf32>,
    return
  }
}

module attributes {stable_mosaic.version = 11 : i64} {
  func.func @_matmul_bias_relu_kernel(%arg0: memref<200x576xf32, #tpu.memory_space<vmem>>, %arg1: memref<576x64xf32, #tpu.memory_space<vmem>>, %arg2: memref<1x64xf32, #tpu.memory_space<vmem>>, %arg3: memref<200x64xbf16, #tpu.memory_space<vmem>>) attributes {dimension_semantics = [], scalar_prefetch = 0 : i64, scratch_operands = 0 : i64, tpu.core_type = #tpu.core_type<tc>} {
    %c0 = arith.constant 0 : index
    %c0_0 = arith.constant 0 : index
    %0 = vector.load %arg0[%c0, %c0_0] : memref<200x576xf32, #tpu.memory_space<vmem>>, vector<200x576xf32>
    %c0_1 = arith.constant 0 : index
    %c0_2 = arith.constant 0 : index
    %1 = vector.load %arg1[%c0_1, %c0_2] : memref<576x64xf32, #tpu.memory_space<vmem>>, vector<576x64xf32>
    %cst = arith.constant dense<0.000000e+00> : vector<200x64xf32>
    %2 = tpu.matmul %0, %1, %cst {dimension_numbers = #tpu.dot_dimension_numbers<[1], [0], [0], [1], [0, 0, 1, 1], [], []>} : vector<200x576xf32>, vector<576x64xf32>, vector<200x64xf32> -> vector<200x64xf32>
    %c0_3 = arith.constant 0 : index
    %c0_4 = arith.constant 0 : index
    %3 = vector.load %arg2[%c0_3, %c0_4] : memref<1x64xf32, #tpu.memory_space<vmem>>, vector<1x64xf32>
    %4 = vector.broadcast %3 : vector<1x64xf32> to vector<200x64xf32>
    %5 = arith.addf %2, %4 : vector<200x64xf32>
    %cst_5 = arith.constant 0.000000e+00 : f32
    %6 = vector.broadcast %cst_5 : f32 to vector<200x64xf32>
    %7 = arith.maximumf %5, %6 : vector<200x64xf32>
    %8 = arith.truncf %7 : vector<200x64xf32> to vector<200x64xbf16>
    %c0_6 = arith.constant 0 : index
    %c0_7 = arith.constant 0 : index
    %9 = vector.load %arg3[%c0_6, %c0_7] : memref<200x64xbf16, #tpu.memory_space<vmem>>, vector<200x64xbf16>
    tpu.vector_store %arg3[%c0_6, %c0_7], %8 {strides = array<i32>} : memref<200x64xbf16, #tpu.memory_space<vmem>>, vector<200x64xbf16>,
    return
  }
}

module attributes {stable_mosaic.version = 11 : i64} {
  func.func @_fused_heads_kernel(%arg0: i32, %arg1: i32, %arg2: memref<2x6400xbf16, #tpu.memory_space<vmem>>, %arg3: memref<3200x640xbf16, #tpu.memory_space<vmem>>, %arg4: memref<1x640xf32, #tpu.memory_space<vmem>>, %arg5: memref<640x128xbf16, #tpu.memory_space<vmem>>, %arg6: memref<2x128xf32, #tpu.memory_space<vmem>>, %arg7: memref<2x640xf32, #tpu.memory_space<vmem>>) attributes {dimension_semantics = [#tpu.dimension_semantics<parallel>, #tpu.dimension_semantics<arbitrary>], iteration_bounds = array<i64: 2, 2>, scalar_prefetch = 0 : i64, scratch_operands = 1 : i64, tpu.core_type = #tpu.core_type<tc>, window_params = [{pipeline_mode = #tpu.pipeline_mode<synchronous>, transform_indices = @transform_0, window_bounds = array<i64: 2, 6400>}, {transform_indices = @transform_1, window_bounds = array<i64: 3200, 640>}, {transform_indices = @transform_2, window_bounds = array<i64: 1, 640>}, {transform_indices = @transform_3, window_bounds = array<i64: 640, 128>}, {transform_indices = @transform_4, window_bounds = array<i64: 2, 128>}]} {
    %c0_i32 = arith.constant 0 : i32
    %0 = arith.cmpi eq, %arg1, %c0_i32 : i32
    %1 = arith.extui %0 : i1 to i32
    %c0_i32_0 = arith.constant 0 : i32
    %2 = arith.cmpi ne, %1, %c0_i32_0 : i32
    scf.if %2 {
      %cst_8 = arith.constant 0.000000e+00 : f32
      %15 = vector.broadcast %cst_8 : f32 to vector<2x640xf32>
      %c0_9 = arith.constant 0 : index
      %c0_10 = arith.constant 0 : index
      %16 = vector.load %arg7[%c0_9, %c0_10] : memref<2x640xf32, #tpu.memory_space<vmem>>, vector<2x640xf32>
      tpu.vector_store %arg7[%c0_9, %c0_10], %15 {strides = array<i32>} : memref<2x640xf32, #tpu.memory_space<vmem>>, vector<2x640xf32>,
    } else {
    }
    %c3200_i32 = arith.constant 3200 : i32
    %3 = arith.muli %arg1, %c3200_i32 : i32
    %4 = tpu.assume_multiple %3, 128 : i32
    %c0 = arith.constant 0 : index
    %c0_1 = arith.constant 0 : index
    %5 = vector.load %arg7[%c0, %c0_1] : memref<2x640xf32, #tpu.memory_space<vmem>>, vector<2x640xf32>
    %c0_2 = arith.constant 0 : index
    %6 = arith.index_cast %4 : i32 to index
    %7 = vector.load %arg2[%c0_2, %6] : memref<2x6400xbf16, #tpu.memory_space<vmem>>, vector<2x3200xbf16>
    %c0_3 = arith.constant 0 : index
    %c0_4 = arith.constant 0 : index
    %8 = vector.load %arg3[%c0_3, %c0_4] : memref<3200x640xbf16, #tpu.memory_space<vmem>>, vector<3200x640xbf16>
    %cst = arith.constant dense<0.000000e+00> : vector<2x640xf32>
    %9 = tpu.matmul %7, %8, %cst {dimension_numbers = #tpu.dot_dimension_numbers<[1], [0], [0], [1], [0, 0, 1, 1], [], []>} : vector<2x3200xbf16>, vector<3200x640xbf16>, vector<2x640xf32> -> vector<2x640xf32>
    %10 = arith.addf %5, %9 : vector<2x640xf32>
    %c0_5 = arith.constant 0 : index
    %c0_6 = arith.constant 0 : index
    %11 = vector.load %arg7[%c0_5, %c0_6] : memref<2x640xf32, #tpu.memory_space<vmem>>, vector<2x640xf32>
    tpu.vector_store %arg7[%c0_5, %c0_6], %10 {strides = array<i32>} : memref<2x640xf32, #tpu.memory_space<vmem>>, vector<2x640xf32>,
    %c1_i32 = arith.constant 1 : i32
    %12 = arith.cmpi eq, %arg1, %c1_i32 : i32
    %13 = arith.extui %12 : i1 to i32
    %c0_i32_7 = arith.constant 0 : i32
    %14 = arith.cmpi ne, %13, %c0_i32_7 : i32
    scf.if %14 {
      %c0_8 = arith.constant 0 : index
      %c0_9 = arith.constant 0 : index
      %15 = vector.load %arg7[%c0_8, %c0_9] : memref<2x640xf32, #tpu.memory_space<vmem>>, vector<2x640xf32>
      %c0_10 = arith.constant 0 : index
      %c0_11 = arith.constant 0 : index
      %16 = vector.load %arg4[%c0_10, %c0_11] : memref<1x640xf32, #tpu.memory_space<vmem>>, vector<1x640xf32>
      %17 = vector.broadcast %16 : vector<1x640xf32> to vector<2x640xf32>
      %18 = arith.addf %15, %17 : vector<2x640xf32>
      %cst_12 = arith.constant 0.000000e+00 : f32
      %19 = vector.broadcast %cst_12 : f32 to vector<2x640xf32>
      %20 = arith.maximumf %18, %19 : vector<2x640xf32>
      %21 = arith.truncf %20 : vector<2x640xf32> to vector<2x640xbf16>
      %c0_13 = arith.constant 0 : index
      %c0_14 = arith.constant 0 : index
      %22 = vector.load %arg5[%c0_13, %c0_14] : memref<640x128xbf16, #tpu.memory_space<vmem>>, vector<640x128xbf16>
      %cst_15 = arith.constant dense<0.000000e+00> : vector<2x128xf32>
      %23 = tpu.matmul %21, %22, %cst_15 {dimension_numbers = #tpu.dot_dimension_numbers<[1], [0], [0], [1], [0, 0, 1, 1], [], []>} : vector<2x640xbf16>, vector<640x128xbf16>, vector<2x128xf32> -> vector<2x128xf32>
      %c0_16 = arith.constant 0 : index
      %c0_17 = arith.constant 0 : index
      %24 = vector.load %arg6[%c0_16, %c0_17] : memref<2x128xf32, #tpu.memory_space<vmem>>, vector<2x128xf32>
      tpu.vector_store %arg6[%c0_16, %c0_17], %23 {strides = array<i32>} : memref<2x128xf32, #tpu.memory_space<vmem>>, vector<2x128xf32>,
    } else {
    }
    return
  }
  func.func @transform_0(%arg0: i32, %arg1: i32) -> (i32, i32) {
    %c0_i32 = arith.constant 0 : i32
    %c0_i32_0 = arith.constant 0 : i32
    %c0_i32_1 = arith.constant 0 : i32
    return %c0_i32, %c0_i32_0 : i32, i32
  }
  func.func @transform_1(%arg0: i32, %arg1: i32) -> (i32, i32) {
    %c0_i32 = arith.constant 0 : i32
    return %arg1, %arg0 : i32, i32
  }
  func.func @transform_2(%arg0: i32, %arg1: i32) -> (i32, i32) {
    %c0_i32 = arith.constant 0 : i32
    %c0_i32_0 = arith.constant 0 : i32
    return %c0_i32, %arg0 : i32, i32
  }
  func.func @transform_3(%arg0: i32, %arg1: i32) -> (i32, i32) {
    %c0_i32 = arith.constant 0 : i32
    %c0_i32_0 = arith.constant 0 : i32
    return %arg0, %c0_i32 : i32, i32
  }
  func.func @transform_4(%arg0: i32, %arg1: i32) -> (i32, i32) {
    %c0_i32 = arith.constant 0 : i32
    %c0_i32_0 = arith.constant 0 : i32
    return %c0_i32, %arg0 : i32, i32
  }
}

</mosaic_0001>

<bundles_post_ra>
// kernel: ppo_forward.4
= control target key start
LH: loop header
LB: loop body
LE: loop exit
PB: predicated region body
PF: predicated region fallthrough
CT: control target
= control target key end

     0   :  { %8 = vsyncpa [#allocation3], 0  ;;  %s955_s12 = smov [#allocation2]   ;;  %s1549_s0 = inlined_call_operand.vmem [shape: f32[392,36], index: 0, kind: input, shape index: {}]   ;;  %s1550_s1 = inlined_call_operand.vmem [shape: f32[36,32], index: 1, kind: input, shape index: {}]   ;;  %s1551_s2 = inlined_call_operand.hbm [shape: f32[1,32], index: 2, kind: input, shape index: {}]   ;;  %s1552_s3 = inlined_call_operand.vmem [shape: f32[392,32], index: 3, kind: output, shape index: {}]  }
   0x1   :  { %s19_s13 = sshll.u32 %s955_s12, 4  ;;  %s931_s16 = scalar_lea.hbm %s1551_s2, 16  ;;  %s20_s13 = int_to_ptr.vmem [resolvable:$true] %s19_s13 }
   0x2   :  { %p932_p0 = scmp.ne.s32.totalorder %s1551_s2, %s931_s16  ;;  %p935_p1 = scmp.lt.u32.totalorder %s931_s16, %s1551_s2 }
   0x4   :  { %p937_p2 = pnand %p935_p1, %p932_p0 }
   0x6   :  { %940 = shalt.err (!%p937_p2)
}
   0x7   :  { %s941_s21 = scalar_lea.vmem %s20_s13, 16  ;;  %s945_s22 = scalar_lea.vmem %s20_s13, 32 }
   0x8   :  { %p942_p3 = scmp.ne.s32.totalorder %s20_s13, %s941_s21  ;;  %p946_p4 = scmp.lt.s32.totalorder %s20_s13, %s20_s13 }
   0x9   :  { %p947_p5 = scmp.lt.s32.totalorder %s945_s22, %s941_s21 }
   0xb   :  { %p948_p6 = por %p947_p5, %p946_p4 }
   0xd   :  { %p949_p7 = pnand %p948_p6, %p942_p3 }
   0xf   :  { %952 = shalt.err (!%p949_p7)
}
  0x10   :  { %22 = dma.hbm_to_vmem [thread:$0]  %s1551_s2, 16, %s20_s13, [#allocation3]  }
  0x11   :  { %953 = dma.done.wait [#allocation3], 16  }
  0x12   :  { %954 = vsyncadd [#allocation3], 4294967280  ;;  %v956_v0 = vmov 0.0|0.0   ;;  %vm957_vm0 = vmmov 0   ;;  %v958_v1 = vmov 0.0   ;;  %v75_v2 = vld [vmem:[%s1550_s1] sm:$0xff] }
  0x13   :  { %915 = vmatprep.subr.bf16.mxu0 %v956_v0  ;;  %921 = vmatprep.subr.bf16.mxu1 %v956_v0  ;;  %v76_v3 = vld [vmem:[%s1550_s1 + $0x8] sm:$0xff]  ;;  %v77_v4 = vld [vmem:[%s1550_s1 + $0x10] sm:$0xff]  ;;  %v78_v6 = vld [vmem:[%s1550_s1 + $0x18] sm:$0xff]  ;;  %vm235_vm1 = vcmask 1043456   ;;  %vm87_vm2 = vcmask 293888   ;;  %vm598_vm3 = vcmask 261120  }
  0x14   :  { %768 = vmatprep.mubr.msk.f32.mxu0 %vm957_vm0, %v958_v1  ;;  %843 = vmatprep.mubr.msk.f32.mxu1 %vm957_vm0, %v958_v1  ;;  %v916_v5 = vpack.c.bf16 %v76_v3, %v75_v2  ;;  %v919_v7 = vpack.c.bf16 %v78_v6, %v77_v4  ;;  %v79_v8 = vld [vmem:[%s1550_s1 + $0x20] sm:$0xf]  ;;  %v51_v10 = vld [vmem:[%s1549_s0 + $0xc8] sm:$0xff]  ;;  %v52_v12 = vld [vmem:[%s1549_s0 + $0xd0] sm:$0xff] }
  0x15   :  { %v26_v9 = vld [vmem:[%s1549_s0] sm:$0xff]  ;;  %v27_v11 = vld [vmem:[%s1549_s0 + $0x8] sm:$0xff]  ;;  %v28_v13 = vld [vmem:[%s1549_s0 + $0x10] sm:$0xff] }
  0x16   :  { %917 = vmatpush3.bf16.msra.mxu0 %v916_v5  ;;  %924 = vmatpush3.bf16.msra.mxu1 %v916_v5  ;;  %v53_v14 = vld [vmem:[%s1549_s0 + $0xd8] sm:$0xff]  ;;  %v54_v16 = vld [vmem:[%s1549_s0 + $0xe0] sm:$0xff]  ;;  %v55_v18 = vld [vmem:[%s1549_s0 + $0xe8] sm:$0xff] }
  0x17   :  { %918 = vmatprep.subr.bf16.mxu0 %v956_v0  ;;  %922 = vmatprep.subr.bf16.mxu1 %v956_v0  ;;  %v29_v15 = vld [vmem:[%s1549_s0 + $0x18] sm:$0xff]  ;;  %v30_v17 = vld [vmem:[%s1549_s0 + $0x20] sm:$0xff]  ;;  %v31_v19 = vld [vmem:[%s1549_s0 + $0x28] sm:$0xff] }
  0x18   :  { %v56_v20 = vld [vmem:[%s1549_s0 + $0xf0] sm:$0xff]  ;;  %v57_v22 = vld [vmem:[%s1549_s0 + $0xf8] sm:$0xff]  ;;  %v58_v24 = vld [vmem:[%s1549_s0 + $0x100] sm:$0xff] }
  0x19   :  { %v32_v21 = vld [vmem:[%s1549_s0 + $0x30] sm:$0xff]  ;;  %v33_v23 = vld [vmem:[%s1549_s0 + $0x38] sm:$0xff]  ;;  %v34_v25 = vld [vmem:[%s1549_s0 + $0x40] sm:$0xff] }
  0x1a   :  { %920 = vmatpush3.bf16.msra.mxu0 %v919_v7  ;;  %925 = vmatpush3.bf16.msra.mxu1 %v919_v7  ;;  %v59_v26 = vld [vmem:[%s1549_s0 + $0x108] sm:$0xff]  ;;  %v60_v28 = vld [vmem:[%s1549_s0 + $0x110] sm:$0xff]  ;;  %v61_v30 = vld [vmem:[%s1549_s0 + $0x118] sm:$0xff] }
  0x1b   :  { %766 = vmatprep.subr.mxu0 %v958_v1  ;;  %923 = vmatprep.subr.mxu1 %v958_v1  ;;  %v35_v27 = vld [vmem:[%s1549_s0 + $0x48] sm:$0xff]  ;;  %v36_v29 = vld [vmem:[%s1549_s0 + $0x50] sm:$0xff]  ;;  %v37_v31 = vld [vmem:[%s1549_s0 + $0x58] sm:$0xff] }
  0x1c   :  { %v62_v32 = vld [vmem:[%s1549_s0 + $0x120] sm:$0xff]  ;;  %v63_v34 = vld [vmem:[%s1549_s0 + $0x128] sm:$0xff]  ;;  %v64_v36 = vld [vmem:[%s1549_s0 + $0x130] sm:$0xff] }
  0x1d   :  { %v38_v33 = vld [vmem:[%s1549_s0 + $0x60] sm:$0xff]  ;;  %v39_v35 = vld [vmem:[%s1549_s0 + $0x68] sm:$0xff]  ;;  %v40_v37 = vld [vmem:[%s1549_s0 + $0x70] sm:$0xff] }
  0x1e   :  { %767 = vmatpush3.msk.msra.mxu0 %vm235_vm1, %v79_v8  ;;  %926 = vmatpush3.msk.msra.mxu1 %vm235_vm1, %v79_v8  ;;  %v65_v38 = vld [vmem:[%s1549_s0 + $0x138] sm:$0xff]  ;;  %v66_v40 = vld [vmem:[%s1549_s0 + $0x140] sm:$0xff]  ;;  %v67_v42 = vld [vmem:[%s1549_s0 + $0x148] sm:$0xff] }
  0x1f   :  { %769 = vmatmul.mubr.msk.f32.vlgmr.msra.gmra.mrb[0].mxu0 %vm87_vm2, %v26_v9  ;;  %844 = vmatmul.mubr.msk.f32.vlgmr.msra.gmra.mrb[0].mxu1 %vm87_vm2, %v51_v10  ;;  %v41_v39 = vld [vmem:[%s1549_s0 + $0x78] sm:$0xff]  ;;  %v42_v41 = vld [vmem:[%s1549_s0 + $0x80] sm:$0xff]  ;;  %v43_v43 = vld [vmem:[%s1549_s0 + $0x88] sm:$0xff] }
  0x20   :  { %771 = vmatprep.mubr.msk.f32.mxu0 %vm957_vm0, %v958_v1  ;;  %846 = vmatprep.mubr.msk.f32.mxu1 %vm957_vm0, %v958_v1  ;;  %v68_v44 = vld [vmem:[%s1549_s0 + $0x150] sm:$0xff]  ;;  %v69_v46 = vld [vmem:[%s1549_s0 + $0x158] sm:$0xff]  ;;  %v70_v48 = vld [vmem:[%s1549_s0 + $0x160] sm:$0xff] }
  0x21   :  { %v44_v45 = vld [vmem:[%s1549_s0 + $0x90] sm:$0xff]  ;;  %v45_v47 = vld [vmem:[%s1549_s0 + $0x98] sm:$0xff]  ;;  %v46_v49 = vld [vmem:[%s1549_s0 + $0xa0] sm:$0xff] }
  0x22   :  { %v71_v50 = vld [vmem:[%s1549_s0 + $0x168] sm:$0xff]  ;;  %v72_v52 = vld [vmem:[%s1549_s0 + $0x170] sm:$0xff]  ;;  %v73_v54 = vld [vmem:[%s1549_s0 + $0x178] sm:$0xff] }
  0x23   :  { %772 = vmatmul.mubr.msk.f32.gmra.mrb[2].mxu0 %vm87_vm2, %v27_v11  ;;  %847 = vmatmul.mubr.msk.f32.gmra.mrb[2].mxu1 %vm87_vm2, %v52_v12  ;;  %v47_v51 = vld [vmem:[%s1549_s0 + $0xa8] sm:$0xff]  ;;  %v48_v53 = vld [vmem:[%s1549_s0 + $0xb0] sm:$0xff]  ;;  %v49_v55 = vld [vmem:[%s1549_s0 + $0xb8] sm:$0xff] }
  0x24   :  { %774 = vmatprep.mubr.msk.f32.mxu0 %vm957_vm0, %v958_v1  ;;  %849 = vmatprep.mubr.msk.f32.mxu1 %vm957_vm0, %v958_v1  ;;  %v74_v56 = vld [vmem:[%s1549_s0 + $0x180] sm:$0xff] }
  0x25   :  { %v50_v57 = vld [vmem:[%s1549_s0 + $0xc0] sm:$0xff] }
  0x26   :  { %v1302_v58 = vld [vmem:[#allocation2] ss:$0 sm:$0xff] }
  0x27   :  { %775 = vmatmul.mubr.msk.f32.gmra.mrb[4].mxu0 %vm87_vm2, %v28_v13  ;;  %850 = vmatmul.mubr.msk.f32.gmra.mrb[4].mxu1 %vm87_vm2, %v53_v14 }
  0x28   :  { %777 = vmatprep.mubr.msk.f32.mxu0 %vm957_vm0, %v958_v1  ;;  %852 = vmatprep.mubr.msk.f32.mxu1 %vm957_vm0, %v958_v1 }
  0x2b   :  { %778 = vmatmul.mubr.msk.f32.gmra.mrb[6].mxu0 %vm87_vm2, %v29_v15  ;;  %853 = vmatmul.mubr.msk.f32.gmra.mrb[6].mxu1 %vm87_vm2, %v54_v16 }
  0x2c   :  { %780 = vmatprep.mubr.msk.f32.mxu0 %vm957_vm0, %v958_v1  ;;  %855 = vmatprep.mubr.msk.f32.mxu1 %vm957_vm0, %v958_v1 }
  0x2f   :  { %781 = vmatmul.mubr.msk.f32.gmra.mrb[8].mxu0 %vm87_vm2, %v30_v17  ;;  %856 = vmatmul.mubr.msk.f32.gmra.mrb[8].mxu1 %vm87_vm2, %v55_v18 }
  0x30   :  { %783 = vmatprep.mubr.msk.f32.mxu0 %vm957_vm0, %v958_v1  ;;  %858 = vmatprep.mubr.msk.f32.mxu1 %vm957_vm0, %v958_v1 }
  0x33   :  { %784 = vmatmul.mubr.msk.f32.gmra.mrb[10].mxu0 %vm87_vm2, %v31_v19  ;;  %859 = vmatmul.mubr.msk.f32.gmra.mrb[10].mxu1 %vm87_vm2, %v56_v20 }
  0x34   :  { %786 = vmatprep.mubr.msk.f32.mxu0 %vm957_vm0, %v958_v1  ;;  %861 = vmatprep.mubr.msk.f32.mxu1 %vm957_vm0, %v958_v1 }
  0x37   :  { %787 = vmatmul.mubr.msk.f32.gmra.mrb[12].mxu0 %vm87_vm2, %v32_v21  ;;  %862 = vmatmul.mubr.msk.f32.gmra.mrb[12].mxu1 %vm87_vm2, %v57_v22 }
  0x38   :  { %789 = vmatprep.mubr.msk.f32.mxu0 %vm957_vm0, %v958_v1  ;;  %864 = vmatprep.mubr.msk.f32.mxu1 %vm957_vm0, %v958_v1 }
  0x3b   :  { %790 = vmatmul.mubr.msk.f32.gmra.mrb[14].mxu0 %vm87_vm2, %v33_v23  ;;  %865 = vmatmul.mubr.msk.f32.gmra.mrb[14].mxu1 %vm87_vm2, %v58_v24 }
  0x3c   :  { %792 = vmatprep.mubr.msk.f32.mxu0 %vm957_vm0, %v958_v1  ;;  %867 = vmatprep.mubr.msk.f32.mxu1 %vm957_vm0, %v958_v1 }
  0x3f   :  { %793 = vmatmul.mubr.msk.f32.gmra.mrb[16].mxu0 %vm87_vm2, %v34_v25  ;;  %868 = vmatmul.mubr.msk.f32.gmra.mrb[16].mxu1 %vm87_vm2, %v59_v26 }
  0x40   :  { %795 = vmatprep.mubr.msk.f32.mxu0 %vm957_vm0, %v958_v1  ;;  %870 = vmatprep.mubr.msk.f32.mxu1 %vm957_vm0, %v958_v1 }
  0x43   :  { %796 = vmatmul.mubr.msk.f32.gmra.mrb[18].mxu0 %vm87_vm2, %v35_v27  ;;  %871 = vmatmul.mubr.msk.f32.gmra.mrb[18].mxu1 %vm87_vm2, %v60_v28 }
  0x44   :  { %798 = vmatprep.mubr.msk.f32.mxu0 %vm957_vm0, %v958_v1  ;;  %873 = vmatprep.mubr.msk.f32.mxu1 %vm957_vm0, %v958_v1 }
  0x47   :  { %799 = vmatmul.mubr.msk.f32.gmra.mrb[20].mxu0 %vm87_vm2, %v36_v29  ;;  %874 = vmatmul.mubr.msk.f32.gmra.mrb[20].mxu1 %vm87_vm2, %v61_v30 }
  0x48   :  { %801 = vmatprep.mubr.msk.f32.mxu0 %vm957_vm0, %v958_v1  ;;  %876 = vmatprep.mubr.msk.f32.mxu1 %vm957_vm0, %v958_v1 }
  0x4b   :  { %802 = vmatmul.mubr.msk.f32.gmra.mrb[22].mxu0 %vm87_vm2, %v37_v31  ;;  %877 = vmatmul.mubr.msk.f32.gmra.mrb[22].mxu1 %vm87_vm2, %v62_v32 }
  0x4c   :  { %804 = vmatprep.mubr.msk.f32.mxu0 %vm957_vm0, %v958_v1  ;;  %879 = vmatprep.mubr.msk.f32.mxu1 %vm957_vm0, %v958_v1 }
  0x4f   :  { %805 = vmatmul.mubr.msk.f32.gmra.mrb[24].mxu0 %vm87_vm2, %v38_v33  ;;  %880 = vmatmul.mubr.msk.f32.gmra.mrb[24].mxu1 %vm87_vm2, %v63_v34 }
  0x50   :  { %807 = vmatprep.mubr.msk.f32.mxu0 %vm957_vm0, %v958_v1  ;;  %882 = vmatprep.mubr.msk.f32.mxu1 %vm957_vm0, %v958_v1 }
  0x53   :  { %808 = vmatmul.mubr.msk.f32.gmra.mrb[26].mxu0 %vm87_vm2, %v39_v35  ;;  %883 = vmatmul.mubr.msk.f32.gmra.mrb[26].mxu1 %vm87_vm2, %v64_v36 }
  0x54   :  { %810 = vmatprep.mubr.msk.f32.mxu0 %vm957_vm0, %v958_v1  ;;  %885 = vmatprep.mubr.msk.f32.mxu1 %vm957_vm0, %v958_v1 }
  0x57   :  { %811 = vmatmul.mubr.msk.f32.gmra.mrb[28].mxu0 %vm87_vm2, %v40_v37  ;;  %886 = vmatmul.mubr.msk.f32.gmra.mrb[28].mxu1 %vm87_vm2, %v65_v38 }
  0x58   :  { %813 = vmatprep.mubr.msk.f32.mxu0 %vm957_vm0, %v958_v1  ;;  %888 = vmatprep.mubr.msk.f32.mxu1 %vm957_vm0, %v958_v1 }
  0x5b   :  { %814 = vmatmul.mubr.msk.f32.gmra.mrb[30].mxu0 %vm87_vm2, %v41_v39  ;;  %889 = vmatmul.mubr.msk.f32.gmra.mrb[30].mxu1 %vm87_vm2, %v66_v40 }
  0x5c   :  { %816 = vmatprep.mubr.msk.f32.mxu0 %vm957_vm0, %v958_v1  ;;  %891 = vmatprep.mubr.msk.f32.mxu1 %vm957_vm0, %v958_v1 }
  0x5f   :  { %817 = vmatmul.mubr.msk.f32.gmra.mrb[32].mxu0 %vm87_vm2, %v42_v41  ;;  %892 = vmatmul.mubr.msk.f32.gmra.mrb[32].mxu1 %vm87_vm2, %v67_v42 }
  0x60   :  { %819 = vmatprep.mubr.msk.f32.mxu0 %vm957_vm0, %v958_v1  ;;  %894 = vmatprep.mubr.msk.f32.mxu1 %vm957_vm0, %v958_v1 }
  0x63   :  { %820 = vmatmul.mubr.msk.f32.gmra.mrb[34].mxu0 %vm87_vm2, %v43_v43  ;;  %895 = vmatmul.mubr.msk.f32.gmra.mrb[34].mxu1 %vm87_vm2, %v68_v44 }
  0x64   :  { %822 = vmatprep.mubr.msk.f32.mxu0 %vm957_vm0, %v958_v1  ;;  %897 = vmatprep.mubr.msk.f32.mxu1 %vm957_vm0, %v958_v1 }
  0x67   :  { %823 = vmatmul.mubr.msk.f32.gmra.mrb[36].mxu0 %vm87_vm2, %v44_v45  ;;  %898 = vmatmul.mubr.msk.f32.gmra.mrb[36].mxu1 %vm87_vm2, %v69_v46 }
  0x68   :  { %825 = vmatprep.mubr.msk.f32.mxu0 %vm957_vm0, %v958_v1  ;;  %900 = vmatprep.mubr.msk.f32.mxu1 %vm957_vm0, %v958_v1 }
  0x6b   :  { %826 = vmatmul.mubr.msk.f32.gmra.mrb[38].mxu0 %vm87_vm2, %v45_v47  ;;  %901 = vmatmul.mubr.msk.f32.gmra.mrb[38].mxu1 %vm87_vm2, %v70_v48 }
  0x6c   :  { %828 = vmatprep.mubr.msk.f32.mxu0 %vm957_vm0, %v958_v1  ;;  %903 = vmatprep.mubr.msk.f32.mxu1 %vm957_vm0, %v958_v1 }
  0x6f   :  { %829 = vmatmul.mubr.msk.f32.gmra.mrb[40].mxu0 %vm87_vm2, %v46_v49  ;;  %904 = vmatmul.mubr.msk.f32.gmra.mrb[40].mxu1 %vm87_vm2, %v71_v50 }
  0x70   :  { %831 = vmatprep.mubr.msk.f32.mxu0 %vm957_vm0, %v958_v1  ;;  %906 = vmatprep.mubr.msk.f32.mxu1 %vm957_vm0, %v958_v1 }
  0x73   :  { %832 = vmatmul.mubr.msk.f32.gmra.mrb[42].mxu0 %vm87_vm2, %v47_v51  ;;  %907 = vmatmul.mubr.msk.f32.gmra.mrb[42].mxu1 %vm87_vm2, %v72_v52 }
  0x74   :  { %834 = vmatprep.mubr.msk.f32.mxu0 %vm957_vm0, %v958_v1  ;;  %909 = vmatprep.mubr.msk.f32.mxu1 %vm957_vm0, %v958_v1 }
  0x77   :  { %835 = vmatmul.mubr.msk.f32.gmra.mrb[44].mxu0 %vm87_vm2, %v48_v53  ;;  %910 = vmatmul.mubr.msk.f32.gmra.mrb[44].mxu1 %vm87_vm2, %v73_v54 }
  0x78   :  { %837 = vmatprep.mubr.msk.f32.mxu0 %vm957_vm0, %v958_v1  ;;  %912 = vmatprep.mubr.msk.f32.mxu1 %vm957_vm0, %v958_v1 }
  0x7b   :  { %838 = vmatmul.mubr.msk.f32.gmra.mrb[46].mxu0 %vm87_vm2, %v49_v55  ;;  %913 = vmatmul.mubr.msk.f32.gmra.mrb[46].mxu1 %vm87_vm2, %v74_v56 }
  0x7c   :  { %840 = vmatprep.mubr.msk.f32.mxu0 %vm957_vm0, %v958_v1 }
  0x7f   :  { %841 = vmatmul.mubr.msk.f32.gmra.mrb[48].mxu0 %vm87_vm2, %v50_v57 }
  0xf2   :  { %v305_v59 = vpop.f32.mrb[0].mxu0  ;;  %v430_v60 = vpop.f32.mrb[0].mxu1 }
  0xf3   :  { %v306_v61 = vadd.f32 %v1302_v58, %v305_v59  ;;  %v770_v62 = vpop.f32.mrb[1].mxu0  ;;  %v431_v63 = vadd.f32 %v1302_v58, %v430_v60  ;;  %v845_v0 = vpop.f32.mrb[1].mxu1 }
  0xf5   :  { %v549_v2 = vmax.f32 %v306_v61, 0.0  ;;  %v574_v3 = vmax.f32 %v431_v63, 0.0 }
  0xf6   :  { %v310_v1 = vpop.f32.mrb[2].mxu0  ;;  %v435_v4 = vpop.f32.mrb[2].mxu1 }
  0xf7   :  { %599 = vst.msk [vmem:[%s1552_s3] sm:$0xff] %vm598_vm3, %v549_v2  ;;  %624 = vst.msk [vmem:[%s1552_s3 + $0xc8] sm:$0xff] %vm598_vm3, %v574_v3  ;;  %v311_v5 = vadd.f32 %v1302_v58, %v310_v1  ;;  %v773_v6 = vpop.f32.mrb[3].mxu0  ;;  %v436_v7 = vadd.f32 %v1302_v58, %v435_v4  ;;  %v848_v8 = vpop.f32.mrb[3].mxu1 }
  0xf9   :  { %v550_v9 = vmax.f32 %v311_v5, 0.0  ;;  %v575_v10 = vmax.f32 %v436_v7, 0.0 }
  0xfa   :  { %v315_v11 = vpop.f32.mrb[4].mxu0  ;;  %v440_v12 = vpop.f32.mrb[4].mxu1 }
  0xfb   :  { %600 = vst.msk [vmem:[%s1552_s3 + $0x8] sm:$0xff] %vm598_vm3, %v550_v9  ;;  %625 = vst.msk [vmem:[%s1552_s3 + $0xd0] sm:$0xff] %vm598_vm3, %v575_v10  ;;  %v316_v13 = vadd.f32 %v1302_v58, %v315_v11  ;;  %v776_v14 = vpop.f32.mrb[5].mxu0  ;;  %v441_v15 = vadd.f32 %v1302_v58, %v440_v12  ;;  %v851_v16 = vpop.f32.mrb[5].mxu1 }
  0xfd   :  { %v551_v17 = vmax.f32 %v316_v13, 0.0  ;;  %v576_v18 = vmax.f32 %v441_v15, 0.0 }
  0xfe   :  { %v320_v19 = vpop.f32.mrb[6].mxu0  ;;  %v445_v20 = vpop.f32.mrb[6].mxu1 }
  0xff   :  { %601 = vst.msk [vmem:[%s1552_s3 + $0x10] sm:$0xff] %vm598_vm3, %v551_v17  ;;  %626 = vst.msk [vmem:[%s1552_s3 + $0xd8] sm:$0xff] %vm598_vm3, %v576_v18  ;;  %v321_v21 = vadd.f32 %v1302_v58, %v320_v19  ;;  %v779_v22 = vpop.f32.mrb[7].mxu0  ;;  %v446_v23 = vadd.f32 %v1302_v58, %v445_v20  ;;  %v854_v24 = vpop.f32.mrb[7].mxu1 }
 0x101   :  { %v552_v25 = vmax.f32 %v321_v21, 0.0  ;;  %v577_v26 = vmax.f32 %v446_v23, 0.0 }
 0x102   :  { %v325_v27 = vpop.f32.mrb[8].mxu0  ;;  %v450_v28 = vpop.f32.mrb[8].mxu1 }
 0x103   :  { %602 = vst.msk [vmem:[%s1552_s3 + $0x18] sm:$0xff] %vm598_vm3, %v552_v25  ;;  %627 = vst.msk [vmem:[%s1552_s3 + $0xe0] sm:$0xff] %vm598_vm3, %v577_v26  ;;  %v326_v29 = vadd.f32 %v1302_v58, %v325_v27  ;;  %v782_v30 = vpop.f32.mrb[9].mxu0  ;;  %v451_v31 = vadd.f32 %v1302_v58, %v450_v28  ;;  %v857_v32 = vpop.f32.mrb[9].mxu1 }
 0x105   :  { %v553_v33 = vmax.f32 %v326_v29, 0.0  ;;  %v578_v34 = vmax.f32 %v451_v31, 0.0 }
 0x106   :  { %v330_v35 = vpop.f32.mrb[10].mxu0  ;;  %v455_v36 = vpop.f32.mrb[10].mxu1 }
 0x107   :  { %603 = vst.msk [vmem:[%s1552_s3 + $0x20] sm:$0xff] %vm598_vm3, %v553_v33  ;;  %628 = vst.msk [vmem:[%s1552_s3 + $0xe8] sm:$0xff] %vm598_vm3, %v578_v34  ;;  %v331_v37 = vadd.f32 %v1302_v58, %v330_v35  ;;  %v785_v38 = vpop.f32.mrb[11].mxu0  ;;  %v456_v39 = vadd.f32 %v1302_v58, %v455_v36  ;;  %v860_v40 = vpop.f32.mrb[11].mxu1 }
 0x109   :  { %v554_v41 = vmax.f32 %v331_v37, 0.0  ;;  %v579_v42 = vmax.f32 %v456_v39, 0.0 }
 0x10a   :  { %v335_v43 = vpop.f32.mrb[12].mxu0  ;;  %v460_v44 = vpop.f32.mrb[12].mxu1 }
 0x10b   :  { %604 = vst.msk [vmem:[%s1552_s3 + $0x28] sm:$0xff] %vm598_vm3, %v554_v41  ;;  %629 = vst.msk [vmem:[%s1552_s3 + $0xf0] sm:$0xff] %vm598_vm3, %v579_v42  ;;  %v336_v45 = vadd.f32 %v1302_v58, %v335_v43  ;;  %v788_v46 = vpop.f32.mrb[13].mxu0  ;;  %v461_v47 = vadd.f32 %v1302_v58, %v460_v44  ;;  %v863_v48 = vpop.f32.mrb[13].mxu1 }
 0x10d   :  { %v555_v49 = vmax.f32 %v336_v45, 0.0  ;;  %v580_v50 = vmax.f32 %v461_v47, 0.0 }
 0x10e   :  { %v340_v51 = vpop.f32.mrb[14].mxu0  ;;  %v465_v52 = vpop.f32.mrb[14].mxu1 }
 0x10f   :  { %605 = vst.msk [vmem:[%s1552_s3 + $0x30] sm:$0xff] %vm598_vm3, %v555_v49  ;;  %630 = vst.msk [vmem:[%s1552_s3 + $0xf8] sm:$0xff] %vm598_vm3, %v580_v50  ;;  %v341_v53 = vadd.f32 %v1302_v58, %v340_v51  ;;  %v791_v54 = vpop.f32.mrb[15].mxu0  ;;  %v466_v55 = vadd.f32 %v1302_v58, %v465_v52  ;;  %v866_v56 = vpop.f32.mrb[15].mxu1 }
 0x111   :  { %v556_v57 = vmax.f32 %v341_v53, 0.0  ;;  %v581_v59 = vmax.f32 %v466_v55, 0.0 }
 0x112   :  { %v345_v60 = vpop.f32.mrb[16].mxu0  ;;  %v470_v61 = vpop.f32.mrb[16].mxu1 }
 0x113   :  { %606 = vst.msk [vmem:[%s1552_s3 + $0x38] sm:$0xff] %vm598_vm3, %v556_v57  ;;  %631 = vst.msk [vmem:[%s1552_s3 + $0x100] sm:$0xff] %vm598_vm3, %v581_v59  ;;  %v346_v62 = vadd.f32 %v1302_v58, %v345_v60  ;;  %v794_v63 = vpop.f32.mrb[17].mxu0  ;;  %v471_v0 = vadd.f32 %v1302_v58, %v470_v61  ;;  %v869_v2 = vpop.f32.mrb[17].mxu1 }
 0x115   :  { %v557_v3 = vmax.f32 %v346_v62, 0.0  ;;  %v582_v1 = vmax.f32 %v471_v0, 0.0 }
 0x116   :  { %v350_v4 = vpop.f32.mrb[18].mxu0  ;;  %v475_v5 = vpop.f32.mrb[18].mxu1 }
 0x117   :  { %607 = vst.msk [vmem:[%s1552_s3 + $0x40] sm:$0xff] %vm598_vm3, %v557_v3  ;;  %632 = vst.msk [vmem:[%s1552_s3 + $0x108] sm:$0xff] %vm598_vm3, %v582_v1  ;;  %v351_v6 = vadd.f32 %v1302_v58, %v350_v4  ;;  %v797_v7 = vpop.f32.mrb[19].mxu0  ;;  %v476_v8 = vadd.f32 %v1302_v58, %v475_v5  ;;  %v872_v9 = vpop.f32.mrb[19].mxu1 }
 0x119   :  { %v558_v10 = vmax.f32 %v351_v6, 0.0  ;;  %v583_v11 = vmax.f32 %v476_v8, 0.0 }
 0x11a   :  { %v355_v12 = vpop.f32.mrb[20].mxu0  ;;  %v480_v13 = vpop.f32.mrb[20].mxu1 }
 0x11b   :  { %608 = vst.msk [vmem:[%s1552_s3 + $0x48] sm:$0xff] %vm598_vm3, %v558_v10  ;;  %633 = vst.msk [vmem:[%s1552_s3 + $0x110] sm:$0xff] %vm598_vm3, %v583_v11  ;;  %v356_v14 = vadd.f32 %v1302_v58, %v355_v12  ;;  %v800_v15 = vpop.f32.mrb[21].mxu0  ;;  %v481_v16 = vadd.f32 %v1302_v58, %v480_v13  ;;  %v875_v17 = vpop.f32.mrb[21].mxu1 }
 0x11d   :  { %v559_v18 = vmax.f32 %v356_v14, 0.0  ;;  %v584_v19 = vmax.f32 %v481_v16, 0.0 }
 0x11e   :  { %v360_v20 = vpop.f32.mrb[22].mxu0  ;;  %v485_v21 = vpop.f32.mrb[22].mxu1 }
 0x11f   :  { %609 = vst.msk [vmem:[%s1552_s3 + $0x50] sm:$0xff] %vm598_vm3, %v559_v18  ;;  %634 = vst.msk [vmem:[%s1552_s3 + $0x118] sm:$0xff] %vm598_vm3, %v584_v19  ;;  %v361_v22 = vadd.f32 %v1302_v58, %v360_v20  ;;  %v803_v23 = vpop.f32.mrb[23].mxu0  ;;  %v486_v24 = vadd.f32 %v1302_v58, %v485_v21  ;;  %v878_v25 = vpop.f32.mrb[23].mxu1 }
 0x121   :  { %v560_v26 = vmax.f32 %v361_v22, 0.0  ;;  %v585_v27 = vmax.f32 %v486_v24, 0.0 }
 0x122   :  { %v365_v28 = vpop.f32.mrb[24].mxu0  ;;  %v490_v29 = vpop.f32.mrb[24].mxu1 }
 0x123   :  { %610 = vst.msk [vmem:[%s1552_s3 + $0x58] sm:$0xff] %vm598_vm3, %v560_v26  ;;  %635 = vst.msk [vmem:[%s1552_s3 + $0x120] sm:$0xff] %vm598_vm3, %v585_v27  ;;  %v366_v30 = vadd.f32 %v1302_v58, %v365_v28  ;;  %v806_v31 = vpop.f32.mrb[25].mxu0  ;;  %v491_v32 = vadd.f32 %v1302_v58, %v490_v29  ;;  %v881_v33 = vpop.f32.mrb[25].mxu1 }
 0x125   :  { %v561_v34 = vmax.f32 %v366_v30, 0.0  ;;  %v586_v35 = vmax.f32 %v491_v32, 0.0 }
 0x126   :  { %v370_v36 = vpop.f32.mrb[26].mxu0  ;;  %v495_v37 = vpop.f32.mrb[26].mxu1 }
 0x127   :  { %611 = vst.msk [vmem:[%s1552_s3 + $0x60] sm:$0xff] %vm598_vm3, %v561_v34  ;;  %636 = vst.msk [vmem:[%s1552_s3 + $0x128] sm:$0xff] %vm598_vm3, %v586_v35  ;;  %v371_v38 = vadd.f32 %v1302_v58, %v370_v36  ;;  %v809_v39 = vpop.f32.mrb[27].mxu0  ;;  %v496_v40 = vadd.f32 %v1302_v58, %v495_v37  ;;  %v884_v41 = vpop.f32.mrb[27].mxu1 }
 0x129   :  { %v562_v42 = vmax.f32 %v371_v38, 0.0  ;;  %v587_v43 = vmax.f32 %v496_v40, 0.0 }
 0x12a   :  { %v375_v44 = vpop.f32.mrb[28].mxu0  ;;  %v500_v45 = vpop.f32.mrb[28].mxu1 }
 0x12b   :  { %612 = vst.msk [vmem:[%s1552_s3 + $0x68] sm:$0xff] %vm598_vm3, %v562_v42  ;;  %637 = vst.msk [vmem:[%s1552_s3 + $0x130] sm:$0xff] %vm598_vm3, %v587_v43  ;;  %v376_v46 = vadd.f32 %v1302_v58, %v375_v44  ;;  %v812_v47 = vpop.f32.mrb[29].mxu0  ;;  %v501_v48 = vadd.f32 %v1302_v58, %v500_v45  ;;  %v887_v49 = vpop.f32.mrb[29].mxu1 }
 0x12d   :  { %v563_v50 = vmax.f32 %v376_v46, 0.0  ;;  %v588_v51 = vmax.f32 %v501_v48, 0.0 }
 0x12e   :  { %v380_v52 = vpop.f32.mrb[30].mxu0  ;;  %v505_v53 = vpop.f32.mrb[30].mxu1 }
 0x12f   :  { %613 = vst.msk [vmem:[%s1552_s3 + $0x70] sm:$0xff] %vm598_vm3, %v563_v50  ;;  %638 = vst.msk [vmem:[%s1552_s3 + $0x138] sm:$0xff] %vm598_vm3, %v588_v51  ;;  %v381_v54 = vadd.f32 %v1302_v58, %v380_v52  ;;  %v815_v55 = vpop.f32.mrb[31].mxu0  ;;  %v506_v56 = vadd.f32 %v1302_v58, %v505_v53  ;;  %v890_v57 = vpop.f32.mrb[31].mxu1 }
 0x131   :  { %v564_v59 = vmax.f32 %v381_v54, 0.0  ;;  %v589_v60 = vmax.f32 %v506_v56, 0.0 }
 0x132   :  { %v385_v61 = vpop.f32.mrb[32].mxu0  ;;  %v510_v62 = vpop.f32.mrb[32].mxu1 }
 0x133   :  { %614 = vst.msk [vmem:[%s1552_s3 + $0x78] sm:$0xff] %vm598_vm3, %v564_v59  ;;  %639 = vst.msk [vmem:[%s1552_s3 + $0x140] sm:$0xff] %vm598_vm3, %v589_v60  ;;  %v386_v63 = vadd.f32 %v1302_v58, %v385_v61  ;;  %v818_v0 = vpop.f32.mrb[33].mxu0  ;;  %v511_v2 = vadd.f32 %v1302_v58, %v510_v62  ;;  %v893_v3 = vpop.f32.mrb[33].mxu1 }
 0x135   :  { %v565_v1 = vmax.f32 %v386_v63, 0.0  ;;  %v590_v4 = vmax.f32 %v511_v2, 0.0 }
 0x136   :  { %v390_v5 = vpop.f32.mrb[34].mxu0  ;;  %v515_v6 = vpop.f32.mrb[34].mxu1 }
 0x137   :  { %615 = vst.msk [vmem:[%s1552_s3 + $0x80] sm:$0xff] %vm598_vm3, %v565_v1  ;;  %640 = vst.msk [vmem:[%s1552_s3 + $0x148] sm:$0xff] %vm598_vm3, %v590_v4  ;;  %v391_v7 = vadd.f32 %v1302_v58, %v390_v5  ;;  %v821_v8 = vpop.f32.mrb[35].mxu0  ;;  %v516_v9 = vadd.f32 %v1302_v58, %v515_v6  ;;  %v896_v10 = vpop.f32.mrb[35].mxu1 }
 0x139   :  { %v566_v11 = vmax.f32 %v391_v7, 0.0  ;;  %v591_v12 = vmax.f32 %v516_v9, 0.0 }
 0x13a   :  { %v395_v13 = vpop.f32.mrb[36].mxu0  ;;  %v520_v14 = vpop.f32.mrb[36].mxu1 }
 0x13b   :  { %616 = vst.msk [vmem:[%s1552_s3 + $0x88] sm:$0xff] %vm598_vm3, %v566_v11  ;;  %641 = vst.msk [vmem:[%s1552_s3 + $0x150] sm:$0xff] %vm598_vm3, %v591_v12  ;;  %v396_v15 = vadd.f32 %v1302_v58, %v395_v13  ;;  %v824_v16 = vpop.f32.mrb[37].mxu0  ;;  %v521_v17 = vadd.f32 %v1302_v58, %v520_v14  ;;  %v899_v18 = vpop.f32.mrb[37].mxu1 }
 0x13d   :  { %v567_v19 = vmax.f32 %v396_v15, 0.0  ;;  %v592_v20 = vmax.f32 %v521_v17, 0.0 }
 0x13e   :  { %v400_v21 = vpop.f32.mrb[38].mxu0  ;;  %v525_v22 = vpop.f32.mrb[38].mxu1 }
 0x13f   :  { %617 = vst.msk [vmem:[%s1552_s3 + $0x90] sm:$0xff] %vm598_vm3, %v567_v19  ;;  %642 = vst.msk [vmem:[%s1552_s3 + $0x158] sm:$0xff] %vm598_vm3, %v592_v20  ;;  %v401_v23 = vadd.f32 %v1302_v58, %v400_v21  ;;  %v827_v24 = vpop.f32.mrb[39].mxu0  ;;  %v526_v25 = vadd.f32 %v1302_v58, %v525_v22  ;;  %v902_v26 = vpop.f32.mrb[39].mxu1 }
 0x141   :  { %v568_v27 = vmax.f32 %v401_v23, 0.0  ;;  %v593_v28 = vmax.f32 %v526_v25, 0.0 }
 0x142   :  { %v405_v29 = vpop.f32.mrb[40].mxu0  ;;  %v530_v30 = vpop.f32.mrb[40].mxu1 }
 0x143   :  { %618 = vst.msk [vmem:[%s1552_s3 + $0x98] sm:$0xff] %vm598_vm3, %v568_v27  ;;  %643 = vst.msk [vmem:[%s1552_s3 + $0x160] sm:$0xff] %vm598_vm3, %v593_v28  ;;  %v406_v31 = vadd.f32 %v1302_v58, %v405_v29  ;;  %v830_v32 = vpop.f32.mrb[41].mxu0  ;;  %v531_v33 = vadd.f32 %v1302_v58, %v530_v30  ;;  %v905_v34 = vpop.f32.mrb[41].mxu1 }
 0x145   :  { %v569_v35 = vmax.f32 %v406_v31, 0.0  ;;  %v594_v36 = vmax.f32 %v531_v33, 0.0 }
 0x146   :  { %v410_v37 = vpop.f32.mrb[42].mxu0  ;;  %v535_v38 = vpop.f32.mrb[42].mxu1 }
 0x147   :  { %619 = vst.msk [vmem:[%s1552_s3 + $0xa0] sm:$0xff] %vm598_vm3, %v569_v35  ;;  %644 = vst.msk [vmem:[%s1552_s3 + $0x168] sm:$0xff] %vm598_vm3, %v594_v36  ;;  %v411_v39 = vadd.f32 %v1302_v58, %v410_v37  ;;  %v833_v40 = vpop.f32.mrb[43].mxu0  ;;  %v536_v41 = vadd.f32 %v1302_v58, %v535_v38  ;;  %v908_v42 = vpop.f32.mrb[43].mxu1 }
 0x149   :  { %v570_v43 = vmax.f32 %v411_v39, 0.0  ;;  %v595_v44 = vmax.f32 %v536_v41, 0.0 }
 0x14a   :  { %v415_v45 = vpop.f32.mrb[44].mxu0  ;;  %v540_v46 = vpop.f32.mrb[44].mxu1 }
 0x14b   :  { %620 = vst.msk [vmem:[%s1552_s3 + $0xa8] sm:$0xff] %vm598_vm3, %v570_v43  ;;  %645 = vst.msk [vmem:[%s1552_s3 + $0x170] sm:$0xff] %vm598_vm3, %v595_v44  ;;  %v416_v47 = vadd.f32 %v1302_v58, %v415_v45  ;;  %v836_v48 = vpop.f32.mrb[45].mxu0  ;;  %v541_v49 = vadd.f32 %v1302_v58, %v540_v46  ;;  %v911_v50 = vpop.f32.mrb[45].mxu1 }
 0x14d   :  { %v571_v51 = vmax.f32 %v416_v47, 0.0  ;;  %v596_v52 = vmax.f32 %v541_v49, 0.0 }
 0x14e   :  { %v420_v53 = vpop.f32.mrb[46].mxu0  ;;  %v545_v54 = vpop.f32.mrb[46].mxu1 }
 0x14f   :  { %621 = vst.msk [vmem:[%s1552_s3 + $0xb0] sm:$0xff] %vm598_vm3, %v571_v51  ;;  %646 = vst.msk [vmem:[%s1552_s3 + $0x178] sm:$0xff] %vm598_vm3, %v596_v52  ;;  %v421_v55 = vadd.f32 %v1302_v58, %v420_v53  ;;  %v839_v56 = vpop.f32.mrb[47].mxu0  ;;  %v546_v57 = vadd.f32 %v1302_v58, %v545_v54  ;;  %v914_v59 = vpop.f32.mrb[47].mxu1 }
 0x151   :  { %v572_v60 = vmax.f32 %v421_v55, 0.0  ;;  %v597_v61 = vmax.f32 %v546_v57, 0.0 }
 0x152   :  { %v425_v62 = vpop.f32.mrb[48].mxu0 }
 0x153   :  { %622 = vst.msk [vmem:[%s1552_s3 + $0xb8] sm:$0xff] %vm598_vm3, %v572_v60  ;;  %647 = vst.msk [vmem:[%s1552_s3 + $0x180] sm:$0xff] %vm598_vm3, %v597_v61  ;;  %v426_v63 = vadd.f32 %v1302_v58, %v425_v62  ;;  %v842_v0 = vpop.f32.mrb[49].mxu0 }
 0x155   :  { %v573_v2 = vmax.f32 %v426_v63, 0.0 }
 0x157   :  { %623 = vst.msk [vmem:[%s1552_s3 + $0xc0] sm:$0xff] %vm598_vm3, %v573_v2 }
 0x158   :  { %652 = vsyncpa [#allocation3], 1 }

// kernel: ppo_forward.5
= control target key start
LH: loop header
LB: loop body
LE: loop exit
PB: predicated region body
PF: predicated region fallthrough
CT: control target
= control target key end

     0   :  { %8 = vsyncpa [#allocation3], 0  ;;  %s1107_s12 = smov [#allocation2]   ;;  %s1856_s0 = inlined_call_operand.vmem [shape: f32[288,288], index: 0, kind: input, shape index: {}]   ;;  %s1857_s1 = inlined_call_operand.vmem [shape: f32[288,64], index: 1, kind: input, shape index: {}]   ;;  %s1858_s2 = inlined_call_operand.hbm [shape: f32[1,64], index: 2, kind: input, shape index: {}]   ;;  %s1859_s3 = inlined_call_operand.vmem [shape: f32[288,64], index: 3, kind: output, shape index: {}]  }
   0x1   :  { %s19_s13 = sshll.u32 %s1107_s12, 4  ;;  %s1083_s16 = scalar_lea.hbm %s1858_s2, 16  ;;  %s20_s13 = int_to_ptr.vmem [resolvable:$true] %s19_s13 }
   0x2   :  { %p1084_p0 = scmp.ne.s32.totalorder %s1858_s2, %s1083_s16  ;;  %p1087_p1 = scmp.lt.u32.totalorder %s1083_s16, %s1858_s2 }
   0x4   :  { %p1089_p2 = pnand %p1087_p1, %p1084_p0 }
   0x6   :  { %1092 = shalt.err (!%p1089_p2)
}
   0x7   :  { %s1093_s21 = scalar_lea.vmem %s20_s13, 16  ;;  %s1097_s22 = scalar_lea.vmem %s20_s13, 32 }
   0x8   :  { %p1094_p3 = scmp.ne.s32.totalorder %s20_s13, %s1093_s21  ;;  %p1098_p4 = scmp.lt.s32.totalorder %s20_s13, %s20_s13 }
   0x9   :  { %p1099_p5 = scmp.lt.s32.totalorder %s1097_s22, %s1093_s21 }
   0xb   :  { %p1100_p6 = por %p1099_p5, %p1098_p4 }
   0xd   :  { %p1101_p7 = pnand %p1100_p6, %p1094_p3 }
   0xf   :  { %1104 = shalt.err (!%p1101_p7)
}
  0x10   :  { %22 = dma.hbm_to_vmem [thread:$0]  %s1858_s2, 16, %s20_s13, [#allocation3]  }
  0x11   :  { %1105 = dma.done.wait [#allocation3], 16  }
  0x12   :  { %1106 = vsyncadd [#allocation3], 4294967280  ;;  %v1108_v0 = vmov 0.0|0.0   ;;  %v134_v1 = vld [vmem:[%s1857_s1] sm:$0xff]  ;;  %v135_v2 = vld [vmem:[%s1857_s1 + $0x8] sm:$0xff]  ;;  %vm177_vm0 = vcmask 261120  }
  0x13   :  { %993 = vmatprep.subr.bf16.mxu0 %v1108_v0  ;;  %1049 = vmatprep.subr.bf16.mxu1 %v1108_v0  ;;  %v136_v3 = vld [vmem:[%s1857_s1 + $0x10] sm:$0xff]  ;;  %v994_v4 = vpack.c.bf16 %v135_v2, %v134_v1  ;;  %v137_v5 = vld [vmem:[%s1857_s1 + $0x18] sm:$0xff]  ;;  %v138_v7 = vld [vmem:[%s1857_s1 + $0x20] sm:$0xff]  ;;  %vm812_vm1 = vcmask 523264  }
  0x14   :  { %v997_v6 = vpack.c.bf16 %v137_v5, %v136_v3  ;;  %v139_v8 = vld [vmem:[%s1857_s1 + $0x28] sm:$0xff]  ;;  %v140_v10 = vld [vmem:[%s1857_s1 + $0x30] sm:$0xff]  ;;  %v141_v11 = vld [vmem:[%s1857_s1 + $0x38] sm:$0xff] }
  0x15   :  { %995 = vmatpush1.bf16.msra.mxu0 %v994_v4  ;;  %1065 = vmatpush1.bf16.msra.mxu1 %v994_v4  ;;  %v1000_v9 = vpack.c.bf16 %v139_v8, %v138_v7  ;;  %v27_v12 = vld [vmem:[%s1856_s0 + $0x8] sm:$0xff]  ;;  %v1003_v13 = vpack.c.bf16 %v141_v11, %v140_v10  ;;  %v108_v14 = vld [vmem:[%s1856_s0 + $0x290] sm:$0xff]  ;;  %v142_v15 = vld [vmem:[%s1857_s1 + $0x40] sm:$0xff] }
  0x16   :  { %996 = vmatprep.subr.bf16.mxu0 %v1108_v0  ;;  %1050 = vmatprep.subr.bf16.mxu1 %v1108_v0  ;;  %v143_v16 = vld [vmem:[%s1857_s1 + $0x48] sm:$0xff]  ;;  %v144_v18 = vld [vmem:[%s1857_s1 + $0x50] sm:$0xff]  ;;  %v145_v19 = vld [vmem:[%s1857_s1 + $0x58] sm:$0xff] }
  0x17   :  { %350 = vmatprep.mubr.f32.mxu0 %v27_v12  ;;  %485 = vmatprep.mubr.f32.mxu1 %v108_v14  ;;  %v1006_v17 = vpack.c.bf16 %v143_v16, %v142_v15  ;;  %v1009_v20 = vpack.c.bf16 %v145_v19, %v144_v18  ;;  %v146_v21 = vld [vmem:[%s1857_s1 + $0x60] sm:$0xff]  ;;  %v147_v22 = vld [vmem:[%s1857_s1 + $0x68] sm:$0xff]  ;;  %v148_v24 = vld [vmem:[%s1857_s1 + $0x70] sm:$0xff] }
  0x18   :  { %v1012_v23 = vpack.c.bf16 %v147_v22, %v146_v21  ;;  %v149_v25 = vld [vmem:[%s1857_s1 + $0x78] sm:$0xff]  ;;  %v150_v27 = vld [vmem:[%s1857_s1 + $0x80] sm:$0xff]  ;;  %v151_v28 = vld [vmem:[%s1857_s1 + $0x88] sm:$0xff] }
  0x19   :  { %998 = vmatpush1.bf16.msra.mxu0 %v997_v6  ;;  %1066 = vmatpush1.bf16.msra.mxu1 %v997_v6  ;;  %v1015_v26 = vpack.c.bf16 %v149_v25, %v148_v24  ;;  %v1018_v29 = vpack.c.bf16 %v151_v28, %v150_v27  ;;  %v152_v30 = vld [vmem:[%s1857_s1 + $0x90] sm:$0xff]  ;;  %v153_v31 = vld [vmem:[%s1857_s1 + $0x98] sm:$0xff]  ;;  %v154_v33 = vld [vmem:[%s1857_s1 + $0xa0] sm:$0xff] }
  0x1a   :  { %999 = vmatprep.subr.bf16.mxu0 %v1108_v0  ;;  %1051 = vmatprep.subr.bf16.mxu1 %v1108_v0  ;;  %v1021_v32 = vpack.c.bf16 %v153_v31, %v152_v30  ;;  %v155_v34 = vld [vmem:[%s1857_s1 + $0xa8] sm:$0xff]  ;;  %v156_v36 = vld [vmem:[%s1857_s1 + $0xb0] sm:$0xff]  ;;  %v157_v37 = vld [vmem:[%s1857_s1 + $0xb8] sm:$0xff] }
  0x1b   :  { %v1024_v35 = vpack.c.bf16 %v155_v34, %v154_v33  ;;  %v1027_v38 = vpack.c.bf16 %v157_v37, %v156_v36  ;;  %v158_v39 = vld [vmem:[%s1857_s1 + $0xc0] sm:$0xff]  ;;  %v159_v40 = vld [vmem:[%s1857_s1 + $0xc8] sm:$0xff]  ;;  %v160_v42 = vld [vmem:[%s1857_s1 + $0xd0] sm:$0xff] }
  0x1c   :  { %v1030_v41 = vpack.c.bf16 %v159_v40, %v158_v39  ;;  %v161_v43 = vld [vmem:[%s1857_s1 + $0xd8] sm:$0xff]  ;;  %v162_v45 = vld [vmem:[%s1857_s1 + $0xe0] sm:$0xff]  ;;  %v163_v46 = vld [vmem:[%s1857_s1 + $0xe8] sm:$0xff] }
  0x1d   :  { %1001 = vmatpush1.bf16.msra.mxu0 %v1000_v9  ;;  %1067 = vmatpush1.bf16.msra.mxu1 %v1000_v9  ;;  %v1033_v44 = vpack.c.bf16 %v161_v43, %v160_v42  ;;  %v1036_v47 = vpack.c.bf16 %v163_v46, %v162_v45  ;;  %v164_v48 = vld [vmem:[%s1857_s1 + $0xf0] sm:$0xff]  ;;  %v165_v49 = vld [vmem:[%s1857_s1 + $0xf8] sm:$0xff]  ;;  %v166_v50 = vld [vmem:[%s1857_s1 + $0x100] sm:$0xff] }
  0x1e   :  { %1002 = vmatprep.subr.bf16.mxu0 %v1108_v0  ;;  %1052 = vmatprep.subr.bf16.mxu1 %v1108_v0  ;;  %v167_v51 = vld [vmem:[%s1857_s1 + $0x108] sm:$0xff]  ;;  %v1039_v52 = vpack.c.bf16 %v165_v49, %v164_v48  ;;  %v168_v54 = vld [vmem:[%s1857_s1 + $0x110] sm:$0xff]  ;;  %v169_v55 = vld [vmem:[%s1857_s1 + $0x118] sm:$0xff] }
  0x1f   :  { %v1041_v53 = vpack.c.bf16 %v167_v51, %v166_v50  ;;  %v26_v56 = vld [vmem:[%s1856_s0] sm:$0xff]  ;;  %v107_v57 = vld [vmem:[%s1856_s0 + $0x288] sm:$0xff]  ;;  %v1045_v59 = vpack.c.bf16 %v169_v55, %v168_v54  ;;  %v29_v61 = vld [vmem:[%s1856_s0 + $0x18] sm:$0xff] }
  0x20   :  { %v30_v58 = vld [vmem:[%s1856_s0 + $0x20] sm:$0xff]  ;;  %v111_v60 = vld [vmem:[%s1856_s0 + $0x2a8] sm:$0xff]  ;;  %v33_v63 = vld [vmem:[%s1856_s0 + $0x38] sm:$0xff] }
  0x21   :  { %1004 = vmatpush1.bf16.msra.mxu0 %v1003_v13  ;;  %1068 = vmatpush1.bf16.msra.mxu1 %v1003_v13  ;;  %v110_v62 = vld [vmem:[%s1856_s0 + $0x2a0] sm:$0xff]  ;;  %v32_v1 = vld [vmem:[%s1856_s0 + $0x30] sm:$0xff]  ;;  %v113_v2 = vld [vmem:[%s1856_s0 + $0x2b8] sm:$0xff] }
  0x22   :  { %1005 = vmatprep.subr.bf16.mxu0 %v1108_v0  ;;  %1053 = vmatprep.subr.bf16.mxu1 %v1108_v0  ;;  %v36_v3 = vld [vmem:[%s1856_s0 + $0x50] sm:$0xff]  ;;  %v117_v4 = vld [vmem:[%s1856_s0 + $0x2d8] sm:$0xff]  ;;  %v35_v5 = vld [vmem:[%s1856_s0 + $0x48] sm:$0xff] }
  0x23   :  { %v116_v6 = vld [vmem:[%s1856_s0 + $0x2d0] sm:$0xff]  ;;  %v39_v7 = vld [vmem:[%s1856_s0 + $0x68] sm:$0xff]  ;;  %v38_v9 = vld [vmem:[%s1856_s0 + $0x60] sm:$0xff] }
  0x24   :  { %v120_v8 = vld [vmem:[%s1856_s0 + $0x2f0] sm:$0xff]  ;;  %v119_v10 = vld [vmem:[%s1856_s0 + $0x2e8] sm:$0xff]  ;;  %v42_v11 = vld [vmem:[%s1856_s0 + $0x80] sm:$0xff] }
  0x25   :  { %1007 = vmatpush1.bf16.msra.mxu0 %v1006_v17  ;;  %1069 = vmatpush1.bf16.msra.mxu1 %v1006_v17  ;;  %v123_v12 = vld [vmem:[%s1856_s0 + $0x308] sm:$0xff]  ;;  %v41_v13 = vld [vmem:[%s1856_s0 + $0x78] sm:$0xff]  ;;  %v122_v14 = vld [vmem:[%s1856_s0 + $0x300] sm:$0xff] }
  0x26   :  { %1008 = vmatprep.subr.bf16.mxu0 %v1108_v0  ;;  %1054 = vmatprep.subr.bf16.mxu1 %v1108_v0  ;;  %v45_v15 = vld [vmem:[%s1856_s0 + $0x98] sm:$0xff]  ;;  %v126_v16 = vld [vmem:[%s1856_s0 + $0x320] sm:$0xff]  ;;  %v44_v17 = vld [vmem:[%s1856_s0 + $0x90] sm:$0xff] }
  0x27   :  { %v125_v18 = vld [vmem:[%s1856_s0 + $0x318] sm:$0xff]  ;;  %v48_v19 = vld [vmem:[%s1856_s0 + $0xb0] sm:$0xff]  ;;  %v47_v21 = vld [vmem:[%s1856_s0 + $0xa8] sm:$0xff] }
  0x28   :  { %v128_v22 = vld [vmem:[%s1856_s0 + $0x330] sm:$0xff]  ;;  %v50_v25 = vld [vmem:[%s1856_s0 + $0xc0] sm:$0xff]  ;;  %v31_v30 = vld [vmem:[%s1856_s0 + $0x28] sm:$0xff] }
  0x29   :  { %1010 = vmatpush1.bf16.msra.mxu0 %v1009_v20  ;;  %1070 = vmatpush1.bf16.msra.mxu1 %v1009_v20  ;;  %v129_v20 = vld [vmem:[%s1856_s0 + $0x338] sm:$0xff]  ;;  %v132_v24 = vld [vmem:[%s1856_s0 + $0x350] sm:$0xff]  ;;  %v54_v27 = vld [vmem:[%s1856_s0 + $0xe0] sm:$0xff] }
  0x2a   :  { %1011 = vmatprep.subr.bf16.mxu0 %v1108_v0  ;;  %1055 = vmatprep.subr.bf16.mxu1 %v1108_v0  ;;  %v28_v28 = vld [vmem:[%s1856_s0 + $0x10] sm:$0xff]  ;;  %v57_v31 = vld [vmem:[%s1856_s0 + $0xf8] sm:$0xff]  ;;  %v59_v37 = vld [vmem:[%s1856_s0 + $0x108] sm:$0xff] }
  0x2b   :  { %v56_v33 = vld [vmem:[%s1856_s0 + $0xf0] sm:$0xff]  ;;  %v37_v34 = vld [vmem:[%s1856_s0 + $0x58] sm:$0xff]  ;;  %v63_v39 = vld [vmem:[%s1856_s0 + $0x128] sm:$0xff] }
  0x2c   :  { %v40_v36 = vld [vmem:[%s1856_s0 + $0x70] sm:$0xff]  ;;  %v46_v40 = vld [vmem:[%s1856_s0 + $0xa0] sm:$0xff]  ;;  %v49_v42 = vld [vmem:[%s1856_s0 + $0xb8] sm:$0xff] }
  0x2d   :  { %1013 = vmatpush1.bf16.msra.mxu0 %v1012_v23  ;;  %1071 = vmatpush1.bf16.msra.mxu1 %v1012_v23  ;;  %v51_v23 = vld [vmem:[%s1856_s0 + $0xc8] sm:$0xff]  ;;  %v66_v43 = vld [vmem:[%s1856_s0 + $0x140] sm:$0xff]  ;;  %v65_v45 = vld [vmem:[%s1856_s0 + $0x138] sm:$0xff] }
  0x2e   :  { %1014 = vmatprep.subr.bf16.mxu0 %v1108_v0  ;;  %1056 = vmatprep.subr.bf16.mxu1 %v1108_v0  ;;  %v55_v46 = vld [vmem:[%s1856_s0 + $0xe8] sm:$0xff]  ;;  %v58_v48 = vld [vmem:[%s1856_s0 + $0x100] sm:$0xff]  ;;  %v68_v49 = vld [vmem:[%s1856_s0 + $0x150] sm:$0xff] }
  0x2f   :  { %v61_v50 = vld [vmem:[%s1856_s0 + $0x118] sm:$0xff]  ;;  %v72_v51 = vld [vmem:[%s1856_s0 + $0x170] sm:$0xff]  ;;  %v67_v54 = vld [vmem:[%s1856_s0 + $0x148] sm:$0xff] }
  0x30   :  { %v75_v55 = vld [vmem:[%s1856_s0 + $0x188] sm:$0xff] }
  0x31   :  { %1016 = vmatpush1.bf16.msra.mxu0 %v1015_v26  ;;  %1072 = vmatpush1.bf16.msra.mxu1 %v1015_v26  ;;  %v131_v26 = vld [vmem:[%s1856_s0 + $0x348] sm:$0xff] }
  0x32   :  { %1017 = vmatprep.subr.bf16.mxu0 %v1108_v0  ;;  %1057 = vmatprep.subr.bf16.mxu1 %v1108_v0 }
  0x35   :  { %1019 = vmatpush1.bf16.msra.mxu0 %v1018_v29  ;;  %1073 = vmatpush1.bf16.msra.mxu1 %v1018_v29  ;;  %v53_v29 = vld [vmem:[%s1856_s0 + $0xd8] sm:$0xff] }
  0x36   :  { %1020 = vmatprep.subr.bf16.mxu0 %v1108_v0  ;;  %1058 = vmatprep.subr.bf16.mxu1 %v1108_v0 }
  0x39   :  { %1022 = vmatpush1.bf16.msra.mxu0 %v1021_v32  ;;  %1074 = vmatpush1.bf16.msra.mxu1 %v1021_v32  ;;  %v34_v32 = vld [vmem:[%s1856_s0 + $0x40] sm:$0xff] }
  0x3a   :  { %1023 = vmatprep.subr.bf16.mxu0 %v1108_v0  ;;  %1059 = vmatprep.subr.bf16.mxu1 %v1108_v0 }
  0x3d   :  { %1025 = vmatpush1.bf16.msra.mxu0 %v1024_v35  ;;  %1075 = vmatpush1.bf16.msra.mxu1 %v1024_v35  ;;  %v60_v35 = vld [vmem:[%s1856_s0 + $0x110] sm:$0xff] }
  0x3e   :  { %1026 = vmatprep.subr.bf16.mxu0 %v1108_v0  ;;  %1060 = vmatprep.subr.bf16.mxu1 %v1108_v0 }
  0x41   :  { %1028 = vmatpush1.bf16.msra.mxu0 %v1027_v38  ;;  %1076 = vmatpush1.bf16.msra.mxu1 %v1027_v38  ;;  %v43_v38 = vld [vmem:[%s1856_s0 + $0x88] sm:$0xff] }
  0x42   :  { %1029 = vmatprep.subr.bf16.mxu0 %v1108_v0  ;;  %1061 = vmatprep.subr.bf16.mxu1 %v1108_v0 }
  0x45   :  { %1031 = vmatpush1.bf16.msra.mxu0 %v1030_v41  ;;  %1077 = vmatpush1.bf16.msra.mxu1 %v1030_v41  ;;  %v62_v41 = vld [vmem:[%s1856_s0 + $0x120] sm:$0xff] }
  0x46   :  { %1032 = vmatprep.subr.bf16.mxu0 %v1108_v0  ;;  %1062 = vmatprep.subr.bf16.mxu1 %v1108_v0 }
  0x49   :  { %1034 = vmatpush1.bf16.msra.mxu0 %v1033_v44  ;;  %1078 = vmatpush1.bf16.msra.mxu1 %v1033_v44  ;;  %v52_v44 = vld [vmem:[%s1856_s0 + $0xd0] sm:$0xff] }
  0x4a   :  { %1035 = vmatprep.subr.bf16.mxu0 %v1108_v0  ;;  %1063 = vmatprep.subr.bf16.mxu1 %v1108_v0 }
  0x4d   :  { %1037 = vmatpush1.bf16.msra.mxu0 %v1036_v47  ;;  %1079 = vmatpush1.bf16.msra.mxu1 %v1036_v47  ;;  %v69_v47 = vld [vmem:[%s1856_s0 + $0x158] sm:$0xff] }
  0x4e   :  { %1038 = vmatprep.subr.bf16.mxu0 %v1108_v0  ;;  %1064 = vmatprep.subr.bf16.mxu1 %v1108_v0  ;;  %v114_v0 = vld [vmem:[%s1856_s0 + $0x2c0] sm:$0xff] }
  0x51   :  { %1040 = vmatpush1.bf16.msra.mxu0 %v1039_v52  ;;  %1080 = vmatpush1.bf16.msra.mxu1 %v1039_v52  ;;  %v64_v52 = vld [vmem:[%s1856_s0 + $0x130] sm:$0xff] }
  0x52   :  { %1042 = vmatprep.subr.bf16.mxu1 %v1041_v53 }
  0x54   :  { %351 = vmatmul.mubr.f32.vlgmr.msra.gmra.mrb[0].mxu0 %v26_v56  ;;  %486 = vmatmul.mubr.f32.vlgmr.msra.gmra.mrb[0].mxu1 %v107_v57  ;;  %v70_v56 = vld [vmem:[%s1856_s0 + $0x160] sm:$0xff] }
  0x55   :  { %1044 = vmatpush3.bf16.msra.mxu1 %v1041_v53  ;;  %355 = vmatprep.mubr.f32.mxu0 %v30_v58  ;;  %v71_v53 = vld [vmem:[%s1856_s0 + $0x168] sm:$0xff]  ;;  %v74_v57 = vld [vmem:[%s1856_s0 + $0x180] sm:$0xff]  ;;  %v73_v58 = vld [vmem:[%s1856_s0 + $0x178] sm:$0xff] }
  0x56   :  { %490 = vmatprep.mubr.f32.mxu1 %v111_v60  ;;  %1046 = vmatprep.subr.bf16.mxu1 %v1045_v59  ;;  %v76_v60 = vld [vmem:[%s1856_s0 + $0x190] sm:$0xff] }
  0x58   :  { %356 = vmatmul.mubr.f32.gmra.mrb[2].mxu0 %v29_v61  ;;  %491 = vmatmul.mubr.f32.gmra.mrb[2].mxu1 %v110_v62  ;;  %v77_v61 = vld [vmem:[%s1856_s0 + $0x198] sm:$0xff]  ;;  %v79_v62 = vld [vmem:[%s1856_s0 + $0x1a8] sm:$0xff] }
  0x59   :  { %360 = vmatprep.mubr.f32.mxu0 %v33_v63  ;;  %495 = vmatprep.mubr.f32.mxu1 %v114_v0  ;;  %v81_v63 = vld [vmem:[%s1856_s0 + $0x1b8] sm:$0xff]  ;;  %v82_v0 = vld [vmem:[%s1856_s0 + $0x1c0] sm:$0xff] }
  0x5a   :  { %1048 = vmatpush3.bf16.msra.mxu1 %v1045_v59  ;;  %v78_v59 = vld [vmem:[%s1856_s0 + $0x1a0] sm:$0xff] }
  0x5c   :  { %361 = vmatmul.mubr.f32.gmra.mrb[4].mxu0 %v32_v1  ;;  %496 = vmatmul.mubr.f32.gmra.mrb[4].mxu1 %v113_v2  ;;  %v80_v1 = vld [vmem:[%s1856_s0 + $0x1b0] sm:$0xff]  ;;  %v85_v2 = vld [vmem:[%s1856_s0 + $0x1d8] sm:$0xff] }
  0x5d   :  { %365 = vmatprep.mubr.f32.mxu0 %v36_v3  ;;  %500 = vmatprep.mubr.f32.mxu1 %v117_v4  ;;  %v84_v3 = vld [vmem:[%s1856_s0 + $0x1d0] sm:$0xff] }
  0x5e   :  { %v88_v4 = vld [vmem:[%s1856_s0 + $0x1f0] sm:$0xff] }
  0x60   :  { %366 = vmatmul.mubr.f32.gmra.mrb[6].mxu0 %v35_v5  ;;  %501 = vmatmul.mubr.f32.gmra.mrb[6].mxu1 %v116_v6  ;;  %v83_v5 = vld [vmem:[%s1856_s0 + $0x1c8] sm:$0xff] }
  0x61   :  { %370 = vmatprep.mubr.f32.mxu0 %v39_v7  ;;  %505 = vmatprep.mubr.f32.mxu1 %v120_v8  ;;  %v91_v6 = vld [vmem:[%s1856_s0 + $0x208] sm:$0xff]  ;;  %v94_v8 = vld [vmem:[%s1856_s0 + $0x220] sm:$0xff] }
  0x62   :  { %v87_v7 = vld [vmem:[%s1856_s0 + $0x1e8] sm:$0xff] }
  0x64   :  { %371 = vmatmul.mubr.f32.gmra.mrb[8].mxu0 %v38_v9  ;;  %506 = vmatmul.mubr.f32.gmra.mrb[8].mxu1 %v119_v10  ;;  %v86_v9 = vld [vmem:[%s1856_s0 + $0x1e0] sm:$0xff]  ;;  %v97_v10 = vld [vmem:[%s1856_s0 + $0x238] sm:$0xff] }
  0x65   :  { %375 = vmatprep.mubr.f32.mxu0 %v42_v11  ;;  %510 = vmatprep.mubr.f32.mxu1 %v123_v12  ;;  %v90_v11 = vld [vmem:[%s1856_s0 + $0x200] sm:$0xff]  ;;  %v100_v12 = vld [vmem:[%s1856_s0 + $0x250] sm:$0xff] }
  0x68   :  { %376 = vmatmul.mubr.f32.gmra.mrb[10].mxu0 %v41_v13  ;;  %511 = vmatmul.mubr.f32.gmra.mrb[10].mxu1 %v122_v14  ;;  %v89_v13 = vld [vmem:[%s1856_s0 + $0x1f8] sm:$0xff]  ;;  %v103_v14 = vld [vmem:[%s1856_s0 + $0x268] sm:$0xff] }
  0x69   :  { %380 = vmatprep.mubr.f32.mxu0 %v45_v15  ;;  %515 = vmatprep.mubr.f32.mxu1 %v126_v16  ;;  %v93_v15 = vld [vmem:[%s1856_s0 + $0x218] sm:$0xff]  ;;  %v106_v16 = vld [vmem:[%s1856_s0 + $0x280] sm:$0xff] }
  0x6c   :  { %381 = vmatmul.mubr.f32.gmra.mrb[12].mxu0 %v44_v17  ;;  %516 = vmatmul.mubr.f32.gmra.mrb[12].mxu1 %v125_v18  ;;  %v92_v17 = vld [vmem:[%s1856_s0 + $0x210] sm:$0xff]  ;;  %v109_v18 = vld [vmem:[%s1856_s0 + $0x298] sm:$0xff] }
  0x6d   :  { %385 = vmatprep.mubr.f32.mxu0 %v48_v19  ;;  %520 = vmatprep.mubr.f32.mxu1 %v129_v20  ;;  %v96_v19 = vld [vmem:[%s1856_s0 + $0x230] sm:$0xff] }
  0x6e   :  { %v112_v20 = vld [vmem:[%s1856_s0 + $0x2b0] sm:$0xff] }
  0x70   :  { %386 = vmatmul.mubr.f32.gmra.mrb[14].mxu0 %v47_v21  ;;  %521 = vmatmul.mubr.f32.gmra.mrb[14].mxu1 %v128_v22  ;;  %v95_v21 = vld [vmem:[%s1856_s0 + $0x228] sm:$0xff] }
  0x71   :  { %390 = vmatprep.mubr.f32.mxu0 %v51_v23  ;;  %525 = vmatprep.mubr.f32.mxu1 %v132_v24  ;;  %v115_v22 = vld [vmem:[%s1856_s0 + $0x2c8] sm:$0xff]  ;;  %v118_v24 = vld [vmem:[%s1856_s0 + $0x2e0] sm:$0xff] }
  0x72   :  { %v99_v23 = vld [vmem:[%s1856_s0 + $0x248] sm:$0xff] }
  0x74   :  { %391 = vmatmul.mubr.f32.gmra.mrb[16].mxu0 %v50_v25  ;;  %526 = vmatmul.mubr.f32.gmra.mrb[16].mxu1 %v131_v26  ;;  %v98_v25 = vld [vmem:[%s1856_s0 + $0x240] sm:$0xff]  ;;  %v121_v26 = vld [vmem:[%s1856_s0 + $0x2f8] sm:$0xff] }
  0x75   :  { %395 = vmatprep.mubr.f32.mxu0 %v54_v27  ;;  %939 = vmatprep.mubr.msk.f32.mxu1 %vm177_vm0, %v28_v28  ;;  %v102_v27 = vld [vmem:[%s1856_s0 + $0x260] sm:$0xff]  ;;  %v124_v28 = vld [vmem:[%s1856_s0 + $0x310] sm:$0xff] }
  0x78   :  { %396 = vmatmul.mubr.f32.gmra.mrb[18].mxu0 %v53_v29  ;;  %940 = vmatmul.mubr.msk.f32.vlgmr.msra.gmra.mrb[18].mxu1 %vm177_vm0, %v31_v30  ;;  %v101_v29 = vld [vmem:[%s1856_s0 + $0x258] sm:$0xff]  ;;  %v127_v30 = vld [vmem:[%s1856_s0 + $0x328] sm:$0xff] }
  0x79   :  { %400 = vmatprep.mubr.f32.mxu0 %v57_v31  ;;  %942 = vmatprep.mubr.msk.f32.mxu1 %vm177_vm0, %v34_v32  ;;  %v105_v31 = vld [vmem:[%s1856_s0 + $0x278] sm:$0xff]  ;;  %v130_v32 = vld [vmem:[%s1856_s0 + $0x340] sm:$0xff] }
  0x7c   :  { %401 = vmatmul.mubr.f32.gmra.mrb[20].mxu0 %v56_v33  ;;  %943 = vmatmul.mubr.msk.f32.gmra.mrb[20].mxu1 %vm177_vm0, %v37_v34  ;;  %v104_v33 = vld [vmem:[%s1856_s0 + $0x270] sm:$0xff]  ;;  %v133_v34 = vld [vmem:[%s1856_s0 + $0x358] sm:$0xff] }
  0x7d   :  { %405 = vmatprep.mubr.f32.mxu0 %v60_v35  ;;  %945 = vmatprep.mubr.msk.f32.mxu1 %vm177_vm0, %v40_v36 }
  0x80   :  { %406 = vmatmul.mubr.f32.gmra.mrb[22].mxu0 %v59_v37  ;;  %946 = vmatmul.mubr.msk.f32.gmra.mrb[22].mxu1 %vm177_vm0, %v43_v38 }
  0x81   :  { %410 = vmatprep.mubr.f32.mxu0 %v63_v39  ;;  %948 = vmatprep.mubr.msk.f32.mxu1 %vm177_vm0, %v46_v40 }
  0x84   :  { %411 = vmatmul.mubr.f32.gmra.mrb[24].mxu0 %v62_v41  ;;  %949 = vmatmul.mubr.msk.f32.gmra.mrb[24].mxu1 %vm177_vm0, %v49_v42 }
  0x85   :  { %415 = vmatprep.mubr.f32.mxu0 %v66_v43  ;;  %951 = vmatprep.mubr.msk.f32.mxu1 %vm177_vm0, %v52_v44 }
  0x88   :  { %416 = vmatmul.mubr.f32.gmra.mrb[26].mxu0 %v65_v45  ;;  %952 = vmatmul.mubr.msk.f32.gmra.mrb[26].mxu1 %vm177_vm0, %v55_v46 }
  0x89   :  { %420 = vmatprep.mubr.f32.mxu0 %v69_v47  ;;  %954 = vmatprep.mubr.msk.f32.mxu1 %vm177_vm0, %v58_v48 }
  0x8c   :  { %421 = vmatmul.mubr.f32.gmra.mrb[28].mxu0 %v68_v49  ;;  %955 = vmatmul.mubr.msk.f32.gmra.mrb[28].mxu1 %vm177_vm0, %v61_v50 }
  0x8d   :  { %425 = vmatprep.mubr.f32.mxu0 %v72_v51  ;;  %957 = vmatprep.mubr.msk.f32.mxu1 %vm177_vm0, %v64_v52 }
  0x90   :  { %426 = vmatmul.mubr.f32.gmra.mrb[30].mxu0 %v71_v53  ;;  %958 = vmatmul.mubr.msk.f32.gmra.mrb[30].mxu1 %vm177_vm0, %v67_v54 }
  0x91   :  { %430 = vmatprep.mubr.f32.mxu0 %v75_v55  ;;  %960 = vmatprep.mubr.msk.f32.mxu1 %vm177_vm0, %v70_v56 }
  0x94   :  { %431 = vmatmul.mubr.f32.gmra.mrb[32].mxu0 %v74_v57  ;;  %961 = vmatmul.mubr.msk.f32.gmra.mrb[32].mxu1 %vm177_vm0, %v73_v58 }
  0x95   :  { %435 = vmatprep.mubr.f32.mxu0 %v78_v59  ;;  %963 = vmatprep.mubr.msk.f32.mxu1 %vm177_vm0, %v76_v60 }
  0x98   :  { %436 = vmatmul.mubr.f32.gmra.mrb[34].mxu0 %v77_v61  ;;  %964 = vmatmul.mubr.msk.f32.gmra.mrb[34].mxu1 %vm177_vm0, %v79_v62 }
  0x99   :  { %440 = vmatprep.mubr.f32.mxu0 %v81_v63  ;;  %966 = vmatprep.mubr.msk.f32.mxu1 %vm177_vm0, %v82_v0 }
  0x9c   :  { %441 = vmatmul.mubr.f32.gmra.mrb[36].mxu0 %v80_v1  ;;  %967 = vmatmul.mubr.msk.f32.gmra.mrb[36].mxu1 %vm177_vm0, %v85_v2 }
  0x9d   :  { %445 = vmatprep.mubr.f32.mxu0 %v84_v3  ;;  %969 = vmatprep.mubr.msk.f32.mxu1 %vm177_vm0, %v88_v4 }
  0xa0   :  { %446 = vmatmul.mubr.f32.gmra.mrb[38].mxu0 %v83_v5  ;;  %970 = vmatmul.mubr.msk.f32.gmra.mrb[38].mxu1 %vm177_vm0, %v91_v6  ;;  %v1659_v5 = vld [vmem:[#allocation2] ss:$0 sm:$0xff] }
  0xa1   :  { %450 = vmatprep.mubr.f32.mxu0 %v87_v7  ;;  %972 = vmatprep.mubr.msk.f32.mxu1 %vm177_vm0, %v94_v8 }
  0xa4   :  { %451 = vmatmul.mubr.f32.gmra.mrb[40].mxu0 %v86_v9  ;;  %973 = vmatmul.mubr.msk.f32.gmra.mrb[40].mxu1 %vm177_vm0, %v97_v10 }
  0xa5   :  { %455 = vmatprep.mubr.f32.mxu0 %v90_v11  ;;  %975 = vmatprep.mubr.msk.f32.mxu1 %vm177_vm0, %v100_v12 }
  0xa8   :  { %456 = vmatmul.mubr.f32.gmra.mrb[42].mxu0 %v89_v13  ;;  %976 = vmatmul.mubr.msk.f32.gmra.mrb[42].mxu1 %vm177_vm0, %v103_v14 }
  0xa9   :  { %460 = vmatprep.mubr.f32.mxu0 %v93_v15  ;;  %978 = vmatprep.mubr.msk.f32.mxu1 %vm177_vm0, %v106_v16 }
  0xac   :  { %461 = vmatmul.mubr.f32.gmra.mrb[44].mxu0 %v92_v17  ;;  %979 = vmatmul.mubr.msk.f32.gmra.mrb[44].mxu1 %vm177_vm0, %v109_v18 }
  0xad   :  { %465 = vmatprep.mubr.f32.mxu0 %v96_v19  ;;  %981 = vmatprep.mubr.msk.f32.mxu1 %vm177_vm0, %v112_v20 }
  0xb0   :  { %466 = vmatmul.mubr.f32.gmra.mrb[46].mxu0 %v95_v21  ;;  %982 = vmatmul.mubr.msk.f32.gmra.mrb[46].mxu1 %vm177_vm0, %v115_v22 }
  0xb1   :  { %470 = vmatprep.mubr.f32.mxu0 %v99_v23  ;;  %984 = vmatprep.mubr.msk.f32.mxu1 %vm177_vm0, %v118_v24 }
  0xb4   :  { %471 = vmatmul.mubr.f32.gmra.mrb[48].mxu0 %v98_v25  ;;  %985 = vmatmul.mubr.msk.f32.gmra.mrb[48].mxu1 %vm177_vm0, %v121_v26 }
  0xb5   :  { %475 = vmatprep.mubr.f32.mxu0 %v102_v27  ;;  %987 = vmatprep.mubr.msk.f32.mxu1 %vm177_vm0, %v124_v28 }
  0xb8   :  { %476 = vmatmul.mubr.f32.gmra.mrb[50].mxu0 %v101_v29  ;;  %988 = vmatmul.mubr.msk.f32.gmra.mrb[50].mxu1 %vm177_vm0, %v127_v30 }
  0xb9   :  { %480 = vmatprep.mubr.f32.mxu0 %v105_v31  ;;  %990 = vmatprep.mubr.msk.f32.mxu1 %vm177_vm0, %v130_v32 }
  0xbc   :  { %481 = vmatmul.mubr.f32.gmra.mrb[52].mxu0 %v104_v33  ;;  %991 = vmatmul.mubr.msk.f32.gmra.mrb[52].mxu1 %vm177_vm0, %v133_v34 }
 0x127   :  { %v352_v35 = vpop.f32.mrb[0].mxu0  ;;  %v1641_v36 = vpop.f32.mrb[0].mxu1 }
 0x128   :  { %v354_v37 = vpop.f32.mrb[1].mxu0  ;;  %v489_v38 = vpop.f32.mrb[1].mxu1  ;;  %v353_v9 = vadd.f32 %v1659_v5, %v352_v35 }
 0x12b   :  { %v357_v39 = vpop.f32.mrb[2].mxu0  ;;  %v1643_v40 = vpop.f32.mrb[2].mxu1 }
 0x12c   :  { %v359_v41 = vpop.f32.mrb[3].mxu0  ;;  %v494_v42 = vpop.f32.mrb[3].mxu1  ;;  %v358_v8 = vadd.f32 %v1659_v5, %v357_v39 }
 0x12f   :  { %v362_v43 = vpop.f32.mrb[4].mxu0  ;;  %v1645_v44 = vpop.f32.mrb[4].mxu1 }
 0x130   :  { %v364_v45 = vpop.f32.mrb[5].mxu0  ;;  %v499_v46 = vpop.f32.mrb[5].mxu1  ;;  %v363_v18 = vadd.f32 %v1659_v5, %v362_v43 }
 0x133   :  { %v367_v47 = vpop.f32.mrb[6].mxu0  ;;  %v1647_v48 = vpop.f32.mrb[6].mxu1 }
 0x134   :  { %v369_v49 = vpop.f32.mrb[7].mxu0  ;;  %v504_v50 = vpop.f32.mrb[7].mxu1  ;;  %v368_v16 = vadd.f32 %v1659_v5, %v367_v47 }
 0x137   :  { %v372_v51 = vpop.f32.mrb[8].mxu0  ;;  %v1649_v52 = vpop.f32.mrb[8].mxu1 }
 0x138   :  { %v374_v53 = vpop.f32.mrb[9].mxu0  ;;  %v509_v54 = vpop.f32.mrb[9].mxu1  ;;  %v373_v28 = vadd.f32 %v1659_v5, %v372_v51 }
 0x13b   :  { %v377_v55 = vpop.f32.mrb[10].mxu0  ;;  %v1651_v56 = vpop.f32.mrb[10].mxu1 }
 0x13c   :  { %v379_v57 = vpop.f32.mrb[11].mxu0  ;;  %v514_v58 = vpop.f32.mrb[11].mxu1  ;;  %v378_v26 = vadd.f32 %v1659_v5, %v377_v55 }
 0x13f   :  { %v382_v59 = vpop.f32.mrb[12].mxu0  ;;  %v1653_v60 = vpop.f32.mrb[12].mxu1 }
 0x140   :  { %v384_v61 = vpop.f32.mrb[13].mxu0  ;;  %v519_v62 = vpop.f32.mrb[13].mxu1  ;;  %v383_v39 = vadd.f32 %v1659_v5, %v382_v59 }
 0x143   :  { %v387_v63 = vpop.f32.mrb[14].mxu0  ;;  %v1655_v0 = vpop.f32.mrb[14].mxu1 }
 0x144   :  { %v389_v1 = vpop.f32.mrb[15].mxu0  ;;  %v524_v2 = vpop.f32.mrb[15].mxu1  ;;  %v388_v37 = vadd.f32 %v1659_v5, %v387_v63 }
 0x147   :  { %v392_v3 = vpop.f32.mrb[16].mxu0  ;;  %v1657_v4 = vpop.f32.mrb[16].mxu1 }
 0x148   :  { %v394_v6 = vpop.f32.mrb[17].mxu0  ;;  %v529_v7 = vpop.f32.mrb[17].mxu1  ;;  %v393_v53 = vadd.f32 %v1659_v5, %v392_v3 }
 0x14b   :  { %v397_v10 = vpop.f32.mrb[18].mxu0  ;;  %v941_v11 = vpop.f32.mrb[18].mxu1 }
 0x14c   :  { %v603_v12 = vadd.f32 %v941_v11, %v358_v8  ;;  %v399_v13 = vpop.f32.mrb[19].mxu0  ;;  %v597_v14 = vpop.f32.mrb[19].mxu1  ;;  %v398_v50 = vadd.f32 %v1659_v5, %v397_v10 }
 0x14d   :  { %v598_v15 = vadd.f32 %v597_v14, %v353_v9 }
 0x14e   :  { %v777_v17 = vmax.f32 %v603_v12, 0.0 }
 0x14f   :  { %v776_v19 = vmax.f32 %v598_v15, 0.0  ;;  %v402_v20 = vpop.f32.mrb[20].mxu0  ;;  %v944_v21 = vpop.f32.mrb[20].mxu1 }
 0x150   :  { %814 = vst.msk [vmem:[%s1859_s3 + $0x8] sm:$0xff] %vm812_vm1, %v777_v17  ;;  %v613_v22 = vadd.f32 %v944_v21, %v368_v16  ;;  %v404_v23 = vpop.f32.mrb[21].mxu0  ;;  %v607_v24 = vpop.f32.mrb[21].mxu1  ;;  %v403_v2 = vadd.f32 %v1659_v5, %v402_v20 }
 0x151   :  { %813 = vst.msk [vmem:[%s1859_s3] sm:$0xff] %vm812_vm1, %v776_v19  ;;  %v608_v25 = vadd.f32 %v607_v24, %v363_v18 }
 0x152   :  { %v779_v27 = vmax.f32 %v613_v22, 0.0 }
 0x153   :  { %v778_v29 = vmax.f32 %v608_v25, 0.0  ;;  %v407_v30 = vpop.f32.mrb[22].mxu0  ;;  %v947_v31 = vpop.f32.mrb[22].mxu1 }
 0x154   :  { %816 = vst.msk [vmem:[%s1859_s3 + $0x18] sm:$0xff] %vm812_vm1, %v779_v27  ;;  %v623_v32 = vadd.f32 %v947_v31, %v378_v26  ;;  %v409_v33 = vpop.f32.mrb[23].mxu0  ;;  %v617_v34 = vpop.f32.mrb[23].mxu1  ;;  %v408_v63 = vadd.f32 %v1659_v5, %v407_v30 }
 0x155   :  { %815 = vst.msk [vmem:[%s1859_s3 + $0x10] sm:$0xff] %vm812_vm1, %v778_v29  ;;  %v618_v35 = vadd.f32 %v617_v34, %v373_v28 }
 0x156   :  { %v781_v38 = vmax.f32 %v623_v32, 0.0 }
 0x157   :  { %v780_v41 = vmax.f32 %v618_v35, 0.0  ;;  %v412_v42 = vpop.f32.mrb[24].mxu0  ;;  %v950_v43 = vpop.f32.mrb[24].mxu1 }
 0x158   :  { %818 = vst.msk [vmem:[%s1859_s3 + $0x28] sm:$0xff] %vm812_vm1, %v781_v38  ;;  %v633_v45 = vadd.f32 %v950_v43, %v388_v37  ;;  %v414_v46 = vpop.f32.mrb[25].mxu0  ;;  %v627_v47 = vpop.f32.mrb[25].mxu1  ;;  %v413_v14 = vadd.f32 %v1659_v5, %v412_v42 }
 0x159   :  { %817 = vst.msk [vmem:[%s1859_s3 + $0x20] sm:$0xff] %vm812_vm1, %v780_v41  ;;  %v628_v49 = vadd.f32 %v627_v47, %v383_v39 }
 0x15a   :  { %v783_v51 = vmax.f32 %v633_v45, 0.0 }
 0x15b   :  { %v782_v54 = vmax.f32 %v628_v49, 0.0  ;;  %v417_v55 = vpop.f32.mrb[26].mxu0  ;;  %v953_v57 = vpop.f32.mrb[26].mxu1 }
 0x15c   :  { %820 = vst.msk [vmem:[%s1859_s3 + $0x38] sm:$0xff] %vm812_vm1, %v783_v51  ;;  %v643_v58 = vadd.f32 %v953_v57, %v398_v50  ;;  %v419_v59 = vpop.f32.mrb[27].mxu0  ;;  %v637_v61 = vpop.f32.mrb[27].mxu1  ;;  %v418_v12 = vadd.f32 %v1659_v5, %v417_v55 }
 0x15d   :  { %819 = vst.msk [vmem:[%s1859_s3 + $0x30] sm:$0xff] %vm812_vm1, %v782_v54  ;;  %v638_v62 = vadd.f32 %v637_v61, %v393_v53 }
 0x15e   :  { %v785_v1 = vmax.f32 %v643_v58, 0.0 }
 0x15f   :  { %v784_v3 = vmax.f32 %v638_v62, 0.0  ;;  %v422_v6 = vpop.f32.mrb[28].mxu0  ;;  %v956_v7 = vpop.f32.mrb[28].mxu1 }
 0x160   :  { %822 = vst.msk [vmem:[%s1859_s3 + $0x48] sm:$0xff] %vm812_vm1, %v785_v1  ;;  %v653_v8 = vadd.f32 %v956_v7, %v408_v63  ;;  %v424_v9 = vpop.f32.mrb[29].mxu0  ;;  %v647_v10 = vpop.f32.mrb[29].mxu1  ;;  %v423_v24 = vadd.f32 %v1659_v5, %v422_v6 }
 0x161   :  { %821 = vst.msk [vmem:[%s1859_s3 + $0x40] sm:$0xff] %vm812_vm1, %v784_v3  ;;  %v648_v11 = vadd.f32 %v647_v10, %v403_v2 }
 0x162   :  { %v787_v13 = vmax.f32 %v653_v8, 0.0 }
 0x163   :  { %v786_v15 = vmax.f32 %v648_v11, 0.0  ;;  %v427_v16 = vpop.f32.mrb[30].mxu0  ;;  %v959_v17 = vpop.f32.mrb[30].mxu1 }
 0x164   :  { %824 = vst.msk [vmem:[%s1859_s3 + $0x58] sm:$0xff] %vm812_vm1, %v787_v13  ;;  %v663_v18 = vadd.f32 %v959_v17, %v418_v12  ;;  %v429_v19 = vpop.f32.mrb[31].mxu0  ;;  %v657_v20 = vpop.f32.mrb[31].mxu1  ;;  %v428_v22 = vadd.f32 %v1659_v5, %v427_v16  ;;  %v488_v16 = vadd.f32 %v1659_v5, %v1641_v36 }
 0x165   :  { %823 = vst.msk [vmem:[%s1859_s3 + $0x50] sm:$0xff] %vm812_vm1, %v786_v15  ;;  %v658_v21 = vadd.f32 %v657_v20, %v413_v14 }
 0x166   :  { %v789_v23 = vmax.f32 %v663_v18, 0.0 }
 0x167   :  { %v788_v25 = vmax.f32 %v658_v21, 0.0  ;;  %v432_v26 = vpop.f32.mrb[32].mxu0  ;;  %v962_v27 = vpop.f32.mrb[32].mxu1 }
 0x168   :  { %826 = vst.msk [vmem:[%s1859_s3 + $0x68] sm:$0xff] %vm812_vm1, %v789_v23  ;;  %v673_v28 = vadd.f32 %v962_v27, %v428_v22  ;;  %v434_v29 = vpop.f32.mrb[33].mxu0  ;;  %v667_v30 = vpop.f32.mrb[33].mxu1  ;;  %v433_v33 = vadd.f32 %v1659_v5, %v432_v26  ;;  %v493_v27 = vadd.f32 %v1659_v5, %v1643_v40 }
 0x169   :  { %825 = vst.msk [vmem:[%s1859_s3 + $0x60] sm:$0xff] %vm812_vm1, %v788_v25  ;;  %v668_v31 = vadd.f32 %v667_v30, %v423_v24  ;;  %v498_v25 = vadd.f32 %v1659_v5, %v1645_v44 }
 0x16a   :  { %v791_v32 = vmax.f32 %v673_v28, 0.0 }
 0x16b   :  { %v790_v34 = vmax.f32 %v668_v31, 0.0  ;;  %v437_v35 = vpop.f32.mrb[34].mxu0  ;;  %v965_v37 = vpop.f32.mrb[34].mxu1 }
 0x16c   :  { %828 = vst.msk [vmem:[%s1859_s3 + $0x78] sm:$0xff] %vm812_vm1, %v791_v32  ;;  %v438_v38 = vadd.f32 %v1659_v5, %v437_v35  ;;  %v439_v39 = vpop.f32.mrb[35].mxu0  ;;  %v677_v41 = vpop.f32.mrb[35].mxu1  ;;  %v508_v35 = vadd.f32 %v1659_v5, %v1649_v52 }
 0x16d   :  { %827 = vst.msk [vmem:[%s1859_s3 + $0x70] sm:$0xff] %vm812_vm1, %v790_v34  ;;  %v678_v42 = vadd.f32 %v677_v41, %v433_v33 }
 0x16e   :  { %v683_v43 = vadd.f32 %v965_v37, %v438_v38  ;;  %v503_v38 = vadd.f32 %v1659_v5, %v1647_v48 }
 0x16f   :  { %v792_v45 = vmax.f32 %v678_v42, 0.0  ;;  %v442_v46 = vpop.f32.mrb[36].mxu0  ;;  %v968_v47 = vpop.f32.mrb[36].mxu1 }
 0x170   :  { %v793_v49 = vmax.f32 %v683_v43, 0.0  ;;  %v443_v50 = vadd.f32 %v1659_v5, %v442_v46  ;;  %v444_v51 = vpop.f32.mrb[37].mxu0  ;;  %v687_v53 = vpop.f32.mrb[37].mxu1 }
 0x171   :  { %829 = vst.msk [vmem:[%s1859_s3 + $0x80] sm:$0xff] %vm812_vm1, %v792_v45 }
 0x172   :  { %830 = vst.msk [vmem:[%s1859_s3 + $0x88] sm:$0xff] %vm812_vm1, %v793_v49  ;;  %v688_v54 = vadd.f32 %v687_v53, %v443_v50  ;;  %v518_v49 = vadd.f32 %v1659_v5, %v1653_v60  ;;  %v513_v53 = vadd.f32 %v1659_v5, %v1651_v56 }
 0x173   :  { %v447_v55 = vpop.f32.mrb[38].mxu0  ;;  %v971_v57 = vpop.f32.mrb[38].mxu1 }
 0x174   :  { %v794_v58 = vmax.f32 %v688_v54, 0.0  ;;  %v448_v59 = vadd.f32 %v1659_v5, %v447_v55  ;;  %v449_v61 = vpop.f32.mrb[39].mxu0  ;;  %v697_v62 = vpop.f32.mrb[39].mxu1 }
 0x176   :  { %831 = vst.msk [vmem:[%s1859_s3 + $0x90] sm:$0xff] %vm812_vm1, %v794_v58  ;;  %v693_v63 = vadd.f32 %v968_v47, %v448_v59 }
 0x177   :  { %v452_v1 = vpop.f32.mrb[40].mxu0  ;;  %v974_v2 = vpop.f32.mrb[40].mxu1 }
 0x178   :  { %v795_v3 = vmax.f32 %v693_v63, 0.0  ;;  %v453_v6 = vadd.f32 %v1659_v5, %v452_v1  ;;  %v454_v7 = vpop.f32.mrb[41].mxu0  ;;  %v707_v8 = vpop.f32.mrb[41].mxu1  ;;  %v528_v63 = vadd.f32 %v1659_v5, %v1657_v4 }
 0x17a   :  { %832 = vst.msk [vmem:[%s1859_s3 + $0x98] sm:$0xff] %vm812_vm1, %v795_v3  ;;  %v698_v9 = vadd.f32 %v697_v62, %v453_v6  ;;  %v523_v3 = vadd.f32 %v1659_v5, %v1655_v0 }
 0x17b   :  { %v457_v10 = vpop.f32.mrb[42].mxu0  ;;  %v1762_v11 = vpop.f32.mrb[42].mxu1 }
 0x17c   :  { %v796_v12 = vmax.f32 %v698_v9, 0.0  ;;  %v458_v13 = vadd.f32 %v1659_v5, %v457_v10  ;;  %v459_v14 = vpop.f32.mrb[43].mxu0  ;;  %v717_v15 = vpop.f32.mrb[43].mxu1 }
 0x17e   :  { %833 = vst.msk [vmem:[%s1859_s3 + $0xa0] sm:$0xff] %vm812_vm1, %v796_v12  ;;  %v703_v17 = vadd.f32 %v971_v57, %v458_v13 }
 0x17f   :  { %v462_v18 = vpop.f32.mrb[44].mxu0  ;;  %v980_v19 = vpop.f32.mrb[44].mxu1 }
 0x180   :  { %v797_v20 = vmax.f32 %v703_v17, 0.0  ;;  %v463_v21 = vadd.f32 %v1659_v5, %v462_v18  ;;  %v733_v22 = vadd.f32 %v980_v19, %v488_v16  ;;  %v464_v23 = vpop.f32.mrb[45].mxu0  ;;  %v1772_v24 = vpop.f32.mrb[45].mxu1 }
 0x182   :  { %834 = vst.msk [vmem:[%s1859_s3 + $0xa8] sm:$0xff] %vm812_vm1, %v797_v20  ;;  %v708_v36 = vadd.f32 %v707_v8, %v463_v21  ;;  %v803_v26 = vmax.f32 %v733_v22, 0.0 }
 0x183   :  { %v467_v28 = vpop.f32.mrb[46].mxu0  ;;  %v983_v29 = vpop.f32.mrb[46].mxu1 }
 0x184   :  { %v798_v30 = vmax.f32 %v708_v36, 0.0  ;;  %840 = vst.msk [vmem:[%s1859_s3 + $0xd8] sm:$0xff] %vm812_vm1, %v803_v26  ;;  %v468_v44 = vadd.f32 %v1659_v5, %v467_v28  ;;  %v743_v31 = vadd.f32 %v983_v29, %v498_v25  ;;  %v469_v32 = vpop.f32.mrb[47].mxu0  ;;  %v737_v33 = vpop.f32.mrb[47].mxu1 }
 0x185   :  { %v738_v34 = vadd.f32 %v737_v33, %v493_v27 }
 0x186   :  { %835 = vst.msk [vmem:[%s1859_s3 + $0xb0] sm:$0xff] %vm812_vm1, %v798_v30  ;;  %v713_v40 = vadd.f32 %v974_v2, %v468_v44  ;;  %v805_v37 = vmax.f32 %v743_v31, 0.0 }
 0x187   :  { %v804_v39 = vmax.f32 %v738_v34, 0.0  ;;  %v472_v41 = vpop.f32.mrb[48].mxu0  ;;  %v986_v42 = vpop.f32.mrb[48].mxu1 }
 0x188   :  { %v799_v43 = vmax.f32 %v713_v40, 0.0  ;;  %842 = vst.msk [vmem:[%s1859_s3 + $0xe8] sm:$0xff] %vm812_vm1, %v805_v37  ;;  %v473_v52 = vadd.f32 %v1659_v5, %v472_v41  ;;  %v753_v45 = vadd.f32 %v986_v42, %v508_v35  ;;  %v474_v46 = vpop.f32.mrb[49].mxu0  ;;  %v747_v47 = vpop.f32.mrb[49].mxu1 }
 0x189   :  { %841 = vst.msk [vmem:[%s1859_s3 + $0xe0] sm:$0xff] %vm812_vm1, %v804_v39  ;;  %v748_v48 = vadd.f32 %v747_v47, %v503_v38 }
 0x18a   :  { %836 = vst.msk [vmem:[%s1859_s3 + $0xb8] sm:$0xff] %vm812_vm1, %v799_v43  ;;  %v718_v50 = vadd.f32 %v717_v15, %v473_v52  ;;  %v807_v51 = vmax.f32 %v753_v45, 0.0 }
 0x18b   :  { %v806_v54 = vmax.f32 %v748_v48, 0.0  ;;  %v477_v55 = vpop.f32.mrb[50].mxu0  ;;  %v989_v57 = vpop.f32.mrb[50].mxu1 }
 0x18c   :  { %v800_v58 = vmax.f32 %v718_v50, 0.0  ;;  %844 = vst.msk [vmem:[%s1859_s3 + $0xf8] sm:$0xff] %vm812_vm1, %v807_v51  ;;  %v478_v60 = vadd.f32 %v1659_v5, %v477_v55  ;;  %v763_v59 = vadd.f32 %v989_v57, %v518_v49  ;;  %v479_v61 = vpop.f32.mrb[51].mxu0  ;;  %v757_v62 = vpop.f32.mrb[51].mxu1 }
 0x18d   :  { %843 = vst.msk [vmem:[%s1859_s3 + $0xf0] sm:$0xff] %vm812_vm1, %v806_v54  ;;  %v758_v56 = vadd.f32 %v757_v62, %v513_v53 }
 0x18e   :  { %837 = vst.msk [vmem:[%s1859_s3 + $0xc0] sm:$0xff] %vm812_vm1, %v800_v58  ;;  %v723_v1 = vadd.f32 %v1762_v11, %v478_v60  ;;  %v809_v2 = vmax.f32 %v763_v59, 0.0 }
 0x18f   :  { %v808_v6 = vmax.f32 %v758_v56, 0.0  ;;  %v482_v7 = vpop.f32.mrb[52].mxu0  ;;  %v992_v8 = vpop.f32.mrb[52].mxu1 }
 0x190   :  { %v801_v9 = vmax.f32 %v723_v1, 0.0  ;;  %846 = vst.msk [vmem:[%s1859_s3 + $0x108] sm:$0xff] %vm812_vm1, %v809_v2  ;;  %v483_v4 = vadd.f32 %v1659_v5, %v482_v7  ;;  %v773_v10 = vadd.f32 %v992_v8, %v528_v63  ;;  %v484_v12 = vpop.f32.mrb[53].mxu0  ;;  %v767_v13 = vpop.f32.mrb[53].mxu1 }
 0x191   :  { %845 = vst.msk [vmem:[%s1859_s3 + $0x100] sm:$0xff] %vm812_vm1, %v808_v6  ;;  %v768_v0 = vadd.f32 %v767_v13, %v523_v3 }
 0x192   :  { %838 = vst.msk [vmem:[%s1859_s3 + $0xc8] sm:$0xff] %vm812_vm1, %v801_v9  ;;  %v728_v11 = vadd.f32 %v1772_v24, %v483_v4  ;;  %v811_v14 = vmax.f32 %v773_v10, 0.0 }
 0x193   :  { %v810_v15 = vmax.f32 %v768_v0, 0.0 }
 0x194   :  { %v802_v16 = vmax.f32 %v728_v11, 0.0  ;;  %848 = vst.msk [vmem:[%s1859_s3 + $0x118] sm:$0xff] %vm812_vm1, %v811_v14 }
 0x195   :  { %847 = vst.msk [vmem:[%s1859_s3 + $0x110] sm:$0xff] %vm812_vm1, %v810_v15 }
 0x196   :  { %839 = vst.msk [vmem:[%s1859_s3 + $0xd0] sm:$0xff] %vm812_vm1, %v802_v16 }
 0x197   :  { %853 = vsyncpa [#allocation3], 1 }

// kernel: ppo_forward.6
= control target key start
LH: loop header
LB: loop body
LE: loop exit
PB: predicated region body
PF: predicated region fallthrough
CT: control target
= control target key end

     0   :  { %v1463_v0 = vmov 0.0|0.0   ;;  %vm1464_vm0 = vmmov 0   ;;  %vm218_vm1 = vcmask 523264   ;;  %vm990_vm2 = vcmask 519168   ;;  %s2413_s1 = inlined_call_operand.vmem [shape: f32[576,64], index: 1, kind: input, shape index: {}]   ;;  %s2414_s0 = inlined_call_operand.vmem [shape: f32[200,576], index: 0, kind: input, shape index: {}]   ;;  %s2415_s2 = inlined_call_operand.vmem [shape: f32[1,64], index: 2, kind: input, shape index: {}]   ;;  %s2416_s3 = inlined_call_operand.vmem [shape: bf16[200,64], index: 3, kind: output, shape index: {}]  }
   0x1   :  { %1220 = vmatprep.subr.bf16.mxu1 %v1463_v0  ;;  %1268 = vmatprep.subr.bf16.mxu0 %v1463_v0  ;;  %v139_v1 = vld [vmem:[%s2413_s1] sm:$0xff]  ;;  %v140_v2 = vld [vmem:[%s2413_s1 + $0x8] sm:$0xff]  ;;  %v141_v6 = vld [vmem:[%s2413_s1 + $0x10] sm:$0xff] }
   0x2   :  { %v171_v3 = vld [vmem:[%s2413_s1 + $0x100] sm:$0xff]  ;;  %v1221_v4 = vpack.c.bf16 %v140_v2, %v139_v1  ;;  %v172_v5 = vld [vmem:[%s2413_s1 + $0x108] sm:$0xff]  ;;  %v142_v7 = vld [vmem:[%s2413_s1 + $0x18] sm:$0xff] }
   0x3   :  { %v1506_v8 = vpack.c.bf16 %v172_v5, %v171_v3  ;;  %v173_v9 = vld [vmem:[%s2413_s1 + $0x110] sm:$0xff]  ;;  %v174_v10 = vld [vmem:[%s2413_s1 + $0x118] sm:$0xff]  ;;  %v1224_v11 = vpack.c.bf16 %v142_v7, %v141_v6  ;;  %v143_v13 = vld [vmem:[%s2413_s1 + $0x20] sm:$0xff] }
   0x4   :  { %1222 = vmatpush1.bf16.msra.mxu1 %v1221_v4  ;;  %v1516_v12 = vpack.c.bf16 %v174_v10, %v173_v9  ;;  %v144_v14 = vld [vmem:[%s2413_s1 + $0x28] sm:$0xff]  ;;  %v175_v15 = vld [vmem:[%s2413_s1 + $0x120] sm:$0xff]  ;;  %v145_v19 = vld [vmem:[%s2413_s1 + $0x30] sm:$0xff] }
   0x5   :  { %1270 = vmatpush1.bf16.msra.mxu0 %v1506_v8  ;;  %1223 = vmatprep.subr.bf16.mxu1 %v1463_v0  ;;  %v176_v16 = vld [vmem:[%s2413_s1 + $0x128] sm:$0xff]  ;;  %v1227_v17 = vpack.c.bf16 %v144_v14, %v143_v13  ;;  %v146_v20 = vld [vmem:[%s2413_s1 + $0x38] sm:$0xff]  ;;  %v177_v21 = vld [vmem:[%s2413_s1 + $0x130] sm:$0xff] }
   0x6   :  { %1271 = vmatprep.subr.bf16.mxu0 %v1463_v0  ;;  %v1533_v18 = vpack.c.bf16 %v176_v16, %v175_v15  ;;  %v178_v22 = vld [vmem:[%s2413_s1 + $0x138] sm:$0xff]  ;;  %v1230_v23 = vpack.c.bf16 %v146_v20, %v145_v19  ;;  %v147_v25 = vld [vmem:[%s2413_s1 + $0x40] sm:$0xff]  ;;  %v148_v26 = vld [vmem:[%s2413_s1 + $0x48] sm:$0xff] }
   0x7   :  { %v1550_v24 = vpack.c.bf16 %v178_v22, %v177_v21  ;;  %v179_v27 = vld [vmem:[%s2413_s1 + $0x140] sm:$0xff]  ;;  %v180_v28 = vld [vmem:[%s2413_s1 + $0x148] sm:$0xff]  ;;  %v1233_v29 = vpack.c.bf16 %v148_v26, %v147_v25  ;;  %v149_v31 = vld [vmem:[%s2413_s1 + $0x50] sm:$0xff] }
   0x8   :  { %1225 = vmatpush1.bf16.msra.mxu1 %v1224_v11  ;;  %v1567_v30 = vpack.c.bf16 %v180_v28, %v179_v27  ;;  %v150_v32 = vld [vmem:[%s2413_s1 + $0x58] sm:$0xff]  ;;  %v181_v33 = vld [vmem:[%s2413_s1 + $0x150] sm:$0xff]  ;;  %v151_v37 = vld [vmem:[%s2413_s1 + $0x60] sm:$0xff] }
   0x9   :  { %1273 = vmatpush1.bf16.msra.mxu0 %v1516_v12  ;;  %1226 = vmatprep.subr.bf16.mxu1 %v1463_v0  ;;  %v182_v34 = vld [vmem:[%s2413_s1 + $0x158] sm:$0xff]  ;;  %v1236_v35 = vpack.c.bf16 %v150_v32, %v149_v31  ;;  %v152_v38 = vld [vmem:[%s2413_s1 + $0x68] sm:$0xff]  ;;  %v183_v39 = vld [vmem:[%s2413_s1 + $0x160] sm:$0xff] }
   0xa   :  { %1274 = vmatprep.subr.bf16.mxu0 %v1463_v0  ;;  %v1584_v36 = vpack.c.bf16 %v182_v34, %v181_v33  ;;  %v184_v40 = vld [vmem:[%s2413_s1 + $0x168] sm:$0xff]  ;;  %v17_v42 = vld [vmem:[%s2414_s0 + $0x18] sm:$0xff]  ;;  %v1239_v43 = vpack.c.bf16 %v152_v38, %v151_v37  ;;  %v153_v45 = vld [vmem:[%s2413_s1 + $0x70] sm:$0xff] }
   0xb   :  { %v15_v41 = vld [vmem:[%s2414_s0 + $0x8] sm:$0xff]  ;;  %548 = vmatprep.mubr.f32.mxu0 %v17_v42  ;;  %v1607_v44 = vpack.c.bf16 %v184_v40, %v183_v39  ;;  %v154_v46 = vld [vmem:[%s2413_s1 + $0x78] sm:$0xff]  ;;  %v185_v47 = vld [vmem:[%s2413_s1 + $0x170] sm:$0xff] }
   0xc   :  { %1228 = vmatpush1.bf16.msra.mxu1 %v1227_v17  ;;  %358 = vmatprep.mubr.f32.mxu1 %v15_v41  ;;  %v186_v48 = vld [vmem:[%s2413_s1 + $0x178] sm:$0xff]  ;;  %v1242_v49 = vpack.c.bf16 %v154_v46, %v153_v45  ;;  %v155_v51 = vld [vmem:[%s2413_s1 + $0x80] sm:$0xff]  ;;  %v156_v52 = vld [vmem:[%s2413_s1 + $0x88] sm:$0xff] }
   0xd   :  { %1276 = vmatpush1.bf16.msra.mxu0 %v1533_v18  ;;  %1229 = vmatprep.subr.bf16.mxu1 %v1463_v0  ;;  %v1624_v50 = vpack.c.bf16 %v186_v48, %v185_v47  ;;  %v187_v53 = vld [vmem:[%s2413_s1 + $0x180] sm:$0xff]  ;;  %v188_v54 = vld [vmem:[%s2413_s1 + $0x188] sm:$0xff]  ;;  %v1245_v55 = vpack.c.bf16 %v156_v52, %v155_v51  ;;  %v157_v57 = vld [vmem:[%s2413_s1 + $0x90] sm:$0xff] }
   0xe   :  { %1277 = vmatprep.subr.bf16.mxu0 %v1463_v0  ;;  %v1641_v56 = vpack.c.bf16 %v188_v54, %v187_v53  ;;  %v158_v58 = vld [vmem:[%s2413_s1 + $0x98] sm:$0xff]  ;;  %v189_v59 = vld [vmem:[%s2413_s1 + $0x190] sm:$0xff]  ;;  %v159_v63 = vld [vmem:[%s2413_s1 + $0xa0] sm:$0xff] }
   0xf   :  { %v190_v60 = vld [vmem:[%s2413_s1 + $0x198] sm:$0xff]  ;;  %v1248_v61 = vpack.c.bf16 %v158_v58, %v157_v57  ;;  %v160_v1 = vld [vmem:[%s2413_s1 + $0xa8] sm:$0xff]  ;;  %v191_v2 = vld [vmem:[%s2413_s1 + $0x1a0] sm:$0xff] }
  0x10   :  { %1231 = vmatpush1.bf16.msra.mxu1 %v1230_v23  ;;  %v1658_v62 = vpack.c.bf16 %v190_v60, %v189_v59  ;;  %v192_v3 = vld [vmem:[%s2413_s1 + $0x1a8] sm:$0xff]  ;;  %v1251_v4 = vpack.c.bf16 %v160_v1, %v159_v63  ;;  %v161_v6 = vld [vmem:[%s2413_s1 + $0xb0] sm:$0xff]  ;;  %v162_v7 = vld [vmem:[%s2413_s1 + $0xb8] sm:$0xff] }
  0x11   :  { %1279 = vmatpush1.bf16.msra.mxu0 %v1550_v24  ;;  %1232 = vmatprep.subr.bf16.mxu1 %v1463_v0  ;;  %v1675_v5 = vpack.c.bf16 %v192_v3, %v191_v2  ;;  %v193_v9 = vld [vmem:[%s2413_s1 + $0x1b0] sm:$0xff]  ;;  %v194_v10 = vld [vmem:[%s2413_s1 + $0x1b8] sm:$0xff]  ;;  %v1254_v11 = vpack.c.bf16 %v162_v7, %v161_v6  ;;  %v163_v14 = vld [vmem:[%s2413_s1 + $0xc0] sm:$0xff] }
  0x12   :  { %1280 = vmatprep.subr.bf16.mxu0 %v1463_v0  ;;  %v1692_v13 = vpack.c.bf16 %v194_v10, %v193_v9  ;;  %v164_v15 = vld [vmem:[%s2413_s1 + $0xc8] sm:$0xff]  ;;  %v195_v16 = vld [vmem:[%s2413_s1 + $0x1c0] sm:$0xff]  ;;  %v165_v21 = vld [vmem:[%s2413_s1 + $0xd0] sm:$0xff] }
  0x13   :  { %v196_v17 = vld [vmem:[%s2413_s1 + $0x1c8] sm:$0xff]  ;;  %v1257_v19 = vpack.c.bf16 %v164_v15, %v163_v14  ;;  %v166_v22 = vld [vmem:[%s2413_s1 + $0xd8] sm:$0xff]  ;;  %v197_v23 = vld [vmem:[%s2413_s1 + $0x1d0] sm:$0xff] }
  0x14   :  { %1234 = vmatpush1.bf16.msra.mxu1 %v1233_v29  ;;  %v1709_v20 = vpack.c.bf16 %v196_v17, %v195_v16  ;;  %v198_v25 = vld [vmem:[%s2413_s1 + $0x1d8] sm:$0xff]  ;;  %v1260_v26 = vpack.c.bf16 %v166_v22, %v165_v21  ;;  %v167_v28 = vld [vmem:[%s2413_s1 + $0xe0] sm:$0xff]  ;;  %v168_v29 = vld [vmem:[%s2413_s1 + $0xe8] sm:$0xff] }
  0x15   :  { %1282 = vmatpush1.bf16.msra.mxu0 %v1567_v30  ;;  %1235 = vmatprep.subr.bf16.mxu1 %v1463_v0  ;;  %v1726_v27 = vpack.c.bf16 %v198_v25, %v197_v23  ;;  %v199_v31 = vld [vmem:[%s2413_s1 + $0x1e0] sm:$0xff]  ;;  %v200_v32 = vld [vmem:[%s2413_s1 + $0x1e8] sm:$0xff]  ;;  %v1263_v33 = vpack.c.bf16 %v168_v29, %v167_v28  ;;  %v170_v37 = vld [vmem:[%s2413_s1 + $0xf8] sm:$0xff] }
  0x16   :  { %1283 = vmatprep.subr.bf16.mxu0 %v1463_v0  ;;  %v1743_v34 = vpack.c.bf16 %v200_v32, %v199_v31  ;;  %v201_v38 = vld [vmem:[%s2413_s1 + $0x1f0] sm:$0xff]  ;;  %v202_v39 = vld [vmem:[%s2413_s1 + $0x1f8] sm:$0xff]  ;;  %v203_v42 = vld [vmem:[%s2413_s1 + $0x200] sm:$0xff] }
  0x17   :  { %v1760_v41 = vpack.c.bf16 %v202_v39, %v201_v38  ;;  %v14_v45 = vld [vmem:[%s2414_s0] sm:$0xff]  ;;  %v16_v46 = vld [vmem:[%s2414_s0 + $0x10] sm:$0xff]  ;;  %v206_v52 = vld [vmem:[%s2413_s1 + $0x218] sm:$0xff] }
  0x18   :  { %1237 = vmatpush1.bf16.msra.mxu1 %v1236_v35  ;;  %v169_v35 = vld [vmem:[%s2413_s1 + $0xf0] sm:$0xff]  ;;  %v19_v53 = vld [vmem:[%s2414_s0 + $0x28] sm:$0xff]  ;;  %v21_v54 = vld [vmem:[%s2414_s0 + $0x38] sm:$0xff] }
  0x19   :  { %1285 = vmatpush1.bf16.msra.mxu0 %v1584_v36  ;;  %1238 = vmatprep.subr.bf16.mxu1 %v1463_v0  ;;  %v1266_v40 = vpack.c.bf16 %v170_v37, %v169_v35  ;;  %v20_v48 = vld [vmem:[%s2414_s0 + $0x30] sm:$0xff]  ;;  %v27_v57 = vld [vmem:[%s2414_s0 + $0x68] sm:$0xff]  ;;  %v30_v63 = vld [vmem:[%s2414_s0 + $0x80] sm:$0xff] }
  0x1a   :  { %1286 = vmatprep.subr.bf16.mxu0 %v1463_v0  ;;  %v205_v51 = vld [vmem:[%s2413_s1 + $0x210] sm:$0xff]  ;;  %v208_v59 = vld [vmem:[%s2413_s1 + $0x228] sm:$0xff]  ;;  %v37_v9 = vld [vmem:[%s2414_s0 + $0xb8] sm:$0xff] }
  0x1b   :  { %v1320_v58 = vpack.c.bf16 %v206_v52, %v205_v51  ;;  %v24_v60 = vld [vmem:[%s2414_s0 + $0x50] sm:$0xff]  ;;  %v31_v6 = vld [vmem:[%s2414_s0 + $0x88] sm:$0xff]  ;;  %v42_v15 = vld [vmem:[%s2414_s0 + $0xe0] sm:$0xff] }
  0x1c   :  { %1240 = vmatpush1.bf16.msra.mxu1 %v1239_v43  ;;  %v204_v43 = vld [vmem:[%s2413_s1 + $0x208] sm:$0xff]  ;;  %v32_v1 = vld [vmem:[%s2414_s0 + $0x90] sm:$0xff]  ;;  %v41_v17 = vld [vmem:[%s2414_s0 + $0xd8] sm:$0xff] }
  0x1d   :  { %1288 = vmatpush1.bf16.msra.mxu0 %v1607_v44  ;;  %1241 = vmatprep.subr.bf16.mxu1 %v1463_v0  ;;  %v1317_v47 = vpack.c.bf16 %v204_v43, %v203_v42  ;;  %v209_v3 = vld [vmem:[%s2413_s1 + $0x230] sm:$0xff]  ;;  %v35_v7 = vld [vmem:[%s2414_s0 + $0xa8] sm:$0xff]  ;;  %v46_v22 = vld [vmem:[%s2414_s0 + $0x100] sm:$0xff] }
  0x1e   :  { %1289 = vmatprep.subr.bf16.mxu0 %v1463_v0  ;;  %v40_v14 = vld [vmem:[%s2414_s0 + $0xd0] sm:$0xff]  ;;  %v39_v16 = vld [vmem:[%s2414_s0 + $0xc8] sm:$0xff]  ;;  %v49_v25 = vld [vmem:[%s2414_s0 + $0x118] sm:$0xff] }
  0x1f   :  { %v44_v21 = vld [vmem:[%s2414_s0 + $0xf0] sm:$0xff]  ;;  %v57_v28 = vld [vmem:[%s2414_s0 + $0x158] sm:$0xff]  ;;  %v54_v29 = vld [vmem:[%s2414_s0 + $0x140] sm:$0xff] }
  0x20   :  { %1243 = vmatpush1.bf16.msra.mxu1 %v1242_v49  ;;  %v22_v49 = vld [vmem:[%s2414_s0 + $0x40] sm:$0xff]  ;;  %v52_v23 = vld [vmem:[%s2414_s0 + $0x130] sm:$0xff]  ;;  %v61_v35 = vld [vmem:[%s2414_s0 + $0x178] sm:$0xff] }
  0x21   :  { %1291 = vmatpush1.bf16.msra.mxu0 %v1624_v50  ;;  %1244 = vmatprep.subr.bf16.mxu1 %v1463_v0  ;;  %v56_v31 = vld [vmem:[%s2414_s0 + $0x150] sm:$0xff]  ;;  %v62_v32 = vld [vmem:[%s2414_s0 + $0x180] sm:$0xff]  ;;  %v67_v37 = vld [vmem:[%s2414_s0 + $0x1a8] sm:$0xff] }
  0x22   :  { %1292 = vmatprep.subr.bf16.mxu0 %v1463_v0  ;;  %v64_v38 = vld [vmem:[%s2414_s0 + $0x190] sm:$0xff]  ;;  %v66_v39 = vld [vmem:[%s2414_s0 + $0x1a0] sm:$0xff]  ;;  %v69_v42 = vld [vmem:[%s2414_s0 + $0x1b8] sm:$0xff] }
  0x23   :  { %v71_v43 = vld [vmem:[%s2414_s0 + $0x1c8] sm:$0xff]  ;;  %v18_v51 = vld [vmem:[%s2414_s0 + $0x20] sm:$0xff]  ;;  %v84_v52 = vld [vmem:[%s2414_s0 + $0x230] sm:$0xff] }
  0x24   :  { %1246 = vmatpush1.bf16.msra.mxu1 %v1245_v55  ;;  %v25_v55 = vld [vmem:[%s2414_s0 + $0x58] sm:$0xff] }
  0x25   :  { %1294 = vmatpush1.bf16.msra.mxu0 %v1641_v56  ;;  %1247 = vmatprep.subr.bf16.mxu1 %v1463_v0 }
  0x26   :  { %1295 = vmatprep.subr.bf16.mxu0 %v1463_v0 }
  0x28   :  { %1249 = vmatpush1.bf16.msra.mxu1 %v1248_v61  ;;  %v26_v61 = vld [vmem:[%s2414_s0 + $0x60] sm:$0xff] }
  0x29   :  { %1297 = vmatpush1.bf16.msra.mxu0 %v1658_v62  ;;  %1250 = vmatprep.subr.bf16.mxu1 %v1463_v0 }
  0x2a   :  { %1298 = vmatprep.subr.bf16.mxu0 %v1463_v0 }
  0x2c   :  { %1252 = vmatpush1.bf16.msra.mxu1 %v1251_v4  ;;  %v29_v4 = vld [vmem:[%s2414_s0 + $0x78] sm:$0xff] }
  0x2d   :  { %1300 = vmatpush1.bf16.msra.mxu0 %v1675_v5  ;;  %1253 = vmatprep.subr.bf16.mxu1 %v1463_v0 }
  0x2e   :  { %1301 = vmatprep.subr.bf16.mxu0 %v1463_v0 }
  0x30   :  { %1255 = vmatpush1.bf16.msra.mxu1 %v1254_v11  ;;  %v34_v11 = vld [vmem:[%s2414_s0 + $0xa0] sm:$0xff] }
  0x31   :  { %1303 = vmatpush1.bf16.msra.mxu0 %v1692_v13  ;;  %1256 = vmatprep.subr.bf16.mxu1 %v1463_v0 }
  0x32   :  { %1304 = vmatprep.subr.bf16.mxu0 %v1463_v0 }
  0x34   :  { %1258 = vmatpush1.bf16.msra.mxu1 %v1257_v19  ;;  %v47_v19 = vld [vmem:[%s2414_s0 + $0x108] sm:$0xff] }
  0x35   :  { %1306 = vmatpush1.bf16.msra.mxu0 %v1709_v20  ;;  %1259 = vmatprep.subr.bf16.mxu1 %v1463_v0 }
  0x36   :  { %1307 = vmatprep.subr.bf16.mxu0 %v1463_v0 }
  0x38   :  { %1261 = vmatpush1.bf16.msra.mxu1 %v1260_v26  ;;  %v51_v26 = vld [vmem:[%s2414_s0 + $0x128] sm:$0xff] }
  0x39   :  { %1309 = vmatpush1.bf16.msra.mxu0 %v1726_v27  ;;  %1262 = vmatprep.subr.bf16.mxu1 %v1463_v0 }
  0x3a   :  { %1310 = vmatprep.subr.bf16.mxu0 %v1463_v0 }
  0x3c   :  { %1264 = vmatpush1.bf16.msra.mxu1 %v1263_v33  ;;  %v59_v33 = vld [vmem:[%s2414_s0 + $0x168] sm:$0xff] }
  0x3d   :  { %1312 = vmatpush1.bf16.msra.mxu0 %v1743_v34  ;;  %1265 = vmatprep.subr.bf16.mxu1 %v1463_v0 }
  0x3e   :  { %1313 = vmatprep.subr.bf16.mxu0 %v1463_v0 }
  0x40   :  { %1267 = vmatpush1.bf16.msra.mxu1 %v1266_v40  ;;  %v72_v40 = vld [vmem:[%s2414_s0 + $0x1d0] sm:$0xff] }
  0x41   :  { %1315 = vmatpush1.bf16.msra.mxu0 %v1760_v41  ;;  %1328 = vmatprep.subr.bf16.mxu1 %v1463_v0 }
  0x42   :  { %1316 = vmatprep.subr.bf16.mxu0 %v1463_v0 }
  0x43   :  { %359 = vmatmul.mubr.f32.vlgmr.msra.gmra.mrb[0].mxu1 %v14_v45  ;;  %v77_v45 = vld [vmem:[%s2414_s0 + $0x1f8] sm:$0xff] }
  0x44   :  { %549 = vmatmul.mubr.f32.vlgmr.msra.gmra.mrb[0].mxu0 %v16_v46  ;;  %363 = vmatprep.mubr.f32.mxu1 %v20_v48  ;;  %v74_v46 = vld [vmem:[%s2414_s0 + $0x1e0] sm:$0xff]  ;;  %v79_v48 = vld [vmem:[%s2414_s0 + $0x208] sm:$0xff] }
  0x45   :  { %1318 = vmatpush3.bf16.msra.mxu0 %v1317_v47  ;;  %1344 = vmatpush1.bf16.msra.mxu1 %v1506_v8  ;;  %v207_v8 = vld [vmem:[%s2413_s1 + $0x220] sm:$0xff]  ;;  %v76_v47 = vld [vmem:[%s2414_s0 + $0x1f0] sm:$0xff] }
  0x46   :  { %553 = vmatprep.mubr.f32.mxu0 %v22_v49  ;;  %1329 = vmatprep.subr.bf16.mxu1 %v1463_v0  ;;  %v1323_v2 = vpack.c.bf16 %v208_v59, %v207_v8  ;;  %v1465_v49 = vmov 0.0   ;;  %v38_v8 = vld [vmem:[%s2414_s0 + $0xc0] sm:$0xff]  ;;  %v105_v59 = vld [vmem:[%s2414_s0 + $0x2d8] sm:$0xff] }
  0x47   :  { %364 = vmatmul.mubr.f32.gmra.mrb[2].mxu1 %v19_v53  ;;  %1319 = vmatprep.subr.bf16.mxu0 %v1463_v0  ;;  %v23_v53 = vld [vmem:[%s2414_s0 + $0x48] sm:$0xff] }
  0x48   :  { %554 = vmatmul.mubr.f32.gmra.mrb[2].mxu0 %v21_v54  ;;  %368 = vmatprep.mubr.f32.mxu1 %v25_v55  ;;  %v89_v54 = vld [vmem:[%s2414_s0 + $0x258] sm:$0xff]  ;;  %v28_v55 = vld [vmem:[%s2414_s0 + $0x70] sm:$0xff] }
  0x49   :  { %558 = vmatprep.mubr.f32.mxu0 %v27_v57  ;;  %1345 = vmatpush1.bf16.msra.mxu1 %v1516_v12  ;;  %v210_v12 = vld [vmem:[%s2413_s1 + $0x238] sm:$0xff]  ;;  %v94_v57 = vld [vmem:[%s2414_s0 + $0x280] sm:$0xff] }
  0x4a   :  { %1321 = vmatpush3.bf16.msra.mxu0 %v1320_v58  ;;  %1330 = vmatprep.subr.bf16.mxu1 %v1463_v0  ;;  %v1326_v10 = vpack.c.bf16 %v210_v12, %v209_v3  ;;  %v33_v58 = vld [vmem:[%s2414_s0 + $0x98] sm:$0xff]  ;;  %v114_v3 = vld [vmem:[%s2414_s0 + $0x320] sm:$0xff] }
  0x4b   :  { %369 = vmatmul.mubr.f32.gmra.mrb[4].mxu1 %v24_v60  ;;  %1322 = vmatprep.subr.bf16.mxu0 %v1463_v0  ;;  %v43_v60 = vld [vmem:[%s2414_s0 + $0xe8] sm:$0xff]  ;;  %v53_v12 = vld [vmem:[%s2414_s0 + $0x138] sm:$0xff] }
  0x4c   :  { %559 = vmatmul.mubr.f32.gmra.mrb[4].mxu0 %v26_v61  ;;  %373 = vmatprep.mubr.f32.mxu1 %v30_v63  ;;  %v110_v61 = vld [vmem:[%s2414_s0 + $0x300] sm:$0xff]  ;;  %v109_v63 = vld [vmem:[%s2414_s0 + $0x2f8] sm:$0xff] }
  0x4d   :  { %563 = vmatprep.mubr.f32.mxu0 %v32_v1  ;;  %1346 = vmatpush1.bf16.msra.mxu1 %v1533_v18  ;;  %v36_v18 = vld [vmem:[%s2414_s0 + $0xb0] sm:$0xff] }
  0x4e   :  { %1331 = vmatprep.subr.bf16.mxu1 %v1463_v0  ;;  %1324 = vmatpush3.bf16.msra.mxu0 %v1323_v2  ;;  %v48_v1 = vld [vmem:[%s2414_s0 + $0x110] sm:$0xff]  ;;  %v115_v2 = vld [vmem:[%s2414_s0 + $0x328] sm:$0xff] }
  0x4f   :  { %374 = vmatmul.mubr.f32.gmra.mrb[6].mxu1 %v29_v4  ;;  %1325 = vmatprep.subr.bf16.mxu0 %v1463_v0  ;;  %v120_v4 = vld [vmem:[%s2414_s0 + $0x350] sm:$0xff] }
  0x50   :  { %564 = vmatmul.mubr.f32.gmra.mrb[6].mxu0 %v31_v6  ;;  %378 = vmatprep.mubr.f32.mxu1 %v35_v7  ;;  %v119_v6 = vld [vmem:[%s2414_s0 + $0x348] sm:$0xff]  ;;  %v58_v7 = vld [vmem:[%s2414_s0 + $0x160] sm:$0xff] }
  0x51   :  { %568 = vmatprep.mubr.f32.mxu0 %v37_v9  ;;  %1347 = vmatpush1.bf16.msra.mxu1 %v1550_v24  ;;  %v45_v24 = vld [vmem:[%s2414_s0 + $0xf8] sm:$0xff] }
  0x52   :  { %1332 = vmatprep.subr.bf16.mxu1 %v1463_v0  ;;  %1327 = vmatpush3.bf16.msra.mxu0 %v1326_v10  ;;  %v125_v9 = vld [vmem:[%s2414_s0 + $0x378] sm:$0xff]  ;;  %v124_v10 = vld [vmem:[%s2414_s0 + $0x370] sm:$0xff] }
  0x53   :  { %379 = vmatmul.mubr.f32.gmra.mrb[8].mxu1 %v34_v11  ;;  %v63_v11 = vld [vmem:[%s2414_s0 + $0x188] sm:$0xff] }
  0x54   :  { %569 = vmatmul.mubr.f32.gmra.mrb[8].mxu0 %v36_v18  ;;  %383 = vmatprep.mubr.f32.mxu1 %v40_v14  ;;  %v130_v18 = vld [vmem:[%s2414_s0 + $0x3a0] sm:$0xff]  ;;  %v129_v14 = vld [vmem:[%s2414_s0 + $0x398] sm:$0xff] }
  0x55   :  { %573 = vmatprep.mubr.f32.mxu0 %v42_v15  ;;  %1348 = vmatpush1.bf16.msra.mxu1 %v1567_v30  ;;  %v50_v30 = vld [vmem:[%s2414_s0 + $0x120] sm:$0xff]  ;;  %v68_v15 = vld [vmem:[%s2414_s0 + $0x1b0] sm:$0xff] }
  0x56   :  { %1333 = vmatprep.subr.bf16.mxu1 %v1463_v0 }
  0x57   :  { %384 = vmatmul.mubr.f32.gmra.mrb[10].mxu1 %v39_v16  ;;  %v135_v16 = vld [vmem:[%s2414_s0 + $0x3c8] sm:$0xff] }
  0x58   :  { %574 = vmatmul.mubr.f32.gmra.mrb[10].mxu0 %v41_v17  ;;  %388 = vmatprep.mubr.f32.mxu1 %v45_v24  ;;  %v134_v17 = vld [vmem:[%s2414_s0 + $0x3c0] sm:$0xff]  ;;  %v73_v24 = vld [vmem:[%s2414_s0 + $0x1d8] sm:$0xff] }
  0x59   :  { %578 = vmatprep.mubr.f32.mxu0 %v47_v19  ;;  %1349 = vmatpush1.bf16.msra.mxu1 %v1584_v36  ;;  %v55_v36 = vld [vmem:[%s2414_s0 + $0x148] sm:$0xff]  ;;  %v82_v19 = vld [vmem:[%s2414_s0 + $0x220] sm:$0xff] }
  0x5a   :  { %1334 = vmatprep.subr.bf16.mxu1 %v1463_v0 }
  0x5b   :  { %389 = vmatmul.mubr.f32.gmra.mrb[12].mxu1 %v44_v21  ;;  %v81_v21 = vld [vmem:[%s2414_s0 + $0x218] sm:$0xff] }
  0x5c   :  { %579 = vmatmul.mubr.f32.gmra.mrb[12].mxu0 %v46_v22  ;;  %393 = vmatprep.mubr.f32.mxu1 %v50_v30  ;;  %v78_v22 = vld [vmem:[%s2414_s0 + $0x200] sm:$0xff]  ;;  %v87_v30 = vld [vmem:[%s2414_s0 + $0x248] sm:$0xff] }
  0x5d   :  { %583 = vmatprep.mubr.f32.mxu0 %v52_v23  ;;  %1350 = vmatpush1.bf16.msra.mxu1 %v1607_v44  ;;  %v60_v44 = vld [vmem:[%s2414_s0 + $0x170] sm:$0xff]  ;;  %v86_v23 = vld [vmem:[%s2414_s0 + $0x240] sm:$0xff] }
  0x5e   :  { %1335 = vmatprep.subr.bf16.mxu1 %v1463_v0 }
  0x5f   :  { %394 = vmatmul.mubr.f32.gmra.mrb[14].mxu1 %v49_v25  ;;  %v83_v25 = vld [vmem:[%s2414_s0 + $0x228] sm:$0xff] }
  0x60   :  { %584 = vmatmul.mubr.f32.gmra.mrb[14].mxu0 %v51_v26  ;;  %398 = vmatprep.mubr.f32.mxu1 %v55_v36  ;;  %v92_v26 = vld [vmem:[%s2414_s0 + $0x270] sm:$0xff]  ;;  %v91_v36 = vld [vmem:[%s2414_s0 + $0x268] sm:$0xff] }
  0x61   :  { %588 = vmatprep.mubr.f32.mxu0 %v57_v28  ;;  %1351 = vmatpush1.bf16.msra.mxu1 %v1624_v50  ;;  %v65_v50 = vld [vmem:[%s2414_s0 + $0x198] sm:$0xff]  ;;  %v88_v28 = vld [vmem:[%s2414_s0 + $0x250] sm:$0xff] }
  0x62   :  { %1336 = vmatprep.subr.bf16.mxu1 %v1463_v0 }
  0x63   :  { %399 = vmatmul.mubr.f32.gmra.mrb[16].mxu1 %v54_v29  ;;  %v97_v29 = vld [vmem:[%s2414_s0 + $0x298] sm:$0xff] }
  0x64   :  { %589 = vmatmul.mubr.f32.gmra.mrb[16].mxu0 %v56_v31  ;;  %403 = vmatprep.mubr.f32.mxu1 %v60_v44  ;;  %v96_v31 = vld [vmem:[%s2414_s0 + $0x290] sm:$0xff]  ;;  %v93_v44 = vld [vmem:[%s2414_s0 + $0x278] sm:$0xff] }
  0x65   :  { %593 = vmatprep.mubr.f32.mxu0 %v62_v32  ;;  %1352 = vmatpush1.bf16.msra.mxu1 %v1641_v56  ;;  %v70_v56 = vld [vmem:[%s2414_s0 + $0x1c0] sm:$0xff] }
  0x66   :  { %1337 = vmatprep.subr.bf16.mxu1 %v1463_v0  ;;  %v102_v32 = vld [vmem:[%s2414_s0 + $0x2c0] sm:$0xff] }
  0x67   :  { %404 = vmatmul.mubr.f32.gmra.mrb[18].mxu1 %v59_v33  ;;  %v101_v33 = vld [vmem:[%s2414_s0 + $0x2b8] sm:$0xff] }
  0x68   :  { %594 = vmatmul.mubr.f32.gmra.mrb[18].mxu0 %v61_v35  ;;  %408 = vmatprep.mubr.f32.mxu1 %v65_v50  ;;  %v98_v35 = vld [vmem:[%s2414_s0 + $0x2a0] sm:$0xff]  ;;  %v107_v50 = vld [vmem:[%s2414_s0 + $0x2e8] sm:$0xff] }
  0x69   :  { %598 = vmatprep.mubr.f32.mxu0 %v67_v37  ;;  %1353 = vmatpush1.bf16.msra.mxu1 %v1658_v62  ;;  %v75_v62 = vld [vmem:[%s2414_s0 + $0x1e8] sm:$0xff]  ;;  %v106_v37 = vld [vmem:[%s2414_s0 + $0x2e0] sm:$0xff] }
  0x6a   :  { %1338 = vmatprep.subr.bf16.mxu1 %v1463_v0 }
  0x6b   :  { %409 = vmatmul.mubr.f32.gmra.mrb[20].mxu1 %v64_v38  ;;  %v103_v38 = vld [vmem:[%s2414_s0 + $0x2c8] sm:$0xff] }
  0x6c   :  { %599 = vmatmul.mubr.f32.gmra.mrb[20].mxu0 %v66_v39  ;;  %413 = vmatprep.mubr.f32.mxu1 %v70_v56  ;;  %v112_v39 = vld [vmem:[%s2414_s0 + $0x310] sm:$0xff]  ;;  %v111_v56 = vld [vmem:[%s2414_s0 + $0x308] sm:$0xff] }
  0x6d   :  { %603 = vmatprep.mubr.f32.mxu0 %v72_v40  ;;  %1354 = vmatpush1.bf16.msra.mxu1 %v1675_v5  ;;  %v80_v5 = vld [vmem:[%s2414_s0 + $0x210] sm:$0xff] }
  0x6e   :  { %1339 = vmatprep.subr.bf16.mxu1 %v1463_v0  ;;  %v108_v40 = vld [vmem:[%s2414_s0 + $0x2f0] sm:$0xff] }
  0x6f   :  { %414 = vmatmul.mubr.f32.gmra.mrb[22].mxu1 %v69_v42  ;;  %v117_v42 = vld [vmem:[%s2414_s0 + $0x338] sm:$0xff] }
  0x70   :  { %604 = vmatmul.mubr.f32.gmra.mrb[22].mxu0 %v71_v43  ;;  %418 = vmatprep.mubr.f32.mxu1 %v75_v62  ;;  %v116_v43 = vld [vmem:[%s2414_s0 + $0x330] sm:$0xff]  ;;  %v113_v62 = vld [vmem:[%s2414_s0 + $0x318] sm:$0xff] }
  0x71   :  { %608 = vmatprep.mubr.f32.mxu0 %v77_v45  ;;  %1355 = vmatpush1.bf16.msra.mxu1 %v1692_v13  ;;  %v85_v13 = vld [vmem:[%s2414_s0 + $0x238] sm:$0xff]  ;;  %v122_v45 = vld [vmem:[%s2414_s0 + $0x360] sm:$0xff] }
  0x72   :  { %1340 = vmatprep.subr.bf16.mxu1 %v1463_v0 }
  0x73   :  { %419 = vmatmul.mubr.f32.gmra.mrb[24].mxu1 %v74_v46  ;;  %v121_v46 = vld [vmem:[%s2414_s0 + $0x358] sm:$0xff] }
  0x74   :  { %609 = vmatmul.mubr.f32.gmra.mrb[24].mxu0 %v76_v47  ;;  %423 = vmatprep.mubr.f32.mxu1 %v80_v5  ;;  %v118_v47 = vld [vmem:[%s2414_s0 + $0x340] sm:$0xff]  ;;  %v127_v5 = vld [vmem:[%s2414_s0 + $0x388] sm:$0xff] }
  0x75   :  { %1145 = vmatprep.mubr.msk.f32.mxu0 %vm1464_vm0, %v1465_v49  ;;  %1356 = vmatpush1.bf16.msra.mxu1 %v1709_v20  ;;  %v90_v20 = vld [vmem:[%s2414_s0 + $0x260] sm:$0xff] }
  0x76   :  { %1341 = vmatprep.subr.bf16.mxu1 %v1463_v0 }
  0x77   :  { %424 = vmatmul.mubr.f32.gmra.mrb[26].mxu1 %v79_v48  ;;  %v126_v48 = vld [vmem:[%s2414_s0 + $0x380] sm:$0xff] }
  0x78   :  { %1146 = vmatmul.mubr.msk.f32.vlgmr.msra.gmra.mrb[0].mxu0 %vm218_vm1, %v18_v51  ;;  %428 = vmatprep.mubr.f32.mxu1 %v85_v13  ;;  %v123_v51 = vld [vmem:[%s2414_s0 + $0x368] sm:$0xff]  ;;  %v132_v13 = vld [vmem:[%s2414_s0 + $0x3b0] sm:$0xff] }
  0x79   :  { %1148 = vmatprep.mubr.msk.f32.mxu0 %vm1464_vm0, %v1465_v49  ;;  %1357 = vmatpush1.bf16.msra.mxu1 %v1726_v27  ;;  %v95_v27 = vld [vmem:[%s2414_s0 + $0x288] sm:$0xff] }
  0x7a   :  { %1342 = vmatprep.subr.bf16.mxu1 %v1463_v0 }
  0x7b   :  { %429 = vmatmul.mubr.f32.gmra.mrb[28].mxu1 %v84_v52  ;;  %v131_v52 = vld [vmem:[%s2414_s0 + $0x3a8] sm:$0xff] }
  0x7c   :  { %1149 = vmatmul.mubr.msk.f32.gmra.mrb[2].mxu0 %vm218_vm1, %v23_v53  ;;  %433 = vmatprep.mubr.f32.mxu1 %v90_v20  ;;  %v128_v53 = vld [vmem:[%s2414_s0 + $0x390] sm:$0xff]  ;;  %v137_v20 = vld [vmem:[%s2414_s0 + $0x3d8] sm:$0xff] }
  0x7d   :  { %1151 = vmatprep.mubr.msk.f32.mxu0 %vm1464_vm0, %v1465_v49  ;;  %1358 = vmatpush1.bf16.msra.mxu1 %v1743_v34  ;;  %v100_v34 = vld [vmem:[%s2414_s0 + $0x2b0] sm:$0xff] }
  0x7e   :  { %1343 = vmatprep.subr.bf16.mxu1 %v1463_v0  ;;  %v99_v0 = vld [vmem:[%s2414_s0 + $0x2a8] sm:$0xff] }
  0x7f   :  { %434 = vmatmul.mubr.f32.gmra.mrb[30].mxu1 %v89_v54  ;;  %v136_v54 = vld [vmem:[%s2414_s0 + $0x3d0] sm:$0xff] }
  0x80   :  { %1152 = vmatmul.mubr.msk.f32.gmra.mrb[4].mxu0 %vm218_vm1, %v28_v55  ;;  %438 = vmatprep.mubr.f32.mxu1 %v95_v27  ;;  %v133_v55 = vld [vmem:[%s2414_s0 + $0x3b8] sm:$0xff]  ;;  %v138_v27 = vld [vmem:[%s2414_s0 + $0x3e0] sm:$0xff] }
  0x81   :  { %1154 = vmatprep.mubr.msk.f32.mxu0 %vm1464_vm0, %v1465_v49  ;;  %1359 = vmatpush1.bf16.msra.mxu1 %v1760_v41  ;;  %v104_v41 = vld [vmem:[%s2414_s0 + $0x2d0] sm:$0xff] }
  0x83   :  { %439 = vmatmul.mubr.f32.gmra.mrb[32].mxu1 %v94_v57 }
  0x84   :  { %1155 = vmatmul.mubr.msk.f32.gmra.mrb[6].mxu0 %vm218_vm1, %v33_v58  ;;  %443 = vmatprep.mubr.f32.mxu1 %v100_v34 }
  0x85   :  { %1157 = vmatprep.mubr.msk.f32.mxu0 %vm1464_vm0, %v1465_v49 }
  0x87   :  { %444 = vmatmul.mubr.f32.gmra.mrb[34].mxu1 %v99_v0 }
  0x88   :  { %1158 = vmatmul.mubr.msk.f32.gmra.mrb[8].mxu0 %vm218_vm1, %v38_v8  ;;  %448 = vmatprep.mubr.f32.mxu1 %v105_v59 }
  0x89   :  { %1160 = vmatprep.mubr.msk.f32.mxu0 %vm1464_vm0, %v1465_v49 }
  0x8b   :  { %449 = vmatmul.mubr.f32.gmra.mrb[36].mxu1 %v104_v41 }
  0x8c   :  { %1161 = vmatmul.mubr.msk.f32.gmra.mrb[10].mxu0 %vm218_vm1, %v43_v60  ;;  %453 = vmatprep.mubr.f32.mxu1 %v110_v61 }
  0x8d   :  { %1163 = vmatprep.mubr.msk.f32.mxu0 %vm1464_vm0, %v1465_v49 }
  0x8f   :  { %454 = vmatmul.mubr.f32.gmra.mrb[38].mxu1 %v109_v63 }
  0x90   :  { %1164 = vmatmul.mubr.msk.f32.gmra.mrb[12].mxu0 %vm218_vm1, %v48_v1  ;;  %458 = vmatprep.mubr.f32.mxu1 %v115_v2 }
  0x91   :  { %1166 = vmatprep.mubr.msk.f32.mxu0 %vm1464_vm0, %v1465_v49 }
  0x93   :  { %459 = vmatmul.mubr.f32.gmra.mrb[40].mxu1 %v114_v3 }
  0x94   :  { %1167 = vmatmul.mubr.msk.f32.gmra.mrb[14].mxu0 %vm218_vm1, %v53_v12  ;;  %463 = vmatprep.mubr.f32.mxu1 %v120_v4 }
  0x95   :  { %1169 = vmatprep.mubr.msk.f32.mxu0 %vm1464_vm0, %v1465_v49 }
  0x97   :  { %464 = vmatmul.mubr.f32.gmra.mrb[42].mxu1 %v119_v6 }
  0x98   :  { %1170 = vmatmul.mubr.msk.f32.gmra.mrb[16].mxu0 %vm218_vm1, %v58_v7  ;;  %468 = vmatprep.mubr.f32.mxu1 %v125_v9 }
  0x99   :  { %1172 = vmatprep.mubr.msk.f32.mxu0 %vm1464_vm0, %v1465_v49 }
  0x9b   :  { %469 = vmatmul.mubr.f32.gmra.mrb[44].mxu1 %v124_v10 }
  0x9c   :  { %1173 = vmatmul.mubr.msk.f32.gmra.mrb[18].mxu0 %vm218_vm1, %v63_v11  ;;  %473 = vmatprep.mubr.f32.mxu1 %v130_v18 }
  0x9d   :  { %1175 = vmatprep.mubr.msk.f32.mxu0 %vm1464_vm0, %v1465_v49 }
  0x9f   :  { %474 = vmatmul.mubr.f32.gmra.mrb[46].mxu1 %v129_v14 }
  0xa0   :  { %1176 = vmatmul.mubr.msk.f32.gmra.mrb[20].mxu0 %vm218_vm1, %v68_v15  ;;  %478 = vmatprep.mubr.f32.mxu1 %v135_v16 }
  0xa1   :  { %1178 = vmatprep.mubr.msk.f32.mxu0 %vm1464_vm0, %v1465_v49 }
  0xa3   :  { %479 = vmatmul.mubr.f32.gmra.mrb[48].mxu1 %v134_v17  ;;  %v2281_v17 = vld [vmem:[%s2415_s2] ss:$0 sm:$0xff] }
  0xa4   :  { %1179 = vmatmul.mubr.msk.f32.gmra.mrb[22].mxu0 %vm218_vm1, %v73_v24  ;;  %613 = vmatprep.mubr.f32.mxu1 %v82_v19 }
  0xa5   :  { %1181 = vmatprep.mubr.msk.f32.mxu0 %vm1464_vm0, %v1465_v49 }
  0xa7   :  { %614 = vmatmul.mubr.f32.vlgmr.msra.gmra.mrb[26].mxu1 %v81_v21 }
  0xa8   :  { %1182 = vmatmul.mubr.msk.f32.gmra.mrb[24].mxu0 %vm218_vm1, %v78_v22  ;;  %618 = vmatprep.mubr.f32.mxu1 %v87_v30 }
  0xa9   :  { %1184 = vmatprep.mubr.msk.f32.mxu0 %vm1464_vm0, %v1465_v49 }
  0xab   :  { %619 = vmatmul.mubr.f32.gmra.mrb[28].mxu1 %v86_v23 }
  0xac   :  { %1185 = vmatmul.mubr.msk.f32.gmra.mrb[26].mxu0 %vm218_vm1, %v83_v25  ;;  %623 = vmatprep.mubr.f32.mxu1 %v92_v26 }
  0xad   :  { %1187 = vmatprep.mubr.msk.f32.mxu0 %vm1464_vm0, %v1465_v49 }
  0xaf   :  { %624 = vmatmul.mubr.f32.gmra.mrb[30].mxu1 %v91_v36 }
  0xb0   :  { %1188 = vmatmul.mubr.msk.f32.gmra.mrb[28].mxu0 %vm218_vm1, %v88_v28  ;;  %628 = vmatprep.mubr.f32.mxu1 %v97_v29 }
  0xb1   :  { %1190 = vmatprep.mubr.msk.f32.mxu0 %vm1464_vm0, %v1465_v49 }
  0xb3   :  { %629 = vmatmul.mubr.f32.gmra.mrb[32].mxu1 %v96_v31 }
  0xb4   :  { %1191 = vmatmul.mubr.msk.f32.gmra.mrb[30].mxu0 %vm218_vm1, %v93_v44  ;;  %633 = vmatprep.mubr.f32.mxu1 %v102_v32 }
  0xb5   :  { %1193 = vmatprep.mubr.msk.f32.mxu0 %vm1464_vm0, %v1465_v49 }
  0xb7   :  { %634 = vmatmul.mubr.f32.gmra.mrb[34].mxu1 %v101_v33 }
  0xb8   :  { %1194 = vmatmul.mubr.msk.f32.gmra.mrb[32].mxu0 %vm218_vm1, %v98_v35  ;;  %638 = vmatprep.mubr.f32.mxu1 %v107_v50 }
  0xb9   :  { %1196 = vmatprep.mubr.msk.f32.mxu0 %vm1464_vm0, %v1465_v49 }
  0xbb   :  { %639 = vmatmul.mubr.f32.gmra.mrb[36].mxu1 %v106_v37 }
  0xbc   :  { %1197 = vmatmul.mubr.msk.f32.gmra.mrb[34].mxu0 %vm218_vm1, %v103_v38  ;;  %643 = vmatprep.mubr.f32.mxu1 %v112_v39 }
  0xbd   :  { %1199 = vmatprep.mubr.msk.f32.mxu0 %vm1464_vm0, %v1465_v49 }
  0xbf   :  { %644 = vmatmul.mubr.f32.gmra.mrb[38].mxu1 %v111_v56 }
  0xc0   :  { %1200 = vmatmul.mubr.msk.f32.gmra.mrb[36].mxu0 %vm218_vm1, %v108_v40  ;;  %648 = vmatprep.mubr.f32.mxu1 %v117_v42 }
  0xc1   :  { %1202 = vmatprep.mubr.msk.f32.mxu0 %vm1464_vm0, %v1465_v49 }
  0xc3   :  { %649 = vmatmul.mubr.f32.gmra.mrb[40].mxu1 %v116_v43 }
  0xc4   :  { %1203 = vmatmul.mubr.msk.f32.gmra.mrb[38].mxu0 %vm218_vm1, %v113_v62  ;;  %653 = vmatprep.mubr.f32.mxu1 %v122_v45 }
  0xc5   :  { %1205 = vmatprep.mubr.msk.f32.mxu0 %vm1464_vm0, %v1465_v49 }
  0xc7   :  { %654 = vmatmul.mubr.f32.gmra.mrb[42].mxu1 %v121_v46 }
  0xc8   :  { %1206 = vmatmul.mubr.msk.f32.gmra.mrb[40].mxu0 %vm218_vm1, %v118_v47  ;;  %658 = vmatprep.mubr.f32.mxu1 %v127_v5 }
  0xc9   :  { %1208 = vmatprep.mubr.msk.f32.mxu0 %vm1464_vm0, %v1465_v49 }
  0xcb   :  { %659 = vmatmul.mubr.f32.gmra.mrb[44].mxu1 %v126_v48 }
  0xcc   :  { %1209 = vmatmul.mubr.msk.f32.gmra.mrb[42].mxu0 %vm218_vm1, %v123_v51  ;;  %663 = vmatprep.mubr.f32.mxu1 %v132_v13 }
  0xcd   :  { %1211 = vmatprep.mubr.msk.f32.mxu0 %vm1464_vm0, %v1465_v49 }
  0xcf   :  { %664 = vmatmul.mubr.f32.gmra.mrb[46].mxu1 %v131_v52 }
  0xd0   :  { %1212 = vmatmul.mubr.msk.f32.gmra.mrb[44].mxu0 %vm218_vm1, %v128_v53  ;;  %668 = vmatprep.mubr.f32.mxu1 %v137_v20 }
  0xd1   :  { %1214 = vmatprep.mubr.msk.f32.mxu0 %vm1464_vm0, %v1465_v49 }
  0xd3   :  { %669 = vmatmul.mubr.f32.gmra.mrb[48].mxu1 %v136_v54 }
  0xd4   :  { %1215 = vmatmul.mubr.msk.f32.gmra.mrb[46].mxu0 %vm218_vm1, %v133_v55 }
  0xd5   :  { %1217 = vmatprep.mubr.msk.f32.mxu0 %vm1464_vm0, %v1465_v49 }
  0xd8   :  { %1218 = vmatmul.mubr.msk.f32.gmra.mrb[48].mxu0 %vm218_vm1, %v138_v27 }
 0x116   :  { %v360_v57 = vpop.f32.mrb[0].mxu1 }
 0x117   :  { %v362_v58 = vpop.f32.mrb[1].mxu1  ;;  %v361_v19 = vadd.f32 %v2281_v17, %v360_v57 }
 0x11a   :  { %v365_v34 = vpop.f32.mrb[2].mxu1 }
 0x11b   :  { %v367_v0 = vpop.f32.mrb[3].mxu1  ;;  %v366_v23 = vadd.f32 %v2281_v17, %v365_v34 }
 0x11e   :  { %v370_v8 = vpop.f32.mrb[4].mxu1 }
 0x11f   :  { %v372_v59 = vpop.f32.mrb[5].mxu1  ;;  %v371_v31 = vadd.f32 %v2281_v17, %v370_v8 }
 0x122   :  { %v375_v41 = vpop.f32.mrb[6].mxu1 }
 0x123   :  { %v377_v60 = vpop.f32.mrb[7].mxu1  ;;  %v376_v37 = vadd.f32 %v2281_v17, %v375_v41 }
 0x126   :  { %v380_v61 = vpop.f32.mrb[8].mxu1 }
 0x127   :  { %v382_v63 = vpop.f32.mrb[9].mxu1  ;;  %v381_v43 = vadd.f32 %v2281_v17, %v380_v61 }
 0x12a   :  { %v385_v1 = vpop.f32.mrb[10].mxu1 }
 0x12b   :  { %v387_v2 = vpop.f32.mrb[11].mxu1  ;;  %v386_v48 = vadd.f32 %v2281_v17, %v385_v1 }
 0x12e   :  { %v390_v3 = vpop.f32.mrb[12].mxu1 }
 0x12f   :  { %v392_v49 = vpop.f32.mrb[13].mxu1  ;;  %v391_v54 = vadd.f32 %v2281_v17, %v390_v3 }
 0x132   :  { %v395_v12 = vpop.f32.mrb[14].mxu1 }
 0x133   :  { %v397_v4 = vpop.f32.mrb[15].mxu1  ;;  %v396_v0 = vadd.f32 %v2281_v17, %v395_v12 }
 0x136   :  { %v2268_v6 = vpop.f32.mrb[16].mxu1 }
 0x137   :  { %v402_v7 = vpop.f32.mrb[17].mxu1  ;;  %v401_v63 = vadd.f32 %v2281_v17, %v2268_v6 }
 0x13a   :  { %v2270_v9 = vpop.f32.mrb[18].mxu1 }
 0x13b   :  { %v407_v10 = vpop.f32.mrb[19].mxu1  ;;  %v406_v4 = vadd.f32 %v2281_v17, %v2270_v9 }
 0x13e   :  { %v2272_v11 = vpop.f32.mrb[20].mxu1 }
 0x13f   :  { %v412_v18 = vpop.f32.mrb[21].mxu1 }
 0x142   :  { %v2274_v14 = vpop.f32.mrb[22].mxu1 }
 0x143   :  { %v417_v15 = vpop.f32.mrb[23].mxu1 }
 0x146   :  { %v2276_v16 = vpop.f32.mrb[24].mxu1 }
 0x147   :  { %v422_v24 = vpop.f32.mrb[25].mxu1 }
 0x148   :  { %v411_v24 = vadd.f32 %v2281_v17, %v2272_v11 }
 0x14b   :  { %v740_v21 = vpop.f32.mrb[0].mxu0 }
 0x14c   :  { %v1361_v22 = vadd.f32 %v740_v21, %v361_v19  ;;  %v1147_v30 = vpop.f32.mrb[1].mxu0 }
 0x14e   :  { %v864_v25 = vmax.f32 %v1361_v22, 0.0 }
 0x14f   :  { %v745_v26 = vpop.f32.mrb[2].mxu0 }
 0x150   :  { %v1071_v36 = vpack.c.bf16 %v864_v25, %v864_v25  ;;  %v1363_v28 = vadd.f32 %v745_v26, %v366_v23  ;;  %v1150_v29 = vpop.f32.mrb[3].mxu0  ;;  %v416_v23 = vadd.f32 %v2281_v17, %v2274_v14 }
 0x151   :  { %v421_v29 = vadd.f32 %v2281_v17, %v2276_v16 }
 0x152   :  { %991 = vst.msk [vmem:[%s2416_s3] sm:$0xf] %vm990_vm2, %v1071_v36  ;;  %v865_v44 = vmax.f32 %v1363_v28, 0.0 }
 0x153   :  { %v750_v32 = vpop.f32.mrb[4].mxu0 }
 0x154   :  { %v1072_v33 = vpack.c.bf16 %v865_v44, %v865_v44  ;;  %v1365_v35 = vadd.f32 %v750_v32, %v371_v31  ;;  %v1153_v50 = vpop.f32.mrb[5].mxu0 }
 0x156   :  { %992 = vst.msk [vmem:[%s2416_s3 + $0x4] sm:$0xf] %vm990_vm2, %v1072_v33  ;;  %v866_v38 = vmax.f32 %v1365_v35, 0.0 }
 0x157   :  { %v755_v39 = vpop.f32.mrb[6].mxu0 }
 0x158   :  { %v1073_v56 = vpack.c.bf16 %v866_v38, %v866_v38  ;;  %v1367_v40 = vadd.f32 %v755_v39, %v376_v37  ;;  %v1156_v42 = vpop.f32.mrb[7].mxu0 }
 0x15a   :  { %993 = vst.msk [vmem:[%s2416_s3 + $0x8] sm:$0xf] %vm990_vm2, %v1073_v56  ;;  %v867_v62 = vmax.f32 %v1367_v40, 0.0 }
 0x15b   :  { %v760_v45 = vpop.f32.mrb[8].mxu0 }
 0x15c   :  { %v1074_v46 = vpack.c.bf16 %v867_v62, %v867_v62  ;;  %v1369_v47 = vadd.f32 %v760_v45, %v381_v43  ;;  %v1159_v5 = vpop.f32.mrb[9].mxu0 }
 0x15e   :  { %994 = vst.msk [vmem:[%s2416_s3 + $0xc] sm:$0xf] %vm990_vm2, %v1074_v46  ;;  %v868_v51 = vmax.f32 %v1369_v47, 0.0 }
 0x15f   :  { %v765_v13 = vpop.f32.mrb[10].mxu0 }
 0x160   :  { %v1075_v52 = vpack.c.bf16 %v868_v51, %v868_v51  ;;  %v1371_v53 = vadd.f32 %v765_v13, %v386_v48  ;;  %v1162_v20 = vpop.f32.mrb[11].mxu0 }
 0x162   :  { %995 = vst.msk [vmem:[%s2416_s3 + $0x10] sm:$0xf] %vm990_vm2, %v1075_v52  ;;  %v869_v55 = vmax.f32 %v1371_v53, 0.0 }
 0x163   :  { %v770_v27 = vpop.f32.mrb[12].mxu0 }
 0x164   :  { %v1076_v57 = vpack.c.bf16 %v869_v55, %v869_v55  ;;  %v1373_v58 = vadd.f32 %v770_v27, %v391_v54  ;;  %v1165_v34 = vpop.f32.mrb[13].mxu0 }
 0x166   :  { %996 = vst.msk [vmem:[%s2416_s3 + $0x14] sm:$0xf] %vm990_vm2, %v1076_v57  ;;  %v870_v8 = vmax.f32 %v1373_v58, 0.0 }
 0x167   :  { %v775_v59 = vpop.f32.mrb[14].mxu0 }
 0x168   :  { %v1077_v41 = vpack.c.bf16 %v870_v8, %v870_v8  ;;  %v1375_v60 = vadd.f32 %v775_v59, %v396_v0  ;;  %v1168_v61 = vpop.f32.mrb[15].mxu0 }
 0x16a   :  { %997 = vst.msk [vmem:[%s2416_s3 + $0x18] sm:$0xf] %vm990_vm2, %v1077_v41  ;;  %v871_v1 = vmax.f32 %v1375_v60, 0.0 }
 0x16b   :  { %v780_v2 = vpop.f32.mrb[16].mxu0 }
 0x16c   :  { %v1078_v3 = vpack.c.bf16 %v871_v1, %v871_v1  ;;  %v1377_v49 = vadd.f32 %v780_v2, %v401_v63  ;;  %v1171_v12 = vpop.f32.mrb[17].mxu0 }
 0x16e   :  { %998 = vst.msk [vmem:[%s2416_s3 + $0x1c] sm:$0xf] %vm990_vm2, %v1078_v3  ;;  %v872_v7 = vmax.f32 %v1377_v49, 0.0 }
 0x16f   :  { %v785_v6 = vpop.f32.mrb[18].mxu0 }
 0x170   :  { %v1079_v10 = vpack.c.bf16 %v872_v7, %v872_v7  ;;  %v1379_v18 = vadd.f32 %v785_v6, %v406_v4  ;;  %v1174_v15 = vpop.f32.mrb[19].mxu0 }
 0x172   :  { %999 = vst.msk [vmem:[%s2416_s3 + $0x20] sm:$0xf] %vm990_vm2, %v1079_v10  ;;  %v873_v19 = vmax.f32 %v1379_v18, 0.0 }
 0x173   :  { %v790_v9 = vpop.f32.mrb[20].mxu0 }
 0x174   :  { %v1080_v21 = vpack.c.bf16 %v873_v19, %v873_v19  ;;  %v1381_v22 = vadd.f32 %v790_v9, %v411_v24  ;;  %v1177_v30 = vpop.f32.mrb[21].mxu0 }
 0x176   :  { %1000 = vst.msk [vmem:[%s2416_s3 + $0x24] sm:$0xf] %vm990_vm2, %v1080_v21  ;;  %v874_v25 = vmax.f32 %v1381_v22, 0.0 }
 0x177   :  { %v795_v11 = vpop.f32.mrb[22].mxu0 }
 0x178   :  { %v1081_v26 = vpack.c.bf16 %v874_v25, %v874_v25  ;;  %v1383_v36 = vadd.f32 %v795_v11, %v416_v23  ;;  %v1180_v28 = vpop.f32.mrb[23].mxu0 }
 0x17a   :  { %1001 = vst.msk [vmem:[%s2416_s3 + $0x28] sm:$0xf] %vm990_vm2, %v1081_v26  ;;  %v875_v31 = vmax.f32 %v1383_v36, 0.0  ;;  %v615_v14 = vpop.f32.mrb[26].mxu1 }
 0x17b   :  { %v800_v44 = vpop.f32.mrb[24].mxu0  ;;  %v617_v32 = vpop.f32.mrb[27].mxu1  ;;  %v1386_v37 = vadd.f32 %v2281_v17, %v615_v14 }
 0x17c   :  { %v1082_v33 = vpack.c.bf16 %v875_v31, %v875_v31  ;;  %v1385_v35 = vadd.f32 %v800_v44, %v421_v29  ;;  %v1183_v50 = vpop.f32.mrb[25].mxu0 }
 0x17e   :  { %1002 = vst.msk [vmem:[%s2416_s3 + $0x2c] sm:$0xf] %vm990_vm2, %v1082_v33  ;;  %v876_v16 = vmax.f32 %v1385_v35, 0.0  ;;  %v620_v38 = vpop.f32.mrb[28].mxu1 }
 0x17f   :  { %v805_v39 = vpop.f32.mrb[26].mxu0  ;;  %v622_v56 = vpop.f32.mrb[29].mxu1  ;;  %v1388_v62 = vadd.f32 %v2281_v17, %v620_v38 }
 0x180   :  { %v1083_v40 = vpack.c.bf16 %v876_v16, %v876_v16  ;;  %v1387_v42 = vadd.f32 %v1386_v37, %v805_v39  ;;  %v1186_v43 = vpop.f32.mrb[27].mxu0 }
 0x182   :  { %1003 = vst.msk [vmem:[%s2416_s3 + $0x30] sm:$0xf] %vm990_vm2, %v1083_v40  ;;  %v877_v45 = vmax.f32 %v1387_v42, 0.0  ;;  %v625_v46 = vpop.f32.mrb[30].mxu1 }
 0x183   :  { %v810_v47 = vpop.f32.mrb[28].mxu0  ;;  %v627_v5 = vpop.f32.mrb[31].mxu1  ;;  %v1390_v52 = vadd.f32 %v2281_v17, %v625_v46 }
 0x184   :  { %v1084_v48 = vpack.c.bf16 %v877_v45, %v877_v45  ;;  %v1389_v51 = vadd.f32 %v1388_v62, %v810_v47  ;;  %v1189_v13 = vpop.f32.mrb[29].mxu0 }
 0x186   :  { %1004 = vst.msk [vmem:[%s2416_s3 + $0x34] sm:$0xf] %vm990_vm2, %v1084_v48  ;;  %v878_v53 = vmax.f32 %v1389_v51, 0.0  ;;  %v630_v20 = vpop.f32.mrb[32].mxu1 }
 0x187   :  { %v815_v54 = vpop.f32.mrb[30].mxu0  ;;  %v632_v55 = vpop.f32.mrb[33].mxu1  ;;  %v1392_v34 = vadd.f32 %v2281_v17, %v630_v20 }
 0x188   :  { %v1085_v27 = vpack.c.bf16 %v878_v53, %v878_v53  ;;  %v1391_v57 = vadd.f32 %v1390_v52, %v815_v54  ;;  %v1192_v58 = vpop.f32.mrb[31].mxu0 }
 0x18a   :  { %1005 = vst.msk [vmem:[%s2416_s3 + $0x38] sm:$0xf] %vm990_vm2, %v1085_v27  ;;  %v879_v0 = vmax.f32 %v1391_v57, 0.0  ;;  %v635_v8 = vpop.f32.mrb[34].mxu1 }
 0x18b   :  { %v820_v59 = vpop.f32.mrb[32].mxu0  ;;  %v637_v41 = vpop.f32.mrb[35].mxu1  ;;  %v1394_v1 = vadd.f32 %v2281_v17, %v635_v8 }
 0x18c   :  { %v1086_v60 = vpack.c.bf16 %v879_v0, %v879_v0  ;;  %v1393_v61 = vadd.f32 %v1392_v34, %v820_v59  ;;  %v1195_v63 = vpop.f32.mrb[33].mxu0 }
 0x18e   :  { %1006 = vst.msk [vmem:[%s2416_s3 + $0x3c] sm:$0xf] %vm990_vm2, %v1086_v60  ;;  %v880_v2 = vmax.f32 %v1393_v61, 0.0  ;;  %v640_v3 = vpop.f32.mrb[36].mxu1 }
 0x18f   :  { %v825_v49 = vpop.f32.mrb[34].mxu0  ;;  %v642_v12 = vpop.f32.mrb[37].mxu1  ;;  %v1396_v10 = vadd.f32 %v2281_v17, %v640_v3 }
 0x190   :  { %v1087_v4 = vpack.c.bf16 %v880_v2, %v880_v2  ;;  %v1395_v7 = vadd.f32 %v1394_v1, %v825_v49  ;;  %v1198_v6 = vpop.f32.mrb[35].mxu0 }
 0x192   :  { %1007 = vst.msk [vmem:[%s2416_s3 + $0x40] sm:$0xf] %vm990_vm2, %v1087_v4  ;;  %v881_v18 = vmax.f32 %v1395_v7, 0.0  ;;  %v645_v15 = vpop.f32.mrb[38].mxu1 }
 0x193   :  { %v830_v24 = vpop.f32.mrb[36].mxu0  ;;  %v647_v19 = vpop.f32.mrb[39].mxu1  ;;  %v1398_v30 = vadd.f32 %v2281_v17, %v645_v15 }
 0x194   :  { %v1088_v9 = vpack.c.bf16 %v881_v18, %v881_v18  ;;  %v1397_v21 = vadd.f32 %v1396_v10, %v830_v24  ;;  %v1201_v22 = vpop.f32.mrb[37].mxu0 }
 0x196   :  { %1008 = vst.msk [vmem:[%s2416_s3 + $0x44] sm:$0xf] %vm990_vm2, %v1088_v9  ;;  %v882_v23 = vmax.f32 %v1397_v21, 0.0  ;;  %v650_v25 = vpop.f32.mrb[40].mxu1 }
 0x197   :  { %v835_v11 = vpop.f32.mrb[38].mxu0  ;;  %v652_v26 = vpop.f32.mrb[41].mxu1  ;;  %v1400_v31 = vadd.f32 %v2281_v17, %v650_v25 }
 0x198   :  { %v1089_v36 = vpack.c.bf16 %v882_v23, %v882_v23  ;;  %v1399_v28 = vadd.f32 %v1398_v30, %v835_v11  ;;  %v1204_v29 = vpop.f32.mrb[39].mxu0 }
 0x19a   :  { %1009 = vst.msk [vmem:[%s2416_s3 + $0x48] sm:$0xf] %vm990_vm2, %v1089_v36  ;;  %v883_v14 = vmax.f32 %v1399_v28, 0.0  ;;  %v655_v44 = vpop.f32.mrb[42].mxu1 }
 0x19b   :  { %v840_v32 = vpop.f32.mrb[40].mxu0  ;;  %v657_v33 = vpop.f32.mrb[43].mxu1  ;;  %v1402_v16 = vadd.f32 %v2281_v17, %v655_v44 }
 0x19c   :  { %v1090_v35 = vpack.c.bf16 %v883_v14, %v883_v14  ;;  %v1401_v50 = vadd.f32 %v1400_v31, %v840_v32  ;;  %v1207_v37 = vpop.f32.mrb[41].mxu0 }
 0x19e   :  { %1010 = vst.msk [vmem:[%s2416_s3 + $0x4c] sm:$0xf] %vm990_vm2, %v1090_v35  ;;  %v884_v38 = vmax.f32 %v1401_v50, 0.0  ;;  %v660_v39 = vpop.f32.mrb[44].mxu1 }
 0x19f   :  { %v845_v56 = vpop.f32.mrb[42].mxu0  ;;  %v662_v40 = vpop.f32.mrb[45].mxu1  ;;  %v1404_v45 = vadd.f32 %v2281_v17, %v660_v39 }
 0x1a0   :  { %v1091_v42 = vpack.c.bf16 %v884_v38, %v884_v38  ;;  %v1403_v43 = vadd.f32 %v1402_v16, %v845_v56  ;;  %v1210_v62 = vpop.f32.mrb[43].mxu0 }
 0x1a2   :  { %1011 = vst.msk [vmem:[%s2416_s3 + $0x50] sm:$0xf] %vm990_vm2, %v1091_v42  ;;  %v885_v46 = vmax.f32 %v1403_v43, 0.0  ;;  %v665_v47 = vpop.f32.mrb[46].mxu1 }
 0x1a3   :  { %v850_v5 = vpop.f32.mrb[44].mxu0  ;;  %v667_v48 = vpop.f32.mrb[47].mxu1  ;;  %v1406_v53 = vadd.f32 %v2281_v17, %v665_v47 }
 0x1a4   :  { %v1092_v51 = vpack.c.bf16 %v885_v46, %v885_v46  ;;  %v1405_v13 = vadd.f32 %v1404_v45, %v850_v5  ;;  %v1213_v52 = vpop.f32.mrb[45].mxu0 }
 0x1a6   :  { %1012 = vst.msk [vmem:[%s2416_s3 + $0x54] sm:$0xf] %vm990_vm2, %v1092_v51  ;;  %v886_v20 = vmax.f32 %v1405_v13, 0.0  ;;  %v670_v54 = vpop.f32.mrb[48].mxu1 }
 0x1a7   :  { %v855_v55 = vpop.f32.mrb[46].mxu0  ;;  %v672_v27 = vpop.f32.mrb[49].mxu1  ;;  %v1408_v0 = vadd.f32 %v2281_v17, %v670_v54 }
 0x1a8   :  { %v1093_v57 = vpack.c.bf16 %v886_v20, %v886_v20  ;;  %v1407_v58 = vadd.f32 %v1406_v53, %v855_v55  ;;  %v1216_v34 = vpop.f32.mrb[47].mxu0 }
 0x1aa   :  { %1013 = vst.msk [vmem:[%s2416_s3 + $0x58] sm:$0xf] %vm990_vm2, %v1093_v57  ;;  %v887_v8 = vmax.f32 %v1407_v58, 0.0 }
 0x1ab   :  { %v860_v59 = vpop.f32.mrb[48].mxu0 }
 0x1ac   :  { %v1094_v41 = vpack.c.bf16 %v887_v8, %v887_v8  ;;  %v1409_v60 = vadd.f32 %v1408_v0, %v860_v59  ;;  %v1219_v61 = vpop.f32.mrb[49].mxu0 }
 0x1ae   :  { %1014 = vst.msk [vmem:[%s2416_s3 + $0x5c] sm:$0xf] %vm990_vm2, %v1094_v41  ;;  %v888_v63 = vmax.f32 %v1409_v60, 0.0 }
 0x1b0   :  { %v1095_v1 = vpack.c.bf16 %v888_v63, %v888_v63 }
 0x1b2   :  { %1015 = vst.msk [vmem:[%s2416_s3 + $0x60] sm:$0xf] %vm990_vm2, %v1095_v1 }

// kernel: ppo_forward.7
= control target key start
LH: loop header
LB: loop body
LE: loop exit
PB: predicated region body
PF: predicated region fallthrough
CT: control target
= control target key end

     0   :  { %s15464_s15 = smov 0   ;;  %s15466_s16 = smov 0   ;;  %s19252_s0 = inlined_call_operand.vmem [shape: bf16[2,6400], index: 0, kind: input, shape index: {}]   ;;  %s19253_s1 = inlined_call_operand.vmem [shape: bf16[6400,1280], index: 1, kind: input, shape index: {}]   ;;  %s19254_s2 = inlined_call_operand.vmem [shape: f32[1,1280], index: 2, kind: input, shape index: {}]   ;;  %s19255_s3 = inlined_call_operand.vmem [shape: bf16[1280,128], index: 3, kind: input, shape index: {}]   ;;  %s19256_s4 = inlined_call_operand.vmem [shape: f32[2,256], index: 4, kind: output, shape index: {}]  }
   0x1   :  { %s15468_s17 = smov 0   ;;  %s15470_s18 = smov 0  }
   0x2   :  { %s15472_s19 = smov 0   ;;  %s15474_s20 = smov 0  }
   0x3   :  { %s15476_s21 = smov 0  }
   0x4 LB: > { %s23_s22 = sadd.s32 1, %s15421_s19  ;;  %s26_s23 = sadd.s32 1, %s15425_s20  ;;  %s15429_s21 = sphi %s15476_s21, %s14_s21   ;;  %s15425_s20 = sphi %s15474_s20, %s19262_s20   ;;  %s15421_s19 = sphi %s15472_s19, %s19261_s19   ;;  %s15417_s18 = sphi %s15470_s18, %s19260_s18   ;;  %s15413_s17 = sphi %s15468_s17, %s19259_s17   ;;  %s15409_s16 = sphi %s15466_s16, %s19258_s16   ;;  %s15405_s15 = sphi %s15464_s15, %s19257_s15  }
   0x5   : > { %p24_p0 = scmp.ge.s32.totalorder %s23_s22, 2  ;;  %p63_p1 = scmp.ne.s32.totalorder %s15409_s16, %s15405_s15 }
   0x6   : > { %p64_p2 = scmp.eq.s32.totalorder %s15429_s21, 0  ;;  %s56_s27 = sadd.s32 1, %s15409_s16 }
   0x7   : > { %s19264_s22 = smov (%p24_p0, %s23_s22), 0  ;;  %s19266_s23 = smov (!%p24_p0, %s26_s23), %s15425_s20 }
   0x8   : > { %p65_p3 = por %p64_p2, %p63_p1  ;;  %p28_p4 = scmp.ge.s32.totalorder %s19266_s23, 2 }
   0x9   : > { %s51_s24 = ssub.s32 %s15421_s19, %s19264_s22  ;;  %p11548_p6 = scmp.ge.s32.totalorder %s15429_s21, 4 }
   0xa   : > { %s19268_s23 = smov (%p28_p4, %s19266_s23), 0 }
   0xb   : > { %s52_s25 = ssub.s32 %s15425_s20, %s19268_s23  ;;  %170 = sbr.rel (%p11548_p6) target bundleno = 693 (0x2b5), region = 20 }
   0xc   : > { %s53_s26 = sor.u32 %s52_s25, %s51_s24 }
   0xd   : > { %p54_p5 = scmp.eq.s32.totalorder %s53_s26, 0 }
   0xf   : > { %s15515_s28 = scalar_select %p54_p5, %s15409_s16, %s56_s27  }
  0x12   : > { %173 = sbr.rel (!%p65_p3) target bundleno = 693 (0x2b5), region = 24  ;;  %s175_s29 = sand.u32 (%p65_p3), 1, %s15409_s16  }
  0x13   : > { %s13860_s30 = smul.u32 (%p65_p3), 8000, %s175_s29 }
  0x14   : > { %s179_s5 = smul.u32 (%p65_p3), 5, %s15425_s20 }
  0x15   : > { %s13863_s6 = smul.u32 (%p65_p3), 4000, %s15421_s19  ;;  %s15529_s12 = scalar_lea.vmem (%p65_p3), [#allocation3], %s13860_s30 }
  0x17   : > { %s181_s7 = sadd.s32 (%p65_p3), %s13863_s6, %s179_s5 }
  0x18   : > { %s11549_s8 = sshll.u32 (%p65_p3), %s181_s7, 2 }
  0x19   : > { %s15524_s11 = scalar_lea.vmem %s19253_s1, %s11549_s8 }
  0x1a   : > { %v198_v0 = vld [vmem:[%s15524_s11] sm:$0xff]  ;;  %v200_v1 = vld [vmem:[%s15524_s11 + $0x8] sm:$0xff]  ;;  %v204_v3 = vld [vmem:[%s15524_s11 + $0x30] sm:$0xff] }
  0x1b   : > { %v202_v2 = vld [vmem:[%s15524_s11 + $0x28] sm:$0xff]  ;;  %199 = vst [vmem:[%s15529_s12] sm:$0xff] %v198_v0  ;;  %201 = vst [vmem:[%s15529_s12 + $0x8] sm:$0xff] %v200_v1  ;;  %v206_v4 = vld [vmem:[%s15524_s11 + $0x50] sm:$0xff] }
  0x1c   : > { %203 = vst [vmem:[%s15529_s12 + $0x14] sm:$0xff] %v202_v2  ;;  %v208_v5 = vld [vmem:[%s15524_s11 + $0x58] sm:$0xff]  ;;  %205 = vst [vmem:[%s15529_s12 + $0x1c] sm:$0xff] %v204_v3  ;;  %v212_v7 = vld [vmem:[%s15524_s11 + $0x80] sm:$0xff] }
  0x1d   : > { %207 = vst [vmem:[%s15529_s12 + $0x28] sm:$0xff] %v206_v4  ;;  %209 = vst [vmem:[%s15529_s12 + $0x30] sm:$0xff] %v208_v5  ;;  %v210_v6 = vld [vmem:[%s15524_s11 + $0x78] sm:$0xff]  ;;  %v214_v8 = vld [vmem:[%s15524_s11 + $0xa0] sm:$0xff] }
  0x1e   : > { %211 = vst [vmem:[%s15529_s12 + $0x3c] sm:$0xff] %v210_v6  ;;  %213 = vst [vmem:[%s15529_s12 + $0x44] sm:$0xff] %v212_v7  ;;  %v216_v9 = vld [vmem:[%s15524_s11 + $0xa8] sm:$0xff]  ;;  %v220_v11 = vld [vmem:[%s15524_s11 + $0xd0] sm:$0xff] }
  0x1f   : > { %215 = vst [vmem:[%s15529_s12 + $0x50] sm:$0xff] %v214_v8  ;;  %v218_v10 = vld [vmem:[%s15524_s11 + $0xc8] sm:$0xff]  ;;  %217 = vst [vmem:[%s15529_s12 + $0x58] sm:$0xff] %v216_v9  ;;  %v222_v12 = vld [vmem:[%s15524_s11 + $0xf0] sm:$0xff] }
  0x20   : > { %219 = vst [vmem:[%s15529_s12 + $0x64] sm:$0xff] %v218_v10  ;;  %221 = vst [vmem:[%s15529_s12 + $0x6c] sm:$0xff] %v220_v11  ;;  %v224_v13 = vld [vmem:[%s15524_s11 + $0xf8] sm:$0xff]  ;;  %v228_v15 = vld [vmem:[%s15524_s11 + $0x120] sm:$0xff] }
  0x21   : > { %v226_v14 = vld [vmem:[%s15524_s11 + $0x118] sm:$0xff]  ;;  %223 = vst [vmem:[%s15529_s12 + $0x78] sm:$0xff] %v222_v12  ;;  %225 = vst [vmem:[%s15529_s12 + $0x80] sm:$0xff] %v224_v13  ;;  %v230_v16 = vld [vmem:[%s15524_s11 + $0x140] sm:$0xff] }
  0x22   : > { %227 = vst [vmem:[%s15529_s12 + $0x8c] sm:$0xff] %v226_v14  ;;  %v232_v17 = vld [vmem:[%s15524_s11 + $0x148] sm:$0xff]  ;;  %229 = vst [vmem:[%s15529_s12 + $0x94] sm:$0xff] %v228_v15  ;;  %v236_v19 = vld [vmem:[%s15524_s11 + $0x170] sm:$0xff] }
  0x23   : > { %231 = vst [vmem:[%s15529_s12 + $0xa0] sm:$0xff] %v230_v16  ;;  %233 = vst [vmem:[%s15529_s12 + $0xa8] sm:$0xff] %v232_v17  ;;  %v234_v18 = vld [vmem:[%s15524_s11 + $0x168] sm:$0xff]  ;;  %v238_v20 = vld [vmem:[%s15524_s11 + $0x190] sm:$0xff] }
  0x24   : > { %235 = vst [vmem:[%s15529_s12 + $0xb4] sm:$0xff] %v234_v18  ;;  %237 = vst [vmem:[%s15529_s12 + $0xbc] sm:$0xff] %v236_v19  ;;  %v240_v21 = vld [vmem:[%s15524_s11 + $0x198] sm:$0xff]  ;;  %v244_v23 = vld [vmem:[%s15524_s11 + $0x1c0] sm:$0xff] }
  0x25   : > { %239 = vst [vmem:[%s15529_s12 + $0xc8] sm:$0xff] %v238_v20  ;;  %v242_v22 = vld [vmem:[%s15524_s11 + $0x1b8] sm:$0xff]  ;;  %241 = vst [vmem:[%s15529_s12 + $0xd0] sm:$0xff] %v240_v21  ;;  %v246_v24 = vld [vmem:[%s15524_s11 + $0x1e0] sm:$0xff] }
  0x26   : > { %243 = vst [vmem:[%s15529_s12 + $0xdc] sm:$0xff] %v242_v22  ;;  %245 = vst [vmem:[%s15529_s12 + $0xe4] sm:$0xff] %v244_v23  ;;  %v248_v25 = vld [vmem:[%s15524_s11 + $0x1e8] sm:$0xff]  ;;  %v252_v27 = vld [vmem:[%s15524_s11 + $0x210] sm:$0xff] }
  0x27   : > { %v250_v26 = vld [vmem:[%s15524_s11 + $0x208] sm:$0xff]  ;;  %247 = vst [vmem:[%s15529_s12 + $0xf0] sm:$0xff] %v246_v24  ;;  %249 = vst [vmem:[%s15529_s12 + $0xf8] sm:$0xff] %v248_v25  ;;  %v254_v28 = vld [vmem:[%s15524_s11 + $0x230] sm:$0xff] }
  0x28   : > { %251 = vst [vmem:[%s15529_s12 + $0x104] sm:$0xff] %v250_v26  ;;  %v256_v29 = vld [vmem:[%s15524_s11 + $0x238] sm:$0xff]  ;;  %253 = vst [vmem:[%s15529_s12 + $0x10c] sm:$0xff] %v252_v27  ;;  %v260_v31 = vld [vmem:[%s15524_s11 + $0x260] sm:$0xff] }
  0x29   : > { %255 = vst [vmem:[%s15529_s12 + $0x118] sm:$0xff] %v254_v28  ;;  %257 = vst [vmem:[%s15529_s12 + $0x120] sm:$0xff] %v256_v29  ;;  %v258_v30 = vld [vmem:[%s15524_s11 + $0x258] sm:$0xff]  ;;  %v262_v32 = vld [vmem:[%s15524_s11 + $0x280] sm:$0xff] }
  0x2a   : > { %259 = vst [vmem:[%s15529_s12 + $0x12c] sm:$0xff] %v258_v30  ;;  %261 = vst [vmem:[%s15529_s12 + $0x134] sm:$0xff] %v260_v31  ;;  %v264_v33 = vld [vmem:[%s15524_s11 + $0x288] sm:$0xff]  ;;  %v268_v35 = vld [vmem:[%s15524_s11 + $0x2b0] sm:$0xff] }
  0x2b   : > { %263 = vst [vmem:[%s15529_s12 + $0x140] sm:$0xff] %v262_v32  ;;  %v266_v34 = vld [vmem:[%s15524_s11 + $0x2a8] sm:$0xff]  ;;  %265 = vst [vmem:[%s15529_s12 + $0x148] sm:$0xff] %v264_v33  ;;  %v270_v36 = vld [vmem:[%s15524_s11 + $0x2d0] sm:$0xff] }
  0x2c   : > { %267 = vst [vmem:[%s15529_s12 + $0x154] sm:$0xff] %v266_v34  ;;  %269 = vst [vmem:[%s15529_s12 + $0x15c] sm:$0xff] %v268_v35  ;;  %v272_v37 = vld [vmem:[%s15524_s11 + $0x2d8] sm:$0xff]  ;;  %v276_v39 = vld [vmem:[%s15524_s11 + $0x300] sm:$0xff] }
  0x2d   : > { %v274_v38 = vld [vmem:[%s15524_s11 + $0x2f8] sm:$0xff]  ;;  %271 = vst [vmem:[%s15529_s12 + $0x168] sm:$0xff] %v270_v36  ;;  %273 = vst [vmem:[%s15529_s12 + $0x170] sm:$0xff] %v272_v37  ;;  %v278_v40 = vld [vmem:[%s15524_s11 + $0x320] sm:$0xff] }
  0x2e   : > { %275 = vst [vmem:[%s15529_s12 + $0x17c] sm:$0xff] %v274_v38  ;;  %v280_v41 = vld [vmem:[%s15524_s11 + $0x328] sm:$0xff]  ;;  %277 = vst [vmem:[%s15529_s12 + $0x184] sm:$0xff] %v276_v39  ;;  %v284_v43 = vld [vmem:[%s15524_s11 + $0x350] sm:$0xff] }
  0x2f   : > { %279 = vst [vmem:[%s15529_s12 + $0x190] sm:$0xff] %v278_v40  ;;  %281 = vst [vmem:[%s15529_s12 + $0x198] sm:$0xff] %v280_v41  ;;  %v282_v42 = vld [vmem:[%s15524_s11 + $0x348] sm:$0xff]  ;;  %v286_v44 = vld [vmem:[%s15524_s11 + $0x370] sm:$0xff] }
  0x30   : > { %283 = vst [vmem:[%s15529_s12 + $0x1a4] sm:$0xff] %v282_v42  ;;  %285 = vst [vmem:[%s15529_s12 + $0x1ac] sm:$0xff] %v284_v43  ;;  %v288_v45 = vld [vmem:[%s15524_s11 + $0x378] sm:$0xff]  ;;  %v292_v47 = vld [vmem:[%s15524_s11 + $0x3a0] sm:$0xff] }
  0x31   : > { %287 = vst [vmem:[%s15529_s12 + $0x1b8] sm:$0xff] %v286_v44  ;;  %v290_v46 = vld [vmem:[%s15524_s11 + $0x398] sm:$0xff]  ;;  %289 = vst [vmem:[%s15529_s12 + $0x1c0] sm:$0xff] %v288_v45  ;;  %v294_v48 = vld [vmem:[%s15524_s11 + $0x3c0] sm:$0xff] }
  0x32   : > { %291 = vst [vmem:[%s15529_s12 + $0x1cc] sm:$0xff] %v290_v46  ;;  %293 = vst [vmem:[%s15529_s12 + $0x1d4] sm:$0xff] %v292_v47  ;;  %v296_v49 = vld [vmem:[%s15524_s11 + $0x3c8] sm:$0xff]  ;;  %v300_v51 = vld [vmem:[%s15524_s11 + $0x3f0] sm:$0xff] }
  0x33   : > { %v298_v50 = vld [vmem:[%s15524_s11 + $0x3e8] sm:$0xff]  ;;  %295 = vst [vmem:[%s15529_s12 + $0x1e0] sm:$0xff] %v294_v48  ;;  %297 = vst [vmem:[%s15529_s12 + $0x1e8] sm:$0xff] %v296_v49  ;;  %v302_v52 = vld [vmem:[%s15524_s11 + $0x410] sm:$0xff] }
  0x34   : > { %299 = vst [vmem:[%s15529_s12 + $0x1f4] sm:$0xff] %v298_v50  ;;  %v304_v53 = vld [vmem:[%s15524_s11 + $0x418] sm:$0xff]  ;;  %301 = vst [vmem:[%s15529_s12 + $0x1fc] sm:$0xff] %v300_v51  ;;  %v308_v55 = vld [vmem:[%s15524_s11 + $0x440] sm:$0xff] }
  0x35   : > { %303 = vst [vmem:[%s15529_s12 + $0x208] sm:$0xff] %v302_v52  ;;  %305 = vst [vmem:[%s15529_s12 + $0x210] sm:$0xff] %v304_v53  ;;  %v306_v54 = vld [vmem:[%s15524_s11 + $0x438] sm:$0xff]  ;;  %v310_v56 = vld [vmem:[%s15524_s11 + $0x460] sm:$0xff] }
  0x36   : > { %307 = vst [vmem:[%s15529_s12 + $0x21c] sm:$0xff] %v306_v54  ;;  %309 = vst [vmem:[%s15529_s12 + $0x224] sm:$0xff] %v308_v55  ;;  %v312_v57 = vld [vmem:[%s15524_s11 + $0x468] sm:$0xff]  ;;  %v316_v59 = vld [vmem:[%s15524_s11 + $0x490] sm:$0xff] }
  0x37   : > { %311 = vst [vmem:[%s15529_s12 + $0x230] sm:$0xff] %v310_v56  ;;  %v314_v58 = vld [vmem:[%s15524_s11 + $0x488] sm:$0xff]  ;;  %313 = vst [vmem:[%s15529_s12 + $0x238] sm:$0xff] %v312_v57  ;;  %v318_v60 = vld [vmem:[%s15524_s11 + $0x4b0] sm:$0xff] }
  0x38   : > { %315 = vst [vmem:[%s15529_s12 + $0x244] sm:$0xff] %v314_v58  ;;  %317 = vst [vmem:[%s15529_s12 + $0x24c] sm:$0xff] %v316_v59  ;;  %v320_v61 = vld [vmem:[%s15524_s11 + $0x4b8] sm:$0xff]  ;;  %v324_v63 = vld [vmem:[%s15524_s11 + $0x4e0] sm:$0xff] }
  0x39   : > { %v322_v62 = vld [vmem:[%s15524_s11 + $0x4d8] sm:$0xff]  ;;  %319 = vst [vmem:[%s15529_s12 + $0x258] sm:$0xff] %v318_v60  ;;  %321 = vst [vmem:[%s15529_s12 + $0x260] sm:$0xff] %v320_v61  ;;  %v326_v0 = vld [vmem:[%s15524_s11 + $0x500] sm:$0xff] }
  0x3a   : > { %323 = vst [vmem:[%s15529_s12 + $0x26c] sm:$0xff] %v322_v62  ;;  %v328_v1 = vld [vmem:[%s15524_s11 + $0x508] sm:$0xff]  ;;  %325 = vst [vmem:[%s15529_s12 + $0x274] sm:$0xff] %v324_v63  ;;  %v332_v3 = vld [vmem:[%s15524_s11 + $0x530] sm:$0xff] }
  0x3b   : > { %327 = vst [vmem:[%s15529_s12 + $0x280] sm:$0xff] %v326_v0  ;;  %329 = vst [vmem:[%s15529_s12 + $0x288] sm:$0xff] %v328_v1  ;;  %v330_v2 = vld [vmem:[%s15524_s11 + $0x528] sm:$0xff]  ;;  %v334_v4 = vld [vmem:[%s15524_s11 + $0x550] sm:$0xff] }
  0x3c   : > { %331 = vst [vmem:[%s15529_s12 + $0x294] sm:$0xff] %v330_v2  ;;  %333 = vst [vmem:[%s15529_s12 + $0x29c] sm:$0xff] %v332_v3  ;;  %v336_v5 = vld [vmem:[%s15524_s11 + $0x558] sm:$0xff]  ;;  %v340_v7 = vld [vmem:[%s15524_s11 + $0x580] sm:$0xff] }
  0x3d   : > { %335 = vst [vmem:[%s15529_s12 + $0x2a8] sm:$0xff] %v334_v4  ;;  %v338_v6 = vld [vmem:[%s15524_s11 + $0x578] sm:$0xff]  ;;  %337 = vst [vmem:[%s15529_s12 + $0x2b0] sm:$0xff] %v336_v5  ;;  %v342_v8 = vld [vmem:[%s15524_s11 + $0x5a0] sm:$0xff] }
  0x3e   : > { %339 = vst [vmem:[%s15529_s12 + $0x2bc] sm:$0xff] %v338_v6  ;;  %341 = vst [vmem:[%s15529_s12 + $0x2c4] sm:$0xff] %v340_v7  ;;  %v344_v9 = vld [vmem:[%s15524_s11 + $0x5a8] sm:$0xff]  ;;  %v348_v11 = vld [vmem:[%s15524_s11 + $0x5d0] sm:$0xff] }
  0x3f   : > { %v346_v10 = vld [vmem:[%s15524_s11 + $0x5c8] sm:$0xff]  ;;  %343 = vst [vmem:[%s15529_s12 + $0x2d0] sm:$0xff] %v342_v8  ;;  %345 = vst [vmem:[%s15529_s12 + $0x2d8] sm:$0xff] %v344_v9  ;;  %v350_v12 = vld [vmem:[%s15524_s11 + $0x5f0] sm:$0xff] }
  0x40   : > { %347 = vst [vmem:[%s15529_s12 + $0x2e4] sm:$0xff] %v346_v10  ;;  %v352_v13 = vld [vmem:[%s15524_s11 + $0x5f8] sm:$0xff]  ;;  %349 = vst [vmem:[%s15529_s12 + $0x2ec] sm:$0xff] %v348_v11  ;;  %v356_v15 = vld [vmem:[%s15524_s11 + $0x620] sm:$0xff] }
  0x41   : > { %351 = vst [vmem:[%s15529_s12 + $0x2f8] sm:$0xff] %v350_v12  ;;  %353 = vst [vmem:[%s15529_s12 + $0x300] sm:$0xff] %v352_v13  ;;  %v354_v14 = vld [vmem:[%s15524_s11 + $0x618] sm:$0xff]  ;;  %v358_v16 = vld [vmem:[%s15524_s11 + $0x640] sm:$0xff] }
  0x42   : > { %355 = vst [vmem:[%s15529_s12 + $0x30c] sm:$0xff] %v354_v14  ;;  %357 = vst [vmem:[%s15529_s12 + $0x314] sm:$0xff] %v356_v15  ;;  %v360_v17 = vld [vmem:[%s15524_s11 + $0x648] sm:$0xff]  ;;  %v364_v19 = vld [vmem:[%s15524_s11 + $0x670] sm:$0xff] }
  0x43   : > { %359 = vst [vmem:[%s15529_s12 + $0x320] sm:$0xff] %v358_v16  ;;  %v362_v18 = vld [vmem:[%s15524_s11 + $0x668] sm:$0xff]  ;;  %361 = vst [vmem:[%s15529_s12 + $0x328] sm:$0xff] %v360_v17  ;;  %v366_v20 = vld [vmem:[%s15524_s11 + $0x690] sm:$0xff] }
  0x44   : > { %363 = vst [vmem:[%s15529_s12 + $0x334] sm:$0xff] %v362_v18  ;;  %365 = vst [vmem:[%s15529_s12 + $0x33c] sm:$0xff] %v364_v19  ;;  %v368_v21 = vld [vmem:[%s15524_s11 + $0x698] sm:$0xff]  ;;  %v372_v23 = vld [vmem:[%s15524_s11 + $0x6c0] sm:$0xff] }
  0x45   : > { %v370_v22 = vld [vmem:[%s15524_s11 + $0x6b8] sm:$0xff]  ;;  %367 = vst [vmem:[%s15529_s12 + $0x348] sm:$0xff] %v366_v20  ;;  %369 = vst [vmem:[%s15529_s12 + $0x350] sm:$0xff] %v368_v21  ;;  %v374_v24 = vld [vmem:[%s15524_s11 + $0x6e0] sm:$0xff] }
  0x46   : > { %371 = vst [vmem:[%s15529_s12 + $0x35c] sm:$0xff] %v370_v22  ;;  %v376_v25 = vld [vmem:[%s15524_s11 + $0x6e8] sm:$0xff]  ;;  %373 = vst [vmem:[%s15529_s12 + $0x364] sm:$0xff] %v372_v23  ;;  %v380_v27 = vld [vmem:[%s15524_s11 + $0x710] sm:$0xff] }
  0x47   : > { %375 = vst [vmem:[%s15529_s12 + $0x370] sm:$0xff] %v374_v24  ;;  %377 = vst [vmem:[%s15529_s12 + $0x378] sm:$0xff] %v376_v25  ;;  %v378_v26 = vld [vmem:[%s15524_s11 + $0x708] sm:$0xff]  ;;  %v382_v28 = vld [vmem:[%s15524_s11 + $0x730] sm:$0xff] }
  0x48   : > { %379 = vst [vmem:[%s15529_s12 + $0x384] sm:$0xff] %v378_v26  ;;  %381 = vst [vmem:[%s15529_s12 + $0x38c] sm:$0xff] %v380_v27  ;;  %v384_v29 = vld [vmem:[%s15524_s11 + $0x738] sm:$0xff]  ;;  %v388_v31 = vld [vmem:[%s15524_s11 + $0x760] sm:$0xff] }
  0x49   : > { %383 = vst [vmem:[%s15529_s12 + $0x398] sm:$0xff] %v382_v28  ;;  %v386_v30 = vld [vmem:[%s15524_s11 + $0x758] sm:$0xff]  ;;  %385 = vst [vmem:[%s15529_s12 + $0x3a0] sm:$0xff] %v384_v29  ;;  %v390_v32 = vld [vmem:[%s15524_s11 + $0x780] sm:$0xff] }
  0x4a   : > { %387 = vst [vmem:[%s15529_s12 + $0x3ac] sm:$0xff] %v386_v30  ;;  %389 = vst [vmem:[%s15529_s12 + $0x3b4] sm:$0xff] %v388_v31  ;;  %v392_v33 = vld [vmem:[%s15524_s11 + $0x788] sm:$0xff]  ;;  %v396_v35 = vld [vmem:[%s15524_s11 + $0x7b0] sm:$0xff] }
  0x4b   : > { %v394_v34 = vld [vmem:[%s15524_s11 + $0x7a8] sm:$0xff]  ;;  %391 = vst [vmem:[%s15529_s12 + $0x3c0] sm:$0xff] %v390_v32  ;;  %393 = vst [vmem:[%s15529_s12 + $0x3c8] sm:$0xff] %v392_v33  ;;  %v398_v36 = vld [vmem:[%s15524_s11 + $0x7d0] sm:$0xff] }
  0x4c   : > { %395 = vst [vmem:[%s15529_s12 + $0x3d4] sm:$0xff] %v394_v34  ;;  %v400_v37 = vld [vmem:[%s15524_s11 + $0x7d8] sm:$0xff]  ;;  %397 = vst [vmem:[%s15529_s12 + $0x3dc] sm:$0xff] %v396_v35  ;;  %v404_v39 = vld [vmem:[%s15524_s11 + $0x800] sm:$0xff] }
  0x4d   : > { %399 = vst [vmem:[%s15529_s12 + $0x3e8] sm:$0xff] %v398_v36  ;;  %401 = vst [vmem:[%s15529_s12 + $0x3f0] sm:$0xff] %v400_v37  ;;  %v402_v38 = vld [vmem:[%s15524_s11 + $0x7f8] sm:$0xff]  ;;  %v406_v40 = vld [vmem:[%s15524_s11 + $0x820] sm:$0xff] }
  0x4e   : > { %403 = vst [vmem:[%s15529_s12 + $0x3fc] sm:$0xff] %v402_v38  ;;  %405 = vst [vmem:[%s15529_s12 + $0x404] sm:$0xff] %v404_v39  ;;  %v408_v41 = vld [vmem:[%s15524_s11 + $0x828] sm:$0xff]  ;;  %v412_v43 = vld [vmem:[%s15524_s11 + $0x850] sm:$0xff] }
  0x4f   : > { %407 = vst [vmem:[%s15529_s12 + $0x410] sm:$0xff] %v406_v40  ;;  %v410_v42 = vld [vmem:[%s15524_s11 + $0x848] sm:$0xff]  ;;  %409 = vst [vmem:[%s15529_s12 + $0x418] sm:$0xff] %v408_v41  ;;  %v414_v44 = vld [vmem:[%s15524_s11 + $0x870] sm:$0xff] }
  0x50   : > { %411 = vst [vmem:[%s15529_s12 + $0x424] sm:$0xff] %v410_v42  ;;  %413 = vst [vmem:[%s15529_s12 + $0x42c] sm:$0xff] %v412_v43  ;;  %v416_v45 = vld [vmem:[%s15524_s11 + $0x878] sm:$0xff]  ;;  %v420_v47 = vld [vmem:[%s15524_s11 + $0x8a0] sm:$0xff] }
  0x51   : > { %v418_v46 = vld [vmem:[%s15524_s11 + $0x898] sm:$0xff]  ;;  %415 = vst [vmem:[%s15529_s12 + $0x438] sm:$0xff] %v414_v44  ;;  %417 = vst [vmem:[%s15529_s12 + $0x440] sm:$0xff] %v416_v45  ;;  %v422_v48 = vld [vmem:[%s15524_s11 + $0x8c0] sm:$0xff] }
  0x52   : > { %419 = vst [vmem:[%s15529_s12 + $0x44c] sm:$0xff] %v418_v46  ;;  %v424_v49 = vld [vmem:[%s15524_s11 + $0x8c8] sm:$0xff]  ;;  %421 = vst [vmem:[%s15529_s12 + $0x454] sm:$0xff] %v420_v47  ;;  %v428_v51 = vld [vmem:[%s15524_s11 + $0x8f0] sm:$0xff] }
  0x53   : > { %423 = vst [vmem:[%s15529_s12 + $0x460] sm:$0xff] %v422_v48  ;;  %425 = vst [vmem:[%s15529_s12 + $0x468] sm:$0xff] %v424_v49  ;;  %v426_v50 = vld [vmem:[%s15524_s11 + $0x8e8] sm:$0xff]  ;;  %v430_v52 = vld [vmem:[%s15524_s11 + $0x910] sm:$0xff] }
  0x54   : > { %427 = vst [vmem:[%s15529_s12 + $0x474] sm:$0xff] %v426_v50  ;;  %429 = vst [vmem:[%s15529_s12 + $0x47c] sm:$0xff] %v428_v51  ;;  %v432_v53 = vld [vmem:[%s15524_s11 + $0x918] sm:$0xff]  ;;  %v436_v55 = vld [vmem:[%s15524_s11 + $0x940] sm:$0xff] }
  0x55   : > { %431 = vst [vmem:[%s15529_s12 + $0x488] sm:$0xff] %v430_v52  ;;  %v434_v54 = vld [vmem:[%s15524_s11 + $0x938] sm:$0xff]  ;;  %433 = vst [vmem:[%s15529_s12 + $0x490] sm:$0xff] %v432_v53  ;;  %v438_v56 = vld [vmem:[%s15524_s11 + $0x960] sm:$0xff] }
  0x56   : > { %435 = vst [vmem:[%s15529_s12 + $0x49c] sm:$0xff] %v434_v54  ;;  %437 = vst [vmem:[%s15529_s12 + $0x4a4] sm:$0xff] %v436_v55  ;;  %v440_v57 = vld [vmem:[%s15524_s11 + $0x968] sm:$0xff]  ;;  %v444_v59 = vld [vmem:[%s15524_s11 + $0x990] sm:$0xff] }
  0x57   : > { %v442_v58 = vld [vmem:[%s15524_s11 + $0x988] sm:$0xff]  ;;  %439 = vst [vmem:[%s15529_s12 + $0x4b0] sm:$0xff] %v438_v56  ;;  %441 = vst [vmem:[%s15529_s12 + $0x4b8] sm:$0xff] %v440_v57  ;;  %v446_v60 = vld [vmem:[%s15524_s11 + $0x9b0] sm:$0xff] }
  0x58   : > { %443 = vst [vmem:[%s15529_s12 + $0x4c4] sm:$0xff] %v442_v58  ;;  %v448_v61 = vld [vmem:[%s15524_s11 + $0x9b8] sm:$0xff]  ;;  %445 = vst [vmem:[%s15529_s12 + $0x4cc] sm:$0xff] %v444_v59  ;;  %v452_v63 = vld [vmem:[%s15524_s11 + $0x9e0] sm:$0xff] }
  0x59   : > { %447 = vst [vmem:[%s15529_s12 + $0x4d8] sm:$0xff] %v446_v60  ;;  %449 = vst [vmem:[%s15529_s12 + $0x4e0] sm:$0xff] %v448_v61  ;;  %v450_v62 = vld [vmem:[%s15524_s11 + $0x9d8] sm:$0xff]  ;;  %v454_v0 = vld [vmem:[%s15524_s11 + $0xa00] sm:$0xff] }
  0x5a   : > { %451 = vst [vmem:[%s15529_s12 + $0x4ec] sm:$0xff] %v450_v62  ;;  %453 = vst [vmem:[%s15529_s12 + $0x4f4] sm:$0xff] %v452_v63  ;;  %v456_v1 = vld [vmem:[%s15524_s11 + $0xa08] sm:$0xff]  ;;  %v460_v3 = vld [vmem:[%s15524_s11 + $0xa30] sm:$0xff] }
  0x5b   : > { %455 = vst [vmem:[%s15529_s12 + $0x500] sm:$0xff] %v454_v0  ;;  %v458_v2 = vld [vmem:[%s15524_s11 + $0xa28] sm:$0xff]  ;;  %457 = vst [vmem:[%s15529_s12 + $0x508] sm:$0xff] %v456_v1  ;;  %v462_v4 = vld [vmem:[%s15524_s11 + $0xa50] sm:$0xff] }
  0x5c   : > { %459 = vst [vmem:[%s15529_s12 + $0x514] sm:$0xff] %v458_v2  ;;  %461 = vst [vmem:[%s15529_s12 + $0x51c] sm:$0xff] %v460_v3  ;;  %v464_v5 = vld [vmem:[%s15524_s11 + $0xa58] sm:$0xff]  ;;  %v468_v7 = vld [vmem:[%s15524_s11 + $0xa80] sm:$0xff] }
  0x5d   : > { %v466_v6 = vld [vmem:[%s15524_s11 + $0xa78] sm:$0xff]  ;;  %463 = vst [vmem:[%s15529_s12 + $0x528] sm:$0xff] %v462_v4  ;;  %465 = vst [vmem:[%s15529_s12 + $0x530] sm:$0xff] %v464_v5  ;;  %v470_v8 = vld [vmem:[%s15524_s11 + $0xaa0] sm:$0xff] }
  0x5e   : > { %467 = vst [vmem:[%s15529_s12 + $0x53c] sm:$0xff] %v466_v6  ;;  %v472_v9 = vld [vmem:[%s15524_s11 + $0xaa8] sm:$0xff]  ;;  %469 = vst [vmem:[%s15529_s12 + $0x544] sm:$0xff] %v468_v7  ;;  %v476_v11 = vld [vmem:[%s15524_s11 + $0xad0] sm:$0xff] }
  0x5f   : > { %471 = vst [vmem:[%s15529_s12 + $0x550] sm:$0xff] %v470_v8  ;;  %473 = vst [vmem:[%s15529_s12 + $0x558] sm:$0xff] %v472_v9  ;;  %v474_v10 = vld [vmem:[%s15524_s11 + $0xac8] sm:$0xff]  ;;  %v478_v12 = vld [vmem:[%s15524_s11 + $0xaf0] sm:$0xff] }
  0x60   : > { %475 = vst [vmem:[%s15529_s12 + $0x564] sm:$0xff] %v474_v10  ;;  %477 = vst [vmem:[%s15529_s12 + $0x56c] sm:$0xff] %v476_v11  ;;  %v480_v13 = vld [vmem:[%s15524_s11 + $0xaf8] sm:$0xff]  ;;  %v484_v15 = vld [vmem:[%s15524_s11 + $0xb20] sm:$0xff] }
  0x61   : > { %479 = vst [vmem:[%s15529_s12 + $0x578] sm:$0xff] %v478_v12  ;;  %v482_v14 = vld [vmem:[%s15524_s11 + $0xb18] sm:$0xff]  ;;  %481 = vst [vmem:[%s15529_s12 + $0x580] sm:$0xff] %v480_v13  ;;  %v486_v16 = vld [vmem:[%s15524_s11 + $0xb40] sm:$0xff] }
  0x62   : > { %483 = vst [vmem:[%s15529_s12 + $0x58c] sm:$0xff] %v482_v14  ;;  %485 = vst [vmem:[%s15529_s12 + $0x594] sm:$0xff] %v484_v15  ;;  %v488_v17 = vld [vmem:[%s15524_s11 + $0xb48] sm:$0xff]  ;;  %v492_v19 = vld [vmem:[%s15524_s11 + $0xb70] sm:$0xff] }
  0x63   : > { %v490_v18 = vld [vmem:[%s15524_s11 + $0xb68] sm:$0xff]  ;;  %487 = vst [vmem:[%s15529_s12 + $0x5a0] sm:$0xff] %v486_v16  ;;  %489 = vst [vmem:[%s15529_s12 + $0x5a8] sm:$0xff] %v488_v17  ;;  %v494_v20 = vld [vmem:[%s15524_s11 + $0xb90] sm:$0xff] }
  0x64   : > { %491 = vst [vmem:[%s15529_s12 + $0x5b4] sm:$0xff] %v490_v18  ;;  %v496_v21 = vld [vmem:[%s15524_s11 + $0xb98] sm:$0xff]  ;;  %493 = vst [vmem:[%s15529_s12 + $0x5bc] sm:$0xff] %v492_v19  ;;  %v500_v23 = vld [vmem:[%s15524_s11 + $0xbc0] sm:$0xff] }
  0x65   : > { %495 = vst [vmem:[%s15529_s12 + $0x5c8] sm:$0xff] %v494_v20  ;;  %497 = vst [vmem:[%s15529_s12 + $0x5d0] sm:$0xff] %v496_v21  ;;  %v498_v22 = vld [vmem:[%s15524_s11 + $0xbb8] sm:$0xff]  ;;  %v502_v24 = vld [vmem:[%s15524_s11 + $0xbe0] sm:$0xff] }
  0x66   : > { %499 = vst [vmem:[%s15529_s12 + $0x5dc] sm:$0xff] %v498_v22  ;;  %501 = vst [vmem:[%s15529_s12 + $0x5e4] sm:$0xff] %v500_v23  ;;  %v504_v25 = vld [vmem:[%s15524_s11 + $0xbe8] sm:$0xff]  ;;  %v508_v27 = vld [vmem:[%s15524_s11 + $0xc10] sm:$0xff] }
  0x67   : > { %503 = vst [vmem:[%s15529_s12 + $0x5f0] sm:$0xff] %v502_v24  ;;  %v506_v26 = vld [vmem:[%s15524_s11 + $0xc08] sm:$0xff]  ;;  %505 = vst [vmem:[%s15529_s12 + $0x5f8] sm:$0xff] %v504_v25  ;;  %v510_v28 = vld [vmem:[%s15524_s11 + $0xc30] sm:$0xff] }
  0x68   : > { %507 = vst [vmem:[%s15529_s12 + $0x604] sm:$0xff] %v506_v26  ;;  %509 = vst [vmem:[%s15529_s12 + $0x60c] sm:$0xff] %v508_v27  ;;  %v512_v29 = vld [vmem:[%s15524_s11 + $0xc38] sm:$0xff]  ;;  %v516_v31 = vld [vmem:[%s15524_s11 + $0xc60] sm:$0xff] }
  0x69   : > { %v514_v30 = vld [vmem:[%s15524_s11 + $0xc58] sm:$0xff]  ;;  %511 = vst [vmem:[%s15529_s12 + $0x618] sm:$0xff] %v510_v28  ;;  %513 = vst [vmem:[%s15529_s12 + $0x620] sm:$0xff] %v512_v29  ;;  %v518_v32 = vld [vmem:[%s15524_s11 + $0xc80] sm:$0xff] }
  0x6a   : > { %515 = vst [vmem:[%s15529_s12 + $0x62c] sm:$0xff] %v514_v30  ;;  %v520_v33 = vld [vmem:[%s15524_s11 + $0xc88] sm:$0xff]  ;;  %517 = vst [vmem:[%s15529_s12 + $0x634] sm:$0xff] %v516_v31  ;;  %v524_v35 = vld [vmem:[%s15524_s11 + $0xcb0] sm:$0xff] }
  0x6b   : > { %519 = vst [vmem:[%s15529_s12 + $0x640] sm:$0xff] %v518_v32  ;;  %521 = vst [vmem:[%s15529_s12 + $0x648] sm:$0xff] %v520_v33  ;;  %v522_v34 = vld [vmem:[%s15524_s11 + $0xca8] sm:$0xff]  ;;  %v526_v36 = vld [vmem:[%s15524_s11 + $0xcd0] sm:$0xff] }
  0x6c   : > { %523 = vst [vmem:[%s15529_s12 + $0x654] sm:$0xff] %v522_v34  ;;  %525 = vst [vmem:[%s15529_s12 + $0x65c] sm:$0xff] %v524_v35  ;;  %v528_v37 = vld [vmem:[%s15524_s11 + $0xcd8] sm:$0xff]  ;;  %v532_v39 = vld [vmem:[%s15524_s11 + $0xd00] sm:$0xff] }
  0x6d   : > { %527 = vst [vmem:[%s15529_s12 + $0x668] sm:$0xff] %v526_v36  ;;  %v530_v38 = vld [vmem:[%s15524_s11 + $0xcf8] sm:$0xff]  ;;  %529 = vst [vmem:[%s15529_s12 + $0x670] sm:$0xff] %v528_v37  ;;  %v534_v40 = vld [vmem:[%s15524_s11 + $0xd20] sm:$0xff] }
  0x6e   : > { %531 = vst [vmem:[%s15529_s12 + $0x67c] sm:$0xff] %v530_v38  ;;  %533 = vst [vmem:[%s15529_s12 + $0x684] sm:$0xff] %v532_v39  ;;  %v536_v41 = vld [vmem:[%s15524_s11 + $0xd28] sm:$0xff]  ;;  %v540_v43 = vld [vmem:[%s15524_s11 + $0xd50] sm:$0xff] }
  0x6f   : > { %v538_v42 = vld [vmem:[%s15524_s11 + $0xd48] sm:$0xff]  ;;  %535 = vst [vmem:[%s15529_s12 + $0x690] sm:$0xff] %v534_v40  ;;  %537 = vst [vmem:[%s15529_s12 + $0x698] sm:$0xff] %v536_v41  ;;  %v542_v44 = vld [vmem:[%s15524_s11 + $0xd70] sm:$0xff] }
  0x70   : > { %539 = vst [vmem:[%s15529_s12 + $0x6a4] sm:$0xff] %v538_v42  ;;  %v544_v45 = vld [vmem:[%s15524_s11 + $0xd78] sm:$0xff]  ;;  %541 = vst [vmem:[%s15529_s12 + $0x6ac] sm:$0xff] %v540_v43  ;;  %v548_v47 = vld [vmem:[%s15524_s11 + $0xda0] sm:$0xff] }
  0x71   : > { %543 = vst [vmem:[%s15529_s12 + $0x6b8] sm:$0xff] %v542_v44  ;;  %545 = vst [vmem:[%s15529_s12 + $0x6c0] sm:$0xff] %v544_v45  ;;  %v546_v46 = vld [vmem:[%s15524_s11 + $0xd98] sm:$0xff]  ;;  %v550_v48 = vld [vmem:[%s15524_s11 + $0xdc0] sm:$0xff] }
  0x72   : > { %547 = vst [vmem:[%s15529_s12 + $0x6cc] sm:$0xff] %v546_v46  ;;  %549 = vst [vmem:[%s15529_s12 + $0x6d4] sm:$0xff] %v548_v47  ;;  %v552_v49 = vld [vmem:[%s15524_s11 + $0xdc8] sm:$0xff]  ;;  %v556_v51 = vld [vmem:[%s15524_s11 + $0xdf0] sm:$0xff] }
  0x73   : > { %551 = vst [vmem:[%s15529_s12 + $0x6e0] sm:$0xff] %v550_v48  ;;  %v554_v50 = vld [vmem:[%s15524_s11 + $0xde8] sm:$0xff]  ;;  %553 = vst [vmem:[%s15529_s12 + $0x6e8] sm:$0xff] %v552_v49  ;;  %v558_v52 = vld [vmem:[%s15524_s11 + $0xe10] sm:$0xff] }
  0x74   : > { %555 = vst [vmem:[%s15529_s12 + $0x6f4] sm:$0xff] %v554_v50  ;;  %557 = vst [vmem:[%s15529_s12 + $0x6fc] sm:$0xff] %v556_v51  ;;  %v560_v53 = vld [vmem:[%s15524_s11 + $0xe18] sm:$0xff]  ;;  %v564_v55 = vld [vmem:[%s15524_s11 + $0xe40] sm:$0xff] }
  0x75   : > { %v562_v54 = vld [vmem:[%s15524_s11 + $0xe38] sm:$0xff]  ;;  %559 = vst [vmem:[%s15529_s12 + $0x708] sm:$0xff] %v558_v52  ;;  %561 = vst [vmem:[%s15529_s12 + $0x710] sm:$0xff] %v560_v53  ;;  %v566_v56 = vld [vmem:[%s15524_s11 + $0xe60] sm:$0xff] }
  0x76   : > { %563 = vst [vmem:[%s15529_s12 + $0x71c] sm:$0xff] %v562_v54  ;;  %v568_v57 = vld [vmem:[%s15524_s11 + $0xe68] sm:$0xff]  ;;  %565 = vst [vmem:[%s15529_s12 + $0x724] sm:$0xff] %v564_v55  ;;  %v572_v59 = vld [vmem:[%s15524_s11 + $0xe90] sm:$0xff] }
  0x77   : > { %567 = vst [vmem:[%s15529_s12 + $0x730] sm:$0xff] %v566_v56  ;;  %569 = vst [vmem:[%s15529_s12 + $0x738] sm:$0xff] %v568_v57  ;;  %v570_v58 = vld [vmem:[%s15524_s11 + $0xe88] sm:$0xff]  ;;  %v574_v60 = vld [vmem:[%s15524_s11 + $0xeb0] sm:$0xff] }
  0x78   : > { %571 = vst [vmem:[%s15529_s12 + $0x744] sm:$0xff] %v570_v58  ;;  %573 = vst [vmem:[%s15529_s12 + $0x74c] sm:$0xff] %v572_v59  ;;  %v576_v61 = vld [vmem:[%s15524_s11 + $0xeb8] sm:$0xff]  ;;  %v580_v63 = vld [vmem:[%s15524_s11 + $0xee0] sm:$0xff] }
  0x79   : > { %575 = vst [vmem:[%s15529_s12 + $0x758] sm:$0xff] %v574_v60  ;;  %v578_v62 = vld [vmem:[%s15524_s11 + $0xed8] sm:$0xff]  ;;  %577 = vst [vmem:[%s15529_s12 + $0x760] sm:$0xff] %v576_v61  ;;  %v582_v0 = vld [vmem:[%s15524_s11 + $0xf00] sm:$0xff] }
  0x7a   : > { %579 = vst [vmem:[%s15529_s12 + $0x76c] sm:$0xff] %v578_v62  ;;  %581 = vst [vmem:[%s15529_s12 + $0x774] sm:$0xff] %v580_v63  ;;  %v584_v1 = vld [vmem:[%s15524_s11 + $0xf08] sm:$0xff]  ;;  %v588_v3 = vld [vmem:[%s15524_s11 + $0xf30] sm:$0xff] }
  0x7b   : > { %v586_v2 = vld [vmem:[%s15524_s11 + $0xf28] sm:$0xff]  ;;  %583 = vst [vmem:[%s15529_s12 + $0x780] sm:$0xff] %v582_v0  ;;  %585 = vst [vmem:[%s15529_s12 + $0x788] sm:$0xff] %v584_v1  ;;  %v590_v4 = vld [vmem:[%s15524_s11 + $0xf50] sm:$0xff] }
  0x7c   : > { %587 = vst [vmem:[%s15529_s12 + $0x794] sm:$0xff] %v586_v2  ;;  %v592_v5 = vld [vmem:[%s15524_s11 + $0xf58] sm:$0xff]  ;;  %589 = vst [vmem:[%s15529_s12 + $0x79c] sm:$0xff] %v588_v3  ;;  %v596_v7 = vld [vmem:[%s15524_s11 + $0xf80] sm:$0xff] }
  0x7d   : > { %591 = vst [vmem:[%s15529_s12 + $0x7a8] sm:$0xff] %v590_v4  ;;  %593 = vst [vmem:[%s15529_s12 + $0x7b0] sm:$0xff] %v592_v5  ;;  %v594_v6 = vld [vmem:[%s15524_s11 + $0xf78] sm:$0xff]  ;;  %v598_v8 = vld [vmem:[%s15524_s11 + $0xfa0] sm:$0xff] }
  0x7e   : > { %595 = vst [vmem:[%s15529_s12 + $0x7bc] sm:$0xff] %v594_v6  ;;  %597 = vst [vmem:[%s15529_s12 + $0x7c4] sm:$0xff] %v596_v7  ;;  %v600_v9 = vld [vmem:[%s15524_s11 + $0xfa8] sm:$0xff]  ;;  %v604_v11 = vld [vmem:[%s15524_s11 + $0xfd0] sm:$0xff] }
  0x7f   : > { %599 = vst [vmem:[%s15529_s12 + $0x7d0] sm:$0xff] %v598_v8  ;;  %v602_v10 = vld [vmem:[%s15524_s11 + $0xfc8] sm:$0xff]  ;;  %601 = vst [vmem:[%s15529_s12 + $0x7d8] sm:$0xff] %v600_v9  ;;  %v606_v12 = vld [vmem:[%s15524_s11 + $0xff0] sm:$0xff] }
  0x80   : > { %603 = vst [vmem:[%s15529_s12 + $0x7e4] sm:$0xff] %v602_v10  ;;  %605 = vst [vmem:[%s15529_s12 + $0x7ec] sm:$0xff] %v604_v11  ;;  %v608_v13 = vld [vmem:[%s15524_s11 + $0xff8] sm:$0xff]  ;;  %v612_v15 = vld [vmem:[%s15524_s11 + $0x1020] sm:$0xff] }
  0x81   : > { %v610_v14 = vld [vmem:[%s15524_s11 + $0x1018] sm:$0xff]  ;;  %607 = vst [vmem:[%s15529_s12 + $0x7f8] sm:$0xff] %v606_v12  ;;  %609 = vst [vmem:[%s15529_s12 + $0x800] sm:$0xff] %v608_v13  ;;  %v614_v16 = vld [vmem:[%s15524_s11 + $0x1040] sm:$0xff] }
  0x82   : > { %611 = vst [vmem:[%s15529_s12 + $0x80c] sm:$0xff] %v610_v14  ;;  %v616_v17 = vld [vmem:[%s15524_s11 + $0x1048] sm:$0xff]  ;;  %613 = vst [vmem:[%s15529_s12 + $0x814] sm:$0xff] %v612_v15  ;;  %v620_v19 = vld [vmem:[%s15524_s11 + $0x1070] sm:$0xff] }
  0x83   : > { %615 = vst [vmem:[%s15529_s12 + $0x820] sm:$0xff] %v614_v16  ;;  %617 = vst [vmem:[%s15529_s12 + $0x828] sm:$0xff] %v616_v17  ;;  %v618_v18 = vld [vmem:[%s15524_s11 + $0x1068] sm:$0xff]  ;;  %v622_v20 = vld [vmem:[%s15524_s11 + $0x1090] sm:$0xff] }
  0x84   : > { %619 = vst [vmem:[%s15529_s12 + $0x834] sm:$0xff] %v618_v18  ;;  %621 = vst [vmem:[%s15529_s12 + $0x83c] sm:$0xff] %v620_v19  ;;  %v624_v21 = vld [vmem:[%s15524_s11 + $0x1098] sm:$0xff]  ;;  %v628_v23 = vld [vmem:[%s15524_s11 + $0x10c0] sm:$0xff] }
  0x85   : > { %623 = vst [vmem:[%s15529_s12 + $0x848] sm:$0xff] %v622_v20  ;;  %v626_v22 = vld [vmem:[%s15524_s11 + $0x10b8] sm:$0xff]  ;;  %625 = vst [vmem:[%s15529_s12 + $0x850] sm:$0xff] %v624_v21  ;;  %v630_v24 = vld [vmem:[%s15524_s11 + $0x10e0] sm:$0xff] }
  0x86   : > { %627 = vst [vmem:[%s15529_s12 + $0x85c] sm:$0xff] %v626_v22  ;;  %629 = vst [vmem:[%s15529_s12 + $0x864] sm:$0xff] %v628_v23  ;;  %v632_v25 = vld [vmem:[%s15524_s11 + $0x10e8] sm:$0xff]  ;;  %v636_v27 = vld [vmem:[%s15524_s11 + $0x1110] sm:$0xff] }
  0x87   : > { %v634_v26 = vld [vmem:[%s15524_s11 + $0x1108] sm:$0xff]  ;;  %631 = vst [vmem:[%s15529_s12 + $0x870] sm:$0xff] %v630_v24  ;;  %633 = vst [vmem:[%s15529_s12 + $0x878] sm:$0xff] %v632_v25  ;;  %v638_v28 = vld [vmem:[%s15524_s11 + $0x1130] sm:$0xff] }
  0x88   : > { %635 = vst [vmem:[%s15529_s12 + $0x884] sm:$0xff] %v634_v26  ;;  %v640_v29 = vld [vmem:[%s15524_s11 + $0x1138] sm:$0xff]  ;;  %637 = vst [vmem:[%s15529_s12 + $0x88c] sm:$0xff] %v636_v27  ;;  %v644_v31 = vld [vmem:[%s15524_s11 + $0x1160] sm:$0xff] }
  0x89   : > { %639 = vst [vmem:[%s15529_s12 + $0x898] sm:$0xff] %v638_v28  ;;  %641 = vst [vmem:[%s15529_s12 + $0x8a0] sm:$0xff] %v640_v29  ;;  %v642_v30 = vld [vmem:[%s15524_s11 + $0x1158] sm:$0xff]  ;;  %v646_v32 = vld [vmem:[%s15524_s11 + $0x1180] sm:$0xff] }
  0x8a   : > { %643 = vst [vmem:[%s15529_s12 + $0x8ac] sm:$0xff] %v642_v30  ;;  %645 = vst [vmem:[%s15529_s12 + $0x8b4] sm:$0xff] %v644_v31  ;;  %v648_v33 = vld [vmem:[%s15524_s11 + $0x1188] sm:$0xff]  ;;  %v652_v35 = vld [vmem:[%s15524_s11 + $0x11b0] sm:$0xff] }
  0x8b   : > { %647 = vst [vmem:[%s15529_s12 + $0x8c0] sm:$0xff] %v646_v32  ;;  %v650_v34 = vld [vmem:[%s15524_s11 + $0x11a8] sm:$0xff]  ;;  %649 = vst [vmem:[%s15529_s12 + $0x8c8] sm:$0xff] %v648_v33  ;;  %v654_v36 = vld [vmem:[%s15524_s11 + $0x11d0] sm:$0xff] }
  0x8c   : > { %651 = vst [vmem:[%s15529_s12 + $0x8d4] sm:$0xff] %v650_v34  ;;  %653 = vst [vmem:[%s15529_s12 + $0x8dc] sm:$0xff] %v652_v35  ;;  %v656_v37 = vld [vmem:[%s15524_s11 + $0x11d8] sm:$0xff]  ;;  %v660_v39 = vld [vmem:[%s15524_s11 + $0x1200] sm:$0xff] }
  0x8d   : > { %v658_v38 = vld [vmem:[%s15524_s11 + $0x11f8] sm:$0xff]  ;;  %655 = vst [vmem:[%s15529_s12 + $0x8e8] sm:$0xff] %v654_v36  ;;  %657 = vst [vmem:[%s15529_s12 + $0x8f0] sm:$0xff] %v656_v37  ;;  %v662_v40 = vld [vmem:[%s15524_s11 + $0x1220] sm:$0xff] }
  0x8e   : > { %659 = vst [vmem:[%s15529_s12 + $0x8fc] sm:$0xff] %v658_v38  ;;  %v664_v41 = vld [vmem:[%s15524_s11 + $0x1228] sm:$0xff]  ;;  %661 = vst [vmem:[%s15529_s12 + $0x904] sm:$0xff] %v660_v39  ;;  %v668_v43 = vld [vmem:[%s15524_s11 + $0x1250] sm:$0xff] }
  0x8f   : > { %663 = vst [vmem:[%s15529_s12 + $0x910] sm:$0xff] %v662_v40  ;;  %665 = vst [vmem:[%s15529_s12 + $0x918] sm:$0xff] %v664_v41  ;;  %v666_v42 = vld [vmem:[%s15524_s11 + $0x1248] sm:$0xff]  ;;  %v670_v44 = vld [vmem:[%s15524_s11 + $0x1270] sm:$0xff] }
  0x90   : > { %667 = vst [vmem:[%s15529_s12 + $0x924] sm:$0xff] %v666_v42  ;;  %669 = vst [vmem:[%s15529_s12 + $0x92c] sm:$0xff] %v668_v43  ;;  %v672_v45 = vld [vmem:[%s15524_s11 + $0x1278] sm:$0xff]  ;;  %v676_v47 = vld [vmem:[%s15524_s11 + $0x12a0] sm:$0xff] }
  0x91   : > { %671 = vst [vmem:[%s15529_s12 + $0x938] sm:$0xff] %v670_v44  ;;  %v674_v46 = vld [vmem:[%s15524_s11 + $0x1298] sm:$0xff]  ;;  %673 = vst [vmem:[%s15529_s12 + $0x940] sm:$0xff] %v672_v45  ;;  %v678_v48 = vld [vmem:[%s15524_s11 + $0x12c0] sm:$0xff] }
  0x92   : > { %675 = vst [vmem:[%s15529_s12 + $0x94c] sm:$0xff] %v674_v46  ;;  %677 = vst [vmem:[%s15529_s12 + $0x954] sm:$0xff] %v676_v47  ;;  %v680_v49 = vld [vmem:[%s15524_s11 + $0x12c8] sm:$0xff]  ;;  %v684_v51 = vld [vmem:[%s15524_s11 + $0x12f0] sm:$0xff] }
  0x93   : > { %v682_v50 = vld [vmem:[%s15524_s11 + $0x12e8] sm:$0xff]  ;;  %679 = vst [vmem:[%s15529_s12 + $0x960] sm:$0xff] %v678_v48  ;;  %681 = vst [vmem:[%s15529_s12 + $0x968] sm:$0xff] %v680_v49  ;;  %v686_v52 = vld [vmem:[%s15524_s11 + $0x1310] sm:$0xff] }
  0x94   : > { %683 = vst [vmem:[%s15529_s12 + $0x974] sm:$0xff] %v682_v50  ;;  %v688_v53 = vld [vmem:[%s15524_s11 + $0x1318] sm:$0xff]  ;;  %685 = vst [vmem:[%s15529_s12 + $0x97c] sm:$0xff] %v684_v51  ;;  %v692_v55 = vld [vmem:[%s15524_s11 + $0x1340] sm:$0xff] }
  0x95   : > { %687 = vst [vmem:[%s15529_s12 + $0x988] sm:$0xff] %v686_v52  ;;  %689 = vst [vmem:[%s15529_s12 + $0x990] sm:$0xff] %v688_v53  ;;  %v690_v54 = vld [vmem:[%s15524_s11 + $0x1338] sm:$0xff]  ;;  %v694_v56 = vld [vmem:[%s15524_s11 + $0x1360] sm:$0xff] }
  0x96   : > { %691 = vst [vmem:[%s15529_s12 + $0x99c] sm:$0xff] %v690_v54  ;;  %693 = vst [vmem:[%s15529_s12 + $0x9a4] sm:$0xff] %v692_v55  ;;  %v696_v57 = vld [vmem:[%s15524_s11 + $0x1368] sm:$0xff]  ;;  %v700_v59 = vld [vmem:[%s15524_s11 + $0x1390] sm:$0xff] }
  0x97   : > { %695 = vst [vmem:[%s15529_s12 + $0x9b0] sm:$0xff] %v694_v56  ;;  %v698_v58 = vld [vmem:[%s15524_s11 + $0x1388] sm:$0xff]  ;;  %697 = vst [vmem:[%s15529_s12 + $0x9b8] sm:$0xff] %v696_v57  ;;  %v702_v60 = vld [vmem:[%s15524_s11 + $0x13b0] sm:$0xff] }
  0x98   : > { %699 = vst [vmem:[%s15529_s12 + $0x9c4] sm:$0xff] %v698_v58  ;;  %701 = vst [vmem:[%s15529_s12 + $0x9cc] sm:$0xff] %v700_v59  ;;  %v704_v61 = vld [vmem:[%s15524_s11 + $0x13b8] sm:$0xff]  ;;  %v708_v63 = vld [vmem:[%s15524_s11 + $0x13e0] sm:$0xff] }
  0x99   : > { %v706_v62 = vld [vmem:[%s15524_s11 + $0x13d8] sm:$0xff]  ;;  %703 = vst [vmem:[%s15529_s12 + $0x9d8] sm:$0xff] %v702_v60  ;;  %705 = vst [vmem:[%s15529_s12 + $0x9e0] sm:$0xff] %v704_v61  ;;  %v710_v0 = vld [vmem:[%s15524_s11 + $0x1400] sm:$0xff] }
  0x9a   : > { %707 = vst [vmem:[%s15529_s12 + $0x9ec] sm:$0xff] %v706_v62  ;;  %v712_v1 = vld [vmem:[%s15524_s11 + $0x1408] sm:$0xff]  ;;  %709 = vst [vmem:[%s15529_s12 + $0x9f4] sm:$0xff] %v708_v63  ;;  %v716_v3 = vld [vmem:[%s15524_s11 + $0x1430] sm:$0xff] }
  0x9b   : > { %711 = vst [vmem:[%s15529_s12 + $0xa00] sm:$0xff] %v710_v0  ;;  %713 = vst [vmem:[%s15529_s12 + $0xa08] sm:$0xff] %v712_v1  ;;  %v714_v2 = vld [vmem:[%s15524_s11 + $0x1428] sm:$0xff]  ;;  %v718_v4 = vld [vmem:[%s15524_s11 + $0x1450] sm:$0xff] }
  0x9c   : > { %715 = vst [vmem:[%s15529_s12 + $0xa14] sm:$0xff] %v714_v2  ;;  %717 = vst [vmem:[%s15529_s12 + $0xa1c] sm:$0xff] %v716_v3  ;;  %v720_v5 = vld [vmem:[%s15524_s11 + $0x1458] sm:$0xff]  ;;  %v724_v7 = vld [vmem:[%s15524_s11 + $0x1480] sm:$0xff] }
  0x9d   : > { %719 = vst [vmem:[%s15529_s12 + $0xa28] sm:$0xff] %v718_v4  ;;  %v722_v6 = vld [vmem:[%s15524_s11 + $0x1478] sm:$0xff]  ;;  %721 = vst [vmem:[%s15529_s12 + $0xa30] sm:$0xff] %v720_v5  ;;  %v726_v8 = vld [vmem:[%s15524_s11 + $0x14a0] sm:$0xff] }
  0x9e   : > { %723 = vst [vmem:[%s15529_s12 + $0xa3c] sm:$0xff] %v722_v6  ;;  %725 = vst [vmem:[%s15529_s12 + $0xa44] sm:$0xff] %v724_v7  ;;  %v728_v9 = vld [vmem:[%s15524_s11 + $0x14a8] sm:$0xff]  ;;  %v732_v11 = vld [vmem:[%s15524_s11 + $0x14d0] sm:$0xff] }
  0x9f   : > { %v730_v10 = vld [vmem:[%s15524_s11 + $0x14c8] sm:$0xff]  ;;  %727 = vst [vmem:[%s15529_s12 + $0xa50] sm:$0xff] %v726_v8  ;;  %729 = vst [vmem:[%s15529_s12 + $0xa58] sm:$0xff] %v728_v9  ;;  %v734_v12 = vld [vmem:[%s15524_s11 + $0x14f0] sm:$0xff] }
  0xa0   : > { %731 = vst [vmem:[%s15529_s12 + $0xa64] sm:$0xff] %v730_v10  ;;  %v736_v13 = vld [vmem:[%s15524_s11 + $0x14f8] sm:$0xff]  ;;  %733 = vst [vmem:[%s15529_s12 + $0xa6c] sm:$0xff] %v732_v11  ;;  %v740_v15 = vld [vmem:[%s15524_s11 + $0x1520] sm:$0xff] }
  0xa1   : > { %735 = vst [vmem:[%s15529_s12 + $0xa78] sm:$0xff] %v734_v12  ;;  %737 = vst [vmem:[%s15529_s12 + $0xa80] sm:$0xff] %v736_v13  ;;  %v738_v14 = vld [vmem:[%s15524_s11 + $0x1518] sm:$0xff]  ;;  %v742_v16 = vld [vmem:[%s15524_s11 + $0x1540] sm:$0xff] }
  0xa2   : > { %739 = vst [vmem:[%s15529_s12 + $0xa8c] sm:$0xff] %v738_v14  ;;  %741 = vst [vmem:[%s15529_s12 + $0xa94] sm:$0xff] %v740_v15  ;;  %v744_v17 = vld [vmem:[%s15524_s11 + $0x1548] sm:$0xff]  ;;  %v748_v19 = vld [vmem:[%s15524_s11 + $0x1570] sm:$0xff] }
  0xa3   : > { %743 = vst [vmem:[%s15529_s12 + $0xaa0] sm:$0xff] %v742_v16  ;;  %v746_v18 = vld [vmem:[%s15524_s11 + $0x1568] sm:$0xff]  ;;  %745 = vst [vmem:[%s15529_s12 + $0xaa8] sm:$0xff] %v744_v17  ;;  %v750_v20 = vld [vmem:[%s15524_s11 + $0x1590] sm:$0xff] }
  0xa4   : > { %747 = vst [vmem:[%s15529_s12 + $0xab4] sm:$0xff] %v746_v18  ;;  %749 = vst [vmem:[%s15529_s12 + $0xabc] sm:$0xff] %v748_v19  ;;  %v752_v21 = vld [vmem:[%s15524_s11 + $0x1598] sm:$0xff]  ;;  %v756_v23 = vld [vmem:[%s15524_s11 + $0x15c0] sm:$0xff] }
  0xa5   : > { %v754_v22 = vld [vmem:[%s15524_s11 + $0x15b8] sm:$0xff]  ;;  %751 = vst [vmem:[%s15529_s12 + $0xac8] sm:$0xff] %v750_v20  ;;  %753 = vst [vmem:[%s15529_s12 + $0xad0] sm:$0xff] %v752_v21  ;;  %v758_v24 = vld [vmem:[%s15524_s11 + $0x15e0] sm:$0xff] }
  0xa6   : > { %755 = vst [vmem:[%s15529_s12 + $0xadc] sm:$0xff] %v754_v22  ;;  %v760_v25 = vld [vmem:[%s15524_s11 + $0x15e8] sm:$0xff]  ;;  %757 = vst [vmem:[%s15529_s12 + $0xae4] sm:$0xff] %v756_v23  ;;  %v764_v27 = vld [vmem:[%s15524_s11 + $0x1610] sm:$0xff] }
  0xa7   : > { %759 = vst [vmem:[%s15529_s12 + $0xaf0] sm:$0xff] %v758_v24  ;;  %761 = vst [vmem:[%s15529_s12 + $0xaf8] sm:$0xff] %v760_v25  ;;  %v762_v26 = vld [vmem:[%s15524_s11 + $0x1608] sm:$0xff]  ;;  %v766_v28 = vld [vmem:[%s15524_s11 + $0x1630] sm:$0xff] }
  0xa8   : > { %763 = vst [vmem:[%s15529_s12 + $0xb04] sm:$0xff] %v762_v26  ;;  %765 = vst [vmem:[%s15529_s12 + $0xb0c] sm:$0xff] %v764_v27  ;;  %v768_v29 = vld [vmem:[%s15524_s11 + $0x1638] sm:$0xff]  ;;  %v772_v31 = vld [vmem:[%s15524_s11 + $0x1660] sm:$0xff] }
  0xa9   : > { %767 = vst [vmem:[%s15529_s12 + $0xb18] sm:$0xff] %v766_v28  ;;  %v770_v30 = vld [vmem:[%s15524_s11 + $0x1658] sm:$0xff]  ;;  %769 = vst [vmem:[%s15529_s12 + $0xb20] sm:$0xff] %v768_v29  ;;  %v774_v32 = vld [vmem:[%s15524_s11 + $0x1680] sm:$0xff] }
  0xaa   : > { %771 = vst [vmem:[%s15529_s12 + $0xb2c] sm:$0xff] %v770_v30  ;;  %773 = vst [vmem:[%s15529_s12 + $0xb34] sm:$0xff] %v772_v31  ;;  %v776_v33 = vld [vmem:[%s15524_s11 + $0x1688] sm:$0xff]  ;;  %v780_v35 = vld [vmem:[%s15524_s11 + $0x16b0] sm:$0xff] }
  0xab   : > { %v778_v34 = vld [vmem:[%s15524_s11 + $0x16a8] sm:$0xff]  ;;  %775 = vst [vmem:[%s15529_s12 + $0xb40] sm:$0xff] %v774_v32  ;;  %777 = vst [vmem:[%s15529_s12 + $0xb48] sm:$0xff] %v776_v33  ;;  %v782_v36 = vld [vmem:[%s15524_s11 + $0x16d0] sm:$0xff] }
  0xac   : > { %779 = vst [vmem:[%s15529_s12 + $0xb54] sm:$0xff] %v778_v34  ;;  %v784_v37 = vld [vmem:[%s15524_s11 + $0x16d8] sm:$0xff]  ;;  %781 = vst [vmem:[%s15529_s12 + $0xb5c] sm:$0xff] %v780_v35  ;;  %v788_v39 = vld [vmem:[%s15524_s11 + $0x1700] sm:$0xff] }
  0xad   : > { %783 = vst [vmem:[%s15529_s12 + $0xb68] sm:$0xff] %v782_v36  ;;  %785 = vst [vmem:[%s15529_s12 + $0xb70] sm:$0xff] %v784_v37  ;;  %v786_v38 = vld [vmem:[%s15524_s11 + $0x16f8] sm:$0xff]  ;;  %v790_v40 = vld [vmem:[%s15524_s11 + $0x1720] sm:$0xff] }
  0xae   : > { %787 = vst [vmem:[%s15529_s12 + $0xb7c] sm:$0xff] %v786_v38  ;;  %789 = vst [vmem:[%s15529_s12 + $0xb84] sm:$0xff] %v788_v39  ;;  %v792_v41 = vld [vmem:[%s15524_s11 + $0x1728] sm:$0xff]  ;;  %v796_v43 = vld [vmem:[%s15524_s11 + $0x1750] sm:$0xff] }
  0xaf   : > { %791 = vst [vmem:[%s15529_s12 + $0xb90] sm:$0xff] %v790_v40  ;;  %v794_v42 = vld [vmem:[%s15524_s11 + $0x1748] sm:$0xff]  ;;  %793 = vst [vmem:[%s15529_s12 + $0xb98] sm:$0xff] %v792_v41  ;;  %v798_v44 = vld [vmem:[%s15524_s11 + $0x1770] sm:$0xff] }
  0xb0   : > { %795 = vst [vmem:[%s15529_s12 + $0xba4] sm:$0xff] %v794_v42  ;;  %797 = vst [vmem:[%s15529_s12 + $0xbac] sm:$0xff] %v796_v43  ;;  %v800_v45 = vld [vmem:[%s15524_s11 + $0x1778] sm:$0xff]  ;;  %v804_v47 = vld [vmem:[%s15524_s11 + $0x17a0] sm:$0xff] }
  0xb1   : > { %v802_v46 = vld [vmem:[%s15524_s11 + $0x1798] sm:$0xff]  ;;  %799 = vst [vmem:[%s15529_s12 + $0xbb8] sm:$0xff] %v798_v44  ;;  %801 = vst [vmem:[%s15529_s12 + $0xbc0] sm:$0xff] %v800_v45  ;;  %v806_v48 = vld [vmem:[%s15524_s11 + $0x17c0] sm:$0xff] }
  0xb2   : > { %803 = vst [vmem:[%s15529_s12 + $0xbcc] sm:$0xff] %v802_v46  ;;  %v808_v49 = vld [vmem:[%s15524_s11 + $0x17c8] sm:$0xff]  ;;  %805 = vst [vmem:[%s15529_s12 + $0xbd4] sm:$0xff] %v804_v47  ;;  %v812_v51 = vld [vmem:[%s15524_s11 + $0x17f0] sm:$0xff] }
  0xb3   : > { %807 = vst [vmem:[%s15529_s12 + $0xbe0] sm:$0xff] %v806_v48  ;;  %809 = vst [vmem:[%s15529_s12 + $0xbe8] sm:$0xff] %v808_v49  ;;  %v810_v50 = vld [vmem:[%s15524_s11 + $0x17e8] sm:$0xff]  ;;  %v814_v52 = vld [vmem:[%s15524_s11 + $0x1810] sm:$0xff] }
  0xb4   : > { %811 = vst [vmem:[%s15529_s12 + $0xbf4] sm:$0xff] %v810_v50  ;;  %813 = vst [vmem:[%s15529_s12 + $0xbfc] sm:$0xff] %v812_v51  ;;  %v816_v53 = vld [vmem:[%s15524_s11 + $0x1818] sm:$0xff]  ;;  %v820_v55 = vld [vmem:[%s15524_s11 + $0x1840] sm:$0xff] }
  0xb5   : > { %815 = vst [vmem:[%s15529_s12 + $0xc08] sm:$0xff] %v814_v52  ;;  %v818_v54 = vld [vmem:[%s15524_s11 + $0x1838] sm:$0xff]  ;;  %817 = vst [vmem:[%s15529_s12 + $0xc10] sm:$0xff] %v816_v53  ;;  %v822_v56 = vld [vmem:[%s15524_s11 + $0x1860] sm:$0xff] }
  0xb6   : > { %819 = vst [vmem:[%s15529_s12 + $0xc1c] sm:$0xff] %v818_v54  ;;  %821 = vst [vmem:[%s15529_s12 + $0xc24] sm:$0xff] %v820_v55  ;;  %v824_v57 = vld [vmem:[%s15524_s11 + $0x1868] sm:$0xff]  ;;  %v828_v59 = vld [vmem:[%s15524_s11 + $0x1890] sm:$0xff] }
  0xb7   : > { %v826_v58 = vld [vmem:[%s15524_s11 + $0x1888] sm:$0xff]  ;;  %823 = vst [vmem:[%s15529_s12 + $0xc30] sm:$0xff] %v822_v56  ;;  %825 = vst [vmem:[%s15529_s12 + $0xc38] sm:$0xff] %v824_v57  ;;  %v830_v60 = vld [vmem:[%s15524_s11 + $0x18b0] sm:$0xff] }
  0xb8   : > { %827 = vst [vmem:[%s15529_s12 + $0xc44] sm:$0xff] %v826_v58  ;;  %v832_v61 = vld [vmem:[%s15524_s11 + $0x18b8] sm:$0xff]  ;;  %829 = vst [vmem:[%s15529_s12 + $0xc4c] sm:$0xff] %v828_v59  ;;  %v836_v63 = vld [vmem:[%s15524_s11 + $0x18e0] sm:$0xff] }
  0xb9   : > { %831 = vst [vmem:[%s15529_s12 + $0xc58] sm:$0xff] %v830_v60  ;;  %833 = vst [vmem:[%s15529_s12 + $0xc60] sm:$0xff] %v832_v61  ;;  %v834_v62 = vld [vmem:[%s15524_s11 + $0x18d8] sm:$0xff]  ;;  %v838_v0 = vld [vmem:[%s15524_s11 + $0x1900] sm:$0xff] }
  0xba   : > { %835 = vst [vmem:[%s15529_s12 + $0xc6c] sm:$0xff] %v834_v62  ;;  %837 = vst [vmem:[%s15529_s12 + $0xc74] sm:$0xff] %v836_v63  ;;  %v840_v1 = vld [vmem:[%s15524_s11 + $0x1908] sm:$0xff]  ;;  %v844_v3 = vld [vmem:[%s15524_s11 + $0x1930] sm:$0xff] }
  0xbb   : > { %839 = vst [vmem:[%s15529_s12 + $0xc80] sm:$0xff] %v838_v0  ;;  %v842_v2 = vld [vmem:[%s15524_s11 + $0x1928] sm:$0xff]  ;;  %841 = vst [vmem:[%s15529_s12 + $0xc88] sm:$0xff] %v840_v1  ;;  %v846_v4 = vld [vmem:[%s15524_s11 + $0x1950] sm:$0xff] }
  0xbc   : > { %843 = vst [vmem:[%s15529_s12 + $0xc94] sm:$0xff] %v842_v2  ;;  %845 = vst [vmem:[%s15529_s12 + $0xc9c] sm:$0xff] %v844_v3  ;;  %v848_v5 = vld [vmem:[%s15524_s11 + $0x1958] sm:$0xff]  ;;  %v852_v7 = vld [vmem:[%s15524_s11 + $0x1980] sm:$0xff] }
  0xbd   : > { %v850_v6 = vld [vmem:[%s15524_s11 + $0x1978] sm:$0xff]  ;;  %847 = vst [vmem:[%s15529_s12 + $0xca8] sm:$0xff] %v846_v4  ;;  %849 = vst [vmem:[%s15529_s12 + $0xcb0] sm:$0xff] %v848_v5  ;;  %v854_v8 = vld [vmem:[%s15524_s11 + $0x19a0] sm:$0xff] }
  0xbe   : > { %851 = vst [vmem:[%s15529_s12 + $0xcbc] sm:$0xff] %v850_v6  ;;  %v856_v9 = vld [vmem:[%s15524_s11 + $0x19a8] sm:$0xff]  ;;  %853 = vst [vmem:[%s15529_s12 + $0xcc4] sm:$0xff] %v852_v7  ;;  %v860_v11 = vld [vmem:[%s15524_s11 + $0x19d0] sm:$0xff] }
  0xbf   : > { %855 = vst [vmem:[%s15529_s12 + $0xcd0] sm:$0xff] %v854_v8  ;;  %857 = vst [vmem:[%s15529_s12 + $0xcd8] sm:$0xff] %v856_v9  ;;  %v858_v10 = vld [vmem:[%s15524_s11 + $0x19c8] sm:$0xff]  ;;  %v862_v12 = vld [vmem:[%s15524_s11 + $0x19f0] sm:$0xff] }
  0xc0   : > { %859 = vst [vmem:[%s15529_s12 + $0xce4] sm:$0xff] %v858_v10  ;;  %861 = vst [vmem:[%s15529_s12 + $0xcec] sm:$0xff] %v860_v11  ;;  %v864_v13 = vld [vmem:[%s15524_s11 + $0x19f8] sm:$0xff]  ;;  %v868_v15 = vld [vmem:[%s15524_s11 + $0x1a20] sm:$0xff] }
  0xc1   : > { %863 = vst [vmem:[%s15529_s12 + $0xcf8] sm:$0xff] %v862_v12  ;;  %v866_v14 = vld [vmem:[%s15524_s11 + $0x1a18] sm:$0xff]  ;;  %865 = vst [vmem:[%s15529_s12 + $0xd00] sm:$0xff] %v864_v13  ;;  %v870_v16 = vld [vmem:[%s15524_s11 + $0x1a40] sm:$0xff] }
  0xc2   : > { %867 = vst [vmem:[%s15529_s12 + $0xd0c] sm:$0xff] %v866_v14  ;;  %869 = vst [vmem:[%s15529_s12 + $0xd14] sm:$0xff] %v868_v15  ;;  %v872_v17 = vld [vmem:[%s15524_s11 + $0x1a48] sm:$0xff]  ;;  %v876_v19 = vld [vmem:[%s15524_s11 + $0x1a70] sm:$0xff] }
  0xc3   : > { %v874_v18 = vld [vmem:[%s15524_s11 + $0x1a68] sm:$0xff]  ;;  %871 = vst [vmem:[%s15529_s12 + $0xd20] sm:$0xff] %v870_v16  ;;  %873 = vst [vmem:[%s15529_s12 + $0xd28] sm:$0xff] %v872_v17  ;;  %v878_v20 = vld [vmem:[%s15524_s11 + $0x1a90] sm:$0xff] }
  0xc4   : > { %875 = vst [vmem:[%s15529_s12 + $0xd34] sm:$0xff] %v874_v18  ;;  %v880_v21 = vld [vmem:[%s15524_s11 + $0x1a98] sm:$0xff]  ;;  %877 = vst [vmem:[%s15529_s12 + $0xd3c] sm:$0xff] %v876_v19  ;;  %v884_v23 = vld [vmem:[%s15524_s11 + $0x1ac0] sm:$0xff] }
  0xc5   : > { %879 = vst [vmem:[%s15529_s12 + $0xd48] sm:$0xff] %v878_v20  ;;  %881 = vst [vmem:[%s15529_s12 + $0xd50] sm:$0xff] %v880_v21  ;;  %v882_v22 = vld [vmem:[%s15524_s11 + $0x1ab8] sm:$0xff]  ;;  %v886_v24 = vld [vmem:[%s15524_s11 + $0x1ae0] sm:$0xff] }
  0xc6   : > { %883 = vst [vmem:[%s15529_s12 + $0xd5c] sm:$0xff] %v882_v22  ;;  %885 = vst [vmem:[%s15529_s12 + $0xd64] sm:$0xff] %v884_v23  ;;  %v888_v25 = vld [vmem:[%s15524_s11 + $0x1ae8] sm:$0xff]  ;;  %v892_v27 = vld [vmem:[%s15524_s11 + $0x1b10] sm:$0xff] }
  0xc7   : > { %887 = vst [vmem:[%s15529_s12 + $0xd70] sm:$0xff] %v886_v24  ;;  %v890_v26 = vld [vmem:[%s15524_s11 + $0x1b08] sm:$0xff]  ;;  %889 = vst [vmem:[%s15529_s12 + $0xd78] sm:$0xff] %v888_v25  ;;  %v894_v28 = vld [vmem:[%s15524_s11 + $0x1b30] sm:$0xff] }
  0xc8   : > { %891 = vst [vmem:[%s15529_s12 + $0xd84] sm:$0xff] %v890_v26  ;;  %893 = vst [vmem:[%s15529_s12 + $0xd8c] sm:$0xff] %v892_v27  ;;  %v896_v29 = vld [vmem:[%s15524_s11 + $0x1b38] sm:$0xff]  ;;  %v900_v31 = vld [vmem:[%s15524_s11 + $0x1b60] sm:$0xff] }
  0xc9   : > { %v898_v30 = vld [vmem:[%s15524_s11 + $0x1b58] sm:$0xff]  ;;  %895 = vst [vmem:[%s15529_s12 + $0xd98] sm:$0xff] %v894_v28  ;;  %897 = vst [vmem:[%s15529_s12 + $0xda0] sm:$0xff] %v896_v29  ;;  %v902_v32 = vld [vmem:[%s15524_s11 + $0x1b80] sm:$0xff] }
  0xca   : > { %899 = vst [vmem:[%s15529_s12 + $0xdac] sm:$0xff] %v898_v30  ;;  %v904_v33 = vld [vmem:[%s15524_s11 + $0x1b88] sm:$0xff]  ;;  %901 = vst [vmem:[%s15529_s12 + $0xdb4] sm:$0xff] %v900_v31  ;;  %v908_v35 = vld [vmem:[%s15524_s11 + $0x1bb0] sm:$0xff] }
  0xcb   : > { %903 = vst [vmem:[%s15529_s12 + $0xdc0] sm:$0xff] %v902_v32  ;;  %905 = vst [vmem:[%s15529_s12 + $0xdc8] sm:$0xff] %v904_v33  ;;  %v906_v34 = vld [vmem:[%s15524_s11 + $0x1ba8] sm:$0xff]  ;;  %v910_v36 = vld [vmem:[%s15524_s11 + $0x1bd0] sm:$0xff] }
  0xcc   : > { %907 = vst [vmem:[%s15529_s12 + $0xdd4] sm:$0xff] %v906_v34  ;;  %909 = vst [vmem:[%s15529_s12 + $0xddc] sm:$0xff] %v908_v35  ;;  %v912_v37 = vld [vmem:[%s15524_s11 + $0x1bd8] sm:$0xff]  ;;  %v916_v39 = vld [vmem:[%s15524_s11 + $0x1c00] sm:$0xff] }
  0xcd   : > { %911 = vst [vmem:[%s15529_s12 + $0xde8] sm:$0xff] %v910_v36  ;;  %v914_v38 = vld [vmem:[%s15524_s11 + $0x1bf8] sm:$0xff]  ;;  %913 = vst [vmem:[%s15529_s12 + $0xdf0] sm:$0xff] %v912_v37  ;;  %v918_v40 = vld [vmem:[%s15524_s11 + $0x1c20] sm:$0xff] }
  0xce   : > { %915 = vst [vmem:[%s15529_s12 + $0xdfc] sm:$0xff] %v914_v38  ;;  %917 = vst [vmem:[%s15529_s12 + $0xe04] sm:$0xff] %v916_v39  ;;  %v920_v41 = vld [vmem:[%s15524_s11 + $0x1c28] sm:$0xff]  ;;  %v924_v43 = vld [vmem:[%s15524_s11 + $0x1c50] sm:$0xff] }
  0xcf   : > { %v922_v42 = vld [vmem:[%s15524_s11 + $0x1c48] sm:$0xff]  ;;  %919 = vst [vmem:[%s15529_s12 + $0xe10] sm:$0xff] %v918_v40  ;;  %921 = vst [vmem:[%s15529_s12 + $0xe18] sm:$0xff] %v920_v41  ;;  %v926_v44 = vld [vmem:[%s15524_s11 + $0x1c70] sm:$0xff] }
  0xd0   : > { %923 = vst [vmem:[%s15529_s12 + $0xe24] sm:$0xff] %v922_v42  ;;  %v928_v45 = vld [vmem:[%s15524_s11 + $0x1c78] sm:$0xff]  ;;  %925 = vst [vmem:[%s15529_s12 + $0xe2c] sm:$0xff] %v924_v43  ;;  %v932_v47 = vld [vmem:[%s15524_s11 + $0x1ca0] sm:$0xff] }
  0xd1   : > { %927 = vst [vmem:[%s15529_s12 + $0xe38] sm:$0xff] %v926_v44  ;;  %929 = vst [vmem:[%s15529_s12 + $0xe40] sm:$0xff] %v928_v45  ;;  %v930_v46 = vld [vmem:[%s15524_s11 + $0x1c98] sm:$0xff]  ;;  %v934_v48 = vld [vmem:[%s15524_s11 + $0x1cc0] sm:$0xff] }
  0xd2   : > { %931 = vst [vmem:[%s15529_s12 + $0xe4c] sm:$0xff] %v930_v46  ;;  %933 = vst [vmem:[%s15529_s12 + $0xe54] sm:$0xff] %v932_v47  ;;  %v936_v49 = vld [vmem:[%s15524_s11 + $0x1cc8] sm:$0xff]  ;;  %v940_v51 = vld [vmem:[%s15524_s11 + $0x1cf0] sm:$0xff] }
  0xd3   : > { %935 = vst [vmem:[%s15529_s12 + $0xe60] sm:$0xff] %v934_v48  ;;  %v938_v50 = vld [vmem:[%s15524_s11 + $0x1ce8] sm:$0xff]  ;;  %937 = vst [vmem:[%s15529_s12 + $0xe68] sm:$0xff] %v936_v49  ;;  %v942_v52 = vld [vmem:[%s15524_s11 + $0x1d10] sm:$0xff] }
  0xd4   : > { %939 = vst [vmem:[%s15529_s12 + $0xe74] sm:$0xff] %v938_v50  ;;  %941 = vst [vmem:[%s15529_s12 + $0xe7c] sm:$0xff] %v940_v51  ;;  %v944_v53 = vld [vmem:[%s15524_s11 + $0x1d18] sm:$0xff]  ;;  %v948_v55 = vld [vmem:[%s15524_s11 + $0x1d40] sm:$0xff] }
  0xd5   : > { %v946_v54 = vld [vmem:[%s15524_s11 + $0x1d38] sm:$0xff]  ;;  %943 = vst [vmem:[%s15529_s12 + $0xe88] sm:$0xff] %v942_v52  ;;  %945 = vst [vmem:[%s15529_s12 + $0xe90] sm:$0xff] %v944_v53  ;;  %v950_v56 = vld [vmem:[%s15524_s11 + $0x1d60] sm:$0xff] }
  0xd6   : > { %947 = vst [vmem:[%s15529_s12 + $0xe9c] sm:$0xff] %v946_v54  ;;  %v952_v57 = vld [vmem:[%s15524_s11 + $0x1d68] sm:$0xff]  ;;  %949 = vst [vmem:[%s15529_s12 + $0xea4] sm:$0xff] %v948_v55  ;;  %v956_v59 = vld [vmem:[%s15524_s11 + $0x1d90] sm:$0xff] }
  0xd7   : > { %951 = vst [vmem:[%s15529_s12 + $0xeb0] sm:$0xff] %v950_v56  ;;  %953 = vst [vmem:[%s15529_s12 + $0xeb8] sm:$0xff] %v952_v57  ;;  %v954_v58 = vld [vmem:[%s15524_s11 + $0x1d88] sm:$0xff]  ;;  %v958_v60 = vld [vmem:[%s15524_s11 + $0x1db0] sm:$0xff] }
  0xd8   : > { %955 = vst [vmem:[%s15529_s12 + $0xec4] sm:$0xff] %v954_v58  ;;  %957 = vst [vmem:[%s15529_s12 + $0xecc] sm:$0xff] %v956_v59  ;;  %v960_v61 = vld [vmem:[%s15524_s11 + $0x1db8] sm:$0xff]  ;;  %v964_v63 = vld [vmem:[%s15524_s11 + $0x1de0] sm:$0xff] }
  0xd9   : > { %959 = vst [vmem:[%s15529_s12 + $0xed8] sm:$0xff] %v958_v60  ;;  %v962_v62 = vld [vmem:[%s15524_s11 + $0x1dd8] sm:$0xff]  ;;  %961 = vst [vmem:[%s15529_s12 + $0xee0] sm:$0xff] %v960_v61  ;;  %v966_v0 = vld [vmem:[%s15524_s11 + $0x1e00] sm:$0xff] }
  0xda   : > { %963 = vst [vmem:[%s15529_s12 + $0xeec] sm:$0xff] %v962_v62  ;;  %965 = vst [vmem:[%s15529_s12 + $0xef4] sm:$0xff] %v964_v63  ;;  %v968_v1 = vld [vmem:[%s15524_s11 + $0x1e08] sm:$0xff]  ;;  %v972_v3 = vld [vmem:[%s15524_s11 + $0x1e30] sm:$0xff] }
  0xdb   : > { %v970_v2 = vld [vmem:[%s15524_s11 + $0x1e28] sm:$0xff]  ;;  %967 = vst [vmem:[%s15529_s12 + $0xf00] sm:$0xff] %v966_v0  ;;  %969 = vst [vmem:[%s15529_s12 + $0xf08] sm:$0xff] %v968_v1  ;;  %v974_v4 = vld [vmem:[%s15524_s11 + $0x1e50] sm:$0xff] }
  0xdc   : > { %971 = vst [vmem:[%s15529_s12 + $0xf14] sm:$0xff] %v970_v2  ;;  %v976_v5 = vld [vmem:[%s15524_s11 + $0x1e58] sm:$0xff]  ;;  %973 = vst [vmem:[%s15529_s12 + $0xf1c] sm:$0xff] %v972_v3  ;;  %v980_v7 = vld [vmem:[%s15524_s11 + $0x1e80] sm:$0xff] }
  0xdd   : > { %975 = vst [vmem:[%s15529_s12 + $0xf28] sm:$0xff] %v974_v4  ;;  %977 = vst [vmem:[%s15529_s12 + $0xf30] sm:$0xff] %v976_v5  ;;  %v978_v6 = vld [vmem:[%s15524_s11 + $0x1e78] sm:$0xff]  ;;  %v982_v8 = vld [vmem:[%s15524_s11 + $0x1ea0] sm:$0xff] }
  0xde   : > { %979 = vst [vmem:[%s15529_s12 + $0xf3c] sm:$0xff] %v978_v6  ;;  %981 = vst [vmem:[%s15529_s12 + $0xf44] sm:$0xff] %v980_v7  ;;  %v984_v9 = vld [vmem:[%s15524_s11 + $0x1ea8] sm:$0xff]  ;;  %v988_v11 = vld [vmem:[%s15524_s11 + $0x1ed0] sm:$0xff] }
  0xdf   : > { %983 = vst [vmem:[%s15529_s12 + $0xf50] sm:$0xff] %v982_v8  ;;  %v986_v10 = vld [vmem:[%s15524_s11 + $0x1ec8] sm:$0xff]  ;;  %985 = vst [vmem:[%s15529_s12 + $0xf58] sm:$0xff] %v984_v9  ;;  %v990_v12 = vld [vmem:[%s15524_s11 + $0x1ef0] sm:$0xff] }
  0xe0   : > { %987 = vst [vmem:[%s15529_s12 + $0xf64] sm:$0xff] %v986_v10  ;;  %989 = vst [vmem:[%s15529_s12 + $0xf6c] sm:$0xff] %v988_v11  ;;  %v992_v13 = vld [vmem:[%s15524_s11 + $0x1ef8] sm:$0xff]  ;;  %v996_v15 = vld [vmem:[%s15524_s11 + $0x1f20] sm:$0xff] }
  0xe1   : > { %v994_v14 = vld [vmem:[%s15524_s11 + $0x1f18] sm:$0xff]  ;;  %991 = vst [vmem:[%s15529_s12 + $0xf78] sm:$0xff] %v990_v12  ;;  %993 = vst [vmem:[%s15529_s12 + $0xf80] sm:$0xff] %v992_v13  ;;  %v998_v16 = vld [vmem:[%s15524_s11 + $0x1f40] sm:$0xff] }
  0xe2   : > { %995 = vst [vmem:[%s15529_s12 + $0xf8c] sm:$0xff] %v994_v14  ;;  %v1000_v17 = vld [vmem:[%s15524_s11 + $0x1f48] sm:$0xff]  ;;  %997 = vst [vmem:[%s15529_s12 + $0xf94] sm:$0xff] %v996_v15  ;;  %v1004_v19 = vld [vmem:[%s15524_s11 + $0x1f70] sm:$0xff] }
  0xe3   : > { %999 = vst [vmem:[%s15529_s12 + $0xfa0] sm:$0xff] %v998_v16  ;;  %1001 = vst [vmem:[%s15529_s12 + $0xfa8] sm:$0xff] %v1000_v17  ;;  %v1002_v18 = vld [vmem:[%s15524_s11 + $0x1f68] sm:$0xff]  ;;  %v1006_v20 = vld [vmem:[%s15524_s11 + $0x1f90] sm:$0xff] }
  0xe4   : > { %1003 = vst [vmem:[%s15529_s12 + $0xfb4] sm:$0xff] %v1002_v18  ;;  %1005 = vst [vmem:[%s15529_s12 + $0xfbc] sm:$0xff] %v1004_v19  ;;  %v1008_v21 = vld [vmem:[%s15524_s11 + $0x1f98] sm:$0xff]  ;;  %v1012_v23 = vld [vmem:[%s15524_s11 + $0x1fc0] sm:$0xff] }
  0xe5   : > { %1007 = vst [vmem:[%s15529_s12 + $0xfc8] sm:$0xff] %v1006_v20  ;;  %v1010_v22 = vld [vmem:[%s15524_s11 + $0x1fb8] sm:$0xff]  ;;  %1009 = vst [vmem:[%s15529_s12 + $0xfd0] sm:$0xff] %v1008_v21  ;;  %v1014_v24 = vld [vmem:[%s15524_s11 + $0x1fe0] sm:$0xff] }
  0xe6   : > { %1011 = vst [vmem:[%s15529_s12 + $0xfdc] sm:$0xff] %v1010_v22  ;;  %1013 = vst [vmem:[%s15529_s12 + $0xfe4] sm:$0xff] %v1012_v23  ;;  %v1016_v25 = vld [vmem:[%s15524_s11 + $0x1fe8] sm:$0xff]  ;;  %v1020_v27 = vld [vmem:[%s15524_s11 + $0x2010] sm:$0xff] }
  0xe7   : > { %v1018_v26 = vld [vmem:[%s15524_s11 + $0x2008] sm:$0xff]  ;;  %1015 = vst [vmem:[%s15529_s12 + $0xff0] sm:$0xff] %v1014_v24  ;;  %1017 = vst [vmem:[%s15529_s12 + $0xff8] sm:$0xff] %v1016_v25  ;;  %v1022_v28 = vld [vmem:[%s15524_s11 + $0x2030] sm:$0xff] }
  0xe8   : > { %1019 = vst [vmem:[%s15529_s12 + $0x1004] sm:$0xff] %v1018_v26  ;;  %v1024_v29 = vld [vmem:[%s15524_s11 + $0x2038] sm:$0xff]  ;;  %1021 = vst [vmem:[%s15529_s12 + $0x100c] sm:$0xff] %v1020_v27  ;;  %v1028_v31 = vld [vmem:[%s15524_s11 + $0x2060] sm:$0xff] }
  0xe9   : > { %1023 = vst [vmem:[%s15529_s12 + $0x1018] sm:$0xff] %v1022_v28  ;;  %1025 = vst [vmem:[%s15529_s12 + $0x1020] sm:$0xff] %v1024_v29  ;;  %v1026_v30 = vld [vmem:[%s15524_s11 + $0x2058] sm:$0xff]  ;;  %v1030_v32 = vld [vmem:[%s15524_s11 + $0x2080] sm:$0xff] }
  0xea   : > { %1027 = vst [vmem:[%s15529_s12 + $0x102c] sm:$0xff] %v1026_v30  ;;  %1029 = vst [vmem:[%s15529_s12 + $0x1034] sm:$0xff] %v1028_v31  ;;  %v1032_v33 = vld [vmem:[%s15524_s11 + $0x2088] sm:$0xff]  ;;  %v1036_v35 = vld [vmem:[%s15524_s11 + $0x20b0] sm:$0xff] }
  0xeb   : > { %1031 = vst [vmem:[%s15529_s12 + $0x1040] sm:$0xff] %v1030_v32  ;;  %v1034_v34 = vld [vmem:[%s15524_s11 + $0x20a8] sm:$0xff]  ;;  %1033 = vst [vmem:[%s15529_s12 + $0x1048] sm:$0xff] %v1032_v33  ;;  %v1038_v36 = vld [vmem:[%s15524_s11 + $0x20d0] sm:$0xff] }
  0xec   : > { %1035 = vst [vmem:[%s15529_s12 + $0x1054] sm:$0xff] %v1034_v34  ;;  %1037 = vst [vmem:[%s15529_s12 + $0x105c] sm:$0xff] %v1036_v35  ;;  %v1040_v37 = vld [vmem:[%s15524_s11 + $0x20d8] sm:$0xff]  ;;  %v1044_v39 = vld [vmem:[%s15524_s11 + $0x2100] sm:$0xff] }
  0xed   : > { %v1042_v38 = vld [vmem:[%s15524_s11 + $0x20f8] sm:$0xff]  ;;  %1039 = vst [vmem:[%s15529_s12 + $0x1068] sm:$0xff] %v1038_v36  ;;  %1041 = vst [vmem:[%s15529_s12 + $0x1070] sm:$0xff] %v1040_v37  ;;  %v1046_v40 = vld [vmem:[%s15524_s11 + $0x2120] sm:$0xff] }
  0xee   : > { %1043 = vst [vmem:[%s15529_s12 + $0x107c] sm:$0xff] %v1042_v38  ;;  %v1048_v41 = vld [vmem:[%s15524_s11 + $0x2128] sm:$0xff]  ;;  %1045 = vst [vmem:[%s15529_s12 + $0x1084] sm:$0xff] %v1044_v39  ;;  %v1052_v43 = vld [vmem:[%s15524_s11 + $0x2150] sm:$0xff] }
  0xef   : > { %1047 = vst [vmem:[%s15529_s12 + $0x1090] sm:$0xff] %v1046_v40  ;;  %1049 = vst [vmem:[%s15529_s12 + $0x1098] sm:$0xff] %v1048_v41  ;;  %v1050_v42 = vld [vmem:[%s15524_s11 + $0x2148] sm:$0xff]  ;;  %v1054_v44 = vld [vmem:[%s15524_s11 + $0x2170] sm:$0xff] }
  0xf0   : > { %1051 = vst [vmem:[%s15529_s12 + $0x10a4] sm:$0xff] %v1050_v42  ;;  %1053 = vst [vmem:[%s15529_s12 + $0x10ac] sm:$0xff] %v1052_v43  ;;  %v1056_v45 = vld [vmem:[%s15524_s11 + $0x2178] sm:$0xff]  ;;  %v1060_v47 = vld [vmem:[%s15524_s11 + $0x21a0] sm:$0xff] }
  0xf1   : > { %1055 = vst [vmem:[%s15529_s12 + $0x10b8] sm:$0xff] %v1054_v44  ;;  %v1058_v46 = vld [vmem:[%s15524_s11 + $0x2198] sm:$0xff]  ;;  %1057 = vst [vmem:[%s15529_s12 + $0x10c0] sm:$0xff] %v1056_v45  ;;  %v1062_v48 = vld [vmem:[%s15524_s11 + $0x21c0] sm:$0xff] }
  0xf2   : > { %1059 = vst [vmem:[%s15529_s12 + $0x10cc] sm:$0xff] %v1058_v46  ;;  %1061 = vst [vmem:[%s15529_s12 + $0x10d4] sm:$0xff] %v1060_v47  ;;  %v1064_v49 = vld [vmem:[%s15524_s11 + $0x21c8] sm:$0xff]  ;;  %v1068_v51 = vld [vmem:[%s15524_s11 + $0x21f0] sm:$0xff] }
  0xf3   : > { %v1066_v50 = vld [vmem:[%s15524_s11 + $0x21e8] sm:$0xff]  ;;  %1063 = vst [vmem:[%s15529_s12 + $0x10e0] sm:$0xff] %v1062_v48  ;;  %1065 = vst [vmem:[%s15529_s12 + $0x10e8] sm:$0xff] %v1064_v49  ;;  %v1070_v52 = vld [vmem:[%s15524_s11 + $0x2210] sm:$0xff] }
  0xf4   : > { %1067 = vst [vmem:[%s15529_s12 + $0x10f4] sm:$0xff] %v1066_v50  ;;  %v1072_v53 = vld [vmem:[%s15524_s11 + $0x2218] sm:$0xff]  ;;  %1069 = vst [vmem:[%s15529_s12 + $0x10fc] sm:$0xff] %v1068_v51  ;;  %v1076_v55 = vld [vmem:[%s15524_s11 + $0x2240] sm:$0xff] }
  0xf5   : > { %1071 = vst [vmem:[%s15529_s12 + $0x1108] sm:$0xff] %v1070_v52  ;;  %1073 = vst [vmem:[%s15529_s12 + $0x1110] sm:$0xff] %v1072_v53  ;;  %v1074_v54 = vld [vmem:[%s15524_s11 + $0x2238] sm:$0xff]  ;;  %v1078_v56 = vld [vmem:[%s15524_s11 + $0x2260] sm:$0xff] }
  0xf6   : > { %1075 = vst [vmem:[%s15529_s12 + $0x111c] sm:$0xff] %v1074_v54  ;;  %1077 = vst [vmem:[%s15529_s12 + $0x1124] sm:$0xff] %v1076_v55  ;;  %v1080_v57 = vld [vmem:[%s15524_s11 + $0x2268] sm:$0xff]  ;;  %v1084_v59 = vld [vmem:[%s15524_s11 + $0x2290] sm:$0xff] }
  0xf7   : > { %1079 = vst [vmem:[%s15529_s12 + $0x1130] sm:$0xff] %v1078_v56  ;;  %v1082_v58 = vld [vmem:[%s15524_s11 + $0x2288] sm:$0xff]  ;;  %1081 = vst [vmem:[%s15529_s12 + $0x1138] sm:$0xff] %v1080_v57  ;;  %v1086_v60 = vld [vmem:[%s15524_s11 + $0x22b0] sm:$0xff] }
  0xf8   : > { %1083 = vst [vmem:[%s15529_s12 + $0x1144] sm:$0xff] %v1082_v58  ;;  %1085 = vst [vmem:[%s15529_s12 + $0x114c] sm:$0xff] %v1084_v59  ;;  %v1088_v61 = vld [vmem:[%s15524_s11 + $0x22b8] sm:$0xff]  ;;  %v1092_v63 = vld [vmem:[%s15524_s11 + $0x22e0] sm:$0xff] }
  0xf9   : > { %v1090_v62 = vld [vmem:[%s15524_s11 + $0x22d8] sm:$0xff]  ;;  %1087 = vst [vmem:[%s15529_s12 + $0x1158] sm:$0xff] %v1086_v60  ;;  %1089 = vst [vmem:[%s15529_s12 + $0x1160] sm:$0xff] %v1088_v61  ;;  %v1094_v0 = vld [vmem:[%s15524_s11 + $0x2300] sm:$0xff] }
  0xfa   : > { %1091 = vst [vmem:[%s15529_s12 + $0x116c] sm:$0xff] %v1090_v62  ;;  %v1096_v1 = vld [vmem:[%s15524_s11 + $0x2308] sm:$0xff]  ;;  %1093 = vst [vmem:[%s15529_s12 + $0x1174] sm:$0xff] %v1092_v63  ;;  %v1100_v3 = vld [vmem:[%s15524_s11 + $0x2330] sm:$0xff] }
  0xfb   : > { %1095 = vst [vmem:[%s15529_s12 + $0x1180] sm:$0xff] %v1094_v0  ;;  %1097 = vst [vmem:[%s15529_s12 + $0x1188] sm:$0xff] %v1096_v1  ;;  %v1098_v2 = vld [vmem:[%s15524_s11 + $0x2328] sm:$0xff]  ;;  %v1102_v4 = vld [vmem:[%s15524_s11 + $0x2350] sm:$0xff] }
  0xfc   : > { %1099 = vst [vmem:[%s15529_s12 + $0x1194] sm:$0xff] %v1098_v2  ;;  %1101 = vst [vmem:[%s15529_s12 + $0x119c] sm:$0xff] %v1100_v3  ;;  %v1104_v5 = vld [vmem:[%s15524_s11 + $0x2358] sm:$0xff]  ;;  %v1108_v7 = vld [vmem:[%s15524_s11 + $0x2380] sm:$0xff] }
  0xfd   : > { %1103 = vst [vmem:[%s15529_s12 + $0x11a8] sm:$0xff] %v1102_v4  ;;  %v1106_v6 = vld [vmem:[%s15524_s11 + $0x2378] sm:$0xff]  ;;  %1105 = vst [vmem:[%s15529_s12 + $0x11b0] sm:$0xff] %v1104_v5  ;;  %v1110_v8 = vld [vmem:[%s15524_s11 + $0x23a0] sm:$0xff] }
  0xfe   : > { %1107 = vst [vmem:[%s15529_s12 + $0x11bc] sm:$0xff] %v1106_v6  ;;  %1109 = vst [vmem:[%s15529_s12 + $0x11c4] sm:$0xff] %v1108_v7  ;;  %v1112_v9 = vld [vmem:[%s15524_s11 + $0x23a8] sm:$0xff]  ;;  %v1116_v11 = vld [vmem:[%s15524_s11 + $0x23d0] sm:$0xff] }
  0xff   : > { %v1114_v10 = vld [vmem:[%s15524_s11 + $0x23c8] sm:$0xff]  ;;  %1111 = vst [vmem:[%s15529_s12 + $0x11d0] sm:$0xff] %v1110_v8  ;;  %1113 = vst [vmem:[%s15529_s12 + $0x11d8] sm:$0xff] %v1112_v9  ;;  %v1118_v12 = vld [vmem:[%s15524_s11 + $0x23f0] sm:$0xff] }
 0x100   : > { %1115 = vst [vmem:[%s15529_s12 + $0x11e4] sm:$0xff] %v1114_v10  ;;  %v1120_v13 = vld [vmem:[%s15524_s11 + $0x23f8] sm:$0xff]  ;;  %1117 = vst [vmem:[%s15529_s12 + $0x11ec] sm:$0xff] %v1116_v11  ;;  %v1124_v15 = vld [vmem:[%s15524_s11 + $0x2420] sm:$0xff] }
 0x101   : > { %1119 = vst [vmem:[%s15529_s12 + $0x11f8] sm:$0xff] %v1118_v12  ;;  %1121 = vst [vmem:[%s15529_s12 + $0x1200] sm:$0xff] %v1120_v13  ;;  %v1122_v14 = vld [vmem:[%s15524_s11 + $0x2418] sm:$0xff]  ;;  %v1126_v16 = vld [vmem:[%s15524_s11 + $0x2440] sm:$0xff] }
 0x102   : > { %1123 = vst [vmem:[%s15529_s12 + $0x120c] sm:$0xff] %v1122_v14  ;;  %1125 = vst [vmem:[%s15529_s12 + $0x1214] sm:$0xff] %v1124_v15  ;;  %v1128_v17 = vld [vmem:[%s15524_s11 + $0x2448] sm:$0xff]  ;;  %v1132_v19 = vld [vmem:[%s15524_s11 + $0x2470] sm:$0xff] }
 0x103   : > { %1127 = vst [vmem:[%s15529_s12 + $0x1220] sm:$0xff] %v1126_v16  ;;  %v1130_v18 = vld [vmem:[%s15524_s11 + $0x2468] sm:$0xff]  ;;  %1129 = vst [vmem:[%s15529_s12 + $0x1228] sm:$0xff] %v1128_v17  ;;  %v1134_v20 = vld [vmem:[%s15524_s11 + $0x2490] sm:$0xff] }
 0x104   : > { %1131 = vst [vmem:[%s15529_s12 + $0x1234] sm:$0xff] %v1130_v18  ;;  %1133 = vst [vmem:[%s15529_s12 + $0x123c] sm:$0xff] %v1132_v19  ;;  %v1136_v21 = vld [vmem:[%s15524_s11 + $0x2498] sm:$0xff]  ;;  %v1140_v23 = vld [vmem:[%s15524_s11 + $0x24c0] sm:$0xff] }
 0x105   : > { %v1138_v22 = vld [vmem:[%s15524_s11 + $0x24b8] sm:$0xff]  ;;  %1135 = vst [vmem:[%s15529_s12 + $0x1248] sm:$0xff] %v1134_v20  ;;  %1137 = vst [vmem:[%s15529_s12 + $0x1250] sm:$0xff] %v1136_v21  ;;  %v1142_v24 = vld [vmem:[%s15524_s11 + $0x24e0] sm:$0xff] }
 0x106   : > { %1139 = vst [vmem:[%s15529_s12 + $0x125c] sm:$0xff] %v1138_v22  ;;  %v1144_v25 = vld [vmem:[%s15524_s11 + $0x24e8] sm:$0xff]  ;;  %1141 = vst [vmem:[%s15529_s12 + $0x1264] sm:$0xff] %v1140_v23  ;;  %v1148_v27 = vld [vmem:[%s15524_s11 + $0x2510] sm:$0xff] }
 0x107   : > { %1143 = vst [vmem:[%s15529_s12 + $0x1270] sm:$0xff] %v1142_v24  ;;  %1145 = vst [vmem:[%s15529_s12 + $0x1278] sm:$0xff] %v1144_v25  ;;  %v1146_v26 = vld [vmem:[%s15524_s11 + $0x2508] sm:$0xff]  ;;  %v1150_v28 = vld [vmem:[%s15524_s11 + $0x2530] sm:$0xff] }
 0x108   : > { %1147 = vst [vmem:[%s15529_s12 + $0x1284] sm:$0xff] %v1146_v26  ;;  %1149 = vst [vmem:[%s15529_s12 + $0x128c] sm:$0xff] %v1148_v27  ;;  %v1152_v29 = vld [vmem:[%s15524_s11 + $0x2538] sm:$0xff]  ;;  %v1156_v31 = vld [vmem:[%s15524_s11 + $0x2560] sm:$0xff] }
 0x109   : > { %1151 = vst [vmem:[%s15529_s12 + $0x1298] sm:$0xff] %v1150_v28  ;;  %v1154_v30 = vld [vmem:[%s15524_s11 + $0x2558] sm:$0xff]  ;;  %1153 = vst [vmem:[%s15529_s12 + $0x12a0] sm:$0xff] %v1152_v29  ;;  %v1158_v32 = vld [vmem:[%s15524_s11 + $0x2580] sm:$0xff] }
 0x10a   : > { %1155 = vst [vmem:[%s15529_s12 + $0x12ac] sm:$0xff] %v1154_v30  ;;  %1157 = vst [vmem:[%s15529_s12 + $0x12b4] sm:$0xff] %v1156_v31  ;;  %v1160_v33 = vld [vmem:[%s15524_s11 + $0x2588] sm:$0xff]  ;;  %v1164_v35 = vld [vmem:[%s15524_s11 + $0x25b0] sm:$0xff] }
 0x10b   : > { %v1162_v34 = vld [vmem:[%s15524_s11 + $0x25a8] sm:$0xff]  ;;  %1159 = vst [vmem:[%s15529_s12 + $0x12c0] sm:$0xff] %v1158_v32  ;;  %1161 = vst [vmem:[%s15529_s12 + $0x12c8] sm:$0xff] %v1160_v33  ;;  %v1166_v36 = vld [vmem:[%s15524_s11 + $0x25d0] sm:$0xff] }
 0x10c   : > { %1163 = vst [vmem:[%s15529_s12 + $0x12d4] sm:$0xff] %v1162_v34  ;;  %v1168_v37 = vld [vmem:[%s15524_s11 + $0x25d8] sm:$0xff]  ;;  %1165 = vst [vmem:[%s15529_s12 + $0x12dc] sm:$0xff] %v1164_v35  ;;  %v1172_v39 = vld [vmem:[%s15524_s11 + $0x2600] sm:$0xff] }
 0x10d   : > { %1167 = vst [vmem:[%s15529_s12 + $0x12e8] sm:$0xff] %v1166_v36  ;;  %1169 = vst [vmem:[%s15529_s12 + $0x12f0] sm:$0xff] %v1168_v37  ;;  %v1170_v38 = vld [vmem:[%s15524_s11 + $0x25f8] sm:$0xff]  ;;  %v1174_v40 = vld [vmem:[%s15524_s11 + $0x2620] sm:$0xff] }
 0x10e   : > { %1171 = vst [vmem:[%s15529_s12 + $0x12fc] sm:$0xff] %v1170_v38  ;;  %1173 = vst [vmem:[%s15529_s12 + $0x1304] sm:$0xff] %v1172_v39  ;;  %v1176_v41 = vld [vmem:[%s15524_s11 + $0x2628] sm:$0xff]  ;;  %v1180_v43 = vld [vmem:[%s15524_s11 + $0x2650] sm:$0xff] }
 0x10f   : > { %1175 = vst [vmem:[%s15529_s12 + $0x1310] sm:$0xff] %v1174_v40  ;;  %v1178_v42 = vld [vmem:[%s15524_s11 + $0x2648] sm:$0xff]  ;;  %1177 = vst [vmem:[%s15529_s12 + $0x1318] sm:$0xff] %v1176_v41  ;;  %v1182_v44 = vld [vmem:[%s15524_s11 + $0x2670] sm:$0xff] }
 0x110   : > { %1179 = vst [vmem:[%s15529_s12 + $0x1324] sm:$0xff] %v1178_v42  ;;  %1181 = vst [vmem:[%s15529_s12 + $0x132c] sm:$0xff] %v1180_v43  ;;  %v1184_v45 = vld [vmem:[%s15524_s11 + $0x2678] sm:$0xff]  ;;  %v1188_v47 = vld [vmem:[%s15524_s11 + $0x26a0] sm:$0xff] }
 0x111   : > { %v1186_v46 = vld [vmem:[%s15524_s11 + $0x2698] sm:$0xff]  ;;  %1183 = vst [vmem:[%s15529_s12 + $0x1338] sm:$0xff] %v1182_v44  ;;  %1185 = vst [vmem:[%s15529_s12 + $0x1340] sm:$0xff] %v1184_v45  ;;  %v1190_v48 = vld [vmem:[%s15524_s11 + $0x26c0] sm:$0xff] }
 0x112   : > { %1187 = vst [vmem:[%s15529_s12 + $0x134c] sm:$0xff] %v1186_v46  ;;  %v1192_v49 = vld [vmem:[%s15524_s11 + $0x26c8] sm:$0xff]  ;;  %1189 = vst [vmem:[%s15529_s12 + $0x1354] sm:$0xff] %v1188_v47  ;;  %v1196_v51 = vld [vmem:[%s15524_s11 + $0x26f0] sm:$0xff] }
 0x113   : > { %1191 = vst [vmem:[%s15529_s12 + $0x1360] sm:$0xff] %v1190_v48  ;;  %1193 = vst [vmem:[%s15529_s12 + $0x1368] sm:$0xff] %v1192_v49  ;;  %v1194_v50 = vld [vmem:[%s15524_s11 + $0x26e8] sm:$0xff]  ;;  %v1198_v52 = vld [vmem:[%s15524_s11 + $0x2710] sm:$0xff] }
 0x114   : > { %1195 = vst [vmem:[%s15529_s12 + $0x1374] sm:$0xff] %v1194_v50  ;;  %1197 = vst [vmem:[%s15529_s12 + $0x137c] sm:$0xff] %v1196_v51  ;;  %v1200_v53 = vld [vmem:[%s15524_s11 + $0x2718] sm:$0xff]  ;;  %v1204_v55 = vld [vmem:[%s15524_s11 + $0x2740] sm:$0xff] }
 0x115   : > { %1199 = vst [vmem:[%s15529_s12 + $0x1388] sm:$0xff] %v1198_v52  ;;  %v1202_v54 = vld [vmem:[%s15524_s11 + $0x2738] sm:$0xff]  ;;  %1201 = vst [vmem:[%s15529_s12 + $0x1390] sm:$0xff] %v1200_v53  ;;  %v1206_v56 = vld [vmem:[%s15524_s11 + $0x2760] sm:$0xff] }
 0x116   : > { %1203 = vst [vmem:[%s15529_s12 + $0x139c] sm:$0xff] %v1202_v54  ;;  %1205 = vst [vmem:[%s15529_s12 + $0x13a4] sm:$0xff] %v1204_v55  ;;  %v1208_v57 = vld [vmem:[%s15524_s11 + $0x2768] sm:$0xff]  ;;  %v1212_v59 = vld [vmem:[%s15524_s11 + $0x2790] sm:$0xff] }
 0x117   : > { %v1210_v58 = vld [vmem:[%s15524_s11 + $0x2788] sm:$0xff]  ;;  %1207 = vst [vmem:[%s15529_s12 + $0x13b0] sm:$0xff] %v1206_v56  ;;  %1209 = vst [vmem:[%s15529_s12 + $0x13b8] sm:$0xff] %v1208_v57  ;;  %v1214_v60 = vld [vmem:[%s15524_s11 + $0x27b0] sm:$0xff] }
 0x118   : > { %1211 = vst [vmem:[%s15529_s12 + $0x13c4] sm:$0xff] %v1210_v58  ;;  %v1216_v61 = vld [vmem:[%s15524_s11 + $0x27b8] sm:$0xff]  ;;  %1213 = vst [vmem:[%s15529_s12 + $0x13cc] sm:$0xff] %v1212_v59  ;;  %v1220_v63 = vld [vmem:[%s15524_s11 + $0x27e0] sm:$0xff] }
 0x119   : > { %1215 = vst [vmem:[%s15529_s12 + $0x13d8] sm:$0xff] %v1214_v60  ;;  %1217 = vst [vmem:[%s15529_s12 + $0x13e0] sm:$0xff] %v1216_v61  ;;  %v1218_v62 = vld [vmem:[%s15524_s11 + $0x27d8] sm:$0xff]  ;;  %v1222_v0 = vld [vmem:[%s15524_s11 + $0x2800] sm:$0xff] }
 0x11a   : > { %1219 = vst [vmem:[%s15529_s12 + $0x13ec] sm:$0xff] %v1218_v62  ;;  %1221 = vst [vmem:[%s15529_s12 + $0x13f4] sm:$0xff] %v1220_v63  ;;  %v1224_v1 = vld [vmem:[%s15524_s11 + $0x2808] sm:$0xff]  ;;  %v1228_v3 = vld [vmem:[%s15524_s11 + $0x2830] sm:$0xff] }
 0x11b   : > { %1223 = vst [vmem:[%s15529_s12 + $0x1400] sm:$0xff] %v1222_v0  ;;  %v1226_v2 = vld [vmem:[%s15524_s11 + $0x2828] sm:$0xff]  ;;  %1225 = vst [vmem:[%s15529_s12 + $0x1408] sm:$0xff] %v1224_v1  ;;  %v1230_v4 = vld [vmem:[%s15524_s11 + $0x2850] sm:$0xff] }
 0x11c   : > { %1227 = vst [vmem:[%s15529_s12 + $0x1414] sm:$0xff] %v1226_v2  ;;  %1229 = vst [vmem:[%s15529_s12 + $0x141c] sm:$0xff] %v1228_v3  ;;  %v1232_v5 = vld [vmem:[%s15524_s11 + $0x2858] sm:$0xff]  ;;  %v1236_v7 = vld [vmem:[%s15524_s11 + $0x2880] sm:$0xff] }
 0x11d   : > { %v1234_v6 = vld [vmem:[%s15524_s11 + $0x2878] sm:$0xff]  ;;  %1231 = vst [vmem:[%s15529_s12 + $0x1428] sm:$0xff] %v1230_v4  ;;  %1233 = vst [vmem:[%s15529_s12 + $0x1430] sm:$0xff] %v1232_v5  ;;  %v1238_v8 = vld [vmem:[%s15524_s11 + $0x28a0] sm:$0xff] }
 0x11e   : > { %1235 = vst [vmem:[%s15529_s12 + $0x143c] sm:$0xff] %v1234_v6  ;;  %v1240_v9 = vld [vmem:[%s15524_s11 + $0x28a8] sm:$0xff]  ;;  %1237 = vst [vmem:[%s15529_s12 + $0x1444] sm:$0xff] %v1236_v7  ;;  %v1244_v11 = vld [vmem:[%s15524_s11 + $0x28d0] sm:$0xff] }
 0x11f   : > { %1239 = vst [vmem:[%s15529_s12 + $0x1450] sm:$0xff] %v1238_v8  ;;  %1241 = vst [vmem:[%s15529_s12 + $0x1458] sm:$0xff] %v1240_v9  ;;  %v1242_v10 = vld [vmem:[%s15524_s11 + $0x28c8] sm:$0xff]  ;;  %v1246_v12 = vld [vmem:[%s15524_s11 + $0x28f0] sm:$0xff] }
 0x120   : > { %1243 = vst [vmem:[%s15529_s12 + $0x1464] sm:$0xff] %v1242_v10  ;;  %1245 = vst [vmem:[%s15529_s12 + $0x146c] sm:$0xff] %v1244_v11  ;;  %v1248_v13 = vld [vmem:[%s15524_s11 + $0x28f8] sm:$0xff]  ;;  %v1252_v15 = vld [vmem:[%s15524_s11 + $0x2920] sm:$0xff] }
 0x121   : > { %1247 = vst [vmem:[%s15529_s12 + $0x1478] sm:$0xff] %v1246_v12  ;;  %v1250_v14 = vld [vmem:[%s15524_s11 + $0x2918] sm:$0xff]  ;;  %1249 = vst [vmem:[%s15529_s12 + $0x1480] sm:$0xff] %v1248_v13  ;;  %v1254_v16 = vld [vmem:[%s15524_s11 + $0x2940] sm:$0xff] }
 0x122   : > { %1251 = vst [vmem:[%s15529_s12 + $0x148c] sm:$0xff] %v1250_v14  ;;  %1253 = vst [vmem:[%s15529_s12 + $0x1494] sm:$0xff] %v1252_v15  ;;  %v1256_v17 = vld [vmem:[%s15524_s11 + $0x2948] sm:$0xff]  ;;  %v1260_v19 = vld [vmem:[%s15524_s11 + $0x2970] sm:$0xff] }
 0x123   : > { %v1258_v18 = vld [vmem:[%s15524_s11 + $0x2968] sm:$0xff]  ;;  %1255 = vst [vmem:[%s15529_s12 + $0x14a0] sm:$0xff] %v1254_v16  ;;  %1257 = vst [vmem:[%s15529_s12 + $0x14a8] sm:$0xff] %v1256_v17  ;;  %v1262_v20 = vld [vmem:[%s15524_s11 + $0x2990] sm:$0xff] }
 0x124   : > { %1259 = vst [vmem:[%s15529_s12 + $0x14b4] sm:$0xff] %v1258_v18  ;;  %v1264_v21 = vld [vmem:[%s15524_s11 + $0x2998] sm:$0xff]  ;;  %1261 = vst [vmem:[%s15529_s12 + $0x14bc] sm:$0xff] %v1260_v19  ;;  %v1268_v23 = vld [vmem:[%s15524_s11 + $0x29c0] sm:$0xff] }
 0x125   : > { %1263 = vst [vmem:[%s15529_s12 + $0x14c8] sm:$0xff] %v1262_v20  ;;  %1265 = vst [vmem:[%s15529_s12 + $0x14d0] sm:$0xff] %v1264_v21  ;;  %v1266_v22 = vld [vmem:[%s15524_s11 + $0x29b8] sm:$0xff]  ;;  %v1270_v24 = vld [vmem:[%s15524_s11 + $0x29e0] sm:$0xff] }
 0x126   : > { %1267 = vst [vmem:[%s15529_s12 + $0x14dc] sm:$0xff] %v1266_v22  ;;  %1269 = vst [vmem:[%s15529_s12 + $0x14e4] sm:$0xff] %v1268_v23  ;;  %v1272_v25 = vld [vmem:[%s15524_s11 + $0x29e8] sm:$0xff]  ;;  %v1276_v27 = vld [vmem:[%s15524_s11 + $0x2a10] sm:$0xff] }
 0x127   : > { %1271 = vst [vmem:[%s15529_s12 + $0x14f0] sm:$0xff] %v1270_v24  ;;  %v1274_v26 = vld [vmem:[%s15524_s11 + $0x2a08] sm:$0xff]  ;;  %1273 = vst [vmem:[%s15529_s12 + $0x14f8] sm:$0xff] %v1272_v25  ;;  %v1278_v28 = vld [vmem:[%s15524_s11 + $0x2a30] sm:$0xff] }
 0x128   : > { %1275 = vst [vmem:[%s15529_s12 + $0x1504] sm:$0xff] %v1274_v26  ;;  %1277 = vst [vmem:[%s15529_s12 + $0x150c] sm:$0xff] %v1276_v27  ;;  %v1280_v29 = vld [vmem:[%s15524_s11 + $0x2a38] sm:$0xff]  ;;  %v1284_v31 = vld [vmem:[%s15524_s11 + $0x2a60] sm:$0xff] }
 0x129   : > { %v1282_v30 = vld [vmem:[%s15524_s11 + $0x2a58] sm:$0xff]  ;;  %1279 = vst [vmem:[%s15529_s12 + $0x1518] sm:$0xff] %v1278_v28  ;;  %1281 = vst [vmem:[%s15529_s12 + $0x1520] sm:$0xff] %v1280_v29  ;;  %v1286_v32 = vld [vmem:[%s15524_s11 + $0x2a80] sm:$0xff] }
 0x12a   : > { %1283 = vst [vmem:[%s15529_s12 + $0x152c] sm:$0xff] %v1282_v30  ;;  %v1288_v33 = vld [vmem:[%s15524_s11 + $0x2a88] sm:$0xff]  ;;  %1285 = vst [vmem:[%s15529_s12 + $0x1534] sm:$0xff] %v1284_v31  ;;  %v1292_v35 = vld [vmem:[%s15524_s11 + $0x2ab0] sm:$0xff] }
 0x12b   : > { %1287 = vst [vmem:[%s15529_s12 + $0x1540] sm:$0xff] %v1286_v32  ;;  %1289 = vst [vmem:[%s15529_s12 + $0x1548] sm:$0xff] %v1288_v33  ;;  %v1290_v34 = vld [vmem:[%s15524_s11 + $0x2aa8] sm:$0xff]  ;;  %v1294_v36 = vld [vmem:[%s15524_s11 + $0x2ad0] sm:$0xff] }
 0x12c   : > { %1291 = vst [vmem:[%s15529_s12 + $0x1554] sm:$0xff] %v1290_v34  ;;  %1293 = vst [vmem:[%s15529_s12 + $0x155c] sm:$0xff] %v1292_v35  ;;  %v1296_v37 = vld [vmem:[%s15524_s11 + $0x2ad8] sm:$0xff]  ;;  %v1300_v39 = vld [vmem:[%s15524_s11 + $0x2b00] sm:$0xff] }
 0x12d   : > { %1295 = vst [vmem:[%s15529_s12 + $0x1568] sm:$0xff] %v1294_v36  ;;  %v1298_v38 = vld [vmem:[%s15524_s11 + $0x2af8] sm:$0xff]  ;;  %1297 = vst [vmem:[%s15529_s12 + $0x1570] sm:$0xff] %v1296_v37  ;;  %v1302_v40 = vld [vmem:[%s15524_s11 + $0x2b20] sm:$0xff] }
 0x12e   : > { %1299 = vst [vmem:[%s15529_s12 + $0x157c] sm:$0xff] %v1298_v38  ;;  %1301 = vst [vmem:[%s15529_s12 + $0x1584] sm:$0xff] %v1300_v39  ;;  %v1304_v41 = vld [vmem:[%s15524_s11 + $0x2b28] sm:$0xff]  ;;  %v1308_v43 = vld [vmem:[%s15524_s11 + $0x2b50] sm:$0xff] }
 0x12f   : > { %v1306_v42 = vld [vmem:[%s15524_s11 + $0x2b48] sm:$0xff]  ;;  %1303 = vst [vmem:[%s15529_s12 + $0x1590] sm:$0xff] %v1302_v40  ;;  %1305 = vst [vmem:[%s15529_s12 + $0x1598] sm:$0xff] %v1304_v41  ;;  %v1310_v44 = vld [vmem:[%s15524_s11 + $0x2b70] sm:$0xff] }
 0x130   : > { %1307 = vst [vmem:[%s15529_s12 + $0x15a4] sm:$0xff] %v1306_v42  ;;  %v1312_v45 = vld [vmem:[%s15524_s11 + $0x2b78] sm:$0xff]  ;;  %1309 = vst [vmem:[%s15529_s12 + $0x15ac] sm:$0xff] %v1308_v43  ;;  %v1316_v47 = vld [vmem:[%s15524_s11 + $0x2ba0] sm:$0xff] }
 0x131   : > { %1311 = vst [vmem:[%s15529_s12 + $0x15b8] sm:$0xff] %v1310_v44  ;;  %1313 = vst [vmem:[%s15529_s12 + $0x15c0] sm:$0xff] %v1312_v45  ;;  %v1314_v46 = vld [vmem:[%s15524_s11 + $0x2b98] sm:$0xff]  ;;  %v1318_v48 = vld [vmem:[%s15524_s11 + $0x2bc0] sm:$0xff] }
 0x132   : > { %1315 = vst [vmem:[%s15529_s12 + $0x15cc] sm:$0xff] %v1314_v46  ;;  %1317 = vst [vmem:[%s15529_s12 + $0x15d4] sm:$0xff] %v1316_v47  ;;  %v1320_v49 = vld [vmem:[%s15524_s11 + $0x2bc8] sm:$0xff]  ;;  %v1324_v51 = vld [vmem:[%s15524_s11 + $0x2bf0] sm:$0xff] }
 0x133   : > { %1319 = vst [vmem:[%s15529_s12 + $0x15e0] sm:$0xff] %v1318_v48  ;;  %v1322_v50 = vld [vmem:[%s15524_s11 + $0x2be8] sm:$0xff]  ;;  %1321 = vst [vmem:[%s15529_s12 + $0x15e8] sm:$0xff] %v1320_v49  ;;  %v1326_v52 = vld [vmem:[%s15524_s11 + $0x2c10] sm:$0xff] }
 0x134   : > { %1323 = vst [vmem:[%s15529_s12 + $0x15f4] sm:$0xff] %v1322_v50  ;;  %1325 = vst [vmem:[%s15529_s12 + $0x15fc] sm:$0xff] %v1324_v51  ;;  %v1328_v53 = vld [vmem:[%s15524_s11 + $0x2c18] sm:$0xff]  ;;  %v1332_v55 = vld [vmem:[%s15524_s11 + $0x2c40] sm:$0xff] }
 0x135   : > { %v1330_v54 = vld [vmem:[%s15524_s11 + $0x2c38] sm:$0xff]  ;;  %1327 = vst [vmem:[%s15529_s12 + $0x1608] sm:$0xff] %v1326_v52  ;;  %1329 = vst [vmem:[%s15529_s12 + $0x1610] sm:$0xff] %v1328_v53  ;;  %v1334_v56 = vld [vmem:[%s15524_s11 + $0x2c60] sm:$0xff] }
 0x136   : > { %1331 = vst [vmem:[%s15529_s12 + $0x161c] sm:$0xff] %v1330_v54  ;;  %v1336_v57 = vld [vmem:[%s15524_s11 + $0x2c68] sm:$0xff]  ;;  %1333 = vst [vmem:[%s15529_s12 + $0x1624] sm:$0xff] %v1332_v55  ;;  %v1340_v59 = vld [vmem:[%s15524_s11 + $0x2c90] sm:$0xff] }
 0x137   : > { %1335 = vst [vmem:[%s15529_s12 + $0x1630] sm:$0xff] %v1334_v56  ;;  %1337 = vst [vmem:[%s15529_s12 + $0x1638] sm:$0xff] %v1336_v57  ;;  %v1338_v58 = vld [vmem:[%s15524_s11 + $0x2c88] sm:$0xff]  ;;  %v1342_v60 = vld [vmem:[%s15524_s11 + $0x2cb0] sm:$0xff] }
 0x138   : > { %1339 = vst [vmem:[%s15529_s12 + $0x1644] sm:$0xff] %v1338_v58  ;;  %1341 = vst [vmem:[%s15529_s12 + $0x164c] sm:$0xff] %v1340_v59  ;;  %v1344_v61 = vld [vmem:[%s15524_s11 + $0x2cb8] sm:$0xff]  ;;  %v1348_v63 = vld [vmem:[%s15524_s11 + $0x2ce0] sm:$0xff] }
 0x139   : > { %1343 = vst [vmem:[%s15529_s12 + $0x1658] sm:$0xff] %v1342_v60  ;;  %v1346_v62 = vld [vmem:[%s15524_s11 + $0x2cd8] sm:$0xff]  ;;  %1345 = vst [vmem:[%s15529_s12 + $0x1660] sm:$0xff] %v1344_v61  ;;  %v1350_v0 = vld [vmem:[%s15524_s11 + $0x2d00] sm:$0xff] }
 0x13a   : > { %1347 = vst [vmem:[%s15529_s12 + $0x166c] sm:$0xff] %v1346_v62  ;;  %1349 = vst [vmem:[%s15529_s12 + $0x1674] sm:$0xff] %v1348_v63  ;;  %v1352_v1 = vld [vmem:[%s15524_s11 + $0x2d08] sm:$0xff]  ;;  %v1356_v3 = vld [vmem:[%s15524_s11 + $0x2d30] sm:$0xff] }
 0x13b   : > { %v1354_v2 = vld [vmem:[%s15524_s11 + $0x2d28] sm:$0xff]  ;;  %1351 = vst [vmem:[%s15529_s12 + $0x1680] sm:$0xff] %v1350_v0  ;;  %1353 = vst [vmem:[%s15529_s12 + $0x1688] sm:$0xff] %v1352_v1  ;;  %v1358_v4 = vld [vmem:[%s15524_s11 + $0x2d50] sm:$0xff] }
 0x13c   : > { %1355 = vst [vmem:[%s15529_s12 + $0x1694] sm:$0xff] %v1354_v2  ;;  %v1360_v5 = vld [vmem:[%s15524_s11 + $0x2d58] sm:$0xff]  ;;  %1357 = vst [vmem:[%s15529_s12 + $0x169c] sm:$0xff] %v1356_v3  ;;  %v1364_v7 = vld [vmem:[%s15524_s11 + $0x2d80] sm:$0xff] }
 0x13d   : > { %1359 = vst [vmem:[%s15529_s12 + $0x16a8] sm:$0xff] %v1358_v4  ;;  %1361 = vst [vmem:[%s15529_s12 + $0x16b0] sm:$0xff] %v1360_v5  ;;  %v1362_v6 = vld [vmem:[%s15524_s11 + $0x2d78] sm:$0xff]  ;;  %v1366_v8 = vld [vmem:[%s15524_s11 + $0x2da0] sm:$0xff] }
 0x13e   : > { %1363 = vst [vmem:[%s15529_s12 + $0x16bc] sm:$0xff] %v1362_v6  ;;  %1365 = vst [vmem:[%s15529_s12 + $0x16c4] sm:$0xff] %v1364_v7  ;;  %v1368_v9 = vld [vmem:[%s15524_s11 + $0x2da8] sm:$0xff]  ;;  %v1372_v11 = vld [vmem:[%s15524_s11 + $0x2dd0] sm:$0xff] }
 0x13f   : > { %1367 = vst [vmem:[%s15529_s12 + $0x16d0] sm:$0xff] %v1366_v8  ;;  %v1370_v10 = vld [vmem:[%s15524_s11 + $0x2dc8] sm:$0xff]  ;;  %1369 = vst [vmem:[%s15529_s12 + $0x16d8] sm:$0xff] %v1368_v9  ;;  %v1374_v12 = vld [vmem:[%s15524_s11 + $0x2df0] sm:$0xff] }
 0x140   : > { %1371 = vst [vmem:[%s15529_s12 + $0x16e4] sm:$0xff] %v1370_v10  ;;  %1373 = vst [vmem:[%s15529_s12 + $0x16ec] sm:$0xff] %v1372_v11  ;;  %v1376_v13 = vld [vmem:[%s15524_s11 + $0x2df8] sm:$0xff]  ;;  %v1380_v15 = vld [vmem:[%s15524_s11 + $0x2e20] sm:$0xff] }
 0x141   : > { %v1378_v14 = vld [vmem:[%s15524_s11 + $0x2e18] sm:$0xff]  ;;  %1375 = vst [vmem:[%s15529_s12 + $0x16f8] sm:$0xff] %v1374_v12  ;;  %1377 = vst [vmem:[%s15529_s12 + $0x1700] sm:$0xff] %v1376_v13  ;;  %v1382_v16 = vld [vmem:[%s15524_s11 + $0x2e40] sm:$0xff] }
 0x142   : > { %1379 = vst [vmem:[%s15529_s12 + $0x170c] sm:$0xff] %v1378_v14  ;;  %v1384_v17 = vld [vmem:[%s15524_s11 + $0x2e48] sm:$0xff]  ;;  %1381 = vst [vmem:[%s15529_s12 + $0x1714] sm:$0xff] %v1380_v15  ;;  %v1388_v19 = vld [vmem:[%s15524_s11 + $0x2e70] sm:$0xff] }
 0x143   : > { %1383 = vst [vmem:[%s15529_s12 + $0x1720] sm:$0xff] %v1382_v16  ;;  %1385 = vst [vmem:[%s15529_s12 + $0x1728] sm:$0xff] %v1384_v17  ;;  %v1386_v18 = vld [vmem:[%s15524_s11 + $0x2e68] sm:$0xff]  ;;  %v1390_v20 = vld [vmem:[%s15524_s11 + $0x2e90] sm:$0xff] }
 0x144   : > { %1387 = vst [vmem:[%s15529_s12 + $0x1734] sm:$0xff] %v1386_v18  ;;  %1389 = vst [vmem:[%s15529_s12 + $0x173c] sm:$0xff] %v1388_v19  ;;  %v1392_v21 = vld [vmem:[%s15524_s11 + $0x2e98] sm:$0xff]  ;;  %v1396_v23 = vld [vmem:[%s15524_s11 + $0x2ec0] sm:$0xff] }
 0x145   : > { %1391 = vst [vmem:[%s15529_s12 + $0x1748] sm:$0xff] %v1390_v20  ;;  %v1394_v22 = vld [vmem:[%s15524_s11 + $0x2eb8] sm:$0xff]  ;;  %1393 = vst [vmem:[%s15529_s12 + $0x1750] sm:$0xff] %v1392_v21  ;;  %v1398_v24 = vld [vmem:[%s15524_s11 + $0x2ee0] sm:$0xff] }
 0x146   : > { %1395 = vst [vmem:[%s15529_s12 + $0x175c] sm:$0xff] %v1394_v22  ;;  %1397 = vst [vmem:[%s15529_s12 + $0x1764] sm:$0xff] %v1396_v23  ;;  %v1400_v25 = vld [vmem:[%s15524_s11 + $0x2ee8] sm:$0xff]  ;;  %v1404_v27 = vld [vmem:[%s15524_s11 + $0x2f10] sm:$0xff] }
 0x147   : > { %v1402_v26 = vld [vmem:[%s15524_s11 + $0x2f08] sm:$0xff]  ;;  %1399 = vst [vmem:[%s15529_s12 + $0x1770] sm:$0xff] %v1398_v24  ;;  %1401 = vst [vmem:[%s15529_s12 + $0x1778] sm:$0xff] %v1400_v25  ;;  %v1406_v28 = vld [vmem:[%s15524_s11 + $0x2f30] sm:$0xff] }
 0x148   : > { %1403 = vst [vmem:[%s15529_s12 + $0x1784] sm:$0xff] %v1402_v26  ;;  %v1408_v29 = vld [vmem:[%s15524_s11 + $0x2f38] sm:$0xff]  ;;  %1405 = vst [vmem:[%s15529_s12 + $0x178c] sm:$0xff] %v1404_v27  ;;  %v1412_v31 = vld [vmem:[%s15524_s11 + $0x2f60] sm:$0xff] }
 0x149   : > { %1407 = vst [vmem:[%s15529_s12 + $0x1798] sm:$0xff] %v1406_v28  ;;  %1409 = vst [vmem:[%s15529_s12 + $0x17a0] sm:$0xff] %v1408_v29  ;;  %v1410_v30 = vld [vmem:[%s15524_s11 + $0x2f58] sm:$0xff]  ;;  %v1414_v32 = vld [vmem:[%s15524_s11 + $0x2f80] sm:$0xff] }
 0x14a   : > { %1411 = vst [vmem:[%s15529_s12 + $0x17ac] sm:$0xff] %v1410_v30  ;;  %1413 = vst [vmem:[%s15529_s12 + $0x17b4] sm:$0xff] %v1412_v31  ;;  %v1416_v33 = vld [vmem:[%s15524_s11 + $0x2f88] sm:$0xff]  ;;  %v1420_v35 = vld [vmem:[%s15524_s11 + $0x2fb0] sm:$0xff] }
 0x14b   : > { %1415 = vst [vmem:[%s15529_s12 + $0x17c0] sm:$0xff] %v1414_v32  ;;  %v1418_v34 = vld [vmem:[%s15524_s11 + $0x2fa8] sm:$0xff]  ;;  %1417 = vst [vmem:[%s15529_s12 + $0x17c8] sm:$0xff] %v1416_v33  ;;  %v1422_v36 = vld [vmem:[%s15524_s11 + $0x2fd0] sm:$0xff] }
 0x14c   : > { %1419 = vst [vmem:[%s15529_s12 + $0x17d4] sm:$0xff] %v1418_v34  ;;  %1421 = vst [vmem:[%s15529_s12 + $0x17dc] sm:$0xff] %v1420_v35  ;;  %v1424_v37 = vld [vmem:[%s15524_s11 + $0x2fd8] sm:$0xff]  ;;  %v1428_v39 = vld [vmem:[%s15524_s11 + $0x3000] sm:$0xff] }
 0x14d   : > { %v1426_v38 = vld [vmem:[%s15524_s11 + $0x2ff8] sm:$0xff]  ;;  %1423 = vst [vmem:[%s15529_s12 + $0x17e8] sm:$0xff] %v1422_v36  ;;  %1425 = vst [vmem:[%s15529_s12 + $0x17f0] sm:$0xff] %v1424_v37  ;;  %v1430_v40 = vld [vmem:[%s15524_s11 + $0x3020] sm:$0xff] }
 0x14e   : > { %1427 = vst [vmem:[%s15529_s12 + $0x17fc] sm:$0xff] %v1426_v38  ;;  %v1432_v41 = vld [vmem:[%s15524_s11 + $0x3028] sm:$0xff]  ;;  %1429 = vst [vmem:[%s15529_s12 + $0x1804] sm:$0xff] %v1428_v39  ;;  %v1436_v43 = vld [vmem:[%s15524_s11 + $0x3050] sm:$0xff] }
 0x14f   : > { %1431 = vst [vmem:[%s15529_s12 + $0x1810] sm:$0xff] %v1430_v40  ;;  %1433 = vst [vmem:[%s15529_s12 + $0x1818] sm:$0xff] %v1432_v41  ;;  %v1434_v42 = vld [vmem:[%s15524_s11 + $0x3048] sm:$0xff]  ;;  %v1438_v44 = vld [vmem:[%s15524_s11 + $0x3070] sm:$0xff] }
 0x150   : > { %1435 = vst [vmem:[%s15529_s12 + $0x1824] sm:$0xff] %v1434_v42  ;;  %1437 = vst [vmem:[%s15529_s12 + $0x182c] sm:$0xff] %v1436_v43  ;;  %v1440_v45 = vld [vmem:[%s15524_s11 + $0x3078] sm:$0xff]  ;;  %v1444_v47 = vld [vmem:[%s15524_s11 + $0x30a0] sm:$0xff] }
 0x151   : > { %1439 = vst [vmem:[%s15529_s12 + $0x1838] sm:$0xff] %v1438_v44  ;;  %v1442_v46 = vld [vmem:[%s15524_s11 + $0x3098] sm:$0xff]  ;;  %1441 = vst [vmem:[%s15529_s12 + $0x1840] sm:$0xff] %v1440_v45  ;;  %v1446_v48 = vld [vmem:[%s15524_s11 + $0x30c0] sm:$0xff] }
 0x152   : > { %1443 = vst [vmem:[%s15529_s12 + $0x184c] sm:$0xff] %v1442_v46  ;;  %1445 = vst [vmem:[%s15529_s12 + $0x1854] sm:$0xff] %v1444_v47  ;;  %v1448_v49 = vld [vmem:[%s15524_s11 + $0x30c8] sm:$0xff]  ;;  %v1452_v51 = vld [vmem:[%s15524_s11 + $0x30f0] sm:$0xff] }
 0x153   : > { %v1450_v50 = vld [vmem:[%s15524_s11 + $0x30e8] sm:$0xff]  ;;  %1447 = vst [vmem:[%s15529_s12 + $0x1860] sm:$0xff] %v1446_v48  ;;  %1449 = vst [vmem:[%s15529_s12 + $0x1868] sm:$0xff] %v1448_v49  ;;  %v1454_v52 = vld [vmem:[%s15524_s11 + $0x3110] sm:$0xff] }
 0x154   : > { %1451 = vst [vmem:[%s15529_s12 + $0x1874] sm:$0xff] %v1450_v50  ;;  %v1456_v53 = vld [vmem:[%s15524_s11 + $0x3118] sm:$0xff]  ;;  %1453 = vst [vmem:[%s15529_s12 + $0x187c] sm:$0xff] %v1452_v51  ;;  %v1460_v55 = vld [vmem:[%s15524_s11 + $0x3140] sm:$0xff] }
 0x155   : > { %1455 = vst [vmem:[%s15529_s12 + $0x1888] sm:$0xff] %v1454_v52  ;;  %1457 = vst [vmem:[%s15529_s12 + $0x1890] sm:$0xff] %v1456_v53  ;;  %v1458_v54 = vld [vmem:[%s15524_s11 + $0x3138] sm:$0xff]  ;;  %v1462_v56 = vld [vmem:[%s15524_s11 + $0x3160] sm:$0xff] }
 0x156   : > { %1459 = vst [vmem:[%s15529_s12 + $0x189c] sm:$0xff] %v1458_v54  ;;  %1461 = vst [vmem:[%s15529_s12 + $0x18a4] sm:$0xff] %v1460_v55  ;;  %v1464_v57 = vld [vmem:[%s15524_s11 + $0x3168] sm:$0xff]  ;;  %v1468_v59 = vld [vmem:[%s15524_s11 + $0x3190] sm:$0xff] }
 0x157   : > { %1463 = vst [vmem:[%s15529_s12 + $0x18b0] sm:$0xff] %v1462_v56  ;;  %v1466_v58 = vld [vmem:[%s15524_s11 + $0x3188] sm:$0xff]  ;;  %1465 = vst [vmem:[%s15529_s12 + $0x18b8] sm:$0xff] %v1464_v57  ;;  %v1470_v60 = vld [vmem:[%s15524_s11 + $0x31b0] sm:$0xff] }
 0x158   : > { %1467 = vst [vmem:[%s15529_s12 + $0x18c4] sm:$0xff] %v1466_v58  ;;  %1469 = vst [vmem:[%s15529_s12 + $0x18cc] sm:$0xff] %v1468_v59  ;;  %v1472_v61 = vld [vmem:[%s15524_s11 + $0x31b8] sm:$0xff]  ;;  %v1476_v63 = vld [vmem:[%s15524_s11 + $0x31e0] sm:$0xff] }
 0x159   : > { %v1474_v62 = vld [vmem:[%s15524_s11 + $0x31d8] sm:$0xff]  ;;  %1471 = vst [vmem:[%s15529_s12 + $0x18d8] sm:$0xff] %v1470_v60  ;;  %1473 = vst [vmem:[%s15529_s12 + $0x18e0] sm:$0xff] %v1472_v61  ;;  %v1478_v0 = vld [vmem:[%s15524_s11 + $0x3200] sm:$0xff] }
 0x15a   : > { %1475 = vst [vmem:[%s15529_s12 + $0x18ec] sm:$0xff] %v1474_v62  ;;  %v1480_v1 = vld [vmem:[%s15524_s11 + $0x3208] sm:$0xff]  ;;  %1477 = vst [vmem:[%s15529_s12 + $0x18f4] sm:$0xff] %v1476_v63  ;;  %v1484_v3 = vld [vmem:[%s15524_s11 + $0x3230] sm:$0xff] }
 0x15b   : > { %1479 = vst [vmem:[%s15529_s12 + $0x1900] sm:$0xff] %v1478_v0  ;;  %1481 = vst [vmem:[%s15529_s12 + $0x1908] sm:$0xff] %v1480_v1  ;;  %v1482_v2 = vld [vmem:[%s15524_s11 + $0x3228] sm:$0xff]  ;;  %v1486_v4 = vld [vmem:[%s15524_s11 + $0x3250] sm:$0xff] }
 0x15c   : > { %1483 = vst [vmem:[%s15529_s12 + $0x1914] sm:$0xff] %v1482_v2  ;;  %1485 = vst [vmem:[%s15529_s12 + $0x191c] sm:$0xff] %v1484_v3  ;;  %v1488_v5 = vld [vmem:[%s15524_s11 + $0x3258] sm:$0xff]  ;;  %v1492_v7 = vld [vmem:[%s15524_s11 + $0x3280] sm:$0xff] }
 0x15d   : > { %1487 = vst [vmem:[%s15529_s12 + $0x1928] sm:$0xff] %v1486_v4  ;;  %v1490_v6 = vld [vmem:[%s15524_s11 + $0x3278] sm:$0xff]  ;;  %1489 = vst [vmem:[%s15529_s12 + $0x1930] sm:$0xff] %v1488_v5  ;;  %v1494_v8 = vld [vmem:[%s15524_s11 + $0x32a0] sm:$0xff] }
 0x15e   : > { %1491 = vst [vmem:[%s15529_s12 + $0x193c] sm:$0xff] %v1490_v6  ;;  %1493 = vst [vmem:[%s15529_s12 + $0x1944] sm:$0xff] %v1492_v7  ;;  %v1496_v9 = vld [vmem:[%s15524_s11 + $0x32a8] sm:$0xff]  ;;  %v1500_v11 = vld [vmem:[%s15524_s11 + $0x32d0] sm:$0xff] }
 0x15f   : > { %v1498_v10 = vld [vmem:[%s15524_s11 + $0x32c8] sm:$0xff]  ;;  %1495 = vst [vmem:[%s15529_s12 + $0x1950] sm:$0xff] %v1494_v8  ;;  %1497 = vst [vmem:[%s15529_s12 + $0x1958] sm:$0xff] %v1496_v9  ;;  %v1502_v12 = vld [vmem:[%s15524_s11 + $0x32f0] sm:$0xff] }
 0x160   : > { %1499 = vst [vmem:[%s15529_s12 + $0x1964] sm:$0xff] %v1498_v10  ;;  %v1504_v13 = vld [vmem:[%s15524_s11 + $0x32f8] sm:$0xff]  ;;  %1501 = vst [vmem:[%s15529_s12 + $0x196c] sm:$0xff] %v1500_v11  ;;  %v1508_v15 = vld [vmem:[%s15524_s11 + $0x3320] sm:$0xff] }
 0x161   : > { %1503 = vst [vmem:[%s15529_s12 + $0x1978] sm:$0xff] %v1502_v12  ;;  %1505 = vst [vmem:[%s15529_s12 + $0x1980] sm:$0xff] %v1504_v13  ;;  %v1506_v14 = vld [vmem:[%s15524_s11 + $0x3318] sm:$0xff]  ;;  %v1510_v16 = vld [vmem:[%s15524_s11 + $0x3340] sm:$0xff] }
 0x162   : > { %1507 = vst [vmem:[%s15529_s12 + $0x198c] sm:$0xff] %v1506_v14  ;;  %1509 = vst [vmem:[%s15529_s12 + $0x1994] sm:$0xff] %v1508_v15  ;;  %v1512_v17 = vld [vmem:[%s15524_s11 + $0x3348] sm:$0xff]  ;;  %v1516_v19 = vld [vmem:[%s15524_s11 + $0x3370] sm:$0xff] }
 0x163   : > { %1511 = vst [vmem:[%s15529_s12 + $0x19a0] sm:$0xff] %v1510_v16  ;;  %v1514_v18 = vld [vmem:[%s15524_s11 + $0x3368] sm:$0xff]  ;;  %1513 = vst [vmem:[%s15529_s12 + $0x19a8] sm:$0xff] %v1512_v17  ;;  %v1518_v20 = vld [vmem:[%s15524_s11 + $0x3390] sm:$0xff] }
 0x164   : > { %1515 = vst [vmem:[%s15529_s12 + $0x19b4] sm:$0xff] %v1514_v18  ;;  %1517 = vst [vmem:[%s15529_s12 + $0x19bc] sm:$0xff] %v1516_v19  ;;  %v1520_v21 = vld [vmem:[%s15524_s11 + $0x3398] sm:$0xff]  ;;  %v1524_v23 = vld [vmem:[%s15524_s11 + $0x33c0] sm:$0xff] }
 0x165   : > { %v1522_v22 = vld [vmem:[%s15524_s11 + $0x33b8] sm:$0xff]  ;;  %1519 = vst [vmem:[%s15529_s12 + $0x19c8] sm:$0xff] %v1518_v20  ;;  %1521 = vst [vmem:[%s15529_s12 + $0x19d0] sm:$0xff] %v1520_v21  ;;  %v1526_v24 = vld [vmem:[%s15524_s11 + $0x33e0] sm:$0xff] }
 0x166   : > { %1523 = vst [vmem:[%s15529_s12 + $0x19dc] sm:$0xff] %v1522_v22  ;;  %v1528_v25 = vld [vmem:[%s15524_s11 + $0x33e8] sm:$0xff]  ;;  %1525 = vst [vmem:[%s15529_s12 + $0x19e4] sm:$0xff] %v1524_v23  ;;  %v1532_v27 = vld [vmem:[%s15524_s11 + $0x3410] sm:$0xff] }
 0x167   : > { %1527 = vst [vmem:[%s15529_s12 + $0x19f0] sm:$0xff] %v1526_v24  ;;  %1529 = vst [vmem:[%s15529_s12 + $0x19f8] sm:$0xff] %v1528_v25  ;;  %v1530_v26 = vld [vmem:[%s15524_s11 + $0x3408] sm:$0xff]  ;;  %v1534_v28 = vld [vmem:[%s15524_s11 + $0x3430] sm:$0xff] }
 0x168   : > { %1531 = vst [vmem:[%s15529_s12 + $0x1a04] sm:$0xff] %v1530_v26  ;;  %1533 = vst [vmem:[%s15529_s12 + $0x1a0c] sm:$0xff] %v1532_v27  ;;  %v1536_v29 = vld [vmem:[%s15524_s11 + $0x3438] sm:$0xff]  ;;  %v1540_v31 = vld [vmem:[%s15524_s11 + $0x3460] sm:$0xff] }
 0x169   : > { %1535 = vst [vmem:[%s15529_s12 + $0x1a18] sm:$0xff] %v1534_v28  ;;  %v1538_v30 = vld [vmem:[%s15524_s11 + $0x3458] sm:$0xff]  ;;  %1537 = vst [vmem:[%s15529_s12 + $0x1a20] sm:$0xff] %v1536_v29  ;;  %v1542_v32 = vld [vmem:[%s15524_s11 + $0x3480] sm:$0xff] }
 0x16a   : > { %1539 = vst [vmem:[%s15529_s12 + $0x1a2c] sm:$0xff] %v1538_v30  ;;  %1541 = vst [vmem:[%s15529_s12 + $0x1a34] sm:$0xff] %v1540_v31  ;;  %v1544_v33 = vld [vmem:[%s15524_s11 + $0x3488] sm:$0xff]  ;;  %v1548_v35 = vld [vmem:[%s15524_s11 + $0x34b0] sm:$0xff] }
 0x16b   : > { %v1546_v34 = vld [vmem:[%s15524_s11 + $0x34a8] sm:$0xff]  ;;  %1543 = vst [vmem:[%s15529_s12 + $0x1a40] sm:$0xff] %v1542_v32  ;;  %1545 = vst [vmem:[%s15529_s12 + $0x1a48] sm:$0xff] %v1544_v33  ;;  %v1550_v36 = vld [vmem:[%s15524_s11 + $0x34d0] sm:$0xff] }
 0x16c   : > { %1547 = vst [vmem:[%s15529_s12 + $0x1a54] sm:$0xff] %v1546_v34  ;;  %v1552_v37 = vld [vmem:[%s15524_s11 + $0x34d8] sm:$0xff]  ;;  %1549 = vst [vmem:[%s15529_s12 + $0x1a5c] sm:$0xff] %v1548_v35  ;;  %v1556_v39 = vld [vmem:[%s15524_s11 + $0x3500] sm:$0xff] }
 0x16d   : > { %1551 = vst [vmem:[%s15529_s12 + $0x1a68] sm:$0xff] %v1550_v36  ;;  %1553 = vst [vmem:[%s15529_s12 + $0x1a70] sm:$0xff] %v1552_v37  ;;  %v1554_v38 = vld [vmem:[%s15524_s11 + $0x34f8] sm:$0xff]  ;;  %v1558_v40 = vld [vmem:[%s15524_s11 + $0x3520] sm:$0xff] }
 0x16e   : > { %1555 = vst [vmem:[%s15529_s12 + $0x1a7c] sm:$0xff] %v1554_v38  ;;  %1557 = vst [vmem:[%s15529_s12 + $0x1a84] sm:$0xff] %v1556_v39  ;;  %v1560_v41 = vld [vmem:[%s15524_s11 + $0x3528] sm:$0xff]  ;;  %v1564_v43 = vld [vmem:[%s15524_s11 + $0x3550] sm:$0xff] }
 0x16f   : > { %1559 = vst [vmem:[%s15529_s12 + $0x1a90] sm:$0xff] %v1558_v40  ;;  %v1562_v42 = vld [vmem:[%s15524_s11 + $0x3548] sm:$0xff]  ;;  %1561 = vst [vmem:[%s15529_s12 + $0x1a98] sm:$0xff] %v1560_v41  ;;  %v1566_v44 = vld [vmem:[%s15524_s11 + $0x3570] sm:$0xff] }
 0x170   : > { %1563 = vst [vmem:[%s15529_s12 + $0x1aa4] sm:$0xff] %v1562_v42  ;;  %1565 = vst [vmem:[%s15529_s12 + $0x1aac] sm:$0xff] %v1564_v43  ;;  %v1568_v45 = vld [vmem:[%s15524_s11 + $0x3578] sm:$0xff]  ;;  %v1572_v47 = vld [vmem:[%s15524_s11 + $0x35a0] sm:$0xff] }
 0x171   : > { %v1570_v46 = vld [vmem:[%s15524_s11 + $0x3598] sm:$0xff]  ;;  %1567 = vst [vmem:[%s15529_s12 + $0x1ab8] sm:$0xff] %v1566_v44  ;;  %1569 = vst [vmem:[%s15529_s12 + $0x1ac0] sm:$0xff] %v1568_v45  ;;  %v1574_v48 = vld [vmem:[%s15524_s11 + $0x35c0] sm:$0xff] }
 0x172   : > { %1571 = vst [vmem:[%s15529_s12 + $0x1acc] sm:$0xff] %v1570_v46  ;;  %v1576_v49 = vld [vmem:[%s15524_s11 + $0x35c8] sm:$0xff]  ;;  %1573 = vst [vmem:[%s15529_s12 + $0x1ad4] sm:$0xff] %v1572_v47  ;;  %v1580_v51 = vld [vmem:[%s15524_s11 + $0x35f0] sm:$0xff] }
 0x173   : > { %1575 = vst [vmem:[%s15529_s12 + $0x1ae0] sm:$0xff] %v1574_v48  ;;  %1577 = vst [vmem:[%s15529_s12 + $0x1ae8] sm:$0xff] %v1576_v49  ;;  %v1578_v50 = vld [vmem:[%s15524_s11 + $0x35e8] sm:$0xff]  ;;  %v1582_v52 = vld [vmem:[%s15524_s11 + $0x3610] sm:$0xff] }
 0x174   : > { %1579 = vst [vmem:[%s15529_s12 + $0x1af4] sm:$0xff] %v1578_v50  ;;  %1581 = vst [vmem:[%s15529_s12 + $0x1afc] sm:$0xff] %v1580_v51  ;;  %v1584_v53 = vld [vmem:[%s15524_s11 + $0x3618] sm:$0xff]  ;;  %v1588_v55 = vld [vmem:[%s15524_s11 + $0x3640] sm:$0xff] }
 0x175   : > { %1583 = vst [vmem:[%s15529_s12 + $0x1b08] sm:$0xff] %v1582_v52  ;;  %v1586_v54 = vld [vmem:[%s15524_s11 + $0x3638] sm:$0xff]  ;;  %1585 = vst [vmem:[%s15529_s12 + $0x1b10] sm:$0xff] %v1584_v53  ;;  %v1590_v56 = vld [vmem:[%s15524_s11 + $0x3660] sm:$0xff] }
 0x176   : > { %1587 = vst [vmem:[%s15529_s12 + $0x1b1c] sm:$0xff] %v1586_v54  ;;  %1589 = vst [vmem:[%s15529_s12 + $0x1b24] sm:$0xff] %v1588_v55  ;;  %v1592_v57 = vld [vmem:[%s15524_s11 + $0x3668] sm:$0xff]  ;;  %v1596_v59 = vld [vmem:[%s15524_s11 + $0x3690] sm:$0xff] }
 0x177   : > { %v1594_v58 = vld [vmem:[%s15524_s11 + $0x3688] sm:$0xff]  ;;  %1591 = vst [vmem:[%s15529_s12 + $0x1b30] sm:$0xff] %v1590_v56  ;;  %1593 = vst [vmem:[%s15529_s12 + $0x1b38] sm:$0xff] %v1592_v57  ;;  %v1598_v60 = vld [vmem:[%s15524_s11 + $0x36b0] sm:$0xff] }
 0x178   : > { %1595 = vst [vmem:[%s15529_s12 + $0x1b44] sm:$0xff] %v1594_v58  ;;  %v1600_v61 = vld [vmem:[%s15524_s11 + $0x36b8] sm:$0xff]  ;;  %1597 = vst [vmem:[%s15529_s12 + $0x1b4c] sm:$0xff] %v1596_v59  ;;  %v1604_v63 = vld [vmem:[%s15524_s11 + $0x36e0] sm:$0xff] }
 0x179   : > { %1599 = vst [vmem:[%s15529_s12 + $0x1b58] sm:$0xff] %v1598_v60  ;;  %1601 = vst [vmem:[%s15529_s12 + $0x1b60] sm:$0xff] %v1600_v61  ;;  %v1602_v62 = vld [vmem:[%s15524_s11 + $0x36d8] sm:$0xff]  ;;  %v1606_v0 = vld [vmem:[%s15524_s11 + $0x3700] sm:$0xff] }
 0x17a   : > { %1603 = vst [vmem:[%s15529_s12 + $0x1b6c] sm:$0xff] %v1602_v62  ;;  %1605 = vst [vmem:[%s15529_s12 + $0x1b74] sm:$0xff] %v1604_v63  ;;  %v1608_v1 = vld [vmem:[%s15524_s11 + $0x3708] sm:$0xff]  ;;  %v1612_v3 = vld [vmem:[%s15524_s11 + $0x3730] sm:$0xff] }
 0x17b   : > { %1607 = vst [vmem:[%s15529_s12 + $0x1b80] sm:$0xff] %v1606_v0  ;;  %v1610_v2 = vld [vmem:[%s15524_s11 + $0x3728] sm:$0xff]  ;;  %1609 = vst [vmem:[%s15529_s12 + $0x1b88] sm:$0xff] %v1608_v1  ;;  %v1614_v4 = vld [vmem:[%s15524_s11 + $0x3750] sm:$0xff] }
 0x17c   : > { %1611 = vst [vmem:[%s15529_s12 + $0x1b94] sm:$0xff] %v1610_v2  ;;  %1613 = vst [vmem:[%s15529_s12 + $0x1b9c] sm:$0xff] %v1612_v3  ;;  %v1616_v5 = vld [vmem:[%s15524_s11 + $0x3758] sm:$0xff]  ;;  %v1620_v7 = vld [vmem:[%s15524_s11 + $0x3780] sm:$0xff] }
 0x17d   : > { %v1618_v6 = vld [vmem:[%s15524_s11 + $0x3778] sm:$0xff]  ;;  %1615 = vst [vmem:[%s15529_s12 + $0x1ba8] sm:$0xff] %v1614_v4  ;;  %1617 = vst [vmem:[%s15529_s12 + $0x1bb0] sm:$0xff] %v1616_v5  ;;  %v1622_v8 = vld [vmem:[%s15524_s11 + $0x37a0] sm:$0xff] }
 0x17e   : > { %1619 = vst [vmem:[%s15529_s12 + $0x1bbc] sm:$0xff] %v1618_v6  ;;  %v1624_v9 = vld [vmem:[%s15524_s11 + $0x37a8] sm:$0xff]  ;;  %1621 = vst [vmem:[%s15529_s12 + $0x1bc4] sm:$0xff] %v1620_v7  ;;  %v1628_v11 = vld [vmem:[%s15524_s11 + $0x37d0] sm:$0xff] }
 0x17f   : > { %1623 = vst [vmem:[%s15529_s12 + $0x1bd0] sm:$0xff] %v1622_v8  ;;  %1625 = vst [vmem:[%s15529_s12 + $0x1bd8] sm:$0xff] %v1624_v9  ;;  %v1626_v10 = vld [vmem:[%s15524_s11 + $0x37c8] sm:$0xff]  ;;  %v1630_v12 = vld [vmem:[%s15524_s11 + $0x37f0] sm:$0xff] }
 0x180   : > { %1627 = vst [vmem:[%s15529_s12 + $0x1be4] sm:$0xff] %v1626_v10  ;;  %1629 = vst [vmem:[%s15529_s12 + $0x1bec] sm:$0xff] %v1628_v11  ;;  %v1632_v13 = vld [vmem:[%s15524_s11 + $0x37f8] sm:$0xff]  ;;  %v1636_v15 = vld [vmem:[%s15524_s11 + $0x3820] sm:$0xff] }
 0x181   : > { %1631 = vst [vmem:[%s15529_s12 + $0x1bf8] sm:$0xff] %v1630_v12  ;;  %v1634_v14 = vld [vmem:[%s15524_s11 + $0x3818] sm:$0xff]  ;;  %1633 = vst [vmem:[%s15529_s12 + $0x1c00] sm:$0xff] %v1632_v13  ;;  %v1638_v16 = vld [vmem:[%s15524_s11 + $0x3840] sm:$0xff] }
 0x182   : > { %1635 = vst [vmem:[%s15529_s12 + $0x1c0c] sm:$0xff] %v1634_v14  ;;  %1637 = vst [vmem:[%s15529_s12 + $0x1c14] sm:$0xff] %v1636_v15  ;;  %v1640_v17 = vld [vmem:[%s15524_s11 + $0x3848] sm:$0xff]  ;;  %v1644_v19 = vld [vmem:[%s15524_s11 + $0x3870] sm:$0xff] }
 0x183   : > { %v1642_v18 = vld [vmem:[%s15524_s11 + $0x3868] sm:$0xff]  ;;  %1639 = vst [vmem:[%s15529_s12 + $0x1c20] sm:$0xff] %v1638_v16  ;;  %1641 = vst [vmem:[%s15529_s12 + $0x1c28] sm:$0xff] %v1640_v17  ;;  %v1646_v20 = vld [vmem:[%s15524_s11 + $0x3890] sm:$0xff] }
 0x184   : > { %1643 = vst [vmem:[%s15529_s12 + $0x1c34] sm:$0xff] %v1642_v18  ;;  %v1648_v21 = vld [vmem:[%s15524_s11 + $0x3898] sm:$0xff]  ;;  %1645 = vst [vmem:[%s15529_s12 + $0x1c3c] sm:$0xff] %v1644_v19  ;;  %v1652_v23 = vld [vmem:[%s15524_s11 + $0x38c0] sm:$0xff] }
 0x185   : > { %1647 = vst [vmem:[%s15529_s12 + $0x1c48] sm:$0xff] %v1646_v20  ;;  %1649 = vst [vmem:[%s15529_s12 + $0x1c50] sm:$0xff] %v1648_v21  ;;  %v1650_v22 = vld [vmem:[%s15524_s11 + $0x38b8] sm:$0xff]  ;;  %v1654_v24 = vld [vmem:[%s15524_s11 + $0x38e0] sm:$0xff] }
 0x186   : > { %1651 = vst [vmem:[%s15529_s12 + $0x1c5c] sm:$0xff] %v1650_v22  ;;  %1653 = vst [vmem:[%s15529_s12 + $0x1c64] sm:$0xff] %v1652_v23  ;;  %v1656_v25 = vld [vmem:[%s15524_s11 + $0x38e8] sm:$0xff]  ;;  %v1660_v27 = vld [vmem:[%s15524_s11 + $0x3910] sm:$0xff] }
 0x187   : > { %1655 = vst [vmem:[%s15529_s12 + $0x1c70] sm:$0xff] %v1654_v24  ;;  %v1658_v26 = vld [vmem:[%s15524_s11 + $0x3908] sm:$0xff]  ;;  %1657 = vst [vmem:[%s15529_s12 + $0x1c78] sm:$0xff] %v1656_v25  ;;  %v1662_v28 = vld [vmem:[%s15524_s11 + $0x3930] sm:$0xff] }
 0x188   : > { %1659 = vst [vmem:[%s15529_s12 + $0x1c84] sm:$0xff] %v1658_v26  ;;  %1661 = vst [vmem:[%s15529_s12 + $0x1c8c] sm:$0xff] %v1660_v27  ;;  %v1664_v29 = vld [vmem:[%s15524_s11 + $0x3938] sm:$0xff]  ;;  %v1668_v31 = vld [vmem:[%s15524_s11 + $0x3960] sm:$0xff] }
 0x189   : > { %v1666_v30 = vld [vmem:[%s15524_s11 + $0x3958] sm:$0xff]  ;;  %1663 = vst [vmem:[%s15529_s12 + $0x1c98] sm:$0xff] %v1662_v28  ;;  %1665 = vst [vmem:[%s15529_s12 + $0x1ca0] sm:$0xff] %v1664_v29  ;;  %v1670_v32 = vld [vmem:[%s15524_s11 + $0x3980] sm:$0xff] }
 0x18a   : > { %1667 = vst [vmem:[%s15529_s12 + $0x1cac] sm:$0xff] %v1666_v30  ;;  %v1672_v33 = vld [vmem:[%s15524_s11 + $0x3988] sm:$0xff]  ;;  %1669 = vst [vmem:[%s15529_s12 + $0x1cb4] sm:$0xff] %v1668_v31  ;;  %v1676_v35 = vld [vmem:[%s15524_s11 + $0x39b0] sm:$0xff] }
 0x18b   : > { %1671 = vst [vmem:[%s15529_s12 + $0x1cc0] sm:$0xff] %v1670_v32  ;;  %1673 = vst [vmem:[%s15529_s12 + $0x1cc8] sm:$0xff] %v1672_v33  ;;  %v1674_v34 = vld [vmem:[%s15524_s11 + $0x39a8] sm:$0xff]  ;;  %v1678_v36 = vld [vmem:[%s15524_s11 + $0x39d0] sm:$0xff] }
 0x18c   : > { %1675 = vst [vmem:[%s15529_s12 + $0x1cd4] sm:$0xff] %v1674_v34  ;;  %1677 = vst [vmem:[%s15529_s12 + $0x1cdc] sm:$0xff] %v1676_v35  ;;  %v1680_v37 = vld [vmem:[%s15524_s11 + $0x39d8] sm:$0xff]  ;;  %v1684_v39 = vld [vmem:[%s15524_s11 + $0x3a00] sm:$0xff] }
 0x18d   : > { %1679 = vst [vmem:[%s15529_s12 + $0x1ce8] sm:$0xff] %v1678_v36  ;;  %v1682_v38 = vld [vmem:[%s15524_s11 + $0x39f8] sm:$0xff]  ;;  %1681 = vst [vmem:[%s15529_s12 + $0x1cf0] sm:$0xff] %v1680_v37  ;;  %v1686_v40 = vld [vmem:[%s15524_s11 + $0x3a20] sm:$0xff] }
 0x18e   : > { %1683 = vst [vmem:[%s15529_s12 + $0x1cfc] sm:$0xff] %v1682_v38  ;;  %1685 = vst [vmem:[%s15529_s12 + $0x1d04] sm:$0xff] %v1684_v39  ;;  %v1688_v41 = vld [vmem:[%s15524_s11 + $0x3a28] sm:$0xff]  ;;  %v1692_v43 = vld [vmem:[%s15524_s11 + $0x3a50] sm:$0xff] }
 0x18f   : > { %v1690_v42 = vld [vmem:[%s15524_s11 + $0x3a48] sm:$0xff]  ;;  %1687 = vst [vmem:[%s15529_s12 + $0x1d10] sm:$0xff] %v1686_v40  ;;  %1689 = vst [vmem:[%s15529_s12 + $0x1d18] sm:$0xff] %v1688_v41  ;;  %v1694_v44 = vld [vmem:[%s15524_s11 + $0x3a70] sm:$0xff] }
 0x190   : > { %1691 = vst [vmem:[%s15529_s12 + $0x1d24] sm:$0xff] %v1690_v42  ;;  %v1696_v45 = vld [vmem:[%s15524_s11 + $0x3a78] sm:$0xff]  ;;  %1693 = vst [vmem:[%s15529_s12 + $0x1d2c] sm:$0xff] %v1692_v43  ;;  %v1700_v47 = vld [vmem:[%s15524_s11 + $0x3aa0] sm:$0xff] }
 0x191   : > { %1695 = vst [vmem:[%s15529_s12 + $0x1d38] sm:$0xff] %v1694_v44  ;;  %1697 = vst [vmem:[%s15529_s12 + $0x1d40] sm:$0xff] %v1696_v45  ;;  %v1698_v46 = vld [vmem:[%s15524_s11 + $0x3a98] sm:$0xff]  ;;  %v1702_v48 = vld [vmem:[%s15524_s11 + $0x3ac0] sm:$0xff] }
 0x192   : > { %1699 = vst [vmem:[%s15529_s12 + $0x1d4c] sm:$0xff] %v1698_v46  ;;  %1701 = vst [vmem:[%s15529_s12 + $0x1d54] sm:$0xff] %v1700_v47  ;;  %v1704_v49 = vld [vmem:[%s15524_s11 + $0x3ac8] sm:$0xff]  ;;  %v1708_v51 = vld [vmem:[%s15524_s11 + $0x3af0] sm:$0xff] }
 0x193   : > { %1703 = vst [vmem:[%s15529_s12 + $0x1d60] sm:$0xff] %v1702_v48  ;;  %v1706_v50 = vld [vmem:[%s15524_s11 + $0x3ae8] sm:$0xff]  ;;  %1705 = vst [vmem:[%s15529_s12 + $0x1d68] sm:$0xff] %v1704_v49  ;;  %v1710_v52 = vld [vmem:[%s15524_s11 + $0x3b10] sm:$0xff] }
 0x194   : > { %1707 = vst [vmem:[%s15529_s12 + $0x1d74] sm:$0xff] %v1706_v50  ;;  %1709 = vst [vmem:[%s15529_s12 + $0x1d7c] sm:$0xff] %v1708_v51  ;;  %v1712_v53 = vld [vmem:[%s15524_s11 + $0x3b18] sm:$0xff]  ;;  %v1716_v55 = vld [vmem:[%s15524_s11 + $0x3b40] sm:$0xff] }
 0x195   : > { %v1714_v54 = vld [vmem:[%s15524_s11 + $0x3b38] sm:$0xff]  ;;  %1711 = vst [vmem:[%s15529_s12 + $0x1d88] sm:$0xff] %v1710_v52  ;;  %1713 = vst [vmem:[%s15529_s12 + $0x1d90] sm:$0xff] %v1712_v53  ;;  %v1718_v56 = vld [vmem:[%s15524_s11 + $0x3b60] sm:$0xff] }
 0x196   : > { %1715 = vst [vmem:[%s15529_s12 + $0x1d9c] sm:$0xff] %v1714_v54  ;;  %v1720_v57 = vld [vmem:[%s15524_s11 + $0x3b68] sm:$0xff]  ;;  %1717 = vst [vmem:[%s15529_s12 + $0x1da4] sm:$0xff] %v1716_v55  ;;  %v1724_v59 = vld [vmem:[%s15524_s11 + $0x3b90] sm:$0xff] }
 0x197   : > { %1719 = vst [vmem:[%s15529_s12 + $0x1db0] sm:$0xff] %v1718_v56  ;;  %1721 = vst [vmem:[%s15529_s12 + $0x1db8] sm:$0xff] %v1720_v57  ;;  %v1722_v58 = vld [vmem:[%s15524_s11 + $0x3b88] sm:$0xff]  ;;  %v1726_v60 = vld [vmem:[%s15524_s11 + $0x3bb0] sm:$0xff] }
 0x198   : > { %1723 = vst [vmem:[%s15529_s12 + $0x1dc4] sm:$0xff] %v1722_v58  ;;  %1725 = vst [vmem:[%s15529_s12 + $0x1dcc] sm:$0xff] %v1724_v59  ;;  %v1728_v61 = vld [vmem:[%s15524_s11 + $0x3bb8] sm:$0xff]  ;;  %v1732_v63 = vld [vmem:[%s15524_s11 + $0x3be0] sm:$0xff] }
 0x199   : > { %1727 = vst [vmem:[%s15529_s12 + $0x1dd8] sm:$0xff] %v1726_v60  ;;  %v1730_v62 = vld [vmem:[%s15524_s11 + $0x3bd8] sm:$0xff]  ;;  %1729 = vst [vmem:[%s15529_s12 + $0x1de0] sm:$0xff] %v1728_v61  ;;  %v1734_v0 = vld [vmem:[%s15524_s11 + $0x3c00] sm:$0xff] }
 0x19a   : > { %1731 = vst [vmem:[%s15529_s12 + $0x1dec] sm:$0xff] %v1730_v62  ;;  %1733 = vst [vmem:[%s15529_s12 + $0x1df4] sm:$0xff] %v1732_v63  ;;  %v1736_v1 = vld [vmem:[%s15524_s11 + $0x3c08] sm:$0xff]  ;;  %v1740_v3 = vld [vmem:[%s15524_s11 + $0x3c30] sm:$0xff] }
 0x19b   : > { %v1738_v2 = vld [vmem:[%s15524_s11 + $0x3c28] sm:$0xff]  ;;  %1735 = vst [vmem:[%s15529_s12 + $0x1e00] sm:$0xff] %v1734_v0  ;;  %1737 = vst [vmem:[%s15529_s12 + $0x1e08] sm:$0xff] %v1736_v1  ;;  %v1742_v4 = vld [vmem:[%s15524_s11 + $0x3c50] sm:$0xff] }
 0x19c   : > { %1739 = vst [vmem:[%s15529_s12 + $0x1e14] sm:$0xff] %v1738_v2  ;;  %v1744_v5 = vld [vmem:[%s15524_s11 + $0x3c58] sm:$0xff]  ;;  %1741 = vst [vmem:[%s15529_s12 + $0x1e1c] sm:$0xff] %v1740_v3  ;;  %v1748_v7 = vld [vmem:[%s15524_s11 + $0x3c80] sm:$0xff] }
 0x19d   : > { %1743 = vst [vmem:[%s15529_s12 + $0x1e28] sm:$0xff] %v1742_v4  ;;  %1745 = vst [vmem:[%s15529_s12 + $0x1e30] sm:$0xff] %v1744_v5  ;;  %v1746_v6 = vld [vmem:[%s15524_s11 + $0x3c78] sm:$0xff]  ;;  %v1750_v8 = vld [vmem:[%s15524_s11 + $0x3ca0] sm:$0xff] }
 0x19e   : > { %1747 = vst [vmem:[%s15529_s12 + $0x1e3c] sm:$0xff] %v1746_v6  ;;  %1749 = vst [vmem:[%s15529_s12 + $0x1e44] sm:$0xff] %v1748_v7  ;;  %v1752_v9 = vld [vmem:[%s15524_s11 + $0x3ca8] sm:$0xff]  ;;  %v1756_v11 = vld [vmem:[%s15524_s11 + $0x3cd0] sm:$0xff] }
 0x19f   : > { %1751 = vst [vmem:[%s15529_s12 + $0x1e50] sm:$0xff] %v1750_v8  ;;  %v1754_v10 = vld [vmem:[%s15524_s11 + $0x3cc8] sm:$0xff]  ;;  %1753 = vst [vmem:[%s15529_s12 + $0x1e58] sm:$0xff] %v1752_v9  ;;  %v1758_v12 = vld [vmem:[%s15524_s11 + $0x3cf0] sm:$0xff] }
 0x1a0   : > { %1755 = vst [vmem:[%s15529_s12 + $0x1e64] sm:$0xff] %v1754_v10  ;;  %1757 = vst [vmem:[%s15529_s12 + $0x1e6c] sm:$0xff] %v1756_v11  ;;  %v1760_v13 = vld [vmem:[%s15524_s11 + $0x3cf8] sm:$0xff]  ;;  %v1764_v15 = vld [vmem:[%s15524_s11 + $0x3d20] sm:$0xff] }
 0x1a1   : > { %v1762_v14 = vld [vmem:[%s15524_s11 + $0x3d18] sm:$0xff]  ;;  %1759 = vst [vmem:[%s15529_s12 + $0x1e78] sm:$0xff] %v1758_v12  ;;  %1761 = vst [vmem:[%s15529_s12 + $0x1e80] sm:$0xff] %v1760_v13  ;;  %v1766_v16 = vld [vmem:[%s15524_s11 + $0x3d40] sm:$0xff] }
 0x1a2   : > { %1763 = vst [vmem:[%s15529_s12 + $0x1e8c] sm:$0xff] %v1762_v14  ;;  %v1768_v17 = vld [vmem:[%s15524_s11 + $0x3d48] sm:$0xff]  ;;  %1765 = vst [vmem:[%s15529_s12 + $0x1e94] sm:$0xff] %v1764_v15  ;;  %v1772_v19 = vld [vmem:[%s15524_s11 + $0x3d70] sm:$0xff] }
 0x1a3   : > { %1767 = vst [vmem:[%s15529_s12 + $0x1ea0] sm:$0xff] %v1766_v16  ;;  %1769 = vst [vmem:[%s15529_s12 + $0x1ea8] sm:$0xff] %v1768_v17  ;;  %v1770_v18 = vld [vmem:[%s15524_s11 + $0x3d68] sm:$0xff]  ;;  %v1774_v20 = vld [vmem:[%s15524_s11 + $0x3d90] sm:$0xff] }
 0x1a4   : > { %1771 = vst [vmem:[%s15529_s12 + $0x1eb4] sm:$0xff] %v1770_v18  ;;  %1773 = vst [vmem:[%s15529_s12 + $0x1ebc] sm:$0xff] %v1772_v19  ;;  %v1776_v21 = vld [vmem:[%s15524_s11 + $0x3d98] sm:$0xff]  ;;  %v1780_v23 = vld [vmem:[%s15524_s11 + $0x3dc0] sm:$0xff] }
 0x1a5   : > { %1775 = vst [vmem:[%s15529_s12 + $0x1ec8] sm:$0xff] %v1774_v20  ;;  %v1778_v22 = vld [vmem:[%s15524_s11 + $0x3db8] sm:$0xff]  ;;  %1777 = vst [vmem:[%s15529_s12 + $0x1ed0] sm:$0xff] %v1776_v21  ;;  %v1782_v24 = vld [vmem:[%s15524_s11 + $0x3de0] sm:$0xff] }
 0x1a6   : > { %1779 = vst [vmem:[%s15529_s12 + $0x1edc] sm:$0xff] %v1778_v22  ;;  %1781 = vst [vmem:[%s15529_s12 + $0x1ee4] sm:$0xff] %v1780_v23  ;;  %v1784_v25 = vld [vmem:[%s15524_s11 + $0x3de8] sm:$0xff]  ;;  %v1788_v27 = vld [vmem:[%s15524_s11 + $0x3e10] sm:$0xff] }
 0x1a7   : > { %v1786_v26 = vld [vmem:[%s15524_s11 + $0x3e08] sm:$0xff]  ;;  %1783 = vst [vmem:[%s15529_s12 + $0x1ef0] sm:$0xff] %v1782_v24  ;;  %1785 = vst [vmem:[%s15529_s12 + $0x1ef8] sm:$0xff] %v1784_v25  ;;  %v1790_v28 = vld [vmem:[%s15524_s11 + $0x3e30] sm:$0xff] }
 0x1a8   : > { %1787 = vst [vmem:[%s15529_s12 + $0x1f04] sm:$0xff] %v1786_v26  ;;  %v1792_v29 = vld [vmem:[%s15524_s11 + $0x3e38] sm:$0xff]  ;;  %1789 = vst [vmem:[%s15529_s12 + $0x1f0c] sm:$0xff] %v1788_v27  ;;  %v1796_v31 = vld [vmem:[%s15524_s11 + $0x3e60] sm:$0xff] }
 0x1a9   : > { %1791 = vst [vmem:[%s15529_s12 + $0x1f18] sm:$0xff] %v1790_v28  ;;  %1793 = vst [vmem:[%s15529_s12 + $0x1f20] sm:$0xff] %v1792_v29  ;;  %v1794_v30 = vld [vmem:[%s15524_s11 + $0x3e58] sm:$0xff]  ;;  %v11550_v32 = vld [vmem:[%s15524_s11 + $0x10] sm:$0xf] }
 0x1aa   : > { %1795 = vst [vmem:[%s15529_s12 + $0x1f2c] sm:$0xff] %v1794_v30  ;;  %1797 = vst [vmem:[%s15529_s12 + $0x1f34] sm:$0xff] %v1796_v31  ;;  %v11552_v33 = vld [vmem:[%s15524_s11 + $0x38] sm:$0xf]  ;;  %v11554_v34 = vld [vmem:[%s15524_s11 + $0x60] sm:$0xf] }
 0x1ab   : > { %11551 = vst [vmem:[%s15529_s12 + $0x10] sm:$0xf] %v11550_v32  ;;  %v11556_v35 = vld [vmem:[%s15524_s11 + $0x88] sm:$0xf]  ;;  %11553 = vst [vmem:[%s15529_s12 + $0x24] sm:$0xf] %v11552_v33 }
 0x1ac   : > { %11555 = vst [vmem:[%s15529_s12 + $0x38] sm:$0xf] %v11554_v34  ;;  %11557 = vst [vmem:[%s15529_s12 + $0x4c] sm:$0xf] %v11556_v35  ;;  %v11558_v36 = vld [vmem:[%s15524_s11 + $0xb0] sm:$0xf] }
 0x1ad   : > { %v11560_v37 = vld [vmem:[%s15524_s11 + $0xd8] sm:$0xf]  ;;  %v11562_v38 = vld [vmem:[%s15524_s11 + $0x100] sm:$0xf]  ;;  %11559 = vst [vmem:[%s15529_s12 + $0x60] sm:$0xf] %v11558_v36 }
 0x1ae   : > { %11561 = vst [vmem:[%s15529_s12 + $0x74] sm:$0xf] %v11560_v37  ;;  %11563 = vst [vmem:[%s15529_s12 + $0x88] sm:$0xf] %v11562_v38  ;;  %v11564_v39 = vld [vmem:[%s15524_s11 + $0x128] sm:$0xf] }
 0x1af   : > { %v11566_v40 = vld [vmem:[%s15524_s11 + $0x150] sm:$0xf]  ;;  %v11568_v41 = vld [vmem:[%s15524_s11 + $0x178] sm:$0xf]  ;;  %11565 = vst [vmem:[%s15529_s12 + $0x9c] sm:$0xf] %v11564_v39 }
 0x1b0   : > { %11567 = vst [vmem:[%s15529_s12 + $0xb0] sm:$0xf] %v11566_v40  ;;  %11569 = vst [vmem:[%s15529_s12 + $0xc4] sm:$0xf] %v11568_v41  ;;  %v11570_v42 = vld [vmem:[%s15524_s11 + $0x1a0] sm:$0xf] }
 0x1b1   : > { %v11572_v43 = vld [vmem:[%s15524_s11 + $0x1c8] sm:$0xf]  ;;  %v11574_v44 = vld [vmem:[%s15524_s11 + $0x1f0] sm:$0xf]  ;;  %11571 = vst [vmem:[%s15529_s12 + $0xd8] sm:$0xf] %v11570_v42 }
 0x1b2   : > { %11573 = vst [vmem:[%s15529_s12 + $0xec] sm:$0xf] %v11572_v43  ;;  %11575 = vst [vmem:[%s15529_s12 + $0x100] sm:$0xf] %v11574_v44  ;;  %v11576_v45 = vld [vmem:[%s15524_s11 + $0x218] sm:$0xf] }
 0x1b3   : > { %v11578_v46 = vld [vmem:[%s15524_s11 + $0x240] sm:$0xf]  ;;  %v11580_v47 = vld [vmem:[%s15524_s11 + $0x268] sm:$0xf]  ;;  %11577 = vst [vmem:[%s15529_s12 + $0x114] sm:$0xf] %v11576_v45 }
 0x1b4   : > { %11579 = vst [vmem:[%s15529_s12 + $0x128] sm:$0xf] %v11578_v46  ;;  %11581 = vst [vmem:[%s15529_s12 + $0x13c] sm:$0xf] %v11580_v47  ;;  %v11582_v48 = vld [vmem:[%s15524_s11 + $0x290] sm:$0xf] }
 0x1b5   : > { %v11584_v49 = vld [vmem:[%s15524_s11 + $0x2b8] sm:$0xf]  ;;  %v11586_v50 = vld [vmem:[%s15524_s11 + $0x2e0] sm:$0xf]  ;;  %11583 = vst [vmem:[%s15529_s12 + $0x150] sm:$0xf] %v11582_v48 }
 0x1b6   : > { %11585 = vst [vmem:[%s15529_s12 + $0x164] sm:$0xf] %v11584_v49  ;;  %11587 = vst [vmem:[%s15529_s12 + $0x178] sm:$0xf] %v11586_v50  ;;  %v11588_v51 = vld [vmem:[%s15524_s11 + $0x308] sm:$0xf] }
 0x1b7   : > { %v11590_v52 = vld [vmem:[%s15524_s11 + $0x330] sm:$0xf]  ;;  %v11592_v53 = vld [vmem:[%s15524_s11 + $0x358] sm:$0xf]  ;;  %11589 = vst [vmem:[%s15529_s12 + $0x18c] sm:$0xf] %v11588_v51 }
 0x1b8   : > { %11591 = vst [vmem:[%s15529_s12 + $0x1a0] sm:$0xf] %v11590_v52  ;;  %11593 = vst [vmem:[%s15529_s12 + $0x1b4] sm:$0xf] %v11592_v53  ;;  %v11594_v54 = vld [vmem:[%s15524_s11 + $0x380] sm:$0xf] }
 0x1b9   : > { %v11596_v55 = vld [vmem:[%s15524_s11 + $0x3a8] sm:$0xf]  ;;  %v11598_v56 = vld [vmem:[%s15524_s11 + $0x3d0] sm:$0xf]  ;;  %11595 = vst [vmem:[%s15529_s12 + $0x1c8] sm:$0xf] %v11594_v54 }
 0x1ba   : > { %11597 = vst [vmem:[%s15529_s12 + $0x1dc] sm:$0xf] %v11596_v55  ;;  %11599 = vst [vmem:[%s15529_s12 + $0x1f0] sm:$0xf] %v11598_v56  ;;  %v11600_v57 = vld [vmem:[%s15524_s11 + $0x3f8] sm:$0xf] }
 0x1bb   : > { %v11602_v58 = vld [vmem:[%s15524_s11 + $0x420] sm:$0xf]  ;;  %v11604_v59 = vld [vmem:[%s15524_s11 + $0x448] sm:$0xf]  ;;  %11601 = vst [vmem:[%s15529_s12 + $0x204] sm:$0xf] %v11600_v57 }
 0x1bc   : > { %11603 = vst [vmem:[%s15529_s12 + $0x218] sm:$0xf] %v11602_v58  ;;  %11605 = vst [vmem:[%s15529_s12 + $0x22c] sm:$0xf] %v11604_v59  ;;  %v11606_v60 = vld [vmem:[%s15524_s11 + $0x470] sm:$0xf] }
 0x1bd   : > { %v11608_v61 = vld [vmem:[%s15524_s11 + $0x498] sm:$0xf]  ;;  %v11610_v62 = vld [vmem:[%s15524_s11 + $0x4c0] sm:$0xf]  ;;  %11607 = vst [vmem:[%s15529_s12 + $0x240] sm:$0xf] %v11606_v60 }
 0x1be   : > { %11609 = vst [vmem:[%s15529_s12 + $0x254] sm:$0xf] %v11608_v61  ;;  %11611 = vst [vmem:[%s15529_s12 + $0x268] sm:$0xf] %v11610_v62  ;;  %v11612_v63 = vld [vmem:[%s15524_s11 + $0x4e8] sm:$0xf] }
 0x1bf   : > { %v11614_v0 = vld [vmem:[%s15524_s11 + $0x510] sm:$0xf]  ;;  %v11616_v1 = vld [vmem:[%s15524_s11 + $0x538] sm:$0xf]  ;;  %11613 = vst [vmem:[%s15529_s12 + $0x27c] sm:$0xf] %v11612_v63 }
 0x1c0   : > { %11615 = vst [vmem:[%s15529_s12 + $0x290] sm:$0xf] %v11614_v0  ;;  %11617 = vst [vmem:[%s15529_s12 + $0x2a4] sm:$0xf] %v11616_v1  ;;  %v11618_v2 = vld [vmem:[%s15524_s11 + $0x560] sm:$0xf] }
 0x1c1   : > { %v11620_v3 = vld [vmem:[%s15524_s11 + $0x588] sm:$0xf]  ;;  %v11622_v4 = vld [vmem:[%s15524_s11 + $0x5b0] sm:$0xf]  ;;  %11619 = vst [vmem:[%s15529_s12 + $0x2b8] sm:$0xf] %v11618_v2 }
 0x1c2   : > { %11621 = vst [vmem:[%s15529_s12 + $0x2cc] sm:$0xf] %v11620_v3  ;;  %11623 = vst [vmem:[%s15529_s12 + $0x2e0] sm:$0xf] %v11622_v4  ;;  %v11624_v5 = vld [vmem:[%s15524_s11 + $0x5d8] sm:$0xf] }
 0x1c3   : > { %v11626_v6 = vld [vmem:[%s15524_s11 + $0x600] sm:$0xf]  ;;  %v11628_v7 = vld [vmem:[%s15524_s11 + $0x628] sm:$0xf]  ;;  %11625 = vst [vmem:[%s15529_s12 + $0x2f4] sm:$0xf] %v11624_v5 }
 0x1c4   : > { %11627 = vst [vmem:[%s15529_s12 + $0x308] sm:$0xf] %v11626_v6  ;;  %11629 = vst [vmem:[%s15529_s12 + $0x31c] sm:$0xf] %v11628_v7  ;;  %v11630_v8 = vld [vmem:[%s15524_s11 + $0x650] sm:$0xf] }
 0x1c5   : > { %v11632_v9 = vld [vmem:[%s15524_s11 + $0x678] sm:$0xf]  ;;  %v11634_v10 = vld [vmem:[%s15524_s11 + $0x6a0] sm:$0xf]  ;;  %11631 = vst [vmem:[%s15529_s12 + $0x330] sm:$0xf] %v11630_v8 }
 0x1c6   : > { %11633 = vst [vmem:[%s15529_s12 + $0x344] sm:$0xf] %v11632_v9  ;;  %11635 = vst [vmem:[%s15529_s12 + $0x358] sm:$0xf] %v11634_v10  ;;  %v11636_v11 = vld [vmem:[%s15524_s11 + $0x6c8] sm:$0xf] }
 0x1c7   : > { %v11638_v12 = vld [vmem:[%s15524_s11 + $0x6f0] sm:$0xf]  ;;  %v11640_v13 = vld [vmem:[%s15524_s11 + $0x718] sm:$0xf]  ;;  %11637 = vst [vmem:[%s15529_s12 + $0x36c] sm:$0xf] %v11636_v11 }
 0x1c8   : > { %11639 = vst [vmem:[%s15529_s12 + $0x380] sm:$0xf] %v11638_v12  ;;  %11641 = vst [vmem:[%s15529_s12 + $0x394] sm:$0xf] %v11640_v13  ;;  %v11642_v14 = vld [vmem:[%s15524_s11 + $0x740] sm:$0xf] }
 0x1c9   : > { %v11644_v15 = vld [vmem:[%s15524_s11 + $0x768] sm:$0xf]  ;;  %v11646_v16 = vld [vmem:[%s15524_s11 + $0x790] sm:$0xf]  ;;  %11643 = vst [vmem:[%s15529_s12 + $0x3a8] sm:$0xf] %v11642_v14 }
 0x1ca   : > { %11645 = vst [vmem:[%s15529_s12 + $0x3bc] sm:$0xf] %v11644_v15  ;;  %11647 = vst [vmem:[%s15529_s12 + $0x3d0] sm:$0xf] %v11646_v16  ;;  %v11648_v17 = vld [vmem:[%s15524_s11 + $0x7b8] sm:$0xf] }
 0x1cb   : > { %v11650_v18 = vld [vmem:[%s15524_s11 + $0x7e0] sm:$0xf]  ;;  %v11652_v19 = vld [vmem:[%s15524_s11 + $0x808] sm:$0xf]  ;;  %11649 = vst [vmem:[%s15529_s12 + $0x3e4] sm:$0xf] %v11648_v17 }
 0x1cc   : > { %11651 = vst [vmem:[%s15529_s12 + $0x3f8] sm:$0xf] %v11650_v18  ;;  %11653 = vst [vmem:[%s15529_s12 + $0x40c] sm:$0xf] %v11652_v19  ;;  %v11654_v20 = vld [vmem:[%s15524_s11 + $0x830] sm:$0xf] }
 0x1cd   : > { %v11656_v21 = vld [vmem:[%s15524_s11 + $0x858] sm:$0xf]  ;;  %v11658_v22 = vld [vmem:[%s15524_s11 + $0x880] sm:$0xf]  ;;  %11655 = vst [vmem:[%s15529_s12 + $0x420] sm:$0xf] %v11654_v20 }
 0x1ce   : > { %11657 = vst [vmem:[%s15529_s12 + $0x434] sm:$0xf] %v11656_v21  ;;  %11659 = vst [vmem:[%s15529_s12 + $0x448] sm:$0xf] %v11658_v22  ;;  %v11660_v23 = vld [vmem:[%s15524_s11 + $0x8a8] sm:$0xf] }
 0x1cf   : > { %v11662_v24 = vld [vmem:[%s15524_s11 + $0x8d0] sm:$0xf]  ;;  %v11664_v25 = vld [vmem:[%s15524_s11 + $0x8f8] sm:$0xf]  ;;  %11661 = vst [vmem:[%s15529_s12 + $0x45c] sm:$0xf] %v11660_v23 }
 0x1d0   : > { %11663 = vst [vmem:[%s15529_s12 + $0x470] sm:$0xf] %v11662_v24  ;;  %11665 = vst [vmem:[%s15529_s12 + $0x484] sm:$0xf] %v11664_v25  ;;  %v11666_v26 = vld [vmem:[%s15524_s11 + $0x920] sm:$0xf] }
 0x1d1   : > { %v11668_v27 = vld [vmem:[%s15524_s11 + $0x948] sm:$0xf]  ;;  %v11670_v28 = vld [vmem:[%s15524_s11 + $0x970] sm:$0xf]  ;;  %11667 = vst [vmem:[%s15529_s12 + $0x498] sm:$0xf] %v11666_v26 }
 0x1d2   : > { %11669 = vst [vmem:[%s15529_s12 + $0x4ac] sm:$0xf] %v11668_v27  ;;  %11671 = vst [vmem:[%s15529_s12 + $0x4c0] sm:$0xf] %v11670_v28  ;;  %v11672_v29 = vld [vmem:[%s15524_s11 + $0x998] sm:$0xf] }
 0x1d3   : > { %v11674_v30 = vld [vmem:[%s15524_s11 + $0x9c0] sm:$0xf]  ;;  %v11676_v31 = vld [vmem:[%s15524_s11 + $0x9e8] sm:$0xf]  ;;  %11673 = vst [vmem:[%s15529_s12 + $0x4d4] sm:$0xf] %v11672_v29 }
 0x1d4   : > { %11675 = vst [vmem:[%s15529_s12 + $0x4e8] sm:$0xf] %v11674_v30  ;;  %11677 = vst [vmem:[%s15529_s12 + $0x4fc] sm:$0xf] %v11676_v31  ;;  %v11678_v32 = vld [vmem:[%s15524_s11 + $0xa10] sm:$0xf] }
 0x1d5   : > { %v11680_v33 = vld [vmem:[%s15524_s11 + $0xa38] sm:$0xf]  ;;  %v11682_v34 = vld [vmem:[%s15524_s11 + $0xa60] sm:$0xf]  ;;  %11679 = vst [vmem:[%s15529_s12 + $0x510] sm:$0xf] %v11678_v32 }
 0x1d6   : > { %11681 = vst [vmem:[%s15529_s12 + $0x524] sm:$0xf] %v11680_v33  ;;  %11683 = vst [vmem:[%s15529_s12 + $0x538] sm:$0xf] %v11682_v34  ;;  %v11684_v35 = vld [vmem:[%s15524_s11 + $0xa88] sm:$0xf] }
 0x1d7   : > { %v11686_v36 = vld [vmem:[%s15524_s11 + $0xab0] sm:$0xf]  ;;  %v11688_v37 = vld [vmem:[%s15524_s11 + $0xad8] sm:$0xf]  ;;  %11685 = vst [vmem:[%s15529_s12 + $0x54c] sm:$0xf] %v11684_v35 }
 0x1d8   : > { %11687 = vst [vmem:[%s15529_s12 + $0x560] sm:$0xf] %v11686_v36  ;;  %11689 = vst [vmem:[%s15529_s12 + $0x574] sm:$0xf] %v11688_v37  ;;  %v11690_v38 = vld [vmem:[%s15524_s11 + $0xb00] sm:$0xf] }
 0x1d9   : > { %v11692_v39 = vld [vmem:[%s15524_s11 + $0xb28] sm:$0xf]  ;;  %v11694_v40 = vld [vmem:[%s15524_s11 + $0xb50] sm:$0xf]  ;;  %11691 = vst [vmem:[%s15529_s12 + $0x588] sm:$0xf] %v11690_v38 }
 0x1da   : > { %11693 = vst [vmem:[%s15529_s12 + $0x59c] sm:$0xf] %v11692_v39  ;;  %11695 = vst [vmem:[%s15529_s12 + $0x5b0] sm:$0xf] %v11694_v40  ;;  %v11696_v41 = vld [vmem:[%s15524_s11 + $0xb78] sm:$0xf] }
 0x1db   : > { %v11698_v42 = vld [vmem:[%s15524_s11 + $0xba0] sm:$0xf]  ;;  %v11700_v43 = vld [vmem:[%s15524_s11 + $0xbc8] sm:$0xf]  ;;  %11697 = vst [vmem:[%s15529_s12 + $0x5c4] sm:$0xf] %v11696_v41 }
 0x1dc   : > { %11699 = vst [vmem:[%s15529_s12 + $0x5d8] sm:$0xf] %v11698_v42  ;;  %11701 = vst [vmem:[%s15529_s12 + $0x5ec] sm:$0xf] %v11700_v43  ;;  %v11702_v44 = vld [vmem:[%s15524_s11 + $0xbf0] sm:$0xf] }
 0x1dd   : > { %v11704_v45 = vld [vmem:[%s15524_s11 + $0xc18] sm:$0xf]  ;;  %v11706_v46 = vld [vmem:[%s15524_s11 + $0xc40] sm:$0xf]  ;;  %11703 = vst [vmem:[%s15529_s12 + $0x600] sm:$0xf] %v11702_v44 }
 0x1de   : > { %11705 = vst [vmem:[%s15529_s12 + $0x614] sm:$0xf] %v11704_v45  ;;  %11707 = vst [vmem:[%s15529_s12 + $0x628] sm:$0xf] %v11706_v46  ;;  %v11708_v47 = vld [vmem:[%s15524_s11 + $0xc68] sm:$0xf] }
 0x1df   : > { %v11710_v48 = vld [vmem:[%s15524_s11 + $0xc90] sm:$0xf]  ;;  %v11712_v49 = vld [vmem:[%s15524_s11 + $0xcb8] sm:$0xf]  ;;  %11709 = vst [vmem:[%s15529_s12 + $0x63c] sm:$0xf] %v11708_v47 }
 0x1e0   : > { %11711 = vst [vmem:[%s15529_s12 + $0x650] sm:$0xf] %v11710_v48  ;;  %11713 = vst [vmem:[%s15529_s12 + $0x664] sm:$0xf] %v11712_v49  ;;  %v11714_v50 = vld [vmem:[%s15524_s11 + $0xce0] sm:$0xf] }
 0x1e1   : > { %v11716_v51 = vld [vmem:[%s15524_s11 + $0xd08] sm:$0xf]  ;;  %v11718_v52 = vld [vmem:[%s15524_s11 + $0xd30] sm:$0xf]  ;;  %11715 = vst [vmem:[%s15529_s12 + $0x678] sm:$0xf] %v11714_v50 }
 0x1e2   : > { %11717 = vst [vmem:[%s15529_s12 + $0x68c] sm:$0xf] %v11716_v51  ;;  %11719 = vst [vmem:[%s15529_s12 + $0x6a0] sm:$0xf] %v11718_v52  ;;  %v11720_v53 = vld [vmem:[%s15524_s11 + $0xd58] sm:$0xf] }
 0x1e3   : > { %v11722_v54 = vld [vmem:[%s15524_s11 + $0xd80] sm:$0xf]  ;;  %v11724_v55 = vld [vmem:[%s15524_s11 + $0xda8] sm:$0xf]  ;;  %11721 = vst [vmem:[%s15529_s12 + $0x6b4] sm:$0xf] %v11720_v53 }
 0x1e4   : > { %11723 = vst [vmem:[%s15529_s12 + $0x6c8] sm:$0xf] %v11722_v54  ;;  %11725 = vst [vmem:[%s15529_s12 + $0x6dc] sm:$0xf] %v11724_v55  ;;  %v11726_v56 = vld [vmem:[%s15524_s11 + $0xdd0] sm:$0xf] }
 0x1e5   : > { %v11728_v57 = vld [vmem:[%s15524_s11 + $0xdf8] sm:$0xf]  ;;  %v11730_v58 = vld [vmem:[%s15524_s11 + $0xe20] sm:$0xf]  ;;  %11727 = vst [vmem:[%s15529_s12 + $0x6f0] sm:$0xf] %v11726_v56 }
 0x1e6   : > { %11729 = vst [vmem:[%s15529_s12 + $0x704] sm:$0xf] %v11728_v57  ;;  %11731 = vst [vmem:[%s15529_s12 + $0x718] sm:$0xf] %v11730_v58  ;;  %v11732_v59 = vld [vmem:[%s15524_s11 + $0xe48] sm:$0xf] }
 0x1e7   : > { %v11734_v60 = vld [vmem:[%s15524_s11 + $0xe70] sm:$0xf]  ;;  %v11736_v61 = vld [vmem:[%s15524_s11 + $0xe98] sm:$0xf]  ;;  %11733 = vst [vmem:[%s15529_s12 + $0x72c] sm:$0xf] %v11732_v59 }
 0x1e8   : > { %11735 = vst [vmem:[%s15529_s12 + $0x740] sm:$0xf] %v11734_v60  ;;  %11737 = vst [vmem:[%s15529_s12 + $0x754] sm:$0xf] %v11736_v61  ;;  %v11738_v62 = vld [vmem:[%s15524_s11 + $0xec0] sm:$0xf] }
 0x1e9   : > { %v11740_v63 = vld [vmem:[%s15524_s11 + $0xee8] sm:$0xf]  ;;  %v11742_v0 = vld [vmem:[%s15524_s11 + $0xf10] sm:$0xf]  ;;  %11739 = vst [vmem:[%s15529_s12 + $0x768] sm:$0xf] %v11738_v62 }
 0x1ea   : > { %11741 = vst [vmem:[%s15529_s12 + $0x77c] sm:$0xf] %v11740_v63  ;;  %11743 = vst [vmem:[%s15529_s12 + $0x790] sm:$0xf] %v11742_v0  ;;  %v11744_v1 = vld [vmem:[%s15524_s11 + $0xf38] sm:$0xf] }
 0x1eb   : > { %v11746_v2 = vld [vmem:[%s15524_s11 + $0xf60] sm:$0xf]  ;;  %v11748_v3 = vld [vmem:[%s15524_s11 + $0xf88] sm:$0xf]  ;;  %11745 = vst [vmem:[%s15529_s12 + $0x7a4] sm:$0xf] %v11744_v1 }
 0x1ec   : > { %11747 = vst [vmem:[%s15529_s12 + $0x7b8] sm:$0xf] %v11746_v2  ;;  %11749 = vst [vmem:[%s15529_s12 + $0x7cc] sm:$0xf] %v11748_v3  ;;  %v11750_v4 = vld [vmem:[%s15524_s11 + $0xfb0] sm:$0xf] }
 0x1ed   : > { %v11752_v5 = vld [vmem:[%s15524_s11 + $0xfd8] sm:$0xf]  ;;  %v11754_v6 = vld [vmem:[%s15524_s11 + $0x1000] sm:$0xf]  ;;  %11751 = vst [vmem:[%s15529_s12 + $0x7e0] sm:$0xf] %v11750_v4 }
 0x1ee   : > { %11753 = vst [vmem:[%s15529_s12 + $0x7f4] sm:$0xf] %v11752_v5  ;;  %11755 = vst [vmem:[%s15529_s12 + $0x808] sm:$0xf] %v11754_v6  ;;  %v11756_v7 = vld [vmem:[%s15524_s11 + $0x1028] sm:$0xf] }
 0x1ef   : > { %v11758_v8 = vld [vmem:[%s15524_s11 + $0x1050] sm:$0xf]  ;;  %v11760_v9 = vld [vmem:[%s15524_s11 + $0x1078] sm:$0xf]  ;;  %11757 = vst [vmem:[%s15529_s12 + $0x81c] sm:$0xf] %v11756_v7 }
 0x1f0   : > { %11759 = vst [vmem:[%s15529_s12 + $0x830] sm:$0xf] %v11758_v8  ;;  %11761 = vst [vmem:[%s15529_s12 + $0x844] sm:$0xf] %v11760_v9  ;;  %v11762_v10 = vld [vmem:[%s15524_s11 + $0x10a0] sm:$0xf] }
 0x1f1   : > { %v11764_v11 = vld [vmem:[%s15524_s11 + $0x10c8] sm:$0xf]  ;;  %v11766_v12 = vld [vmem:[%s15524_s11 + $0x10f0] sm:$0xf]  ;;  %11763 = vst [vmem:[%s15529_s12 + $0x858] sm:$0xf] %v11762_v10 }
 0x1f2   : > { %11765 = vst [vmem:[%s15529_s12 + $0x86c] sm:$0xf] %v11764_v11  ;;  %11767 = vst [vmem:[%s15529_s12 + $0x880] sm:$0xf] %v11766_v12  ;;  %v11768_v13 = vld [vmem:[%s15524_s11 + $0x1118] sm:$0xf] }
 0x1f3   : > { %v11770_v14 = vld [vmem:[%s15524_s11 + $0x1140] sm:$0xf]  ;;  %v11772_v15 = vld [vmem:[%s15524_s11 + $0x1168] sm:$0xf]  ;;  %11769 = vst [vmem:[%s15529_s12 + $0x894] sm:$0xf] %v11768_v13 }
 0x1f4   : > { %11771 = vst [vmem:[%s15529_s12 + $0x8a8] sm:$0xf] %v11770_v14  ;;  %11773 = vst [vmem:[%s15529_s12 + $0x8bc] sm:$0xf] %v11772_v15  ;;  %v11774_v16 = vld [vmem:[%s15524_s11 + $0x1190] sm:$0xf] }
 0x1f5   : > { %v11776_v17 = vld [vmem:[%s15524_s11 + $0x11b8] sm:$0xf]  ;;  %v11778_v18 = vld [vmem:[%s15524_s11 + $0x11e0] sm:$0xf]  ;;  %11775 = vst [vmem:[%s15529_s12 + $0x8d0] sm:$0xf] %v11774_v16 }
 0x1f6   : > { %11777 = vst [vmem:[%s15529_s12 + $0x8e4] sm:$0xf] %v11776_v17  ;;  %11779 = vst [vmem:[%s15529_s12 + $0x8f8] sm:$0xf] %v11778_v18  ;;  %v11780_v19 = vld [vmem:[%s15524_s11 + $0x1208] sm:$0xf] }
 0x1f7   : > { %v11782_v20 = vld [vmem:[%s15524_s11 + $0x1230] sm:$0xf]  ;;  %v11784_v21 = vld [vmem:[%s15524_s11 + $0x1258] sm:$0xf]  ;;  %11781 = vst [vmem:[%s15529_s12 + $0x90c] sm:$0xf] %v11780_v19 }
 0x1f8   : > { %11783 = vst [vmem:[%s15529_s12 + $0x920] sm:$0xf] %v11782_v20  ;;  %11785 = vst [vmem:[%s15529_s12 + $0x934] sm:$0xf] %v11784_v21  ;;  %v11786_v22 = vld [vmem:[%s15524_s11 + $0x1280] sm:$0xf] }
 0x1f9   : > { %v11788_v23 = vld [vmem:[%s15524_s11 + $0x12a8] sm:$0xf]  ;;  %v11790_v24 = vld [vmem:[%s15524_s11 + $0x12d0] sm:$0xf]  ;;  %11787 = vst [vmem:[%s15529_s12 + $0x948] sm:$0xf] %v11786_v22 }
 0x1fa   : > { %11789 = vst [vmem:[%s15529_s12 + $0x95c] sm:$0xf] %v11788_v23  ;;  %11791 = vst [vmem:[%s15529_s12 + $0x970] sm:$0xf] %v11790_v24  ;;  %v11792_v25 = vld [vmem:[%s15524_s11 + $0x12f8] sm:$0xf] }
 0x1fb   : > { %v11794_v26 = vld [vmem:[%s15524_s11 + $0x1320] sm:$0xf]  ;;  %v11796_v27 = vld [vmem:[%s15524_s11 + $0x1348] sm:$0xf]  ;;  %11793 = vst [vmem:[%s15529_s12 + $0x984] sm:$0xf] %v11792_v25 }
 0x1fc   : > { %11795 = vst [vmem:[%s15529_s12 + $0x998] sm:$0xf] %v11794_v26  ;;  %11797 = vst [vmem:[%s15529_s12 + $0x9ac] sm:$0xf] %v11796_v27  ;;  %v11798_v28 = vld [vmem:[%s15524_s11 + $0x1370] sm:$0xf] }
 0x1fd   : > { %v11800_v29 = vld [vmem:[%s15524_s11 + $0x1398] sm:$0xf]  ;;  %v11802_v30 = vld [vmem:[%s15524_s11 + $0x13c0] sm:$0xf]  ;;  %11799 = vst [vmem:[%s15529_s12 + $0x9c0] sm:$0xf] %v11798_v28 }
 0x1fe   : > { %11801 = vst [vmem:[%s15529_s12 + $0x9d4] sm:$0xf] %v11800_v29  ;;  %11803 = vst [vmem:[%s15529_s12 + $0x9e8] sm:$0xf] %v11802_v30  ;;  %v11804_v31 = vld [vmem:[%s15524_s11 + $0x13e8] sm:$0xf] }
 0x1ff   : > { %v11806_v32 = vld [vmem:[%s15524_s11 + $0x1410] sm:$0xf]  ;;  %v11808_v33 = vld [vmem:[%s15524_s11 + $0x1438] sm:$0xf]  ;;  %11805 = vst [vmem:[%s15529_s12 + $0x9fc] sm:$0xf] %v11804_v31 }
 0x200   : > { %11807 = vst [vmem:[%s15529_s12 + $0xa10] sm:$0xf] %v11806_v32  ;;  %11809 = vst [vmem:[%s15529_s12 + $0xa24] sm:$0xf] %v11808_v33  ;;  %v11810_v34 = vld [vmem:[%s15524_s11 + $0x1460] sm:$0xf] }
 0x201   : > { %v11812_v35 = vld [vmem:[%s15524_s11 + $0x1488] sm:$0xf]  ;;  %v11814_v36 = vld [vmem:[%s15524_s11 + $0x14b0] sm:$0xf]  ;;  %11811 = vst [vmem:[%s15529_s12 + $0xa38] sm:$0xf] %v11810_v34 }
 0x202   : > { %11813 = vst [vmem:[%s15529_s12 + $0xa4c] sm:$0xf] %v11812_v35  ;;  %11815 = vst [vmem:[%s15529_s12 + $0xa60] sm:$0xf] %v11814_v36  ;;  %v11816_v37 = vld [vmem:[%s15524_s11 + $0x14d8] sm:$0xf] }
 0x203   : > { %v11818_v38 = vld [vmem:[%s15524_s11 + $0x1500] sm:$0xf]  ;;  %v11820_v39 = vld [vmem:[%s15524_s11 + $0x1528] sm:$0xf]  ;;  %11817 = vst [vmem:[%s15529_s12 + $0xa74] sm:$0xf] %v11816_v37 }
 0x204   : > { %11819 = vst [vmem:[%s15529_s12 + $0xa88] sm:$0xf] %v11818_v38  ;;  %11821 = vst [vmem:[%s15529_s12 + $0xa9c] sm:$0xf] %v11820_v39  ;;  %v11822_v40 = vld [vmem:[%s15524_s11 + $0x1550] sm:$0xf] }
 0x205   : > { %v11824_v41 = vld [vmem:[%s15524_s11 + $0x1578] sm:$0xf]  ;;  %v11826_v42 = vld [vmem:[%s15524_s11 + $0x15a0] sm:$0xf]  ;;  %11823 = vst [vmem:[%s15529_s12 + $0xab0] sm:$0xf] %v11822_v40 }
 0x206   : > { %11825 = vst [vmem:[%s15529_s12 + $0xac4] sm:$0xf] %v11824_v41  ;;  %11827 = vst [vmem:[%s15529_s12 + $0xad8] sm:$0xf] %v11826_v42  ;;  %v11828_v43 = vld [vmem:[%s15524_s11 + $0x15c8] sm:$0xf] }
 0x207   : > { %v11830_v44 = vld [vmem:[%s15524_s11 + $0x15f0] sm:$0xf]  ;;  %v11832_v45 = vld [vmem:[%s15524_s11 + $0x1618] sm:$0xf]  ;;  %11829 = vst [vmem:[%s15529_s12 + $0xaec] sm:$0xf] %v11828_v43 }
 0x208   : > { %11831 = vst [vmem:[%s15529_s12 + $0xb00] sm:$0xf] %v11830_v44  ;;  %11833 = vst [vmem:[%s15529_s12 + $0xb14] sm:$0xf] %v11832_v45  ;;  %v11834_v46 = vld [vmem:[%s15524_s11 + $0x1640] sm:$0xf] }
 0x209   : > { %v11836_v47 = vld [vmem:[%s15524_s11 + $0x1668] sm:$0xf]  ;;  %v11838_v48 = vld [vmem:[%s15524_s11 + $0x1690] sm:$0xf]  ;;  %11835 = vst [vmem:[%s15529_s12 + $0xb28] sm:$0xf] %v11834_v46 }
 0x20a   : > { %11837 = vst [vmem:[%s15529_s12 + $0xb3c] sm:$0xf] %v11836_v47  ;;  %11839 = vst [vmem:[%s15529_s12 + $0xb50] sm:$0xf] %v11838_v48  ;;  %v11840_v49 = vld [vmem:[%s15524_s11 + $0x16b8] sm:$0xf] }
 0x20b   : > { %v11842_v50 = vld [vmem:[%s15524_s11 + $0x16e0] sm:$0xf]  ;;  %v11844_v51 = vld [vmem:[%s15524_s11 + $0x1708] sm:$0xf]  ;;  %11841 = vst [vmem:[%s15529_s12 + $0xb64] sm:$0xf] %v11840_v49 }
 0x20c   : > { %11843 = vst [vmem:[%s15529_s12 + $0xb78] sm:$0xf] %v11842_v50  ;;  %11845 = vst [vmem:[%s15529_s12 + $0xb8c] sm:$0xf] %v11844_v51  ;;  %v11846_v52 = vld [vmem:[%s15524_s11 + $0x1730] sm:$0xf] }
 0x20d   : > { %v11848_v53 = vld [vmem:[%s15524_s11 + $0x1758] sm:$0xf]  ;;  %v11850_v54 = vld [vmem:[%s15524_s11 + $0x1780] sm:$0xf]  ;;  %11847 = vst [vmem:[%s15529_s12 + $0xba0] sm:$0xf] %v11846_v52 }
 0x20e   : > { %11849 = vst [vmem:[%s15529_s12 + $0xbb4] sm:$0xf] %v11848_v53  ;;  %11851 = vst [vmem:[%s15529_s12 + $0xbc8] sm:$0xf] %v11850_v54  ;;  %v11852_v55 = vld [vmem:[%s15524_s11 + $0x17a8] sm:$0xf] }
 0x20f   : > { %v11854_v56 = vld [vmem:[%s15524_s11 + $0x17d0] sm:$0xf]  ;;  %v11856_v57 = vld [vmem:[%s15524_s11 + $0x17f8] sm:$0xf]  ;;  %11853 = vst [vmem:[%s15529_s12 + $0xbdc] sm:$0xf] %v11852_v55 }
 0x210   : > { %11855 = vst [vmem:[%s15529_s12 + $0xbf0] sm:$0xf] %v11854_v56  ;;  %11857 = vst [vmem:[%s15529_s12 + $0xc04] sm:$0xf] %v11856_v57  ;;  %v11858_v58 = vld [vmem:[%s15524_s11 + $0x1820] sm:$0xf] }
 0x211   : > { %v11860_v59 = vld [vmem:[%s15524_s11 + $0x1848] sm:$0xf]  ;;  %v11862_v60 = vld [vmem:[%s15524_s11 + $0x1870] sm:$0xf]  ;;  %11859 = vst [vmem:[%s15529_s12 + $0xc18] sm:$0xf] %v11858_v58 }
 0x212   : > { %11861 = vst [vmem:[%s15529_s12 + $0xc2c] sm:$0xf] %v11860_v59  ;;  %11863 = vst [vmem:[%s15529_s12 + $0xc40] sm:$0xf] %v11862_v60  ;;  %v11864_v61 = vld [vmem:[%s15524_s11 + $0x1898] sm:$0xf] }
 0x213   : > { %v11866_v62 = vld [vmem:[%s15524_s11 + $0x18c0] sm:$0xf]  ;;  %v11868_v63 = vld [vmem:[%s15524_s11 + $0x18e8] sm:$0xf]  ;;  %11865 = vst [vmem:[%s15529_s12 + $0xc54] sm:$0xf] %v11864_v61 }
 0x214   : > { %11867 = vst [vmem:[%s15529_s12 + $0xc68] sm:$0xf] %v11866_v62  ;;  %11869 = vst [vmem:[%s15529_s12 + $0xc7c] sm:$0xf] %v11868_v63  ;;  %v11870_v0 = vld [vmem:[%s15524_s11 + $0x1910] sm:$0xf] }
 0x215   : > { %v11872_v1 = vld [vmem:[%s15524_s11 + $0x1938] sm:$0xf]  ;;  %v11874_v2 = vld [vmem:[%s15524_s11 + $0x1960] sm:$0xf]  ;;  %11871 = vst [vmem:[%s15529_s12 + $0xc90] sm:$0xf] %v11870_v0 }
 0x216   : > { %11873 = vst [vmem:[%s15529_s12 + $0xca4] sm:$0xf] %v11872_v1  ;;  %11875 = vst [vmem:[%s15529_s12 + $0xcb8] sm:$0xf] %v11874_v2  ;;  %v11876_v3 = vld [vmem:[%s15524_s11 + $0x1988] sm:$0xf] }
 0x217   : > { %v11878_v4 = vld [vmem:[%s15524_s11 + $0x19b0] sm:$0xf]  ;;  %v11880_v5 = vld [vmem:[%s15524_s11 + $0x19d8] sm:$0xf]  ;;  %11877 = vst [vmem:[%s15529_s12 + $0xccc] sm:$0xf] %v11876_v3 }
 0x218   : > { %11879 = vst [vmem:[%s15529_s12 + $0xce0] sm:$0xf] %v11878_v4  ;;  %11881 = vst [vmem:[%s15529_s12 + $0xcf4] sm:$0xf] %v11880_v5  ;;  %v11882_v6 = vld [vmem:[%s15524_s11 + $0x1a00] sm:$0xf] }
 0x219   : > { %v11884_v7 = vld [vmem:[%s15524_s11 + $0x1a28] sm:$0xf]  ;;  %v11886_v8 = vld [vmem:[%s15524_s11 + $0x1a50] sm:$0xf]  ;;  %11883 = vst [vmem:[%s15529_s12 + $0xd08] sm:$0xf] %v11882_v6 }
 0x21a   : > { %11885 = vst [vmem:[%s15529_s12 + $0xd1c] sm:$0xf] %v11884_v7  ;;  %11887 = vst [vmem:[%s15529_s12 + $0xd30] sm:$0xf] %v11886_v8  ;;  %v11888_v9 = vld [vmem:[%s15524_s11 + $0x1a78] sm:$0xf] }
 0x21b   : > { %v11890_v10 = vld [vmem:[%s15524_s11 + $0x1aa0] sm:$0xf]  ;;  %v11892_v11 = vld [vmem:[%s15524_s11 + $0x1ac8] sm:$0xf]  ;;  %11889 = vst [vmem:[%s15529_s12 + $0xd44] sm:$0xf] %v11888_v9 }
 0x21c   : > { %11891 = vst [vmem:[%s15529_s12 + $0xd58] sm:$0xf] %v11890_v10  ;;  %11893 = vst [vmem:[%s15529_s12 + $0xd6c] sm:$0xf] %v11892_v11  ;;  %v11894_v12 = vld [vmem:[%s15524_s11 + $0x1af0] sm:$0xf] }
 0x21d   : > { %v11896_v13 = vld [vmem:[%s15524_s11 + $0x1b18] sm:$0xf]  ;;  %v11898_v14 = vld [vmem:[%s15524_s11 + $0x1b40] sm:$0xf]  ;;  %11895 = vst [vmem:[%s15529_s12 + $0xd80] sm:$0xf] %v11894_v12 }
 0x21e   : > { %11897 = vst [vmem:[%s15529_s12 + $0xd94] sm:$0xf] %v11896_v13  ;;  %11899 = vst [vmem:[%s15529_s12 + $0xda8] sm:$0xf] %v11898_v14  ;;  %v11900_v15 = vld [vmem:[%s15524_s11 + $0x1b68] sm:$0xf] }
 0x21f   : > { %v11902_v16 = vld [vmem:[%s15524_s11 + $0x1b90] sm:$0xf]  ;;  %v11904_v17 = vld [vmem:[%s15524_s11 + $0x1bb8] sm:$0xf]  ;;  %11901 = vst [vmem:[%s15529_s12 + $0xdbc] sm:$0xf] %v11900_v15 }
 0x220   : > { %11903 = vst [vmem:[%s15529_s12 + $0xdd0] sm:$0xf] %v11902_v16  ;;  %11905 = vst [vmem:[%s15529_s12 + $0xde4] sm:$0xf] %v11904_v17  ;;  %v11906_v18 = vld [vmem:[%s15524_s11 + $0x1be0] sm:$0xf] }
 0x221   : > { %v11908_v19 = vld [vmem:[%s15524_s11 + $0x1c08] sm:$0xf]  ;;  %v11910_v20 = vld [vmem:[%s15524_s11 + $0x1c30] sm:$0xf]  ;;  %11907 = vst [vmem:[%s15529_s12 + $0xdf8] sm:$0xf] %v11906_v18 }
 0x222   : > { %11909 = vst [vmem:[%s15529_s12 + $0xe0c] sm:$0xf] %v11908_v19  ;;  %11911 = vst [vmem:[%s15529_s12 + $0xe20] sm:$0xf] %v11910_v20  ;;  %v11912_v21 = vld [vmem:[%s15524_s11 + $0x1c58] sm:$0xf] }
 0x223   : > { %v11914_v22 = vld [vmem:[%s15524_s11 + $0x1c80] sm:$0xf]  ;;  %v11916_v23 = vld [vmem:[%s15524_s11 + $0x1ca8] sm:$0xf]  ;;  %11913 = vst [vmem:[%s15529_s12 + $0xe34] sm:$0xf] %v11912_v21 }
 0x224   : > { %11915 = vst [vmem:[%s15529_s12 + $0xe48] sm:$0xf] %v11914_v22  ;;  %11917 = vst [vmem:[%s15529_s12 + $0xe5c] sm:$0xf] %v11916_v23  ;;  %v11918_v24 = vld [vmem:[%s15524_s11 + $0x1cd0] sm:$0xf] }
 0x225   : > { %v11920_v25 = vld [vmem:[%s15524_s11 + $0x1cf8] sm:$0xf]  ;;  %v11922_v26 = vld [vmem:[%s15524_s11 + $0x1d20] sm:$0xf]  ;;  %11919 = vst [vmem:[%s15529_s12 + $0xe70] sm:$0xf] %v11918_v24 }
 0x226   : > { %11921 = vst [vmem:[%s15529_s12 + $0xe84] sm:$0xf] %v11920_v25  ;;  %11923 = vst [vmem:[%s15529_s12 + $0xe98] sm:$0xf] %v11922_v26  ;;  %v11924_v27 = vld [vmem:[%s15524_s11 + $0x1d48] sm:$0xf] }
 0x227   : > { %v11926_v28 = vld [vmem:[%s15524_s11 + $0x1d70] sm:$0xf]  ;;  %v11928_v29 = vld [vmem:[%s15524_s11 + $0x1d98] sm:$0xf]  ;;  %11925 = vst [vmem:[%s15529_s12 + $0xeac] sm:$0xf] %v11924_v27 }
 0x228   : > { %11927 = vst [vmem:[%s15529_s12 + $0xec0] sm:$0xf] %v11926_v28  ;;  %11929 = vst [vmem:[%s15529_s12 + $0xed4] sm:$0xf] %v11928_v29  ;;  %v11930_v30 = vld [vmem:[%s15524_s11 + $0x1dc0] sm:$0xf] }
 0x229   : > { %v11932_v31 = vld [vmem:[%s15524_s11 + $0x1de8] sm:$0xf]  ;;  %v11934_v32 = vld [vmem:[%s15524_s11 + $0x1e10] sm:$0xf]  ;;  %11931 = vst [vmem:[%s15529_s12 + $0xee8] sm:$0xf] %v11930_v30 }
 0x22a   : > { %11933 = vst [vmem:[%s15529_s12 + $0xefc] sm:$0xf] %v11932_v31  ;;  %11935 = vst [vmem:[%s15529_s12 + $0xf10] sm:$0xf] %v11934_v32  ;;  %v11936_v33 = vld [vmem:[%s15524_s11 + $0x1e38] sm:$0xf] }
 0x22b   : > { %v11938_v34 = vld [vmem:[%s15524_s11 + $0x1e60] sm:$0xf]  ;;  %v11940_v35 = vld [vmem:[%s15524_s11 + $0x1e88] sm:$0xf]  ;;  %11937 = vst [vmem:[%s15529_s12 + $0xf24] sm:$0xf] %v11936_v33 }
 0x22c   : > { %11939 = vst [vmem:[%s15529_s12 + $0xf38] sm:$0xf] %v11938_v34  ;;  %11941 = vst [vmem:[%s15529_s12 + $0xf4c] sm:$0xf] %v11940_v35  ;;  %v11942_v36 = vld [vmem:[%s15524_s11 + $0x1eb0] sm:$0xf] }
 0x22d   : > { %v11944_v37 = vld [vmem:[%s15524_s11 + $0x1ed8] sm:$0xf]  ;;  %v11946_v38 = vld [vmem:[%s15524_s11 + $0x1f00] sm:$0xf]  ;;  %11943 = vst [vmem:[%s15529_s12 + $0xf60] sm:$0xf] %v11942_v36 }
 0x22e   : > { %11945 = vst [vmem:[%s15529_s12 + $0xf74] sm:$0xf] %v11944_v37  ;;  %11947 = vst [vmem:[%s15529_s12 + $0xf88] sm:$0xf] %v11946_v38  ;;  %v11948_v39 = vld [vmem:[%s15524_s11 + $0x1f28] sm:$0xf] }
 0x22f   : > { %v11950_v40 = vld [vmem:[%s15524_s11 + $0x1f50] sm:$0xf]  ;;  %v11952_v41 = vld [vmem:[%s15524_s11 + $0x1f78] sm:$0xf]  ;;  %11949 = vst [vmem:[%s15529_s12 + $0xf9c] sm:$0xf] %v11948_v39 }
 0x230   : > { %11951 = vst [vmem:[%s15529_s12 + $0xfb0] sm:$0xf] %v11950_v40  ;;  %11953 = vst [vmem:[%s15529_s12 + $0xfc4] sm:$0xf] %v11952_v41  ;;  %v11954_v42 = vld [vmem:[%s15524_s11 + $0x1fa0] sm:$0xf] }
 0x231   : > { %v11956_v43 = vld [vmem:[%s15524_s11 + $0x1fc8] sm:$0xf]  ;;  %v11958_v44 = vld [vmem:[%s15524_s11 + $0x1ff0] sm:$0xf]  ;;  %11955 = vst [vmem:[%s15529_s12 + $0xfd8] sm:$0xf] %v11954_v42 }
 0x232   : > { %11957 = vst [vmem:[%s15529_s12 + $0xfec] sm:$0xf] %v11956_v43  ;;  %11959 = vst [vmem:[%s15529_s12 + $0x1000] sm:$0xf] %v11958_v44  ;;  %v11960_v45 = vld [vmem:[%s15524_s11 + $0x2018] sm:$0xf] }
 0x233   : > { %v11962_v46 = vld [vmem:[%s15524_s11 + $0x2040] sm:$0xf]  ;;  %v11964_v47 = vld [vmem:[%s15524_s11 + $0x2068] sm:$0xf]  ;;  %11961 = vst [vmem:[%s15529_s12 + $0x1014] sm:$0xf] %v11960_v45 }
 0x234   : > { %11963 = vst [vmem:[%s15529_s12 + $0x1028] sm:$0xf] %v11962_v46  ;;  %11965 = vst [vmem:[%s15529_s12 + $0x103c] sm:$0xf] %v11964_v47  ;;  %v11966_v48 = vld [vmem:[%s15524_s11 + $0x2090] sm:$0xf] }
 0x235   : > { %v11968_v49 = vld [vmem:[%s15524_s11 + $0x20b8] sm:$0xf]  ;;  %v11970_v50 = vld [vmem:[%s15524_s11 + $0x20e0] sm:$0xf]  ;;  %11967 = vst [vmem:[%s15529_s12 + $0x1050] sm:$0xf] %v11966_v48 }
 0x236   : > { %11969 = vst [vmem:[%s15529_s12 + $0x1064] sm:$0xf] %v11968_v49  ;;  %11971 = vst [vmem:[%s15529_s12 + $0x1078] sm:$0xf] %v11970_v50  ;;  %v11972_v51 = vld [vmem:[%s15524_s11 + $0x2108] sm:$0xf] }
 0x237   : > { %v11974_v52 = vld [vmem:[%s15524_s11 + $0x2130] sm:$0xf]  ;;  %v11976_v53 = vld [vmem:[%s15524_s11 + $0x2158] sm:$0xf]  ;;  %11973 = vst [vmem:[%s15529_s12 + $0x108c] sm:$0xf] %v11972_v51 }
 0x238   : > { %11975 = vst [vmem:[%s15529_s12 + $0x10a0] sm:$0xf] %v11974_v52  ;;  %11977 = vst [vmem:[%s15529_s12 + $0x10b4] sm:$0xf] %v11976_v53  ;;  %v11978_v54 = vld [vmem:[%s15524_s11 + $0x2180] sm:$0xf] }
 0x239   : > { %v11980_v55 = vld [vmem:[%s15524_s11 + $0x21a8] sm:$0xf]  ;;  %v11982_v56 = vld [vmem:[%s15524_s11 + $0x21d0] sm:$0xf]  ;;  %11979 = vst [vmem:[%s15529_s12 + $0x10c8] sm:$0xf] %v11978_v54 }
 0x23a   : > { %11981 = vst [vmem:[%s15529_s12 + $0x10dc] sm:$0xf] %v11980_v55  ;;  %11983 = vst [vmem:[%s15529_s12 + $0x10f0] sm:$0xf] %v11982_v56  ;;  %v11984_v57 = vld [vmem:[%s15524_s11 + $0x21f8] sm:$0xf] }
 0x23b   : > { %v11986_v58 = vld [vmem:[%s15524_s11 + $0x2220] sm:$0xf]  ;;  %v11988_v59 = vld [vmem:[%s15524_s11 + $0x2248] sm:$0xf]  ;;  %11985 = vst [vmem:[%s15529_s12 + $0x1104] sm:$0xf] %v11984_v57 }
 0x23c   : > { %11987 = vst [vmem:[%s15529_s12 + $0x1118] sm:$0xf] %v11986_v58  ;;  %11989 = vst [vmem:[%s15529_s12 + $0x112c] sm:$0xf] %v11988_v59  ;;  %v11990_v60 = vld [vmem:[%s15524_s11 + $0x2270] sm:$0xf] }
 0x23d   : > { %v11992_v61 = vld [vmem:[%s15524_s11 + $0x2298] sm:$0xf]  ;;  %v11994_v62 = vld [vmem:[%s15524_s11 + $0x22c0] sm:$0xf]  ;;  %11991 = vst [vmem:[%s15529_s12 + $0x1140] sm:$0xf] %v11990_v60 }
 0x23e   : > { %11993 = vst [vmem:[%s15529_s12 + $0x1154] sm:$0xf] %v11992_v61  ;;  %11995 = vst [vmem:[%s15529_s12 + $0x1168] sm:$0xf] %v11994_v62  ;;  %v11996_v63 = vld [vmem:[%s15524_s11 + $0x22e8] sm:$0xf] }
 0x23f   : > { %v11998_v0 = vld [vmem:[%s15524_s11 + $0x2310] sm:$0xf]  ;;  %v12000_v1 = vld [vmem:[%s15524_s11 + $0x2338] sm:$0xf]  ;;  %11997 = vst [vmem:[%s15529_s12 + $0x117c] sm:$0xf] %v11996_v63 }
 0x240   : > { %11999 = vst [vmem:[%s15529_s12 + $0x1190] sm:$0xf] %v11998_v0  ;;  %12001 = vst [vmem:[%s15529_s12 + $0x11a4] sm:$0xf] %v12000_v1  ;;  %v12002_v2 = vld [vmem:[%s15524_s11 + $0x2360] sm:$0xf] }
 0x241   : > { %v12004_v3 = vld [vmem:[%s15524_s11 + $0x2388] sm:$0xf]  ;;  %v12006_v4 = vld [vmem:[%s15524_s11 + $0x23b0] sm:$0xf]  ;;  %12003 = vst [vmem:[%s15529_s12 + $0x11b8] sm:$0xf] %v12002_v2 }
 0x242   : > { %12005 = vst [vmem:[%s15529_s12 + $0x11cc] sm:$0xf] %v12004_v3  ;;  %12007 = vst [vmem:[%s15529_s12 + $0x11e0] sm:$0xf] %v12006_v4  ;;  %v12008_v5 = vld [vmem:[%s15524_s11 + $0x23d8] sm:$0xf] }
 0x243   : > { %v12010_v6 = vld [vmem:[%s15524_s11 + $0x2400] sm:$0xf]  ;;  %v12012_v7 = vld [vmem:[%s15524_s11 + $0x2428] sm:$0xf]  ;;  %12009 = vst [vmem:[%s15529_s12 + $0x11f4] sm:$0xf] %v12008_v5 }
 0x244   : > { %12011 = vst [vmem:[%s15529_s12 + $0x1208] sm:$0xf] %v12010_v6  ;;  %12013 = vst [vmem:[%s15529_s12 + $0x121c] sm:$0xf] %v12012_v7  ;;  %v12014_v8 = vld [vmem:[%s15524_s11 + $0x2450] sm:$0xf] }
 0x245   : > { %v12016_v9 = vld [vmem:[%s15524_s11 + $0x2478] sm:$0xf]  ;;  %v12018_v10 = vld [vmem:[%s15524_s11 + $0x24a0] sm:$0xf]  ;;  %12015 = vst [vmem:[%s15529_s12 + $0x1230] sm:$0xf] %v12014_v8 }
 0x246   : > { %12017 = vst [vmem:[%s15529_s12 + $0x1244] sm:$0xf] %v12016_v9  ;;  %12019 = vst [vmem:[%s15529_s12 + $0x1258] sm:$0xf] %v12018_v10  ;;  %v12020_v11 = vld [vmem:[%s15524_s11 + $0x24c8] sm:$0xf] }
 0x247   : > { %v12022_v12 = vld [vmem:[%s15524_s11 + $0x24f0] sm:$0xf]  ;;  %v12024_v13 = vld [vmem:[%s15524_s11 + $0x2518] sm:$0xf]  ;;  %12021 = vst [vmem:[%s15529_s12 + $0x126c] sm:$0xf] %v12020_v11 }
 0x248   : > { %12023 = vst [vmem:[%s15529_s12 + $0x1280] sm:$0xf] %v12022_v12  ;;  %12025 = vst [vmem:[%s15529_s12 + $0x1294] sm:$0xf] %v12024_v13  ;;  %v12026_v14 = vld [vmem:[%s15524_s11 + $0x2540] sm:$0xf] }
 0x249   : > { %v12028_v15 = vld [vmem:[%s15524_s11 + $0x2568] sm:$0xf]  ;;  %v12030_v16 = vld [vmem:[%s15524_s11 + $0x2590] sm:$0xf]  ;;  %12027 = vst [vmem:[%s15529_s12 + $0x12a8] sm:$0xf] %v12026_v14 }
 0x24a   : > { %12029 = vst [vmem:[%s15529_s12 + $0x12bc] sm:$0xf] %v12028_v15  ;;  %12031 = vst [vmem:[%s15529_s12 + $0x12d0] sm:$0xf] %v12030_v16  ;;  %v12032_v17 = vld [vmem:[%s15524_s11 + $0x25b8] sm:$0xf] }
 0x24b   : > { %v12034_v18 = vld [vmem:[%s15524_s11 + $0x25e0] sm:$0xf]  ;;  %v12036_v19 = vld [vmem:[%s15524_s11 + $0x2608] sm:$0xf]  ;;  %12033 = vst [vmem:[%s15529_s12 + $0x12e4] sm:$0xf] %v12032_v17 }
 0x24c   : > { %12035 = vst [vmem:[%s15529_s12 + $0x12f8] sm:$0xf] %v12034_v18  ;;  %12037 = vst [vmem:[%s15529_s12 + $0x130c] sm:$0xf] %v12036_v19  ;;  %v12038_v20 = vld [vmem:[%s15524_s11 + $0x2630] sm:$0xf] }
 0x24d   : > { %v12040_v21 = vld [vmem:[%s15524_s11 + $0x2658] sm:$0xf]  ;;  %v12042_v22 = vld [vmem:[%s15524_s11 + $0x2680] sm:$0xf]  ;;  %12039 = vst [vmem:[%s15529_s12 + $0x1320] sm:$0xf] %v12038_v20 }
 0x24e   : > { %12041 = vst [vmem:[%s15529_s12 + $0x1334] sm:$0xf] %v12040_v21  ;;  %12043 = vst [vmem:[%s15529_s12 + $0x1348] sm:$0xf] %v12042_v22  ;;  %v12044_v23 = vld [vmem:[%s15524_s11 + $0x26a8] sm:$0xf] }
 0x24f   : > { %v12046_v24 = vld [vmem:[%s15524_s11 + $0x26d0] sm:$0xf]  ;;  %v12048_v25 = vld [vmem:[%s15524_s11 + $0x26f8] sm:$0xf]  ;;  %12045 = vst [vmem:[%s15529_s12 + $0x135c] sm:$0xf] %v12044_v23 }
 0x250   : > { %12047 = vst [vmem:[%s15529_s12 + $0x1370] sm:$0xf] %v12046_v24  ;;  %12049 = vst [vmem:[%s15529_s12 + $0x1384] sm:$0xf] %v12048_v25  ;;  %v12050_v26 = vld [vmem:[%s15524_s11 + $0x2720] sm:$0xf] }
 0x251   : > { %v12052_v27 = vld [vmem:[%s15524_s11 + $0x2748] sm:$0xf]  ;;  %v12054_v28 = vld [vmem:[%s15524_s11 + $0x2770] sm:$0xf]  ;;  %12051 = vst [vmem:[%s15529_s12 + $0x1398] sm:$0xf] %v12050_v26 }
 0x252   : > { %12053 = vst [vmem:[%s15529_s12 + $0x13ac] sm:$0xf] %v12052_v27  ;;  %12055 = vst [vmem:[%s15529_s12 + $0x13c0] sm:$0xf] %v12054_v28  ;;  %v12056_v29 = vld [vmem:[%s15524_s11 + $0x2798] sm:$0xf] }
 0x253   : > { %v12058_v30 = vld [vmem:[%s15524_s11 + $0x27c0] sm:$0xf]  ;;  %v12060_v31 = vld [vmem:[%s15524_s11 + $0x27e8] sm:$0xf]  ;;  %12057 = vst [vmem:[%s15529_s12 + $0x13d4] sm:$0xf] %v12056_v29 }
 0x254   : > { %12059 = vst [vmem:[%s15529_s12 + $0x13e8] sm:$0xf] %v12058_v30  ;;  %12061 = vst [vmem:[%s15529_s12 + $0x13fc] sm:$0xf] %v12060_v31  ;;  %v12062_v32 = vld [vmem:[%s15524_s11 + $0x2810] sm:$0xf] }
 0x255   : > { %v12064_v33 = vld [vmem:[%s15524_s11 + $0x2838] sm:$0xf]  ;;  %v12066_v34 = vld [vmem:[%s15524_s11 + $0x2860] sm:$0xf]  ;;  %12063 = vst [vmem:[%s15529_s12 + $0x1410] sm:$0xf] %v12062_v32 }
 0x256   : > { %12065 = vst [vmem:[%s15529_s12 + $0x1424] sm:$0xf] %v12064_v33  ;;  %12067 = vst [vmem:[%s15529_s12 + $0x1438] sm:$0xf] %v12066_v34  ;;  %v12068_v35 = vld [vmem:[%s15524_s11 + $0x2888] sm:$0xf] }
 0x257   : > { %v12070_v36 = vld [vmem:[%s15524_s11 + $0x28b0] sm:$0xf]  ;;  %v12072_v37 = vld [vmem:[%s15524_s11 + $0x28d8] sm:$0xf]  ;;  %12069 = vst [vmem:[%s15529_s12 + $0x144c] sm:$0xf] %v12068_v35 }
 0x258   : > { %12071 = vst [vmem:[%s15529_s12 + $0x1460] sm:$0xf] %v12070_v36  ;;  %12073 = vst [vmem:[%s15529_s12 + $0x1474] sm:$0xf] %v12072_v37  ;;  %v12074_v38 = vld [vmem:[%s15524_s11 + $0x2900] sm:$0xf] }
 0x259   : > { %v12076_v39 = vld [vmem:[%s15524_s11 + $0x2928] sm:$0xf]  ;;  %v12078_v40 = vld [vmem:[%s15524_s11 + $0x2950] sm:$0xf]  ;;  %12075 = vst [vmem:[%s15529_s12 + $0x1488] sm:$0xf] %v12074_v38 }
 0x25a   : > { %12077 = vst [vmem:[%s15529_s12 + $0x149c] sm:$0xf] %v12076_v39  ;;  %12079 = vst [vmem:[%s15529_s12 + $0x14b0] sm:$0xf] %v12078_v40  ;;  %v12080_v41 = vld [vmem:[%s15524_s11 + $0x2978] sm:$0xf] }
 0x25b   : > { %v12082_v42 = vld [vmem:[%s15524_s11 + $0x29a0] sm:$0xf]  ;;  %v12084_v43 = vld [vmem:[%s15524_s11 + $0x29c8] sm:$0xf]  ;;  %12081 = vst [vmem:[%s15529_s12 + $0x14c4] sm:$0xf] %v12080_v41 }
 0x25c   : > { %12083 = vst [vmem:[%s15529_s12 + $0x14d8] sm:$0xf] %v12082_v42  ;;  %12085 = vst [vmem:[%s15529_s12 + $0x14ec] sm:$0xf] %v12084_v43  ;;  %v12086_v44 = vld [vmem:[%s15524_s11 + $0x29f0] sm:$0xf] }
 0x25d   : > { %v12088_v45 = vld [vmem:[%s15524_s11 + $0x2a18] sm:$0xf]  ;;  %v12090_v46 = vld [vmem:[%s15524_s11 + $0x2a40] sm:$0xf]  ;;  %12087 = vst [vmem:[%s15529_s12 + $0x1500] sm:$0xf] %v12086_v44 }
 0x25e   : > { %12089 = vst [vmem:[%s15529_s12 + $0x1514] sm:$0xf] %v12088_v45  ;;  %12091 = vst [vmem:[%s15529_s12 + $0x1528] sm:$0xf] %v12090_v46  ;;  %v12092_v47 = vld [vmem:[%s15524_s11 + $0x2a68] sm:$0xf] }
 0x25f   : > { %v12094_v48 = vld [vmem:[%s15524_s11 + $0x2a90] sm:$0xf]  ;;  %v12096_v49 = vld [vmem:[%s15524_s11 + $0x2ab8] sm:$0xf]  ;;  %12093 = vst [vmem:[%s15529_s12 + $0x153c] sm:$0xf] %v12092_v47 }
 0x260   : > { %12095 = vst [vmem:[%s15529_s12 + $0x1550] sm:$0xf] %v12094_v48  ;;  %12097 = vst [vmem:[%s15529_s12 + $0x1564] sm:$0xf] %v12096_v49  ;;  %v12098_v50 = vld [vmem:[%s15524_s11 + $0x2ae0] sm:$0xf] }
 0x261   : > { %v12100_v51 = vld [vmem:[%s15524_s11 + $0x2b08] sm:$0xf]  ;;  %v12102_v52 = vld [vmem:[%s15524_s11 + $0x2b30] sm:$0xf]  ;;  %12099 = vst [vmem:[%s15529_s12 + $0x1578] sm:$0xf] %v12098_v50 }
 0x262   : > { %12101 = vst [vmem:[%s15529_s12 + $0x158c] sm:$0xf] %v12100_v51  ;;  %12103 = vst [vmem:[%s15529_s12 + $0x15a0] sm:$0xf] %v12102_v52  ;;  %v12104_v53 = vld [vmem:[%s15524_s11 + $0x2b58] sm:$0xf] }
 0x263   : > { %v12106_v54 = vld [vmem:[%s15524_s11 + $0x2b80] sm:$0xf]  ;;  %v12108_v55 = vld [vmem:[%s15524_s11 + $0x2ba8] sm:$0xf]  ;;  %12105 = vst [vmem:[%s15529_s12 + $0x15b4] sm:$0xf] %v12104_v53 }
 0x264   : > { %12107 = vst [vmem:[%s15529_s12 + $0x15c8] sm:$0xf] %v12106_v54  ;;  %12109 = vst [vmem:[%s15529_s12 + $0x15dc] sm:$0xf] %v12108_v55  ;;  %v12110_v56 = vld [vmem:[%s15524_s11 + $0x2bd0] sm:$0xf] }
 0x265   : > { %v12112_v57 = vld [vmem:[%s15524_s11 + $0x2bf8] sm:$0xf]  ;;  %v12114_v58 = vld [vmem:[%s15524_s11 + $0x2c20] sm:$0xf]  ;;  %12111 = vst [vmem:[%s15529_s12 + $0x15f0] sm:$0xf] %v12110_v56 }
 0x266   : > { %12113 = vst [vmem:[%s15529_s12 + $0x1604] sm:$0xf] %v12112_v57  ;;  %12115 = vst [vmem:[%s15529_s12 + $0x1618] sm:$0xf] %v12114_v58  ;;  %v12116_v59 = vld [vmem:[%s15524_s11 + $0x2c48] sm:$0xf] }
 0x267   : > { %v12118_v60 = vld [vmem:[%s15524_s11 + $0x2c70] sm:$0xf]  ;;  %v12120_v61 = vld [vmem:[%s15524_s11 + $0x2c98] sm:$0xf]  ;;  %12117 = vst [vmem:[%s15529_s12 + $0x162c] sm:$0xf] %v12116_v59 }
 0x268   : > { %12119 = vst [vmem:[%s15529_s12 + $0x1640] sm:$0xf] %v12118_v60  ;;  %12121 = vst [vmem:[%s15529_s12 + $0x1654] sm:$0xf] %v12120_v61  ;;  %v12122_v62 = vld [vmem:[%s15524_s11 + $0x2cc0] sm:$0xf] }
 0x269   : > { %v12124_v63 = vld [vmem:[%s15524_s11 + $0x2ce8] sm:$0xf]  ;;  %v12126_v0 = vld [vmem:[%s15524_s11 + $0x2d10] sm:$0xf]  ;;  %12123 = vst [vmem:[%s15529_s12 + $0x1668] sm:$0xf] %v12122_v62 }
 0x26a   : > { %12125 = vst [vmem:[%s15529_s12 + $0x167c] sm:$0xf] %v12124_v63  ;;  %12127 = vst [vmem:[%s15529_s12 + $0x1690] sm:$0xf] %v12126_v0  ;;  %v12128_v1 = vld [vmem:[%s15524_s11 + $0x2d38] sm:$0xf] }
 0x26b   : > { %v12130_v2 = vld [vmem:[%s15524_s11 + $0x2d60] sm:$0xf]  ;;  %v12132_v3 = vld [vmem:[%s15524_s11 + $0x2d88] sm:$0xf]  ;;  %12129 = vst [vmem:[%s15529_s12 + $0x16a4] sm:$0xf] %v12128_v1 }
 0x26c   : > { %12131 = vst [vmem:[%s15529_s12 + $0x16b8] sm:$0xf] %v12130_v2  ;;  %12133 = vst [vmem:[%s15529_s12 + $0x16cc] sm:$0xf] %v12132_v3  ;;  %v12134_v4 = vld [vmem:[%s15524_s11 + $0x2db0] sm:$0xf] }
 0x26d   : > { %v12136_v5 = vld [vmem:[%s15524_s11 + $0x2dd8] sm:$0xf]  ;;  %v12138_v6 = vld [vmem:[%s15524_s11 + $0x2e00] sm:$0xf]  ;;  %12135 = vst [vmem:[%s15529_s12 + $0x16e0] sm:$0xf] %v12134_v4 }
 0x26e   : > { %12137 = vst [vmem:[%s15529_s12 + $0x16f4] sm:$0xf] %v12136_v5  ;;  %12139 = vst [vmem:[%s15529_s12 + $0x1708] sm:$0xf] %v12138_v6  ;;  %v12140_v7 = vld [vmem:[%s15524_s11 + $0x2e28] sm:$0xf] }
 0x26f   : > { %v12142_v8 = vld [vmem:[%s15524_s11 + $0x2e50] sm:$0xf]  ;;  %v12144_v9 = vld [vmem:[%s15524_s11 + $0x2e78] sm:$0xf]  ;;  %12141 = vst [vmem:[%s15529_s12 + $0x171c] sm:$0xf] %v12140_v7 }
 0x270   : > { %12143 = vst [vmem:[%s15529_s12 + $0x1730] sm:$0xf] %v12142_v8  ;;  %12145 = vst [vmem:[%s15529_s12 + $0x1744] sm:$0xf] %v12144_v9  ;;  %v12146_v10 = vld [vmem:[%s15524_s11 + $0x2ea0] sm:$0xf] }
 0x271   : > { %v12148_v11 = vld [vmem:[%s15524_s11 + $0x2ec8] sm:$0xf]  ;;  %v12150_v12 = vld [vmem:[%s15524_s11 + $0x2ef0] sm:$0xf]  ;;  %12147 = vst [vmem:[%s15529_s12 + $0x1758] sm:$0xf] %v12146_v10 }
 0x272   : > { %12149 = vst [vmem:[%s15529_s12 + $0x176c] sm:$0xf] %v12148_v11  ;;  %12151 = vst [vmem:[%s15529_s12 + $0x1780] sm:$0xf] %v12150_v12  ;;  %v12152_v13 = vld [vmem:[%s15524_s11 + $0x2f18] sm:$0xf] }
 0x273   : > { %v12154_v14 = vld [vmem:[%s15524_s11 + $0x2f40] sm:$0xf]  ;;  %v12156_v15 = vld [vmem:[%s15524_s11 + $0x2f68] sm:$0xf]  ;;  %12153 = vst [vmem:[%s15529_s12 + $0x1794] sm:$0xf] %v12152_v13 }
 0x274   : > { %12155 = vst [vmem:[%s15529_s12 + $0x17a8] sm:$0xf] %v12154_v14  ;;  %12157 = vst [vmem:[%s15529_s12 + $0x17bc] sm:$0xf] %v12156_v15  ;;  %v12158_v16 = vld [vmem:[%s15524_s11 + $0x2f90] sm:$0xf] }
 0x275   : > { %v12160_v17 = vld [vmem:[%s15524_s11 + $0x2fb8] sm:$0xf]  ;;  %v12162_v18 = vld [vmem:[%s15524_s11 + $0x2fe0] sm:$0xf]  ;;  %12159 = vst [vmem:[%s15529_s12 + $0x17d0] sm:$0xf] %v12158_v16 }
 0x276   : > { %12161 = vst [vmem:[%s15529_s12 + $0x17e4] sm:$0xf] %v12160_v17  ;;  %12163 = vst [vmem:[%s15529_s12 + $0x17f8] sm:$0xf] %v12162_v18  ;;  %v12164_v19 = vld [vmem:[%s15524_s11 + $0x3008] sm:$0xf] }
 0x277   : > { %v12166_v20 = vld [vmem:[%s15524_s11 + $0x3030] sm:$0xf]  ;;  %v12168_v21 = vld [vmem:[%s15524_s11 + $0x3058] sm:$0xf]  ;;  %12165 = vst [vmem:[%s15529_s12 + $0x180c] sm:$0xf] %v12164_v19 }
 0x278   : > { %12167 = vst [vmem:[%s15529_s12 + $0x1820] sm:$0xf] %v12166_v20  ;;  %12169 = vst [vmem:[%s15529_s12 + $0x1834] sm:$0xf] %v12168_v21  ;;  %v12170_v22 = vld [vmem:[%s15524_s11 + $0x3080] sm:$0xf] }
 0x279   : > { %v12172_v23 = vld [vmem:[%s15524_s11 + $0x30a8] sm:$0xf]  ;;  %v12174_v24 = vld [vmem:[%s15524_s11 + $0x30d0] sm:$0xf]  ;;  %12171 = vst [vmem:[%s15529_s12 + $0x1848] sm:$0xf] %v12170_v22 }
 0x27a   : > { %12173 = vst [vmem:[%s15529_s12 + $0x185c] sm:$0xf] %v12172_v23  ;;  %12175 = vst [vmem:[%s15529_s12 + $0x1870] sm:$0xf] %v12174_v24  ;;  %v12176_v25 = vld [vmem:[%s15524_s11 + $0x30f8] sm:$0xf] }
 0x27b   : > { %v12178_v26 = vld [vmem:[%s15524_s11 + $0x3120] sm:$0xf]  ;;  %v12180_v27 = vld [vmem:[%s15524_s11 + $0x3148] sm:$0xf]  ;;  %12177 = vst [vmem:[%s15529_s12 + $0x1884] sm:$0xf] %v12176_v25 }
 0x27c   : > { %12179 = vst [vmem:[%s15529_s12 + $0x1898] sm:$0xf] %v12178_v26  ;;  %12181 = vst [vmem:[%s15529_s12 + $0x18ac] sm:$0xf] %v12180_v27  ;;  %v12182_v28 = vld [vmem:[%s15524_s11 + $0x3170] sm:$0xf] }
 0x27d   : > { %v12184_v29 = vld [vmem:[%s15524_s11 + $0x3198] sm:$0xf]  ;;  %v12186_v30 = vld [vmem:[%s15524_s11 + $0x31c0] sm:$0xf]  ;;  %12183 = vst [vmem:[%s15529_s12 + $0x18c0] sm:$0xf] %v12182_v28 }
 0x27e   : > { %12185 = vst [vmem:[%s15529_s12 + $0x18d4] sm:$0xf] %v12184_v29  ;;  %12187 = vst [vmem:[%s15529_s12 + $0x18e8] sm:$0xf] %v12186_v30  ;;  %v12188_v31 = vld [vmem:[%s15524_s11 + $0x31e8] sm:$0xf] }
 0x27f   : > { %v12190_v32 = vld [vmem:[%s15524_s11 + $0x3210] sm:$0xf]  ;;  %v12192_v33 = vld [vmem:[%s15524_s11 + $0x3238] sm:$0xf]  ;;  %12189 = vst [vmem:[%s15529_s12 + $0x18fc] sm:$0xf] %v12188_v31 }
 0x280   : > { %12191 = vst [vmem:[%s15529_s12 + $0x1910] sm:$0xf] %v12190_v32  ;;  %12193 = vst [vmem:[%s15529_s12 + $0x1924] sm:$0xf] %v12192_v33  ;;  %v12194_v34 = vld [vmem:[%s15524_s11 + $0x3260] sm:$0xf] }
 0x281   : > { %v12196_v35 = vld [vmem:[%s15524_s11 + $0x3288] sm:$0xf]  ;;  %v12198_v36 = vld [vmem:[%s15524_s11 + $0x32b0] sm:$0xf]  ;;  %12195 = vst [vmem:[%s15529_s12 + $0x1938] sm:$0xf] %v12194_v34 }
 0x282   : > { %12197 = vst [vmem:[%s15529_s12 + $0x194c] sm:$0xf] %v12196_v35  ;;  %12199 = vst [vmem:[%s15529_s12 + $0x1960] sm:$0xf] %v12198_v36  ;;  %v12200_v37 = vld [vmem:[%s15524_s11 + $0x32d8] sm:$0xf] }
 0x283   : > { %v12202_v38 = vld [vmem:[%s15524_s11 + $0x3300] sm:$0xf]  ;;  %v12204_v39 = vld [vmem:[%s15524_s11 + $0x3328] sm:$0xf]  ;;  %12201 = vst [vmem:[%s15529_s12 + $0x1974] sm:$0xf] %v12200_v37 }
 0x284   : > { %12203 = vst [vmem:[%s15529_s12 + $0x1988] sm:$0xf] %v12202_v38  ;;  %12205 = vst [vmem:[%s15529_s12 + $0x199c] sm:$0xf] %v12204_v39  ;;  %v12206_v40 = vld [vmem:[%s15524_s11 + $0x3350] sm:$0xf] }
 0x285   : > { %v12208_v41 = vld [vmem:[%s15524_s11 + $0x3378] sm:$0xf]  ;;  %v12210_v42 = vld [vmem:[%s15524_s11 + $0x33a0] sm:$0xf]  ;;  %12207 = vst [vmem:[%s15529_s12 + $0x19b0] sm:$0xf] %v12206_v40 }
 0x286   : > { %12209 = vst [vmem:[%s15529_s12 + $0x19c4] sm:$0xf] %v12208_v41  ;;  %12211 = vst [vmem:[%s15529_s12 + $0x19d8] sm:$0xf] %v12210_v42  ;;  %v12212_v43 = vld [vmem:[%s15524_s11 + $0x33c8] sm:$0xf] }
 0x287   : > { %v12214_v44 = vld [vmem:[%s15524_s11 + $0x33f0] sm:$0xf]  ;;  %v12216_v45 = vld [vmem:[%s15524_s11 + $0x3418] sm:$0xf]  ;;  %12213 = vst [vmem:[%s15529_s12 + $0x19ec] sm:$0xf] %v12212_v43 }
 0x288   : > { %12215 = vst [vmem:[%s15529_s12 + $0x1a00] sm:$0xf] %v12214_v44  ;;  %12217 = vst [vmem:[%s15529_s12 + $0x1a14] sm:$0xf] %v12216_v45  ;;  %v12218_v46 = vld [vmem:[%s15524_s11 + $0x3440] sm:$0xf] }
 0x289   : > { %v12220_v47 = vld [vmem:[%s15524_s11 + $0x3468] sm:$0xf]  ;;  %v12222_v48 = vld [vmem:[%s15524_s11 + $0x3490] sm:$0xf]  ;;  %12219 = vst [vmem:[%s15529_s12 + $0x1a28] sm:$0xf] %v12218_v46 }
 0x28a   : > { %12221 = vst [vmem:[%s15529_s12 + $0x1a3c] sm:$0xf] %v12220_v47  ;;  %12223 = vst [vmem:[%s15529_s12 + $0x1a50] sm:$0xf] %v12222_v48  ;;  %v12224_v49 = vld [vmem:[%s15524_s11 + $0x34b8] sm:$0xf] }
 0x28b   : > { %v12226_v50 = vld [vmem:[%s15524_s11 + $0x34e0] sm:$0xf]  ;;  %v12228_v51 = vld [vmem:[%s15524_s11 + $0x3508] sm:$0xf]  ;;  %12225 = vst [vmem:[%s15529_s12 + $0x1a64] sm:$0xf] %v12224_v49 }
 0x28c   : > { %12227 = vst [vmem:[%s15529_s12 + $0x1a78] sm:$0xf] %v12226_v50  ;;  %12229 = vst [vmem:[%s15529_s12 + $0x1a8c] sm:$0xf] %v12228_v51  ;;  %v12230_v52 = vld [vmem:[%s15524_s11 + $0x3530] sm:$0xf] }
 0x28d   : > { %v12232_v53 = vld [vmem:[%s15524_s11 + $0x3558] sm:$0xf]  ;;  %v12234_v54 = vld [vmem:[%s15524_s11 + $0x3580] sm:$0xf]  ;;  %12231 = vst [vmem:[%s15529_s12 + $0x1aa0] sm:$0xf] %v12230_v52 }
 0x28e   : > { %12233 = vst [vmem:[%s15529_s12 + $0x1ab4] sm:$0xf] %v12232_v53  ;;  %12235 = vst [vmem:[%s15529_s12 + $0x1ac8] sm:$0xf] %v12234_v54  ;;  %v12236_v55 = vld [vmem:[%s15524_s11 + $0x35a8] sm:$0xf] }
 0x28f   : > { %v12238_v56 = vld [vmem:[%s15524_s11 + $0x35d0] sm:$0xf]  ;;  %v12240_v57 = vld [vmem:[%s15524_s11 + $0x35f8] sm:$0xf]  ;;  %12237 = vst [vmem:[%s15529_s12 + $0x1adc] sm:$0xf] %v12236_v55 }
 0x290   : > { %12239 = vst [vmem:[%s15529_s12 + $0x1af0] sm:$0xf] %v12238_v56  ;;  %12241 = vst [vmem:[%s15529_s12 + $0x1b04] sm:$0xf] %v12240_v57  ;;  %v12242_v58 = vld [vmem:[%s15524_s11 + $0x3620] sm:$0xf] }
 0x291   : > { %v12244_v59 = vld [vmem:[%s15524_s11 + $0x3648] sm:$0xf]  ;;  %v12246_v60 = vld [vmem:[%s15524_s11 + $0x3670] sm:$0xf]  ;;  %12243 = vst [vmem:[%s15529_s12 + $0x1b18] sm:$0xf] %v12242_v58 }
 0x292   : > { %12245 = vst [vmem:[%s15529_s12 + $0x1b2c] sm:$0xf] %v12244_v59  ;;  %12247 = vst [vmem:[%s15529_s12 + $0x1b40] sm:$0xf] %v12246_v60  ;;  %v12248_v61 = vld [vmem:[%s15524_s11 + $0x3698] sm:$0xf] }
 0x293   : > { %v12250_v62 = vld [vmem:[%s15524_s11 + $0x36c0] sm:$0xf]  ;;  %v12252_v63 = vld [vmem:[%s15524_s11 + $0x36e8] sm:$0xf]  ;;  %12249 = vst [vmem:[%s15529_s12 + $0x1b54] sm:$0xf] %v12248_v61 }
 0x294   : > { %12251 = vst [vmem:[%s15529_s12 + $0x1b68] sm:$0xf] %v12250_v62  ;;  %12253 = vst [vmem:[%s15529_s12 + $0x1b7c] sm:$0xf] %v12252_v63  ;;  %v12254_v0 = vld [vmem:[%s15524_s11 + $0x3710] sm:$0xf] }
 0x295   : > { %v12256_v1 = vld [vmem:[%s15524_s11 + $0x3738] sm:$0xf]  ;;  %v12258_v2 = vld [vmem:[%s15524_s11 + $0x3760] sm:$0xf]  ;;  %12255 = vst [vmem:[%s15529_s12 + $0x1b90] sm:$0xf] %v12254_v0 }
 0x296   : > { %12257 = vst [vmem:[%s15529_s12 + $0x1ba4] sm:$0xf] %v12256_v1  ;;  %12259 = vst [vmem:[%s15529_s12 + $0x1bb8] sm:$0xf] %v12258_v2  ;;  %v12260_v3 = vld [vmem:[%s15524_s11 + $0x3788] sm:$0xf] }
 0x297   : > { %v12262_v4 = vld [vmem:[%s15524_s11 + $0x37b0] sm:$0xf]  ;;  %v12264_v5 = vld [vmem:[%s15524_s11 + $0x37d8] sm:$0xf]  ;;  %12261 = vst [vmem:[%s15529_s12 + $0x1bcc] sm:$0xf] %v12260_v3 }
 0x298   : > { %12263 = vst [vmem:[%s15529_s12 + $0x1be0] sm:$0xf] %v12262_v4  ;;  %12265 = vst [vmem:[%s15529_s12 + $0x1bf4] sm:$0xf] %v12264_v5  ;;  %v12266_v6 = vld [vmem:[%s15524_s11 + $0x3800] sm:$0xf] }
 0x299   : > { %v12268_v7 = vld [vmem:[%s15524_s11 + $0x3828] sm:$0xf]  ;;  %v12270_v8 = vld [vmem:[%s15524_s11 + $0x3850] sm:$0xf]  ;;  %12267 = vst [vmem:[%s15529_s12 + $0x1c08] sm:$0xf] %v12266_v6 }
 0x29a   : > { %12269 = vst [vmem:[%s15529_s12 + $0x1c1c] sm:$0xf] %v12268_v7  ;;  %12271 = vst [vmem:[%s15529_s12 + $0x1c30] sm:$0xf] %v12270_v8  ;;  %v12272_v9 = vld [vmem:[%s15524_s11 + $0x3878] sm:$0xf] }
 0x29b   : > { %v12274_v10 = vld [vmem:[%s15524_s11 + $0x38a0] sm:$0xf]  ;;  %v12276_v11 = vld [vmem:[%s15524_s11 + $0x38c8] sm:$0xf]  ;;  %12273 = vst [vmem:[%s15529_s12 + $0x1c44] sm:$0xf] %v12272_v9 }
 0x29c   : > { %12275 = vst [vmem:[%s15529_s12 + $0x1c58] sm:$0xf] %v12274_v10  ;;  %12277 = vst [vmem:[%s15529_s12 + $0x1c6c] sm:$0xf] %v12276_v11  ;;  %v12278_v12 = vld [vmem:[%s15524_s11 + $0x38f0] sm:$0xf] }
 0x29d   : > { %v12280_v13 = vld [vmem:[%s15524_s11 + $0x3918] sm:$0xf]  ;;  %v12282_v14 = vld [vmem:[%s15524_s11 + $0x3940] sm:$0xf]  ;;  %12279 = vst [vmem:[%s15529_s12 + $0x1c80] sm:$0xf] %v12278_v12 }
 0x29e   : > { %12281 = vst [vmem:[%s15529_s12 + $0x1c94] sm:$0xf] %v12280_v13  ;;  %12283 = vst [vmem:[%s15529_s12 + $0x1ca8] sm:$0xf] %v12282_v14  ;;  %v12284_v15 = vld [vmem:[%s15524_s11 + $0x3968] sm:$0xf] }
 0x29f   : > { %v12286_v16 = vld [vmem:[%s15524_s11 + $0x3990] sm:$0xf]  ;;  %v12288_v17 = vld [vmem:[%s15524_s11 + $0x39b8] sm:$0xf]  ;;  %12285 = vst [vmem:[%s15529_s12 + $0x1cbc] sm:$0xf] %v12284_v15 }
 0x2a0   : > { %12287 = vst [vmem:[%s15529_s12 + $0x1cd0] sm:$0xf] %v12286_v16  ;;  %12289 = vst [vmem:[%s15529_s12 + $0x1ce4] sm:$0xf] %v12288_v17  ;;  %v12290_v18 = vld [vmem:[%s15524_s11 + $0x39e0] sm:$0xf] }
 0x2a1   : > { %v12292_v19 = vld [vmem:[%s15524_s11 + $0x3a08] sm:$0xf]  ;;  %v12294_v20 = vld [vmem:[%s15524_s11 + $0x3a30] sm:$0xf]  ;;  %12291 = vst [vmem:[%s15529_s12 + $0x1cf8] sm:$0xf] %v12290_v18 }
 0x2a2   : > { %12293 = vst [vmem:[%s15529_s12 + $0x1d0c] sm:$0xf] %v12292_v19  ;;  %12295 = vst [vmem:[%s15529_s12 + $0x1d20] sm:$0xf] %v12294_v20  ;;  %v12296_v21 = vld [vmem:[%s15524_s11 + $0x3a58] sm:$0xf] }
 0x2a3   : > { %v12298_v22 = vld [vmem:[%s15524_s11 + $0x3a80] sm:$0xf]  ;;  %v12300_v23 = vld [vmem:[%s15524_s11 + $0x3aa8] sm:$0xf]  ;;  %12297 = vst [vmem:[%s15529_s12 + $0x1d34] sm:$0xf] %v12296_v21 }
 0x2a4   : > { %12299 = vst [vmem:[%s15529_s12 + $0x1d48] sm:$0xf] %v12298_v22  ;;  %12301 = vst [vmem:[%s15529_s12 + $0x1d5c] sm:$0xf] %v12300_v23  ;;  %v12302_v24 = vld [vmem:[%s15524_s11 + $0x3ad0] sm:$0xf] }
 0x2a5   : > { %v12304_v25 = vld [vmem:[%s15524_s11 + $0x3af8] sm:$0xf]  ;;  %v12306_v26 = vld [vmem:[%s15524_s11 + $0x3b20] sm:$0xf]  ;;  %12303 = vst [vmem:[%s15529_s12 + $0x1d70] sm:$0xf] %v12302_v24 }
 0x2a6   : > { %12305 = vst [vmem:[%s15529_s12 + $0x1d84] sm:$0xf] %v12304_v25  ;;  %12307 = vst [vmem:[%s15529_s12 + $0x1d98] sm:$0xf] %v12306_v26  ;;  %v12308_v27 = vld [vmem:[%s15524_s11 + $0x3b48] sm:$0xf] }
 0x2a7   : > { %v12310_v28 = vld [vmem:[%s15524_s11 + $0x3b70] sm:$0xf]  ;;  %v12312_v29 = vld [vmem:[%s15524_s11 + $0x3b98] sm:$0xf]  ;;  %12309 = vst [vmem:[%s15529_s12 + $0x1dac] sm:$0xf] %v12308_v27 }
 0x2a8   : > { %12311 = vst [vmem:[%s15529_s12 + $0x1dc0] sm:$0xf] %v12310_v28  ;;  %12313 = vst [vmem:[%s15529_s12 + $0x1dd4] sm:$0xf] %v12312_v29  ;;  %v12314_v30 = vld [vmem:[%s15524_s11 + $0x3bc0] sm:$0xf] }
 0x2a9   : > { %v12316_v31 = vld [vmem:[%s15524_s11 + $0x3be8] sm:$0xf]  ;;  %v12318_v32 = vld [vmem:[%s15524_s11 + $0x3c10] sm:$0xf]  ;;  %12315 = vst [vmem:[%s15529_s12 + $0x1de8] sm:$0xf] %v12314_v30 }
 0x2aa   : > { %12317 = vst [vmem:[%s15529_s12 + $0x1dfc] sm:$0xf] %v12316_v31  ;;  %12319 = vst [vmem:[%s15529_s12 + $0x1e10] sm:$0xf] %v12318_v32  ;;  %v12320_v33 = vld [vmem:[%s15524_s11 + $0x3c38] sm:$0xf] }
 0x2ab   : > { %v12322_v34 = vld [vmem:[%s15524_s11 + $0x3c60] sm:$0xf]  ;;  %v12324_v35 = vld [vmem:[%s15524_s11 + $0x3c88] sm:$0xf]  ;;  %12321 = vst [vmem:[%s15529_s12 + $0x1e24] sm:$0xf] %v12320_v33 }
 0x2ac   : > { %12323 = vst [vmem:[%s15529_s12 + $0x1e38] sm:$0xf] %v12322_v34  ;;  %12325 = vst [vmem:[%s15529_s12 + $0x1e4c] sm:$0xf] %v12324_v35  ;;  %v12326_v36 = vld [vmem:[%s15524_s11 + $0x3cb0] sm:$0xf] }
 0x2ad   : > { %v12328_v37 = vld [vmem:[%s15524_s11 + $0x3cd8] sm:$0xf]  ;;  %v12330_v38 = vld [vmem:[%s15524_s11 + $0x3d00] sm:$0xf]  ;;  %12327 = vst [vmem:[%s15529_s12 + $0x1e60] sm:$0xf] %v12326_v36 }
 0x2ae   : > { %12329 = vst [vmem:[%s15529_s12 + $0x1e74] sm:$0xf] %v12328_v37  ;;  %12331 = vst [vmem:[%s15529_s12 + $0x1e88] sm:$0xf] %v12330_v38  ;;  %v12332_v39 = vld [vmem:[%s15524_s11 + $0x3d28] sm:$0xf] }
 0x2af   : > { %v12334_v40 = vld [vmem:[%s15524_s11 + $0x3d50] sm:$0xf]  ;;  %v12336_v41 = vld [vmem:[%s15524_s11 + $0x3d78] sm:$0xf]  ;;  %12333 = vst [vmem:[%s15529_s12 + $0x1e9c] sm:$0xf] %v12332_v39 }
 0x2b0   : > { %12335 = vst [vmem:[%s15529_s12 + $0x1eb0] sm:$0xf] %v12334_v40  ;;  %12337 = vst [vmem:[%s15529_s12 + $0x1ec4] sm:$0xf] %v12336_v41  ;;  %v12338_v42 = vld [vmem:[%s15524_s11 + $0x3da0] sm:$0xf] }
 0x2b1   : > { %v12340_v43 = vld [vmem:[%s15524_s11 + $0x3dc8] sm:$0xf]  ;;  %v12342_v44 = vld [vmem:[%s15524_s11 + $0x3df0] sm:$0xf]  ;;  %12339 = vst [vmem:[%s15529_s12 + $0x1ed8] sm:$0xf] %v12338_v42 }
 0x2b2   : > { %12341 = vst [vmem:[%s15529_s12 + $0x1eec] sm:$0xf] %v12340_v43  ;;  %12343 = vst [vmem:[%s15529_s12 + $0x1f00] sm:$0xf] %v12342_v44  ;;  %v12344_v45 = vld [vmem:[%s15524_s11 + $0x3e18] sm:$0xf] }
 0x2b3   : > { %v12346_v46 = vld [vmem:[%s15524_s11 + $0x3e40] sm:$0xf]  ;;  %v12348_v47 = vld [vmem:[%s15524_s11 + $0x3e68] sm:$0xf]  ;;  %12345 = vst [vmem:[%s15529_s12 + $0x1f14] sm:$0xf] %v12344_v45 }
 0x2b4   : > { %12347 = vst [vmem:[%s15529_s12 + $0x1f28] sm:$0xf] %v12346_v46  ;;  %12349 = vst [vmem:[%s15529_s12 + $0x1f3c] sm:$0xf] %v12348_v47 }
 0x2b5 PF: > { %p12350_p7 = scmp.ge.s32.totalorder %s15429_s21, 1  ;;  %p2626_p8 = scmp.lt.s32.totalorder %s15429_s21, 5 }
 0x2b7   : > { %p2627_p9 = pnand %p12350_p7, %p2626_p8 }
 0x2b8   : > { %s2633_s13 = sand.u32 (!%p2627_p9), 1, %s15405_s15   ;;  %s2668_s14 = smul.u32 (!%p2627_p9), 5, %s15417_s18 }
 0x2b9   : > { %2630 = sbr.rel (%p2627_p9) target bundleno = 2204 (0x89c), region = 58  ;;  %p2679_p11 = scmp.lt.s32.totalorder (!%p2627_p9), %s15417_s18, 1 }
 0x2ba   : > { %s13862_s24 = smul.u32 (!%p2627_p9), 8000, %s2633_s13  ;;  %p2669_p10 = scmp.lt.s32.totalorder (!%p2627_p9), %s2668_s14, 9 }
 0x2bb   : > { %s2673_s25 = smul.u32 (!%p2627_p9), 80, %s15417_s18  ;;  %p12353_p13 = scmp.ne.s32.totalorder (!%p2627_p9), %s15413_s17, 0 }
 0x2bc   : > { %s17951_s11 = scalar_lea.vmem (!%p2627_p9), [#allocation3], %s13862_s24 }
 0x2bd   : > { %p2674_p12 = scmp.lt.s32.totalorder (!%p2627_p9), %s2673_s25, 159 }
 0x2c0   : > { %s19270_s14 = smov (!%p2669_p10, %s2668_s14), 9  ;;  %s19272_s25 = smov (!%p2674_p12, %s2673_s25), 159 }
 0x2c1   : > { %s2671_s29 = scalar_lea.vmem %s19254_s2, %s19270_s14  ;;  %s19274_s18 = smov (!%p2679_p11, %s15417_s18), 1  ;;  %v15431_v48 = vmov (!%p12353_p13), 0.0  }
 0x2c2   : > { %s12351_s30 = sshll.u32 %s19272_s25, 2  ;;  %s12352_s7 = sshll.u32 %s19274_s18, 1  ;;  %2688 = vst [vmem:[#allocation2] sm:$0xff] (!%p12353_p13), %v15431_v48  ;;  %2689 = vst [vmem:[#allocation2 + $0x8] sm:$0x3] (!%p12353_p13), %v15431_v48 }
 0x2c3   : > { %s17944_s15 = scalar_lea.vmem %s19255_s3, %s12351_s30  ;;  %s17949_s10 = scalar_lea.vmem %s19256_s4, %s12352_s7 }
 0x2c4   : > { %2687 = sbr.rel (%p12353_p13) target bundleno = 715 (0x2cb), region = 66 }
 0x2cb PF: > { %v13928_v49 = vld [vmem:[%s17951_s11 + $0x4] ss:$20 sps:$4 sm:$0xff]   ;;  %v13930_v50 = vld [vmem:[%s17951_s11 + $0xc] ss:$20 sps:$4 sm:$0xff]   ;;  %v13933_v52 = vld [vmem:[%s17951_s11 + $0x8] ss:$20 sps:$4 sm:$0xff]   ;;  %v3908_v23 = vlaneseq }
 0x2cc   : > { %9290 = vmatprep.subr.bf16.mxu0 %v13928_v49  ;;  %v13932_v51 = vld [vmem:[%s17951_s11] ss:$20 sps:$4 sm:$0xff]   ;;  %9823 = vmatprep.subr.bf16.mxu1 %v13930_v50  ;;  %v13938_v55 = vld [vmem:[%s17951_s11 + $0x28] ss:$20 sps:$4 sm:$0xff]   ;;  %v13939_v56 = vld [vmem:[%s17951_s11 + $0x30] ss:$20 sps:$4 sm:$0xff]  }
 0x2cd   : > { %v13934_v53 = vld [vmem:[%s17951_s11 + $0x2c] ss:$20 sps:$4 sm:$0xff]   ;;  %9291 = vmatpush1.bf16.msra.mxu0 %v13932_v51  ;;  %9824 = vmatpush1.bf16.msra.mxu1 %v13933_v52  ;;  %v13936_v54 = vld [vmem:[%s17951_s11 + $0x34] ss:$20 sps:$4 sm:$0xff]   ;;  %v13942_v58 = vld [vmem:[%s17951_s11 + $0x5c] ss:$20 sps:$4 sm:$0xff]  }
 0x2ce   : > { %9292 = vmatprep.subr.bf16.mxu0 %v13934_v53  ;;  %9825 = vmatprep.subr.bf16.mxu1 %v13936_v54  ;;  %v13940_v57 = vld [vmem:[%s17951_s11 + $0x54] ss:$20 sps:$4 sm:$0xff]   ;;  %v13944_v59 = vld [vmem:[%s17951_s11 + $0x50] ss:$20 sps:$4 sm:$0xff]   ;;  %v13945_v60 = vld [vmem:[%s17951_s11 + $0x58] ss:$20 sps:$4 sm:$0xff]  }
 0x2cf   : > { %v13946_v61 = vld [vmem:[%s17951_s11 + $0x7c] ss:$20 sps:$4 sm:$0xff]   ;;  %v13948_v62 = vld [vmem:[%s17951_s11 + $0x84] ss:$20 sps:$4 sm:$0xff]   ;;  %v13951_v0 = vld [vmem:[%s17951_s11 + $0x80] ss:$20 sps:$4 sm:$0xff]  }
 0x2d0   : > { %v13950_v63 = vld [vmem:[%s17951_s11 + $0x78] ss:$20 sps:$4 sm:$0xff]   ;;  %v13956_v3 = vld [vmem:[%s17951_s11 + $0xa0] ss:$20 sps:$4 sm:$0xff]   ;;  %v13957_v4 = vld [vmem:[%s17951_s11 + $0xa8] ss:$20 sps:$4 sm:$0xff]  }
 0x2d1   : > { %9293 = vmatpush1.bf16.msra.mxu0 %v13938_v55  ;;  %9826 = vmatpush1.bf16.msra.mxu1 %v13939_v56  ;;  %v13952_v1 = vld [vmem:[%s17951_s11 + $0xa4] ss:$20 sps:$4 sm:$0xff]   ;;  %v13954_v2 = vld [vmem:[%s17951_s11 + $0xac] ss:$20 sps:$4 sm:$0xff]   ;;  %v13960_v6 = vld [vmem:[%s17951_s11 + $0xd4] ss:$20 sps:$4 sm:$0xff]  }
 0x2d2   : > { %9294 = vmatprep.subr.bf16.mxu0 %v13940_v57  ;;  %9827 = vmatprep.subr.bf16.mxu1 %v13942_v58  ;;  %v13958_v5 = vld [vmem:[%s17951_s11 + $0xcc] ss:$20 sps:$4 sm:$0xff]   ;;  %v13962_v7 = vld [vmem:[%s17951_s11 + $0xc8] ss:$20 sps:$4 sm:$0xff]   ;;  %v13963_v8 = vld [vmem:[%s17951_s11 + $0xd0] ss:$20 sps:$4 sm:$0xff]  }
 0x2d3   : > { %v13964_v9 = vld [vmem:[%s17951_s11 + $0xf4] ss:$20 sps:$4 sm:$0xff]   ;;  %v13966_v10 = vld [vmem:[%s17951_s11 + $0xfc] ss:$20 sps:$4 sm:$0xff]   ;;  %v13969_v12 = vld [vmem:[%s17951_s11 + $0xf8] ss:$20 sps:$4 sm:$0xff]  }
 0x2d4   : > { %v13968_v11 = vld [vmem:[%s17951_s11 + $0xf0] ss:$20 sps:$4 sm:$0xff]   ;;  %v13974_v15 = vld [vmem:[%s17951_s11 + $0x118] ss:$20 sps:$4 sm:$0xff]   ;;  %v13975_v16 = vld [vmem:[%s17951_s11 + $0x120] ss:$20 sps:$4 sm:$0xff]  }
 0x2d5   : > { %9295 = vmatpush1.bf16.msra.mxu0 %v13944_v59  ;;  %9828 = vmatpush1.bf16.msra.mxu1 %v13945_v60  ;;  %v13970_v13 = vld [vmem:[%s17951_s11 + $0x11c] ss:$20 sps:$4 sm:$0xff]   ;;  %v13972_v14 = vld [vmem:[%s17951_s11 + $0x124] ss:$20 sps:$4 sm:$0xff]   ;;  %v13978_v18 = vld [vmem:[%s17951_s11 + $0x14c] ss:$20 sps:$4 sm:$0xff]  }
 0x2d6   : > { %9296 = vmatprep.subr.bf16.mxu0 %v13946_v61  ;;  %9829 = vmatprep.subr.bf16.mxu1 %v13948_v62  ;;  %v13976_v17 = vld [vmem:[%s17951_s11 + $0x144] ss:$20 sps:$4 sm:$0xff]   ;;  %v13980_v19 = vld [vmem:[%s17951_s11 + $0x140] ss:$20 sps:$4 sm:$0xff]   ;;  %v13981_v20 = vld [vmem:[%s17951_s11 + $0x148] ss:$20 sps:$4 sm:$0xff]  }
 0x2d7   : > { %v15432_v21 = vmov 1966171168   ;;  %v13982_v24 = vld [vmem:[%s17951_s11 + $0x16c] ss:$20 sps:$4 sm:$0xff]   ;;  %s2690_s18 = smul.u32 3200, %s15413_s17  ;;  %v17994_v28 = vshrl.u32 %v3908_v23, 7 }
 0x2d8   : > { %v3906_v22 = vunpack.c.l.s4 %v15432_v21  ;;  %v13984_v25 = vld [vmem:[%s17951_s11 + $0x174] ss:$20 sps:$4 sm:$0xff]   ;;  %v13987_v29 = vld [vmem:[%s17951_s11 + $0x170] ss:$20 sps:$4 sm:$0xff]   ;;  %v13993_v33 = vld [vmem:[%s17951_s11 + $0x198] ss:$20 sps:$4 sm:$0xff]  }
 0x2d9   : > { %9297 = vmatpush1.bf16.msra.mxu0 %v13950_v63  ;;  %9830 = vmatpush1.bf16.msra.mxu1 %v13951_v0  ;;  %v13986_v26 = vld [vmem:[%s17951_s11 + $0x168] ss:$20 sps:$4 sm:$0xff]   ;;  %s2693_s12 = sshra.s32 %s2690_s18, 7  ;;  %v13992_v32 = vld [vmem:[%s17951_s11 + $0x190] ss:$20 sps:$4 sm:$0xff]   ;;  %vm15435_vm0 = vmmov 0  }
 0x2da   : > { %9298 = vmatprep.subr.bf16.mxu0 %v13952_v1  ;;  %9831 = vmatprep.subr.bf16.mxu1 %v13954_v2  ;;  %v3907_v27 = vunpack.c.0.s8 %v3906_v22  ;;  %v13988_v30 = vld [vmem:[%s17951_s11 + $0x194] ss:$20 sps:$4 sm:$0xff]   ;;  %v13990_v31 = vld [vmem:[%s17951_s11 + $0x19c] ss:$20 sps:$4 sm:$0xff]   ;;  %s18004_s25 = scalar_lea.vmem %s19252_s0, %s2693_s12  ;;  %v13996_v36 = vld [vmem:[%s17951_s11 + $0x1c4] ss:$20 sps:$4 sm:$0xff]  }
 0x2db   : > { %v13994_v35 = vld [vmem:[%s17951_s11 + $0x1bc] ss:$20 sps:$4 sm:$0xff]   ;;  %v13998_v38 = vld [vmem:[%s17951_s11 + $0x1b8] ss:$20 sps:$4 sm:$0xff]   ;;  %v13999_v40 = vld [vmem:[%s17951_s11 + $0x1c0] ss:$20 sps:$4 sm:$0xff]  }
 0x2dc   : > { %v18007_v34 = vsub.s32 %v3907_v27, %v17994_v28  ;;  %v18012_v37 = vld [vmem:[%s18004_s25] sm:$0xff]  ;;  %v14002_v42 = vld [vmem:[%s17951_s11 + $0x1ec] ss:$20 sps:$4 sm:$0xff]   ;;  %v14011_v50 = vld [vmem:[%s17951_s11 + $0x210] ss:$20 sps:$4 sm:$0xff]   ;;  %p13355_p0 = scmp.ne.s32.totalorder %s15413_s17, 1 }
 0x2dd   : > { %9299 = vmatpush1.bf16.msra.mxu0 %v13956_v3  ;;  %9832 = vmatpush1.bf16.msra.mxu1 %v13957_v4  ;;  %v14000_v41 = vld [vmem:[%s17951_s11 + $0x1e4] ss:$20 sps:$4 sm:$0xff]   ;;  %v14004_v44 = vld [vmem:[%s17951_s11 + $0x1e0] ss:$20 sps:$4 sm:$0xff]   ;;  %v14005_v46 = vld [vmem:[%s17951_s11 + $0x1e8] ss:$20 sps:$4 sm:$0xff]  }
 0x2de   : > { %9300 = vmatprep.subr.bf16.mxu0 %v13958_v5  ;;  %9833 = vmatprep.subr.bf16.mxu1 %v13960_v6  ;;  %v3911_v39 = vrot.slane %v18012_v37, %v18007_v34  ;;  %v14006_v47 = vld [vmem:[%s17951_s11 + $0x20c] ss:$20 sps:$4 sm:$0xff]   ;;  %v14008_v48 = vld [vmem:[%s17951_s11 + $0x214] ss:$20 sps:$4 sm:$0xff]   ;;  %v14014_v52 = vld [vmem:[%s17951_s11 + $0x23c] ss:$20 sps:$4 sm:$0xff]  }
 0x2df   : > { %v14010_v49 = vld [vmem:[%s17951_s11 + $0x208] ss:$20 sps:$4 sm:$0xff]   ;;  %v14016_v53 = vld [vmem:[%s17951_s11 + $0x230] ss:$20 sps:$4 sm:$0xff]   ;;  %v14017_v54 = vld [vmem:[%s17951_s11 + $0x238] ss:$20 sps:$4 sm:$0xff]  }
 0x2e0   : > { %v3919_v43 = vcombine.high %v3911_v39, %v3911_v39  ;;  %v14012_v51 = vld [vmem:[%s17951_s11 + $0x234] ss:$20 sps:$4 sm:$0xff]   ;;  %v14018_v55 = vld [vmem:[%s17951_s11 + $0x25c] ss:$20 sps:$4 sm:$0xff]   ;;  %v14020_v56 = vld [vmem:[%s17951_s11 + $0x264] ss:$20 sps:$4 sm:$0xff]   ;;  %v18043_v62 = vrot.slane %v3911_v39, %v18007_v34 }
 0x2e1   : > { %9301 = vmatpush1.bf16.msra.mxu0 %v13962_v7  ;;  %9834 = vmatpush1.bf16.msra.mxu1 %v13963_v8  ;;  %v14022_v57 = vld [vmem:[%s17951_s11 + $0x258] ss:$20 sps:$4 sm:$0xff]   ;;  %v14023_v58 = vld [vmem:[%s17951_s11 + $0x260] ss:$20 sps:$4 sm:$0xff]   ;;  %v14027_v63 = vld [vmem:[%s17951_s11 + $0x288] ss:$20 sps:$4 sm:$0xff]  }
 0x2e2   : > { %9302 = vmatprep.subr.bf16.mxu0 %v13964_v9  ;;  %9835 = vmatprep.subr.bf16.mxu1 %v13966_v10  ;;  %v18022_v45 = vrot.slane %v3919_v43, %v18007_v34  ;;  %v14026_v59 = vld [vmem:[%s17951_s11 + $0x284] ss:$20 sps:$4 sm:$0xff]   ;;  %v14029_v60 = vld [vmem:[%s17951_s11 + $0x28c] ss:$20 sps:$4 sm:$0xff]   ;;  %v14035_v1 = vld [vmem:[%s17951_s11 + $0x2b4] ss:$20 sps:$4 sm:$0xff]  }
 0x2e3   : > { %v14024_v61 = vld [vmem:[%s17951_s11 + $0x280] ss:$20 sps:$4 sm:$0xff]   ;;  %v14030_v3 = vld [vmem:[%s17951_s11 + $0x2a8] ss:$20 sps:$4 sm:$0xff]   ;;  %v14033_v4 = vld [vmem:[%s17951_s11 + $0x2b0] ss:$20 sps:$4 sm:$0xff]  }
 0x2e4   : > { %9322 = vmatprep.mubr.bf16.mxu0 %v18022_v45  ;;  %9855 = vmatprep.mubr.bf16.mxu1 %v18022_v45  ;;  %v14032_v0 = vld [vmem:[%s17951_s11 + $0x2ac] ss:$20 sps:$4 sm:$0xff]   ;;  %v18050_v2 = vcombine.high %v18022_v45, %v18022_v45  ;;  %v14038_v5 = vld [vmem:[%s17951_s11 + $0x2d4] ss:$20 sps:$4 sm:$0xff]   ;;  %v14041_v6 = vld [vmem:[%s17951_s11 + $0x2dc] ss:$20 sps:$4 sm:$0xff]  }
 0x2e5   : > { %9303 = vmatpush1.bf16.msra.mxu0 %v13968_v11  ;;  %9836 = vmatpush1.bf16.msra.mxu1 %v13969_v12  ;;  %v14036_v7 = vld [vmem:[%s17951_s11 + $0x2d0] ss:$20 sps:$4 sm:$0xff]   ;;  %v14039_v8 = vld [vmem:[%s17951_s11 + $0x2d8] ss:$20 sps:$4 sm:$0xff]   ;;  %v14045_v12 = vld [vmem:[%s17951_s11 + $0x300] ss:$20 sps:$4 sm:$0xff]  }
 0x2e6   : > { %9304 = vmatprep.subr.bf16.mxu0 %v13970_v13  ;;  %9837 = vmatprep.subr.bf16.mxu1 %v13972_v14  ;;  %v14044_v9 = vld [vmem:[%s17951_s11 + $0x2fc] ss:$20 sps:$4 sm:$0xff]   ;;  %v14047_v10 = vld [vmem:[%s17951_s11 + $0x304] ss:$20 sps:$4 sm:$0xff]   ;;  %v14053_v14 = vld [vmem:[%s17951_s11 + $0x32c] ss:$20 sps:$4 sm:$0xff]  }
 0x2e7   : > { %v14042_v11 = vld [vmem:[%s17951_s11 + $0x2f8] ss:$20 sps:$4 sm:$0xff]   ;;  %v14062_v21 = vld [vmem:[%s17951_s11 + $0x374] ss:$20 sps:$4 sm:$0xff]   ;;  %v14065_v22 = vld [vmem:[%s17951_s11 + $0x37c] ss:$20 sps:$4 sm:$0xff]  }
 0x2e8   : > { %v14050_v13 = vld [vmem:[%s17951_s11 + $0x324] ss:$20 sps:$4 sm:$0xff]   ;;  %vm15438_vm1 = vmmov (!%p13355_p0), 0  }
 0x2e9   : > { %9305 = vmatpush1.bf16.msra.mxu0 %v13974_v15  ;;  %9838 = vmatpush1.bf16.msra.mxu1 %v13975_v16  ;;  %v14048_v15 = vld [vmem:[%s17951_s11 + $0x320] ss:$20 sps:$4 sm:$0xff]   ;;  %v14051_v16 = vld [vmem:[%s17951_s11 + $0x328] ss:$20 sps:$4 sm:$0xff]   ;;  %v14060_v23 = vld [vmem:[%s17951_s11 + $0x370] ss:$20 sps:$4 sm:$0xff]  }
 0x2ea   : > { %9306 = vmatprep.subr.bf16.mxu0 %v13976_v17  ;;  %9839 = vmatprep.subr.bf16.mxu1 %v13978_v18  ;;  %v14056_v17 = vld [vmem:[%s17951_s11 + $0x34c] ss:$20 sps:$4 sm:$0xff]   ;;  %v14059_v18 = vld [vmem:[%s17951_s11 + $0x354] ss:$20 sps:$4 sm:$0xff]   ;;  %v14081_v39 = vld [vmem:[%s17951_s11 + $0x3f0] ss:$20 sps:$4 sm:$0xff]  }
 0x2eb   : > { %v14066_v27 = vld [vmem:[%s17951_s11 + $0x398] ss:$20 sps:$4 sm:$0xff]  }
 0x2ec   : > { %v14087_v43 = vld [vmem:[%s17951_s11 + $0x418] ss:$20 sps:$4 sm:$0xff]  }
 0x2ed   : > { %9307 = vmatpush1.bf16.msra.mxu0 %v13980_v19  ;;  %9840 = vmatpush1.bf16.msra.mxu1 %v13981_v20  ;;  %v14054_v19 = vld [vmem:[%s17951_s11 + $0x348] ss:$20 sps:$4 sm:$0xff]   ;;  %v14057_v20 = vld [vmem:[%s17951_s11 + $0x350] ss:$20 sps:$4 sm:$0xff]  }
 0x2ee   : > { %9308 = vmatprep.subr.bf16.mxu0 %v13982_v24  ;;  %9841 = vmatprep.subr.bf16.mxu1 %v13984_v25  ;;  %v14063_v24 = vld [vmem:[%s17951_s11 + $0x378] ss:$20 sps:$4 sm:$0xff]   ;;  %v14068_v25 = vld [vmem:[%s17951_s11 + $0x39c] ss:$20 sps:$4 sm:$0xff]  }
 0x2f1   : > { %9309 = vmatpush1.bf16.msra.mxu0 %v13986_v26  ;;  %9842 = vmatpush1.bf16.msra.mxu1 %v13987_v29  ;;  %v14071_v26 = vld [vmem:[%s17951_s11 + $0x3a4] ss:$20 sps:$4 sm:$0xff]   ;;  %v14069_v29 = vld [vmem:[%s17951_s11 + $0x3a0] ss:$20 sps:$4 sm:$0xff]  }
 0x2f2   : > { %9310 = vmatprep.subr.bf16.mxu0 %v13988_v30  ;;  %9843 = vmatprep.subr.bf16.mxu1 %v13990_v31  ;;  %v14074_v30 = vld [vmem:[%s17951_s11 + $0x3c4] ss:$20 sps:$4 sm:$0xff]   ;;  %v14077_v31 = vld [vmem:[%s17951_s11 + $0x3cc] ss:$20 sps:$4 sm:$0xff]  }
 0x2f5   : > { %9311 = vmatpush1.bf16.msra.mxu0 %v13992_v32  ;;  %9844 = vmatpush1.bf16.msra.mxu1 %v13993_v33  ;;  %v14072_v32 = vld [vmem:[%s17951_s11 + $0x3c0] ss:$20 sps:$4 sm:$0xff]   ;;  %v14075_v33 = vld [vmem:[%s17951_s11 + $0x3c8] ss:$20 sps:$4 sm:$0xff]  }
 0x2f6   : > { %9312 = vmatprep.subr.bf16.mxu0 %v13994_v35  ;;  %9845 = vmatprep.subr.bf16.mxu1 %v13996_v36  ;;  %v14080_v35 = vld [vmem:[%s17951_s11 + $0x3ec] ss:$20 sps:$4 sm:$0xff]   ;;  %v14083_v36 = vld [vmem:[%s17951_s11 + $0x3f4] ss:$20 sps:$4 sm:$0xff]  }
 0x2f9   : > { %9313 = vmatpush1.bf16.msra.mxu0 %v13998_v38  ;;  %9846 = vmatpush1.bf16.msra.mxu1 %v13999_v40  ;;  %v14078_v38 = vld [vmem:[%s17951_s11 + $0x3e8] ss:$20 sps:$4 sm:$0xff]  }
 0x2fa   : > { %9314 = vmatprep.subr.bf16.mxu0 %v14000_v41  ;;  %9847 = vmatprep.subr.bf16.mxu1 %v14002_v42  ;;  %v14086_v40 = vld [vmem:[%s17951_s11 + $0x414] ss:$20 sps:$4 sm:$0xff]   ;;  %v14089_v41 = vld [vmem:[%s17951_s11 + $0x41c] ss:$20 sps:$4 sm:$0xff]  }
 0x2fb   : > { %v14084_v42 = vld [vmem:[%s17951_s11 + $0x410] ss:$20 sps:$4 sm:$0xff]  }
 0x2fd   : > { %9315 = vmatpush1.bf16.msra.mxu0 %v14004_v44  ;;  %9848 = vmatpush1.bf16.msra.mxu1 %v14005_v46  ;;  %v14092_v44 = vld [vmem:[%s17951_s11 + $0x43c] ss:$20 sps:$4 sm:$0xff]   ;;  %v14095_v46 = vld [vmem:[%s17951_s11 + $0x444] ss:$20 sps:$4 sm:$0xff]  }
 0x2fe   : > { %9316 = vmatprep.subr.bf16.mxu0 %v14006_v47  ;;  %9849 = vmatprep.subr.bf16.mxu1 %v14008_v48  ;;  %v14090_v47 = vld [vmem:[%s17951_s11 + $0x438] ss:$20 sps:$4 sm:$0xff]   ;;  %v14093_v48 = vld [vmem:[%s17951_s11 + $0x440] ss:$20 sps:$4 sm:$0xff]  }
 0x301   : > { %9317 = vmatpush1.bf16.msra.mxu0 %v14010_v49  ;;  %9850 = vmatpush1.bf16.msra.mxu1 %v14011_v50  ;;  %v14098_v49 = vld [vmem:[%s17951_s11 + $0x464] ss:$20 sps:$4 sm:$0xff]   ;;  %v14101_v50 = vld [vmem:[%s17951_s11 + $0x46c] ss:$20 sps:$4 sm:$0xff]  }
 0x302   : > { %9318 = vmatprep.subr.bf16.mxu0 %v14012_v51  ;;  %9851 = vmatprep.subr.bf16.mxu1 %v14014_v52  ;;  %v14096_v51 = vld [vmem:[%s17951_s11 + $0x460] ss:$20 sps:$4 sm:$0xff]   ;;  %v14099_v52 = vld [vmem:[%s17951_s11 + $0x468] ss:$20 sps:$4 sm:$0xff]  }
 0x305   : > { %9319 = vmatpush1.bf16.msra.mxu0 %v14016_v53  ;;  %9852 = vmatpush1.bf16.msra.mxu1 %v14017_v54  ;;  %v14104_v53 = vld [vmem:[%s17951_s11 + $0x48c] ss:$20 sps:$4 sm:$0xff]   ;;  %v14107_v54 = vld [vmem:[%s17951_s11 + $0x494] ss:$20 sps:$4 sm:$0xff]  }
 0x306   : > { %9320 = vmatprep.subr.bf16.mxu0 %v14018_v55  ;;  %9853 = vmatprep.subr.bf16.mxu1 %v14020_v56  ;;  %v14102_v55 = vld [vmem:[%s17951_s11 + $0x488] ss:$20 sps:$4 sm:$0xff]   ;;  %v14105_v56 = vld [vmem:[%s17951_s11 + $0x490] ss:$20 sps:$4 sm:$0xff]  }
 0x309   : > { %9321 = vmatpush1.bf16.msra.mxu0 %v14022_v57  ;;  %9854 = vmatpush1.bf16.msra.mxu1 %v14023_v58  ;;  %v14110_v57 = vld [vmem:[%s17951_s11 + $0x4b4] ss:$20 sps:$4 sm:$0xff]   ;;  %v14113_v58 = vld [vmem:[%s17951_s11 + $0x4bc] ss:$20 sps:$4 sm:$0xff]  }
 0x30a   : > { %9331 = vmatprep.subr.bf16.mxu0 %v14026_v59  ;;  %9864 = vmatprep.subr.bf16.mxu1 %v14029_v60  ;;  %v3904_v59 = vcombine.high %v18012_v37, %v18012_v37  ;;  %v14108_v60 = vld [vmem:[%s17951_s11 + $0x4b0] ss:$20 sps:$4 sm:$0xff]   ;;  %v14117_v37 = vld [vmem:[%s17951_s11 + $0x4e0] ss:$20 sps:$4 sm:$0xff]  }
 0x30c   : > { %9323 = vmatmul.mubr.bf16.vlgmr.msra.gmra.mrb[0].mxu0 %v18043_v62  ;;  %9856 = vmatmul.mubr.bf16.vlgmr.msra.gmra.mrb[0].mxu1 %v18043_v62 }
 0x30d   : > { %9332 = vmatpush1.bf16.msra.mxu0 %v14024_v61  ;;  %9865 = vmatpush1.bf16.msra.mxu1 %v14027_v63  ;;  %v14111_v61 = vld [vmem:[%s17951_s11 + $0x4b8] ss:$20 sps:$4 sm:$0xff]   ;;  %v14116_v63 = vld [vmem:[%s17951_s11 + $0x4dc] ss:$20 sps:$4 sm:$0xff]  }
 0x30e   : > { %9333 = vmatprep.subr.bf16.mxu0 %v14032_v0  ;;  %9866 = vmatprep.subr.bf16.mxu1 %v14035_v1  ;;  %v14119_v0 = vld [vmem:[%s17951_s11 + $0x4e4] ss:$20 sps:$4 sm:$0xff]   ;;  %v18115_v1 = vrot.slane %v3904_v59, %v18007_v34 }
 0x30f   : > { %9363 = vmatprep.mubr.bf16.mxu0 %v18050_v2  ;;  %9896 = vmatprep.mubr.bf16.mxu1 %v18050_v2  ;;  %v14194_v59 = vld [vmem:[%s17951_s11 + $0x6e4] ss:$20 sps:$4 sm:$0xff]  }
 0x311   : > { %9334 = vmatpush1.bf16.msra.mxu0 %v14030_v3  ;;  %9867 = vmatpush1.bf16.msra.mxu1 %v14033_v4  ;;  %v14114_v3 = vld [vmem:[%s17951_s11 + $0x4d8] ss:$20 sps:$4 sm:$0xff]  }
 0x312   : > { %9335 = vmatprep.subr.bf16.mxu0 %v14038_v5  ;;  %9868 = vmatprep.subr.bf16.mxu1 %v14041_v6  ;;  %v14122_v4 = vld [vmem:[%s17951_s11 + $0x504] ss:$20 sps:$4 sm:$0xff]   ;;  %v14125_v5 = vld [vmem:[%s17951_s11 + $0x50c] ss:$20 sps:$4 sm:$0xff]   ;;  %v3920_v6 = vcombine.high %v18115_v1, %v18115_v1 }
 0x315   : > { %9336 = vmatpush1.bf16.msra.mxu0 %v14036_v7  ;;  %9869 = vmatpush1.bf16.msra.mxu1 %v14039_v8  ;;  %v14120_v7 = vld [vmem:[%s17951_s11 + $0x500] ss:$20 sps:$4 sm:$0xff]   ;;  %v18126_v8 = vcombine.high %v18043_v62, %v18043_v62 }
 0x316   : > { %9337 = vmatprep.subr.bf16.mxu0 %v14044_v9  ;;  %9870 = vmatprep.subr.bf16.mxu1 %v14047_v10  ;;  %v14123_v9 = vld [vmem:[%s17951_s11 + $0x508] ss:$20 sps:$4 sm:$0xff]   ;;  %v14128_v10 = vld [vmem:[%s17951_s11 + $0x52c] ss:$20 sps:$4 sm:$0xff]  }
 0x319   : > { %9338 = vmatpush1.bf16.msra.mxu0 %v14042_v11  ;;  %9871 = vmatpush1.bf16.msra.mxu1 %v14045_v12  ;;  %v14131_v11 = vld [vmem:[%s17951_s11 + $0x534] ss:$20 sps:$4 sm:$0xff]   ;;  %v18132_v12 = vrot.slane %v3920_v6, %v18007_v34  ;;  %v14209_v6 = vld [vmem:[%s17951_s11 + $0x73c] ss:$20 sps:$4 sm:$0xff]  }
 0x31a   : > { %9339 = vmatprep.subr.bf16.mxu0 %v14050_v13  ;;  %9872 = vmatprep.subr.bf16.mxu1 %v14053_v14  ;;  %v14126_v13 = vld [vmem:[%s17951_s11 + $0x528] ss:$20 sps:$4 sm:$0xff]   ;;  %v14129_v14 = vld [vmem:[%s17951_s11 + $0x530] ss:$20 sps:$4 sm:$0xff]  }
 0x31d   : > { %9340 = vmatpush1.bf16.msra.mxu0 %v14048_v15  ;;  %9873 = vmatpush1.bf16.msra.mxu1 %v14051_v16  ;;  %v14134_v15 = vld [vmem:[%s17951_s11 + $0x554] ss:$20 sps:$4 sm:$0xff]   ;;  %v14137_v16 = vld [vmem:[%s17951_s11 + $0x55c] ss:$20 sps:$4 sm:$0xff]  }
 0x31e   : > { %9341 = vmatprep.subr.bf16.mxu0 %v14056_v17  ;;  %9874 = vmatprep.subr.bf16.mxu1 %v14059_v18  ;;  %v14132_v17 = vld [vmem:[%s17951_s11 + $0x550] ss:$20 sps:$4 sm:$0xff]   ;;  %v14135_v18 = vld [vmem:[%s17951_s11 + $0x558] ss:$20 sps:$4 sm:$0xff]  }
 0x321   : > { %9342 = vmatpush1.bf16.msra.mxu0 %v14054_v19  ;;  %9875 = vmatpush1.bf16.msra.mxu1 %v14057_v20  ;;  %v14140_v19 = vld [vmem:[%s17951_s11 + $0x57c] ss:$20 sps:$4 sm:$0xff]   ;;  %v14143_v20 = vld [vmem:[%s17951_s11 + $0x584] ss:$20 sps:$4 sm:$0xff]  }
 0x322   : > { %9343 = vmatprep.subr.bf16.mxu0 %v14062_v21  ;;  %9876 = vmatprep.subr.bf16.mxu1 %v14065_v22  ;;  %v14138_v21 = vld [vmem:[%s17951_s11 + $0x578] ss:$20 sps:$4 sm:$0xff]   ;;  %v14141_v22 = vld [vmem:[%s17951_s11 + $0x580] ss:$20 sps:$4 sm:$0xff]  }
 0x325   : > { %9344 = vmatpush1.bf16.msra.mxu0 %v14060_v23  ;;  %9877 = vmatpush1.bf16.msra.mxu1 %v14063_v24  ;;  %v14146_v23 = vld [vmem:[%s17951_s11 + $0x5a4] ss:$20 sps:$4 sm:$0xff]   ;;  %v14149_v24 = vld [vmem:[%s17951_s11 + $0x5ac] ss:$20 sps:$4 sm:$0xff]  }
 0x326   : > { %9345 = vmatprep.subr.bf16.mxu0 %v14068_v25  ;;  %9878 = vmatprep.subr.bf16.mxu1 %v14071_v26  ;;  %v14144_v25 = vld [vmem:[%s17951_s11 + $0x5a0] ss:$20 sps:$4 sm:$0xff]   ;;  %v14147_v26 = vld [vmem:[%s17951_s11 + $0x5a8] ss:$20 sps:$4 sm:$0xff]  }
 0x329   : > { %9346 = vmatpush1.bf16.msra.mxu0 %v14066_v27  ;;  %9879 = vmatpush1.bf16.msra.mxu1 %v14069_v29  ;;  %v14152_v27 = vld [vmem:[%s17951_s11 + $0x5cc] ss:$20 sps:$4 sm:$0xff]   ;;  %v14155_v29 = vld [vmem:[%s17951_s11 + $0x5d4] ss:$20 sps:$4 sm:$0xff]  }
 0x32a   : > { %9347 = vmatprep.subr.bf16.mxu0 %v14074_v30  ;;  %9880 = vmatprep.subr.bf16.mxu1 %v14077_v31  ;;  %v14150_v30 = vld [vmem:[%s17951_s11 + $0x5c8] ss:$20 sps:$4 sm:$0xff]   ;;  %v14153_v31 = vld [vmem:[%s17951_s11 + $0x5d0] ss:$20 sps:$4 sm:$0xff]  }
 0x32d   : > { %9348 = vmatpush1.bf16.msra.mxu0 %v14072_v32  ;;  %9881 = vmatpush1.bf16.msra.mxu1 %v14075_v33  ;;  %v14158_v32 = vld [vmem:[%s17951_s11 + $0x5f4] ss:$20 sps:$4 sm:$0xff]   ;;  %v14161_v33 = vld [vmem:[%s17951_s11 + $0x5fc] ss:$20 sps:$4 sm:$0xff]  }
 0x32e   : > { %9349 = vmatprep.subr.bf16.mxu0 %v14080_v35  ;;  %9882 = vmatprep.subr.bf16.mxu1 %v14083_v36  ;;  %v14156_v35 = vld [vmem:[%s17951_s11 + $0x5f0] ss:$20 sps:$4 sm:$0xff]   ;;  %v14159_v36 = vld [vmem:[%s17951_s11 + $0x5f8] ss:$20 sps:$4 sm:$0xff]  }
 0x331   : > { %9350 = vmatpush1.bf16.msra.mxu0 %v14078_v38  ;;  %9883 = vmatpush1.bf16.msra.mxu1 %v14081_v39  ;;  %v14164_v38 = vld [vmem:[%s17951_s11 + $0x61c] ss:$20 sps:$4 sm:$0xff]   ;;  %v14167_v39 = vld [vmem:[%s17951_s11 + $0x624] ss:$20 sps:$4 sm:$0xff]  }
 0x332   : > { %9351 = vmatprep.subr.bf16.mxu0 %v14086_v40  ;;  %9884 = vmatprep.subr.bf16.mxu1 %v14089_v41  ;;  %v14162_v40 = vld [vmem:[%s17951_s11 + $0x618] ss:$20 sps:$4 sm:$0xff]   ;;  %v14165_v41 = vld [vmem:[%s17951_s11 + $0x620] ss:$20 sps:$4 sm:$0xff]  }
 0x335   : > { %9352 = vmatpush1.bf16.msra.mxu0 %v14084_v42  ;;  %9885 = vmatpush1.bf16.msra.mxu1 %v14087_v43  ;;  %v14170_v42 = vld [vmem:[%s17951_s11 + $0x644] ss:$20 sps:$4 sm:$0xff]   ;;  %v14173_v43 = vld [vmem:[%s17951_s11 + $0x64c] ss:$20 sps:$4 sm:$0xff]  }
 0x336   : > { %9353 = vmatprep.subr.bf16.mxu0 %v14092_v44  ;;  %9886 = vmatprep.subr.bf16.mxu1 %v14095_v46  ;;  %v14168_v44 = vld [vmem:[%s17951_s11 + $0x640] ss:$20 sps:$4 sm:$0xff]   ;;  %v14171_v46 = vld [vmem:[%s17951_s11 + $0x648] ss:$20 sps:$4 sm:$0xff]  }
 0x339   : > { %9354 = vmatpush1.bf16.msra.mxu0 %v14090_v47  ;;  %9887 = vmatpush1.bf16.msra.mxu1 %v14093_v48  ;;  %v14176_v47 = vld [vmem:[%s17951_s11 + $0x66c] ss:$20 sps:$4 sm:$0xff]   ;;  %v14179_v48 = vld [vmem:[%s17951_s11 + $0x674] ss:$20 sps:$4 sm:$0xff]  }
 0x33a   : > { %9355 = vmatprep.subr.bf16.mxu0 %v14098_v49  ;;  %9888 = vmatprep.subr.bf16.mxu1 %v14101_v50  ;;  %v14174_v49 = vld [vmem:[%s17951_s11 + $0x668] ss:$20 sps:$4 sm:$0xff]   ;;  %v14177_v50 = vld [vmem:[%s17951_s11 + $0x670] ss:$20 sps:$4 sm:$0xff]  }
 0x33d   : > { %9356 = vmatpush1.bf16.msra.mxu0 %v14096_v51  ;;  %9889 = vmatpush1.bf16.msra.mxu1 %v14099_v52  ;;  %v14182_v51 = vld [vmem:[%s17951_s11 + $0x694] ss:$20 sps:$4 sm:$0xff]   ;;  %v14185_v52 = vld [vmem:[%s17951_s11 + $0x69c] ss:$20 sps:$4 sm:$0xff]  }
 0x33e   : > { %9357 = vmatprep.subr.bf16.mxu0 %v14104_v53  ;;  %9890 = vmatprep.subr.bf16.mxu1 %v14107_v54  ;;  %v14180_v53 = vld [vmem:[%s17951_s11 + $0x690] ss:$20 sps:$4 sm:$0xff]   ;;  %v14183_v54 = vld [vmem:[%s17951_s11 + $0x698] ss:$20 sps:$4 sm:$0xff]  }
 0x341   : > { %9358 = vmatpush1.bf16.msra.mxu0 %v14102_v55  ;;  %9891 = vmatpush1.bf16.msra.mxu1 %v14105_v56  ;;  %v14188_v55 = vld [vmem:[%s17951_s11 + $0x6bc] ss:$20 sps:$4 sm:$0xff]   ;;  %v14191_v56 = vld [vmem:[%s17951_s11 + $0x6c4] ss:$20 sps:$4 sm:$0xff]  }
 0x342   : > { %9359 = vmatprep.subr.bf16.mxu0 %v14110_v57  ;;  %9892 = vmatprep.subr.bf16.mxu1 %v14113_v58  ;;  %v14186_v57 = vld [vmem:[%s17951_s11 + $0x6b8] ss:$20 sps:$4 sm:$0xff]   ;;  %v14189_v58 = vld [vmem:[%s17951_s11 + $0x6c0] ss:$20 sps:$4 sm:$0xff]  }
 0x345   : > { %9360 = vmatpush1.bf16.msra.mxu0 %v14108_v60  ;;  %9893 = vmatpush1.bf16.msra.mxu1 %v14111_v61  ;;  %v14197_v60 = vld [vmem:[%s17951_s11 + $0x6ec] ss:$20 sps:$4 sm:$0xff]  }
 0x346   : > { %9361 = vmatprep.subr.bf16.mxu0 %v14116_v63  ;;  %9894 = vmatprep.subr.bf16.mxu1 %v14119_v0  ;;  %v14192_v61 = vld [vmem:[%s17951_s11 + $0x6e0] ss:$20 sps:$4 sm:$0xff]   ;;  %v14195_v63 = vld [vmem:[%s17951_s11 + $0x6e8] ss:$20 sps:$4 sm:$0xff]  }
 0x347   : > { %v14200_v0 = vld [vmem:[%s17951_s11 + $0x70c] ss:$20 sps:$4 sm:$0xff]  }
 0x349   : > { %9362 = vmatpush1.bf16.msra.mxu0 %v14114_v3  ;;  %9895 = vmatpush1.bf16.msra.mxu1 %v14117_v37  ;;  %v14203_v3 = vld [vmem:[%s17951_s11 + $0x714] ss:$20 sps:$4 sm:$0xff]  }
 0x34a   : > { %9372 = vmatprep.subr.bf16.mxu0 %v14122_v4  ;;  %9905 = vmatprep.subr.bf16.mxu1 %v14125_v5  ;;  %v14198_v37 = vld [vmem:[%s17951_s11 + $0x708] ss:$20 sps:$4 sm:$0xff]   ;;  %v14201_v4 = vld [vmem:[%s17951_s11 + $0x710] ss:$20 sps:$4 sm:$0xff]  }
 0x34b   : > { %v14206_v5 = vld [vmem:[%s17951_s11 + $0x734] ss:$20 sps:$4 sm:$0xff]  }
 0x34c   : > { %9364 = vmatmul.mubr.bf16.vlgmr.msra.gmra.mrb[0].mxu0 %v18126_v8  ;;  %9897 = vmatmul.mubr.bf16.vlgmr.msra.gmra.mrb[0].mxu1 %v18126_v8 }
 0x34d   : > { %9373 = vmatpush1.bf16.msra.mxu0 %v14120_v7  ;;  %9906 = vmatpush1.bf16.msra.mxu1 %v14123_v9  ;;  %v14204_v7 = vld [vmem:[%s17951_s11 + $0x730] ss:$20 sps:$4 sm:$0xff]   ;;  %v14207_v9 = vld [vmem:[%s17951_s11 + $0x738] ss:$20 sps:$4 sm:$0xff]  }
 0x34e   : > { %9374 = vmatprep.subr.bf16.mxu0 %v14128_v10  ;;  %9907 = vmatprep.subr.bf16.mxu1 %v14131_v11  ;;  %v14212_v10 = vld [vmem:[%s17951_s11 + $0x75c] ss:$20 sps:$4 sm:$0xff]   ;;  %v14215_v11 = vld [vmem:[%s17951_s11 + $0x764] ss:$20 sps:$4 sm:$0xff]  }
 0x34f   : > { %9404 = vmatprep.mubr.bf16.mxu0 %v18132_v12  ;;  %9937 = vmatprep.mubr.bf16.mxu1 %v18132_v12 }
 0x351   : > { %9375 = vmatpush1.bf16.msra.mxu0 %v14126_v13  ;;  %9908 = vmatpush1.bf16.msra.mxu1 %v14129_v14  ;;  %v14210_v13 = vld [vmem:[%s17951_s11 + $0x758] ss:$20 sps:$4 sm:$0xff]   ;;  %v14213_v14 = vld [vmem:[%s17951_s11 + $0x760] ss:$20 sps:$4 sm:$0xff]  }
 0x352   : > { %9376 = vmatprep.subr.bf16.mxu0 %v14134_v15  ;;  %9909 = vmatprep.subr.bf16.mxu1 %v14137_v16  ;;  %v14219_v15 = vld [vmem:[%s17951_s11 + $0x784] ss:$20 sps:$4 sm:$0xff]   ;;  %v14222_v16 = vld [vmem:[%s17951_s11 + $0x78c] ss:$20 sps:$4 sm:$0xff]  }
 0x355   : > { %9377 = vmatpush1.bf16.msra.mxu0 %v14132_v17  ;;  %9910 = vmatpush1.bf16.msra.mxu1 %v14135_v18  ;;  %v14217_v17 = vld [vmem:[%s17951_s11 + $0x780] ss:$20 sps:$4 sm:$0xff]   ;;  %v18201_v18 = vrot.slane %v18115_v1, %v18007_v34  ;;  %v14223_v1 = vld [vmem:[%s17951_s11 + $0x7a8] ss:$20 sps:$4 sm:$0xff]  }
 0x356   : > { %9378 = vmatprep.subr.bf16.mxu0 %v14140_v19  ;;  %9911 = vmatprep.subr.bf16.mxu1 %v14143_v20  ;;  %v14220_v19 = vld [vmem:[%s17951_s11 + $0x788] ss:$20 sps:$4 sm:$0xff]   ;;  %v14225_v20 = vld [vmem:[%s17951_s11 + $0x7ac] ss:$20 sps:$4 sm:$0xff]  }
 0x359   : > { %9379 = vmatpush1.bf16.msra.mxu0 %v14138_v21  ;;  %9912 = vmatpush1.bf16.msra.mxu1 %v14141_v22  ;;  %v14228_v21 = vld [vmem:[%s17951_s11 + $0x7b4] ss:$20 sps:$4 sm:$0xff]   ;;  %v18208_v22 = vcombine.high %v18132_v12, %v18132_v12 }
 0x35a   : > { %9380 = vmatprep.subr.bf16.mxu0 %v14146_v23  ;;  %9913 = vmatprep.subr.bf16.mxu1 %v14149_v24  ;;  %v14226_v23 = vld [vmem:[%s17951_s11 + $0x7b0] ss:$20 sps:$4 sm:$0xff]   ;;  %v14231_v24 = vld [vmem:[%s17951_s11 + $0x7d4] ss:$20 sps:$4 sm:$0xff]  }
 0x35d   : > { %9381 = vmatpush1.bf16.msra.mxu0 %v14144_v25  ;;  %9914 = vmatpush1.bf16.msra.mxu1 %v14147_v26  ;;  %v14234_v25 = vld [vmem:[%s17951_s11 + $0x7dc] ss:$20 sps:$4 sm:$0xff]  }
 0x35e   : > { %9382 = vmatprep.subr.bf16.mxu0 %v14152_v27  ;;  %9915 = vmatprep.subr.bf16.mxu1 %v14155_v29  ;;  %v14229_v26 = vld [vmem:[%s17951_s11 + $0x7d0] ss:$20 sps:$4 sm:$0xff]   ;;  %v14232_v27 = vld [vmem:[%s17951_s11 + $0x7d8] ss:$20 sps:$4 sm:$0xff]  }
 0x35f   : > { %v14237_v29 = vld [vmem:[%s17951_s11 + $0x7fc] ss:$20 sps:$4 sm:$0xff]  }
 0x361   : > { %9383 = vmatpush1.bf16.msra.mxu0 %v14150_v30  ;;  %9916 = vmatpush1.bf16.msra.mxu1 %v14153_v31  ;;  %v14240_v30 = vld [vmem:[%s17951_s11 + $0x804] ss:$20 sps:$4 sm:$0xff]  }
 0x362   : > { %9384 = vmatprep.subr.bf16.mxu0 %v14158_v32  ;;  %9917 = vmatprep.subr.bf16.mxu1 %v14161_v33  ;;  %v14235_v31 = vld [vmem:[%s17951_s11 + $0x7f8] ss:$20 sps:$4 sm:$0xff]   ;;  %v14238_v32 = vld [vmem:[%s17951_s11 + $0x800] ss:$20 sps:$4 sm:$0xff]  }
 0x363   : > { %v14243_v33 = vld [vmem:[%s17951_s11 + $0x824] ss:$20 sps:$4 sm:$0xff]  }
 0x365   : > { %9385 = vmatpush1.bf16.msra.mxu0 %v14156_v35  ;;  %9918 = vmatpush1.bf16.msra.mxu1 %v14159_v36  ;;  %v14246_v35 = vld [vmem:[%s17951_s11 + $0x82c] ss:$20 sps:$4 sm:$0xff]  }
 0x366   : > { %9386 = vmatprep.subr.bf16.mxu0 %v14164_v38  ;;  %9919 = vmatprep.subr.bf16.mxu1 %v14167_v39  ;;  %v14241_v36 = vld [vmem:[%s17951_s11 + $0x820] ss:$20 sps:$4 sm:$0xff]   ;;  %v14244_v38 = vld [vmem:[%s17951_s11 + $0x828] ss:$20 sps:$4 sm:$0xff]  }
 0x367   : > { %v14249_v39 = vld [vmem:[%s17951_s11 + $0x84c] ss:$20 sps:$4 sm:$0xff]  }
 0x369   : > { %9387 = vmatpush1.bf16.msra.mxu0 %v14162_v40  ;;  %9920 = vmatpush1.bf16.msra.mxu1 %v14165_v41  ;;  %v14252_v40 = vld [vmem:[%s17951_s11 + $0x854] ss:$20 sps:$4 sm:$0xff]  }
 0x36a   : > { %9388 = vmatprep.subr.bf16.mxu0 %v14170_v42  ;;  %9921 = vmatprep.subr.bf16.mxu1 %v14173_v43  ;;  %v14247_v41 = vld [vmem:[%s17951_s11 + $0x848] ss:$20 sps:$4 sm:$0xff]   ;;  %v14250_v42 = vld [vmem:[%s17951_s11 + $0x850] ss:$20 sps:$4 sm:$0xff]  }
 0x36b   : > { %v14255_v43 = vld [vmem:[%s17951_s11 + $0x874] ss:$20 sps:$4 sm:$0xff]  }
 0x36d   : > { %9389 = vmatpush1.bf16.msra.mxu0 %v14168_v44  ;;  %9922 = vmatpush1.bf16.msra.mxu1 %v14171_v46  ;;  %v14258_v44 = vld [vmem:[%s17951_s11 + $0x87c] ss:$20 sps:$4 sm:$0xff]  }
 0x36e   : > { %9390 = vmatprep.subr.bf16.mxu0 %v14176_v47  ;;  %9923 = vmatprep.subr.bf16.mxu1 %v14179_v48  ;;  %v14253_v46 = vld [vmem:[%s17951_s11 + $0x870] ss:$20 sps:$4 sm:$0xff]   ;;  %v14256_v47 = vld [vmem:[%s17951_s11 + $0x878] ss:$20 sps:$4 sm:$0xff]  }
 0x36f   : > { %v14261_v48 = vld [vmem:[%s17951_s11 + $0x89c] ss:$20 sps:$4 sm:$0xff]  }
 0x371   : > { %9391 = vmatpush1.bf16.msra.mxu0 %v14174_v49  ;;  %9924 = vmatpush1.bf16.msra.mxu1 %v14177_v50  ;;  %v14264_v49 = vld [vmem:[%s17951_s11 + $0x8a4] ss:$20 sps:$4 sm:$0xff]  }
 0x372   : > { %9392 = vmatprep.subr.bf16.mxu0 %v14182_v51  ;;  %9925 = vmatprep.subr.bf16.mxu1 %v14185_v52  ;;  %v14259_v50 = vld [vmem:[%s17951_s11 + $0x898] ss:$20 sps:$4 sm:$0xff]   ;;  %v14262_v51 = vld [vmem:[%s17951_s11 + $0x8a0] ss:$20 sps:$4 sm:$0xff]  }
 0x373   : > { %v14267_v52 = vld [vmem:[%s17951_s11 + $0x8c4] ss:$20 sps:$4 sm:$0xff]  }
 0x375   : > { %9393 = vmatpush1.bf16.msra.mxu0 %v14180_v53  ;;  %9926 = vmatpush1.bf16.msra.mxu1 %v14183_v54  ;;  %v14270_v53 = vld [vmem:[%s17951_s11 + $0x8cc] ss:$20 sps:$4 sm:$0xff]  }
 0x376   : > { %9394 = vmatprep.subr.bf16.mxu0 %v14188_v55  ;;  %9927 = vmatprep.subr.bf16.mxu1 %v14191_v56  ;;  %v14265_v54 = vld [vmem:[%s17951_s11 + $0x8c0] ss:$20 sps:$4 sm:$0xff]   ;;  %v14268_v55 = vld [vmem:[%s17951_s11 + $0x8c8] ss:$20 sps:$4 sm:$0xff]  }
 0x377   : > { %v14273_v56 = vld [vmem:[%s17951_s11 + $0x8ec] ss:$20 sps:$4 sm:$0xff]  }
 0x379   : > { %9395 = vmatpush1.bf16.msra.mxu0 %v14186_v57  ;;  %9928 = vmatpush1.bf16.msra.mxu1 %v14189_v58  ;;  %v14276_v57 = vld [vmem:[%s17951_s11 + $0x8f4] ss:$20 sps:$4 sm:$0xff]  }
 0x37a   : > { %9396 = vmatprep.subr.bf16.mxu0 %v14194_v59  ;;  %9929 = vmatprep.subr.bf16.mxu1 %v14197_v60  ;;  %v14271_v58 = vld [vmem:[%s17951_s11 + $0x8e8] ss:$20 sps:$4 sm:$0xff]   ;;  %v14274_v59 = vld [vmem:[%s17951_s11 + $0x8f0] ss:$20 sps:$4 sm:$0xff]  }
 0x37b   : > { %v14279_v60 = vld [vmem:[%s17951_s11 + $0x914] ss:$20 sps:$4 sm:$0xff]  }
 0x37d   : > { %9397 = vmatpush1.bf16.msra.mxu0 %v14192_v61  ;;  %9930 = vmatpush1.bf16.msra.mxu1 %v14195_v63  ;;  %v14282_v61 = vld [vmem:[%s17951_s11 + $0x91c] ss:$20 sps:$4 sm:$0xff]  }
 0x37e   : > { %9398 = vmatprep.subr.bf16.mxu0 %v14200_v0  ;;  %9931 = vmatprep.subr.bf16.mxu1 %v14203_v3  ;;  %v14277_v63 = vld [vmem:[%s17951_s11 + $0x910] ss:$20 sps:$4 sm:$0xff]   ;;  %v14280_v0 = vld [vmem:[%s17951_s11 + $0x918] ss:$20 sps:$4 sm:$0xff]  }
 0x37f   : > { %v14285_v3 = vld [vmem:[%s17951_s11 + $0x93c] ss:$20 sps:$4 sm:$0xff]  }
 0x381   : > { %9399 = vmatpush1.bf16.msra.mxu0 %v14198_v37  ;;  %9932 = vmatpush1.bf16.msra.mxu1 %v14201_v4  ;;  %v14288_v37 = vld [vmem:[%s17951_s11 + $0x944] ss:$20 sps:$4 sm:$0xff]  }
 0x382   : > { %9400 = vmatprep.subr.bf16.mxu0 %v14206_v5  ;;  %9933 = vmatprep.subr.bf16.mxu1 %v14209_v6  ;;  %v14283_v4 = vld [vmem:[%s17951_s11 + $0x938] ss:$20 sps:$4 sm:$0xff]   ;;  %v14286_v5 = vld [vmem:[%s17951_s11 + $0x940] ss:$20 sps:$4 sm:$0xff]  }
 0x383   : > { %v14291_v6 = vld [vmem:[%s17951_s11 + $0x964] ss:$20 sps:$4 sm:$0xff]  }
 0x385   : > { %9401 = vmatpush1.bf16.msra.mxu0 %v14204_v7  ;;  %9934 = vmatpush1.bf16.msra.mxu1 %v14207_v9  ;;  %v14294_v7 = vld [vmem:[%s17951_s11 + $0x96c] ss:$20 sps:$4 sm:$0xff]  }
 0x386   : > { %9402 = vmatprep.subr.bf16.mxu0 %v14212_v10  ;;  %9935 = vmatprep.subr.bf16.mxu1 %v14215_v11  ;;  %v14289_v9 = vld [vmem:[%s17951_s11 + $0x960] ss:$20 sps:$4 sm:$0xff]   ;;  %v14292_v10 = vld [vmem:[%s17951_s11 + $0x968] ss:$20 sps:$4 sm:$0xff]  }
 0x387   : > { %v14297_v11 = vld [vmem:[%s17951_s11 + $0x98c] ss:$20 sps:$4 sm:$0xff]  }
 0x389   : > { %9403 = vmatpush1.bf16.msra.mxu0 %v14210_v13  ;;  %9936 = vmatpush1.bf16.msra.mxu1 %v14213_v14  ;;  %v14300_v13 = vld [vmem:[%s17951_s11 + $0x994] ss:$20 sps:$4 sm:$0xff]  }
 0x38a   : > { %9413 = vmatprep.subr.bf16.mxu0 %v14219_v15  ;;  %9946 = vmatprep.subr.bf16.mxu1 %v14222_v16  ;;  %v14295_v14 = vld [vmem:[%s17951_s11 + $0x988] ss:$20 sps:$4 sm:$0xff]   ;;  %v14298_v15 = vld [vmem:[%s17951_s11 + $0x990] ss:$20 sps:$4 sm:$0xff]  }
 0x38b   : > { %v14303_v16 = vld [vmem:[%s17951_s11 + $0x9b4] ss:$20 sps:$4 sm:$0xff]  }
 0x38c   : > { %9405 = vmatmul.mubr.bf16.vlgmr.msra.gmra.mrb[0].mxu0 %v18201_v18  ;;  %9938 = vmatmul.mubr.bf16.vlgmr.msra.gmra.mrb[0].mxu1 %v18201_v18 }
 0x38d   : > { %9414 = vmatpush1.bf16.msra.mxu0 %v14217_v17  ;;  %9947 = vmatpush1.bf16.msra.mxu1 %v14220_v19  ;;  %v14306_v17 = vld [vmem:[%s17951_s11 + $0x9bc] ss:$20 sps:$4 sm:$0xff]  }
 0x38e   : > { %9415 = vmatprep.subr.bf16.mxu0 %v14225_v20  ;;  %9948 = vmatprep.subr.bf16.mxu1 %v14228_v21  ;;  %v18267_v19 = vld.sshfl [vmem:[%s18004_s25 + $0x8] sm:$0xff pattern:$0x75316420]  ;;  %v14304_v21 = vld [vmem:[%s17951_s11 + $0x9b8] ss:$20 sps:$4 sm:$0xff]  }
 0x38f   : > { %9445 = vmatprep.mubr.bf16.mxu0 %v18208_v22  ;;  %9978 = vmatprep.mubr.bf16.mxu1 %v18208_v22  ;;  %v14301_v20 = vld [vmem:[%s17951_s11 + $0x9b0] ss:$20 sps:$4 sm:$0xff]  }
 0x391   : > { %9416 = vmatpush1.bf16.msra.mxu0 %v14223_v1  ;;  %9949 = vmatpush1.bf16.msra.mxu1 %v14226_v23  ;;  %v14309_v1 = vld [vmem:[%s17951_s11 + $0x9dc] ss:$20 sps:$4 sm:$0xff]   ;;  %v14312_v23 = vld [vmem:[%s17951_s11 + $0x9e4] ss:$20 sps:$4 sm:$0xff]  }
 0x392   : > { %9417 = vmatprep.subr.bf16.mxu0 %v14231_v24  ;;  %9950 = vmatprep.subr.bf16.mxu1 %v14234_v25  ;;  %v14307_v24 = vld [vmem:[%s17951_s11 + $0x9d8] ss:$20 sps:$4 sm:$0xff]   ;;  %v14310_v25 = vld [vmem:[%s17951_s11 + $0x9e0] ss:$20 sps:$4 sm:$0xff]  }
 0x395   : > { %9418 = vmatpush1.bf16.msra.mxu0 %v14229_v26  ;;  %9951 = vmatpush1.bf16.msra.mxu1 %v14232_v27  ;;  %v14315_v26 = vld [vmem:[%s17951_s11 + $0xa04] ss:$20 sps:$4 sm:$0xff]   ;;  %v14318_v27 = vld [vmem:[%s17951_s11 + $0xa0c] ss:$20 sps:$4 sm:$0xff]  }
 0x396   : > { %9419 = vmatprep.subr.bf16.mxu0 %v14237_v29  ;;  %9952 = vmatprep.subr.bf16.mxu1 %v14240_v30  ;;  %v3968_v29 = vcombine.high %v18267_v19, %v18267_v19  ;;  %v18281_v30 = vcombine.high %v18201_v18, %v18201_v18 }
 0x399   : > { %9420 = vmatpush1.bf16.msra.mxu0 %v14235_v31  ;;  %9953 = vmatpush1.bf16.msra.mxu1 %v14238_v32  ;;  %v14313_v31 = vld [vmem:[%s17951_s11 + $0xa00] ss:$20 sps:$4 sm:$0xff]   ;;  %v14316_v32 = vld [vmem:[%s17951_s11 + $0xa08] ss:$20 sps:$4 sm:$0xff]  }
 0x39a   : > { %9421 = vmatprep.subr.bf16.mxu0 %v14243_v33  ;;  %9954 = vmatprep.subr.bf16.mxu1 %v14246_v35  ;;  %v14321_v33 = vld [vmem:[%s17951_s11 + $0xa2c] ss:$20 sps:$4 sm:$0xff]   ;;  %v14324_v35 = vld [vmem:[%s17951_s11 + $0xa34] ss:$20 sps:$4 sm:$0xff]  }
 0x39d   : > { %9422 = vmatpush1.bf16.msra.mxu0 %v14241_v36  ;;  %9955 = vmatpush1.bf16.msra.mxu1 %v14244_v38  ;;  %v18288_v36 = vrot.slane %v3968_v29, %v18007_v34  ;;  %v14319_v38 = vld [vmem:[%s17951_s11 + $0xa28] ss:$20 sps:$4 sm:$0xff]  }
 0x39e   : > { %9423 = vmatprep.subr.bf16.mxu0 %v14249_v39  ;;  %9956 = vmatprep.subr.bf16.mxu1 %v14252_v40  ;;  %v14322_v39 = vld [vmem:[%s17951_s11 + $0xa30] ss:$20 sps:$4 sm:$0xff]   ;;  %v14327_v40 = vld [vmem:[%s17951_s11 + $0xa54] ss:$20 sps:$4 sm:$0xff]  }
 0x39f   : > { %v14396_v29 = vld [vmem:[%s17951_s11 + $0xc14] ss:$20 sps:$4 sm:$0xff]  }
 0x3a1   : > { %9424 = vmatpush1.bf16.msra.mxu0 %v14247_v41  ;;  %9957 = vmatpush1.bf16.msra.mxu1 %v14250_v42  ;;  %v14330_v41 = vld [vmem:[%s17951_s11 + $0xa5c] ss:$20 sps:$4 sm:$0xff]  }
 0x3a2   : > { %9425 = vmatprep.subr.bf16.mxu0 %v14255_v43  ;;  %9958 = vmatprep.subr.bf16.mxu1 %v14258_v44  ;;  %v14325_v42 = vld [vmem:[%s17951_s11 + $0xa50] ss:$20 sps:$4 sm:$0xff]   ;;  %v14328_v43 = vld [vmem:[%s17951_s11 + $0xa58] ss:$20 sps:$4 sm:$0xff]  }
 0x3a3   : > { %v14333_v44 = vld [vmem:[%s17951_s11 + $0xa7c] ss:$20 sps:$4 sm:$0xff]  }
 0x3a5   : > { %9426 = vmatpush1.bf16.msra.mxu0 %v14253_v46  ;;  %9959 = vmatpush1.bf16.msra.mxu1 %v14256_v47  ;;  %v14336_v46 = vld [vmem:[%s17951_s11 + $0xa84] ss:$20 sps:$4 sm:$0xff]  }
 0x3a6   : > { %9427 = vmatprep.subr.bf16.mxu0 %v14261_v48  ;;  %9960 = vmatprep.subr.bf16.mxu1 %v14264_v49  ;;  %v14331_v47 = vld [vmem:[%s17951_s11 + $0xa78] ss:$20 sps:$4 sm:$0xff]   ;;  %v14334_v48 = vld [vmem:[%s17951_s11 + $0xa80] ss:$20 sps:$4 sm:$0xff]  }
 0x3a7   : > { %v14339_v49 = vld [vmem:[%s17951_s11 + $0xaa4] ss:$20 sps:$4 sm:$0xff]  }
 0x3a9   : > { %9428 = vmatpush1.bf16.msra.mxu0 %v14259_v50  ;;  %9961 = vmatpush1.bf16.msra.mxu1 %v14262_v51  ;;  %v14342_v50 = vld [vmem:[%s17951_s11 + $0xaac] ss:$20 sps:$4 sm:$0xff]  }
 0x3aa   : > { %9429 = vmatprep.subr.bf16.mxu0 %v14267_v52  ;;  %9962 = vmatprep.subr.bf16.mxu1 %v14270_v53  ;;  %v14337_v51 = vld [vmem:[%s17951_s11 + $0xaa0] ss:$20 sps:$4 sm:$0xff]   ;;  %v14340_v52 = vld [vmem:[%s17951_s11 + $0xaa8] ss:$20 sps:$4 sm:$0xff]  }
 0x3ab   : > { %v14345_v53 = vld [vmem:[%s17951_s11 + $0xacc] ss:$20 sps:$4 sm:$0xff]  }
 0x3ad   : > { %9430 = vmatpush1.bf16.msra.mxu0 %v14265_v54  ;;  %9963 = vmatpush1.bf16.msra.mxu1 %v14268_v55  ;;  %v14348_v54 = vld [vmem:[%s17951_s11 + $0xad4] ss:$20 sps:$4 sm:$0xff]  }
 0x3ae   : > { %9431 = vmatprep.subr.bf16.mxu0 %v14273_v56  ;;  %9964 = vmatprep.subr.bf16.mxu1 %v14276_v57  ;;  %v14343_v55 = vld [vmem:[%s17951_s11 + $0xac8] ss:$20 sps:$4 sm:$0xff]   ;;  %v14346_v56 = vld [vmem:[%s17951_s11 + $0xad0] ss:$20 sps:$4 sm:$0xff]  }
 0x3af   : > { %v14351_v57 = vld [vmem:[%s17951_s11 + $0xaf4] ss:$20 sps:$4 sm:$0xff]  }
 0x3b1   : > { %9432 = vmatpush1.bf16.msra.mxu0 %v14271_v58  ;;  %9965 = vmatpush1.bf16.msra.mxu1 %v14274_v59  ;;  %v14354_v58 = vld [vmem:[%s17951_s11 + $0xafc] ss:$20 sps:$4 sm:$0xff]  }
 0x3b2   : > { %9433 = vmatprep.subr.bf16.mxu0 %v14279_v60  ;;  %9966 = vmatprep.subr.bf16.mxu1 %v14282_v61  ;;  %v14349_v59 = vld [vmem:[%s17951_s11 + $0xaf0] ss:$20 sps:$4 sm:$0xff]   ;;  %v14352_v60 = vld [vmem:[%s17951_s11 + $0xaf8] ss:$20 sps:$4 sm:$0xff]  }
 0x3b3   : > { %v14357_v61 = vld [vmem:[%s17951_s11 + $0xb1c] ss:$20 sps:$4 sm:$0xff]  }
 0x3b5   : > { %9434 = vmatpush1.bf16.msra.mxu0 %v14277_v63  ;;  %9967 = vmatpush1.bf16.msra.mxu1 %v14280_v0  ;;  %v14360_v63 = vld [vmem:[%s17951_s11 + $0xb24] ss:$20 sps:$4 sm:$0xff]  }
 0x3b6   : > { %9435 = vmatprep.subr.bf16.mxu0 %v14285_v3  ;;  %9968 = vmatprep.subr.bf16.mxu1 %v14288_v37  ;;  %v14355_v0 = vld [vmem:[%s17951_s11 + $0xb18] ss:$20 sps:$4 sm:$0xff]   ;;  %v14358_v3 = vld [vmem:[%s17951_s11 + $0xb20] ss:$20 sps:$4 sm:$0xff]  }
 0x3b7   : > { %v14363_v37 = vld [vmem:[%s17951_s11 + $0xb44] ss:$20 sps:$4 sm:$0xff]  }
 0x3b9   : > { %9436 = vmatpush1.bf16.msra.mxu0 %v14283_v4  ;;  %9969 = vmatpush1.bf16.msra.mxu1 %v14286_v5  ;;  %v14366_v4 = vld [vmem:[%s17951_s11 + $0xb4c] ss:$20 sps:$4 sm:$0xff]  }
 0x3ba   : > { %9437 = vmatprep.subr.bf16.mxu0 %v14291_v6  ;;  %9970 = vmatprep.subr.bf16.mxu1 %v14294_v7  ;;  %v14361_v5 = vld [vmem:[%s17951_s11 + $0xb40] ss:$20 sps:$4 sm:$0xff]   ;;  %v14364_v6 = vld [vmem:[%s17951_s11 + $0xb48] ss:$20 sps:$4 sm:$0xff]  }
 0x3bb   : > { %v14369_v7 = vld [vmem:[%s17951_s11 + $0xb6c] ss:$20 sps:$4 sm:$0xff]  }
 0x3bd   : > { %9438 = vmatpush1.bf16.msra.mxu0 %v14289_v9  ;;  %9971 = vmatpush1.bf16.msra.mxu1 %v14292_v10  ;;  %v14372_v9 = vld [vmem:[%s17951_s11 + $0xb74] ss:$20 sps:$4 sm:$0xff]  }
 0x3be   : > { %9439 = vmatprep.subr.bf16.mxu0 %v14297_v11  ;;  %9972 = vmatprep.subr.bf16.mxu1 %v14300_v13  ;;  %v14367_v10 = vld [vmem:[%s17951_s11 + $0xb68] ss:$20 sps:$4 sm:$0xff]   ;;  %v14370_v11 = vld [vmem:[%s17951_s11 + $0xb70] ss:$20 sps:$4 sm:$0xff]  }
 0x3bf   : > { %v14375_v13 = vld [vmem:[%s17951_s11 + $0xb94] ss:$20 sps:$4 sm:$0xff]  }
 0x3c1   : > { %9440 = vmatpush1.bf16.msra.mxu0 %v14295_v14  ;;  %9973 = vmatpush1.bf16.msra.mxu1 %v14298_v15  ;;  %v14378_v14 = vld [vmem:[%s17951_s11 + $0xb9c] ss:$20 sps:$4 sm:$0xff]  }
 0x3c2   : > { %9441 = vmatprep.subr.bf16.mxu0 %v14303_v16  ;;  %9974 = vmatprep.subr.bf16.mxu1 %v14306_v17  ;;  %v14373_v15 = vld [vmem:[%s17951_s11 + $0xb90] ss:$20 sps:$4 sm:$0xff]   ;;  %v14376_v16 = vld [vmem:[%s17951_s11 + $0xb98] ss:$20 sps:$4 sm:$0xff]  }
 0x3c3   : > { %v14381_v17 = vld [vmem:[%s17951_s11 + $0xbbc] ss:$20 sps:$4 sm:$0xff]  }
 0x3c5   : > { %9442 = vmatpush1.bf16.msra.mxu0 %v14301_v20  ;;  %9975 = vmatpush1.bf16.msra.mxu1 %v14304_v21  ;;  %v14384_v20 = vld [vmem:[%s17951_s11 + $0xbc4] ss:$20 sps:$4 sm:$0xff]  }
 0x3c6   : > { %9443 = vmatprep.subr.bf16.mxu0 %v14309_v1  ;;  %9976 = vmatprep.subr.bf16.mxu1 %v14312_v23  ;;  %v14379_v21 = vld [vmem:[%s17951_s11 + $0xbb8] ss:$20 sps:$4 sm:$0xff]   ;;  %v14382_v1 = vld [vmem:[%s17951_s11 + $0xbc0] ss:$20 sps:$4 sm:$0xff]  }
 0x3c7   : > { %v14387_v23 = vld [vmem:[%s17951_s11 + $0xbe4] ss:$20 sps:$4 sm:$0xff]  }
 0x3c9   : > { %9444 = vmatpush1.bf16.msra.mxu0 %v14307_v24  ;;  %9977 = vmatpush1.bf16.msra.mxu1 %v14310_v25  ;;  %v14390_v24 = vld [vmem:[%s17951_s11 + $0xbec] ss:$20 sps:$4 sm:$0xff]  }
 0x3ca   : > { %9454 = vmatprep.subr.bf16.mxu0 %v14315_v26  ;;  %9987 = vmatprep.subr.bf16.mxu1 %v14318_v27  ;;  %v14385_v25 = vld [vmem:[%s17951_s11 + $0xbe0] ss:$20 sps:$4 sm:$0xff]   ;;  %v14388_v26 = vld [vmem:[%s17951_s11 + $0xbe8] ss:$20 sps:$4 sm:$0xff]  }
 0x3cb   : > { %v14393_v27 = vld [vmem:[%s17951_s11 + $0xc0c] ss:$20 sps:$4 sm:$0xff]  }
 0x3cc   : > { %9446 = vmatmul.mubr.bf16.vlgmr.msra.gmra.mrb[0].mxu0 %v18281_v30  ;;  %9979 = vmatmul.mubr.bf16.vlgmr.msra.gmra.mrb[0].mxu1 %v18281_v30 }
 0x3cd   : > { %9455 = vmatpush1.bf16.msra.mxu0 %v14313_v31  ;;  %9988 = vmatpush1.bf16.msra.mxu1 %v14316_v32  ;;  %v14391_v31 = vld [vmem:[%s17951_s11 + $0xc08] ss:$20 sps:$4 sm:$0xff]   ;;  %v14394_v32 = vld [vmem:[%s17951_s11 + $0xc10] ss:$20 sps:$4 sm:$0xff]  }
 0x3ce   : > { %9456 = vmatprep.subr.bf16.mxu0 %v14321_v33  ;;  %9989 = vmatprep.subr.bf16.mxu1 %v14324_v35  ;;  %v14399_v33 = vld [vmem:[%s17951_s11 + $0xc34] ss:$20 sps:$4 sm:$0xff]   ;;  %v14402_v35 = vld [vmem:[%s17951_s11 + $0xc3c] ss:$20 sps:$4 sm:$0xff]  }
 0x3cf   : > { %9486 = vmatprep.mubr.bf16.mxu0 %v18288_v36  ;;  %10019 = vmatprep.mubr.bf16.mxu1 %v18288_v36 }
 0x3d1   : > { %9457 = vmatpush1.bf16.msra.mxu0 %v14319_v38  ;;  %9990 = vmatpush1.bf16.msra.mxu1 %v14322_v39  ;;  %v14397_v38 = vld [vmem:[%s17951_s11 + $0xc30] ss:$20 sps:$4 sm:$0xff]   ;;  %v14400_v39 = vld [vmem:[%s17951_s11 + $0xc38] ss:$20 sps:$4 sm:$0xff]  }
 0x3d2   : > { %9458 = vmatprep.subr.bf16.mxu0 %v14327_v40  ;;  %9991 = vmatprep.subr.bf16.mxu1 %v14330_v41  ;;  %v14405_v40 = vld [vmem:[%s17951_s11 + $0xc5c] ss:$20 sps:$4 sm:$0xff]   ;;  %v14408_v41 = vld [vmem:[%s17951_s11 + $0xc64] ss:$20 sps:$4 sm:$0xff]  }
 0x3d5   : > { %9459 = vmatpush1.bf16.msra.mxu0 %v14325_v42  ;;  %9992 = vmatpush1.bf16.msra.mxu1 %v14328_v43  ;;  %v14403_v42 = vld [vmem:[%s17951_s11 + $0xc58] ss:$20 sps:$4 sm:$0xff]   ;;  %v14406_v43 = vld [vmem:[%s17951_s11 + $0xc60] ss:$20 sps:$4 sm:$0xff]  }
 0x3d6   : > { %9460 = vmatprep.subr.bf16.mxu0 %v14333_v44  ;;  %9993 = vmatprep.subr.bf16.mxu1 %v14336_v46  ;;  %v14411_v44 = vld [vmem:[%s17951_s11 + $0xc84] ss:$20 sps:$4 sm:$0xff]   ;;  %v14414_v46 = vld [vmem:[%s17951_s11 + $0xc8c] ss:$20 sps:$4 sm:$0xff]  }
 0x3d9   : > { %9461 = vmatpush1.bf16.msra.mxu0 %v14331_v47  ;;  %9994 = vmatpush1.bf16.msra.mxu1 %v14334_v48  ;;  %v18356_v47 = vrot.slane %v18267_v19, %v18007_v34  ;;  %v14409_v48 = vld [vmem:[%s17951_s11 + $0xc80] ss:$20 sps:$4 sm:$0xff]   ;;  %v14415_v19 = vld [vmem:[%s17951_s11 + $0xca8] ss:$20 sps:$4 sm:$0xff]  }
 0x3da   : > { %9462 = vmatprep.subr.bf16.mxu0 %v14339_v49  ;;  %9995 = vmatprep.subr.bf16.mxu1 %v14342_v50  ;;  %v14412_v49 = vld [vmem:[%s17951_s11 + $0xc88] ss:$20 sps:$4 sm:$0xff]   ;;  %v14417_v50 = vld [vmem:[%s17951_s11 + $0xcac] ss:$20 sps:$4 sm:$0xff]  }
 0x3dd   : > { %9463 = vmatpush1.bf16.msra.mxu0 %v14337_v51  ;;  %9996 = vmatpush1.bf16.msra.mxu1 %v14340_v52  ;;  %v14420_v51 = vld [vmem:[%s17951_s11 + $0xcb4] ss:$20 sps:$4 sm:$0xff]   ;;  %v18364_v52 = vcombine.high %v18288_v36, %v18288_v36 }
 0x3de   : > { %9464 = vmatprep.subr.bf16.mxu0 %v14345_v53  ;;  %9997 = vmatprep.subr.bf16.mxu1 %v14348_v54  ;;  %v14418_v53 = vld [vmem:[%s17951_s11 + $0xcb0] ss:$20 sps:$4 sm:$0xff]   ;;  %v14423_v54 = vld [vmem:[%s17951_s11 + $0xcd4] ss:$20 sps:$4 sm:$0xff]  }
 0x3e1   : > { %9465 = vmatpush1.bf16.msra.mxu0 %v14343_v55  ;;  %9998 = vmatpush1.bf16.msra.mxu1 %v14346_v56  ;;  %v14426_v55 = vld [vmem:[%s17951_s11 + $0xcdc] ss:$20 sps:$4 sm:$0xff]  }
 0x3e2   : > { %9466 = vmatprep.subr.bf16.mxu0 %v14351_v57  ;;  %9999 = vmatprep.subr.bf16.mxu1 %v14354_v58  ;;  %v14421_v56 = vld [vmem:[%s17951_s11 + $0xcd0] ss:$20 sps:$4 sm:$0xff]   ;;  %v14424_v57 = vld [vmem:[%s17951_s11 + $0xcd8] ss:$20 sps:$4 sm:$0xff]  }
 0x3e3   : > { %v14429_v58 = vld [vmem:[%s17951_s11 + $0xcfc] ss:$20 sps:$4 sm:$0xff]  }
 0x3e5   : > { %9467 = vmatpush1.bf16.msra.mxu0 %v14349_v59  ;;  %10000 = vmatpush1.bf16.msra.mxu1 %v14352_v60  ;;  %v14432_v59 = vld [vmem:[%s17951_s11 + $0xd04] ss:$20 sps:$4 sm:$0xff]  }
 0x3e6   : > { %9468 = vmatprep.subr.bf16.mxu0 %v14357_v61  ;;  %10001 = vmatprep.subr.bf16.mxu1 %v14360_v63  ;;  %v14427_v60 = vld [vmem:[%s17951_s11 + $0xcf8] ss:$20 sps:$4 sm:$0xff]   ;;  %v14430_v61 = vld [vmem:[%s17951_s11 + $0xd00] ss:$20 sps:$4 sm:$0xff]  }
 0x3e7   : > { %v14435_v63 = vld [vmem:[%s17951_s11 + $0xd24] ss:$20 sps:$4 sm:$0xff]  }
 0x3e9   : > { %9469 = vmatpush1.bf16.msra.mxu0 %v14355_v0  ;;  %10002 = vmatpush1.bf16.msra.mxu1 %v14358_v3  ;;  %v14438_v0 = vld [vmem:[%s17951_s11 + $0xd2c] ss:$20 sps:$4 sm:$0xff]  }
 0x3ea   : > { %9470 = vmatprep.subr.bf16.mxu0 %v14363_v37  ;;  %10003 = vmatprep.subr.bf16.mxu1 %v14366_v4  ;;  %v14433_v3 = vld [vmem:[%s17951_s11 + $0xd20] ss:$20 sps:$4 sm:$0xff]   ;;  %v14436_v37 = vld [vmem:[%s17951_s11 + $0xd28] ss:$20 sps:$4 sm:$0xff]  }
 0x3eb   : > { %v14441_v4 = vld [vmem:[%s17951_s11 + $0xd4c] ss:$20 sps:$4 sm:$0xff]  }
 0x3ed   : > { %9471 = vmatpush1.bf16.msra.mxu0 %v14361_v5  ;;  %10004 = vmatpush1.bf16.msra.mxu1 %v14364_v6  ;;  %v14444_v5 = vld [vmem:[%s17951_s11 + $0xd54] ss:$20 sps:$4 sm:$0xff]  }
 0x3ee   : > { %9472 = vmatprep.subr.bf16.mxu0 %v14369_v7  ;;  %10005 = vmatprep.subr.bf16.mxu1 %v14372_v9  ;;  %v14439_v6 = vld [vmem:[%s17951_s11 + $0xd48] ss:$20 sps:$4 sm:$0xff]   ;;  %v14442_v7 = vld [vmem:[%s17951_s11 + $0xd50] ss:$20 sps:$4 sm:$0xff]  }
 0x3ef   : > { %v14447_v9 = vld [vmem:[%s17951_s11 + $0xd74] ss:$20 sps:$4 sm:$0xff]  }
 0x3f1   : > { %9473 = vmatpush1.bf16.msra.mxu0 %v14367_v10  ;;  %10006 = vmatpush1.bf16.msra.mxu1 %v14370_v11  ;;  %v14450_v10 = vld [vmem:[%s17951_s11 + $0xd7c] ss:$20 sps:$4 sm:$0xff]  }
 0x3f2   : > { %9474 = vmatprep.subr.bf16.mxu0 %v14375_v13  ;;  %10007 = vmatprep.subr.bf16.mxu1 %v14378_v14  ;;  %v14445_v11 = vld [vmem:[%s17951_s11 + $0xd70] ss:$20 sps:$4 sm:$0xff]   ;;  %v14448_v13 = vld [vmem:[%s17951_s11 + $0xd78] ss:$20 sps:$4 sm:$0xff]  }
 0x3f3   : > { %v14453_v14 = vld [vmem:[%s17951_s11 + $0xd9c] ss:$20 sps:$4 sm:$0xff]  }
 0x3f5   : > { %9475 = vmatpush1.bf16.msra.mxu0 %v14373_v15  ;;  %10008 = vmatpush1.bf16.msra.mxu1 %v14376_v16  ;;  %v14456_v15 = vld [vmem:[%s17951_s11 + $0xda4] ss:$20 sps:$4 sm:$0xff]  }
 0x3f6   : > { %9476 = vmatprep.subr.bf16.mxu0 %v14381_v17  ;;  %10009 = vmatprep.subr.bf16.mxu1 %v14384_v20  ;;  %v14451_v16 = vld [vmem:[%s17951_s11 + $0xd98] ss:$20 sps:$4 sm:$0xff]   ;;  %v14454_v17 = vld [vmem:[%s17951_s11 + $0xda0] ss:$20 sps:$4 sm:$0xff]  }
 0x3f7   : > { %v14459_v20 = vld [vmem:[%s17951_s11 + $0xdc4] ss:$20 sps:$4 sm:$0xff]  }
 0x3f9   : > { %9477 = vmatpush1.bf16.msra.mxu0 %v14379_v21  ;;  %10010 = vmatpush1.bf16.msra.mxu1 %v14382_v1  ;;  %v14462_v21 = vld [vmem:[%s17951_s11 + $0xdcc] ss:$20 sps:$4 sm:$0xff]  }
 0x3fa   : > { %9478 = vmatprep.subr.bf16.mxu0 %v14387_v23  ;;  %10011 = vmatprep.subr.bf16.mxu1 %v14390_v24  ;;  %v14457_v1 = vld [vmem:[%s17951_s11 + $0xdc0] ss:$20 sps:$4 sm:$0xff]   ;;  %v14460_v23 = vld [vmem:[%s17951_s11 + $0xdc8] ss:$20 sps:$4 sm:$0xff]  }
 0x3fb   : > { %v14465_v24 = vld [vmem:[%s17951_s11 + $0xdec] ss:$20 sps:$4 sm:$0xff]  }
 0x3fd   : > { %9479 = vmatpush1.bf16.msra.mxu0 %v14385_v25  ;;  %10012 = vmatpush1.bf16.msra.mxu1 %v14388_v26  ;;  %v14468_v25 = vld [vmem:[%s17951_s11 + $0xdf4] ss:$20 sps:$4 sm:$0xff]  }
 0x3fe   : > { %9480 = vmatprep.subr.bf16.mxu0 %v14393_v27  ;;  %10013 = vmatprep.subr.bf16.mxu1 %v14396_v29  ;;  %v14463_v26 = vld [vmem:[%s17951_s11 + $0xde8] ss:$20 sps:$4 sm:$0xff]   ;;  %v14466_v27 = vld [vmem:[%s17951_s11 + $0xdf0] ss:$20 sps:$4 sm:$0xff]  }
 0x3ff   : > { %v14471_v29 = vld [vmem:[%s17951_s11 + $0xe14] ss:$20 sps:$4 sm:$0xff]  }
 0x401   : > { %9481 = vmatpush1.bf16.msra.mxu0 %v14391_v31  ;;  %10014 = vmatpush1.bf16.msra.mxu1 %v14394_v32  ;;  %v14474_v31 = vld [vmem:[%s17951_s11 + $0xe1c] ss:$20 sps:$4 sm:$0xff]  }
 0x402   : > { %9482 = vmatprep.subr.bf16.mxu0 %v14399_v33  ;;  %10015 = vmatprep.subr.bf16.mxu1 %v14402_v35  ;;  %v14469_v32 = vld [vmem:[%s17951_s11 + $0xe10] ss:$20 sps:$4 sm:$0xff]   ;;  %v14472_v33 = vld [vmem:[%s17951_s11 + $0xe18] ss:$20 sps:$4 sm:$0xff]  }
 0x403   : > { %v14477_v35 = vld [vmem:[%s17951_s11 + $0xe3c] ss:$20 sps:$4 sm:$0xff]  }
 0x405   : > { %9483 = vmatpush1.bf16.msra.mxu0 %v14397_v38  ;;  %10016 = vmatpush1.bf16.msra.mxu1 %v14400_v39  ;;  %v14480_v38 = vld [vmem:[%s17951_s11 + $0xe44] ss:$20 sps:$4 sm:$0xff]  }
 0x406   : > { %9484 = vmatprep.subr.bf16.mxu0 %v14405_v40  ;;  %10017 = vmatprep.subr.bf16.mxu1 %v14408_v41  ;;  %v14475_v39 = vld [vmem:[%s17951_s11 + $0xe38] ss:$20 sps:$4 sm:$0xff]   ;;  %v14478_v40 = vld [vmem:[%s17951_s11 + $0xe40] ss:$20 sps:$4 sm:$0xff]  }
 0x407   : > { %v14483_v41 = vld [vmem:[%s17951_s11 + $0xe64] ss:$20 sps:$4 sm:$0xff]  }
 0x409   : > { %9485 = vmatpush1.bf16.msra.mxu0 %v14403_v42  ;;  %10018 = vmatpush1.bf16.msra.mxu1 %v14406_v43  ;;  %v14486_v42 = vld [vmem:[%s17951_s11 + $0xe6c] ss:$20 sps:$4 sm:$0xff]  }
 0x40a   : > { %9495 = vmatprep.subr.bf16.mxu0 %v14411_v44  ;;  %10028 = vmatprep.subr.bf16.mxu1 %v14414_v46  ;;  %v14481_v43 = vld [vmem:[%s17951_s11 + $0xe60] ss:$20 sps:$4 sm:$0xff]   ;;  %v14484_v44 = vld [vmem:[%s17951_s11 + $0xe68] ss:$20 sps:$4 sm:$0xff]  }
 0x40b   : > { %v14489_v46 = vld [vmem:[%s17951_s11 + $0xe8c] ss:$20 sps:$4 sm:$0xff]  }
 0x40c   : > { %9487 = vmatmul.mubr.bf16.vlgmr.msra.gmra.mrb[0].mxu0 %v18356_v47  ;;  %10020 = vmatmul.mubr.bf16.vlgmr.msra.gmra.mrb[0].mxu1 %v18356_v47 }
 0x40d   : > { %9496 = vmatpush1.bf16.msra.mxu0 %v14409_v48  ;;  %10029 = vmatpush1.bf16.msra.mxu1 %v14412_v49  ;;  %v14492_v48 = vld [vmem:[%s17951_s11 + $0xe94] ss:$20 sps:$4 sm:$0xff]  }
 0x40e   : > { %9497 = vmatprep.subr.bf16.mxu0 %v14417_v50  ;;  %10030 = vmatprep.subr.bf16.mxu1 %v14420_v51  ;;  %v14487_v49 = vld [vmem:[%s17951_s11 + $0xe88] ss:$20 sps:$4 sm:$0xff]   ;;  %v14490_v50 = vld [vmem:[%s17951_s11 + $0xe90] ss:$20 sps:$4 sm:$0xff]  }
 0x40f   : > { %9527 = vmatprep.mubr.bf16.mxu0 %v18364_v52  ;;  %10060 = vmatprep.mubr.bf16.mxu1 %v18364_v52  ;;  %v14495_v51 = vld [vmem:[%s17951_s11 + $0xeb4] ss:$20 sps:$4 sm:$0xff]  }
 0x411   : > { %9498 = vmatpush1.bf16.msra.mxu0 %v14415_v19  ;;  %10031 = vmatpush1.bf16.msra.mxu1 %v14418_v53  ;;  %v14498_v19 = vld [vmem:[%s17951_s11 + $0xebc] ss:$20 sps:$4 sm:$0xff]  }
 0x412   : > { %9499 = vmatprep.subr.bf16.mxu0 %v14423_v54  ;;  %10032 = vmatprep.subr.bf16.mxu1 %v14426_v55  ;;  %v15331_v53 = vld [vmem:[%s18004_s25 + $0x8] sm:$0xff] }
 0x413   : > { %v3953_v54 = vcombine.high %v15331_v53, %v15331_v53  ;;  %v14493_v55 = vld [vmem:[%s17951_s11 + $0xeb0] ss:$20 sps:$4 sm:$0xff]  }
 0x414   : > { %v14562_v53 = vld [vmem:[%s17951_s11 + $0x1070] ss:$20 sps:$4 sm:$0xff]  }
 0x415   : > { %9500 = vmatpush1.bf16.msra.mxu0 %v14421_v56  ;;  %10033 = vmatpush1.bf16.msra.mxu1 %v14424_v57  ;;  %v14496_v56 = vld [vmem:[%s17951_s11 + $0xeb8] ss:$20 sps:$4 sm:$0xff]   ;;  %v14501_v57 = vld [vmem:[%s17951_s11 + $0xedc] ss:$20 sps:$4 sm:$0xff]  }
 0x416   : > { %9501 = vmatprep.subr.bf16.mxu0 %v14429_v58  ;;  %10034 = vmatprep.subr.bf16.mxu1 %v14432_v59  ;;  %v14504_v58 = vld [vmem:[%s17951_s11 + $0xee4] ss:$20 sps:$4 sm:$0xff]   ;;  %v18428_v59 = vrot.slane %v3953_v54, %v18007_v34  ;;  %v14567_v54 = vld [vmem:[%s17951_s11 + $0x1094] ss:$20 sps:$4 sm:$0xff]  }
 0x419   : > { %9502 = vmatpush1.bf16.msra.mxu0 %v14427_v60  ;;  %10035 = vmatpush1.bf16.msra.mxu1 %v14430_v61  ;;  %v14499_v60 = vld [vmem:[%s17951_s11 + $0xed8] ss:$20 sps:$4 sm:$0xff]   ;;  %v14502_v61 = vld [vmem:[%s17951_s11 + $0xee0] ss:$20 sps:$4 sm:$0xff]  }
 0x41a   : > { %9503 = vmatprep.subr.bf16.mxu0 %v14435_v63  ;;  %10036 = vmatprep.subr.bf16.mxu1 %v14438_v0  ;;  %v14507_v63 = vld [vmem:[%s17951_s11 + $0xf04] ss:$20 sps:$4 sm:$0xff]   ;;  %v14510_v0 = vld [vmem:[%s17951_s11 + $0xf0c] ss:$20 sps:$4 sm:$0xff]  }
 0x41d   : > { %9504 = vmatpush1.bf16.msra.mxu0 %v14433_v3  ;;  %10037 = vmatpush1.bf16.msra.mxu1 %v14436_v37  ;;  %v3969_v3 = vcombine.high %v18428_v59, %v18428_v59  ;;  %v18438_v37 = vcombine.high %v18356_v47, %v18356_v47 }
 0x41e   : > { %9505 = vmatprep.subr.bf16.mxu0 %v14441_v4  ;;  %10038 = vmatprep.subr.bf16.mxu1 %v14444_v5  ;;  %v14505_v4 = vld [vmem:[%s17951_s11 + $0xf00] ss:$20 sps:$4 sm:$0xff]   ;;  %v14508_v5 = vld [vmem:[%s17951_s11 + $0xf08] ss:$20 sps:$4 sm:$0xff]  }
 0x421   : > { %9506 = vmatpush1.bf16.msra.mxu0 %v14439_v6  ;;  %10039 = vmatpush1.bf16.msra.mxu1 %v14442_v7  ;;  %v14513_v6 = vld [vmem:[%s17951_s11 + $0xf2c] ss:$20 sps:$4 sm:$0xff]   ;;  %v14516_v7 = vld [vmem:[%s17951_s11 + $0xf34] ss:$20 sps:$4 sm:$0xff]  }
 0x422   : > { %9507 = vmatprep.subr.bf16.mxu0 %v14447_v9  ;;  %10040 = vmatprep.subr.bf16.mxu1 %v14450_v10  ;;  %v18445_v9 = vrot.slane %v3969_v3, %v18007_v34  ;;  %v14511_v10 = vld [vmem:[%s17951_s11 + $0xf28] ss:$20 sps:$4 sm:$0xff]   ;;  %v14582_v3 = vld [vmem:[%s17951_s11 + $0x10ec] ss:$20 sps:$4 sm:$0xff]  }
 0x425   : > { %9508 = vmatpush1.bf16.msra.mxu0 %v14445_v11  ;;  %10041 = vmatpush1.bf16.msra.mxu1 %v14448_v13  ;;  %v14514_v11 = vld [vmem:[%s17951_s11 + $0xf30] ss:$20 sps:$4 sm:$0xff]   ;;  %v14519_v13 = vld [vmem:[%s17951_s11 + $0xf54] ss:$20 sps:$4 sm:$0xff]  }
 0x426   : > { %9509 = vmatprep.subr.bf16.mxu0 %v14453_v14  ;;  %10042 = vmatprep.subr.bf16.mxu1 %v14456_v15  ;;  %v14522_v14 = vld [vmem:[%s17951_s11 + $0xf5c] ss:$20 sps:$4 sm:$0xff]  }
 0x427   : > { %v14517_v15 = vld [vmem:[%s17951_s11 + $0xf50] ss:$20 sps:$4 sm:$0xff]  }
 0x429   : > { %9510 = vmatpush1.bf16.msra.mxu0 %v14451_v16  ;;  %10043 = vmatpush1.bf16.msra.mxu1 %v14454_v17  ;;  %v14520_v16 = vld [vmem:[%s17951_s11 + $0xf58] ss:$20 sps:$4 sm:$0xff]   ;;  %v14525_v17 = vld [vmem:[%s17951_s11 + $0xf7c] ss:$20 sps:$4 sm:$0xff]  }
 0x42a   : > { %9511 = vmatprep.subr.bf16.mxu0 %v14459_v20  ;;  %10044 = vmatprep.subr.bf16.mxu1 %v14462_v21  ;;  %v14528_v20 = vld [vmem:[%s17951_s11 + $0xf84] ss:$20 sps:$4 sm:$0xff]  }
 0x42b   : > { %v14523_v21 = vld [vmem:[%s17951_s11 + $0xf78] ss:$20 sps:$4 sm:$0xff]  }
 0x42d   : > { %9512 = vmatpush1.bf16.msra.mxu0 %v14457_v1  ;;  %10045 = vmatpush1.bf16.msra.mxu1 %v14460_v23  ;;  %v14526_v1 = vld [vmem:[%s17951_s11 + $0xf80] ss:$20 sps:$4 sm:$0xff]   ;;  %v14531_v23 = vld [vmem:[%s17951_s11 + $0xfa4] ss:$20 sps:$4 sm:$0xff]  }
 0x42e   : > { %9513 = vmatprep.subr.bf16.mxu0 %v14465_v24  ;;  %10046 = vmatprep.subr.bf16.mxu1 %v14468_v25  ;;  %v14534_v24 = vld [vmem:[%s17951_s11 + $0xfac] ss:$20 sps:$4 sm:$0xff]  }
 0x42f   : > { %v14529_v25 = vld [vmem:[%s17951_s11 + $0xfa0] ss:$20 sps:$4 sm:$0xff]  }
 0x431   : > { %9514 = vmatpush1.bf16.msra.mxu0 %v14463_v26  ;;  %10047 = vmatpush1.bf16.msra.mxu1 %v14466_v27  ;;  %v14532_v26 = vld [vmem:[%s17951_s11 + $0xfa8] ss:$20 sps:$4 sm:$0xff]   ;;  %v14537_v27 = vld [vmem:[%s17951_s11 + $0xfcc] ss:$20 sps:$4 sm:$0xff]  }
 0x432   : > { %9515 = vmatprep.subr.bf16.mxu0 %v14471_v29  ;;  %10048 = vmatprep.subr.bf16.mxu1 %v14474_v31  ;;  %v14540_v29 = vld [vmem:[%s17951_s11 + $0xfd4] ss:$20 sps:$4 sm:$0xff]  }
 0x433   : > { %v14535_v31 = vld [vmem:[%s17951_s11 + $0xfc8] ss:$20 sps:$4 sm:$0xff]  }
 0x435   : > { %9516 = vmatpush1.bf16.msra.mxu0 %v14469_v32  ;;  %10049 = vmatpush1.bf16.msra.mxu1 %v14472_v33  ;;  %v14538_v32 = vld [vmem:[%s17951_s11 + $0xfd0] ss:$20 sps:$4 sm:$0xff]   ;;  %v14543_v33 = vld [vmem:[%s17951_s11 + $0xff4] ss:$20 sps:$4 sm:$0xff]  }
 0x436   : > { %9517 = vmatprep.subr.bf16.mxu0 %v14477_v35  ;;  %10050 = vmatprep.subr.bf16.mxu1 %v14480_v38  ;;  %v14546_v35 = vld [vmem:[%s17951_s11 + $0xffc] ss:$20 sps:$4 sm:$0xff]  }
 0x437   : > { %v14541_v38 = vld [vmem:[%s17951_s11 + $0xff0] ss:$20 sps:$4 sm:$0xff]  }
 0x439   : > { %9518 = vmatpush1.bf16.msra.mxu0 %v14475_v39  ;;  %10051 = vmatpush1.bf16.msra.mxu1 %v14478_v40  ;;  %v14544_v39 = vld [vmem:[%s17951_s11 + $0xff8] ss:$20 sps:$4 sm:$0xff]   ;;  %v14549_v40 = vld [vmem:[%s17951_s11 + $0x101c] ss:$20 sps:$4 sm:$0xff]  }
 0x43a   : > { %9519 = vmatprep.subr.bf16.mxu0 %v14483_v41  ;;  %10052 = vmatprep.subr.bf16.mxu1 %v14486_v42  ;;  %v14552_v41 = vld [vmem:[%s17951_s11 + $0x1024] ss:$20 sps:$4 sm:$0xff]  }
 0x43b   : > { %v14547_v42 = vld [vmem:[%s17951_s11 + $0x1018] ss:$20 sps:$4 sm:$0xff]  }
 0x43d   : > { %9520 = vmatpush1.bf16.msra.mxu0 %v14481_v43  ;;  %10053 = vmatpush1.bf16.msra.mxu1 %v14484_v44  ;;  %v14550_v43 = vld [vmem:[%s17951_s11 + $0x1020] ss:$20 sps:$4 sm:$0xff]   ;;  %v14555_v44 = vld [vmem:[%s17951_s11 + $0x1044] ss:$20 sps:$4 sm:$0xff]  }
 0x43e   : > { %9521 = vmatprep.subr.bf16.mxu0 %v14489_v46  ;;  %10054 = vmatprep.subr.bf16.mxu1 %v14492_v48  ;;  %v14558_v46 = vld [vmem:[%s17951_s11 + $0x104c] ss:$20 sps:$4 sm:$0xff]  }
 0x43f   : > { %v14553_v48 = vld [vmem:[%s17951_s11 + $0x1040] ss:$20 sps:$4 sm:$0xff]  }
 0x441   : > { %9522 = vmatpush1.bf16.msra.mxu0 %v14487_v49  ;;  %10055 = vmatpush1.bf16.msra.mxu1 %v14490_v50  ;;  %v14556_v49 = vld [vmem:[%s17951_s11 + $0x1048] ss:$20 sps:$4 sm:$0xff]   ;;  %v14561_v50 = vld [vmem:[%s17951_s11 + $0x106c] ss:$20 sps:$4 sm:$0xff]  }
 0x442   : > { %9523 = vmatprep.subr.bf16.mxu0 %v14495_v51  ;;  %10056 = vmatprep.subr.bf16.mxu1 %v14498_v19  ;;  %v14564_v51 = vld [vmem:[%s17951_s11 + $0x1074] ss:$20 sps:$4 sm:$0xff]  }
 0x443   : > { %v14559_v19 = vld [vmem:[%s17951_s11 + $0x1068] ss:$20 sps:$4 sm:$0xff]  }
 0x445   : > { %9524 = vmatpush1.bf16.msra.mxu0 %v14493_v55  ;;  %10057 = vmatpush1.bf16.msra.mxu1 %v14496_v56  ;;  %v14570_v55 = vld [vmem:[%s17951_s11 + $0x109c] ss:$20 sps:$4 sm:$0xff]  }
 0x446   : > { %9525 = vmatprep.subr.bf16.mxu0 %v14501_v57  ;;  %10058 = vmatprep.subr.bf16.mxu1 %v14504_v58  ;;  %v14565_v56 = vld [vmem:[%s17951_s11 + $0x1090] ss:$20 sps:$4 sm:$0xff]   ;;  %v14568_v57 = vld [vmem:[%s17951_s11 + $0x1098] ss:$20 sps:$4 sm:$0xff]  }
 0x447   : > { %v14573_v58 = vld [vmem:[%s17951_s11 + $0x10bc] ss:$20 sps:$4 sm:$0xff]  }
 0x449   : > { %9526 = vmatpush1.bf16.msra.mxu0 %v14499_v60  ;;  %10059 = vmatpush1.bf16.msra.mxu1 %v14502_v61  ;;  %v14576_v60 = vld [vmem:[%s17951_s11 + $0x10c4] ss:$20 sps:$4 sm:$0xff]  }
 0x44a   : > { %9536 = vmatprep.subr.bf16.mxu0 %v14507_v63  ;;  %10069 = vmatprep.subr.bf16.mxu1 %v14510_v0  ;;  %v14571_v61 = vld [vmem:[%s17951_s11 + $0x10b8] ss:$20 sps:$4 sm:$0xff]   ;;  %v14574_v63 = vld [vmem:[%s17951_s11 + $0x10c0] ss:$20 sps:$4 sm:$0xff]  }
 0x44b   : > { %v14579_v0 = vld [vmem:[%s17951_s11 + $0x10e4] ss:$20 sps:$4 sm:$0xff]  }
 0x44c   : > { %9528 = vmatmul.mubr.bf16.vlgmr.msra.gmra.mrb[0].mxu0 %v18438_v37  ;;  %10061 = vmatmul.mubr.bf16.vlgmr.msra.gmra.mrb[0].mxu1 %v18438_v37 }
 0x44d   : > { %9537 = vmatpush1.bf16.msra.mxu0 %v14505_v4  ;;  %10070 = vmatpush1.bf16.msra.mxu1 %v14508_v5  ;;  %v14577_v4 = vld [vmem:[%s17951_s11 + $0x10e0] ss:$20 sps:$4 sm:$0xff]   ;;  %v14580_v5 = vld [vmem:[%s17951_s11 + $0x10e8] ss:$20 sps:$4 sm:$0xff]  }
 0x44e   : > { %9538 = vmatprep.subr.bf16.mxu0 %v14513_v6  ;;  %10071 = vmatprep.subr.bf16.mxu1 %v14516_v7  ;;  %v14585_v6 = vld [vmem:[%s17951_s11 + $0x110c] ss:$20 sps:$4 sm:$0xff]   ;;  %v14588_v7 = vld [vmem:[%s17951_s11 + $0x1114] ss:$20 sps:$4 sm:$0xff]  }
 0x44f   : > { %9568 = vmatprep.mubr.bf16.mxu0 %v18445_v9  ;;  %10101 = vmatprep.mubr.bf16.mxu1 %v18445_v9 }
 0x451   : > { %9539 = vmatpush1.bf16.msra.mxu0 %v14511_v10  ;;  %10072 = vmatpush1.bf16.msra.mxu1 %v14514_v11  ;;  %v14583_v10 = vld [vmem:[%s17951_s11 + $0x1108] ss:$20 sps:$4 sm:$0xff]   ;;  %v14586_v11 = vld [vmem:[%s17951_s11 + $0x1110] ss:$20 sps:$4 sm:$0xff]  }
 0x452   : > { %9540 = vmatprep.subr.bf16.mxu0 %v14519_v13  ;;  %10073 = vmatprep.subr.bf16.mxu1 %v14522_v14  ;;  %v14591_v13 = vld [vmem:[%s17951_s11 + $0x1134] ss:$20 sps:$4 sm:$0xff]   ;;  %v14594_v14 = vld [vmem:[%s17951_s11 + $0x113c] ss:$20 sps:$4 sm:$0xff]  }
 0x455   : > { %9541 = vmatpush1.bf16.msra.mxu0 %v14517_v15  ;;  %10074 = vmatpush1.bf16.msra.mxu1 %v14520_v16  ;;  %v14589_v15 = vld [vmem:[%s17951_s11 + $0x1130] ss:$20 sps:$4 sm:$0xff]   ;;  %v14592_v16 = vld [vmem:[%s17951_s11 + $0x1138] ss:$20 sps:$4 sm:$0xff]  }
 0x456   : > { %9542 = vmatprep.subr.bf16.mxu0 %v14525_v17  ;;  %10075 = vmatprep.subr.bf16.mxu1 %v14528_v20  ;;  %v14597_v17 = vld [vmem:[%s17951_s11 + $0x115c] ss:$20 sps:$4 sm:$0xff]   ;;  %v14600_v20 = vld [vmem:[%s17951_s11 + $0x1164] ss:$20 sps:$4 sm:$0xff]  }
 0x459   : > { %9543 = vmatpush1.bf16.msra.mxu0 %v14523_v21  ;;  %10076 = vmatpush1.bf16.msra.mxu1 %v14526_v1  ;;  %v14595_v21 = vld [vmem:[%s17951_s11 + $0x1158] ss:$20 sps:$4 sm:$0xff]   ;;  %v14598_v1 = vld [vmem:[%s17951_s11 + $0x1160] ss:$20 sps:$4 sm:$0xff]  }
 0x45a   : > { %9544 = vmatprep.subr.bf16.mxu0 %v14531_v23  ;;  %10077 = vmatprep.subr.bf16.mxu1 %v14534_v24  ;;  %v14604_v23 = vld [vmem:[%s17951_s11 + $0x1184] ss:$20 sps:$4 sm:$0xff]   ;;  %v14607_v24 = vld [vmem:[%s17951_s11 + $0x118c] ss:$20 sps:$4 sm:$0xff]  }
 0x45d   : > { %9545 = vmatpush1.bf16.msra.mxu0 %v14529_v25  ;;  %10078 = vmatpush1.bf16.msra.mxu1 %v14532_v26  ;;  %v18513_v25 = vrot.slane %v18428_v59, %v18007_v34  ;;  %v14602_v26 = vld [vmem:[%s17951_s11 + $0x1180] ss:$20 sps:$4 sm:$0xff]   ;;  %v14608_v59 = vld [vmem:[%s17951_s11 + $0x11a8] ss:$20 sps:$4 sm:$0xff]  }
 0x45e   : > { %9546 = vmatprep.subr.bf16.mxu0 %v14537_v27  ;;  %10079 = vmatprep.subr.bf16.mxu1 %v14540_v29  ;;  %v14605_v27 = vld [vmem:[%s17951_s11 + $0x1188] ss:$20 sps:$4 sm:$0xff]   ;;  %v14610_v29 = vld [vmem:[%s17951_s11 + $0x11ac] ss:$20 sps:$4 sm:$0xff]  }
 0x461   : > { %9547 = vmatpush1.bf16.msra.mxu0 %v14535_v31  ;;  %10080 = vmatpush1.bf16.msra.mxu1 %v14538_v32  ;;  %v14613_v31 = vld [vmem:[%s17951_s11 + $0x11b4] ss:$20 sps:$4 sm:$0xff]   ;;  %v18521_v32 = vcombine.high %v18445_v9, %v18445_v9 }
 0x462   : > { %9548 = vmatprep.subr.bf16.mxu0 %v14543_v33  ;;  %10081 = vmatprep.subr.bf16.mxu1 %v14546_v35  ;;  %v14611_v33 = vld [vmem:[%s17951_s11 + $0x11b0] ss:$20 sps:$4 sm:$0xff]   ;;  %v14616_v35 = vld [vmem:[%s17951_s11 + $0x11d4] ss:$20 sps:$4 sm:$0xff]  }
 0x465   : > { %9549 = vmatpush1.bf16.msra.mxu0 %v14541_v38  ;;  %10082 = vmatpush1.bf16.msra.mxu1 %v14544_v39  ;;  %v14619_v38 = vld [vmem:[%s17951_s11 + $0x11dc] ss:$20 sps:$4 sm:$0xff]  }
 0x466   : > { %9550 = vmatprep.subr.bf16.mxu0 %v14549_v40  ;;  %10083 = vmatprep.subr.bf16.mxu1 %v14552_v41  ;;  %v14614_v39 = vld [vmem:[%s17951_s11 + $0x11d0] ss:$20 sps:$4 sm:$0xff]   ;;  %v14617_v40 = vld [vmem:[%s17951_s11 + $0x11d8] ss:$20 sps:$4 sm:$0xff]  }
 0x467   : > { %v14622_v41 = vld [vmem:[%s17951_s11 + $0x11fc] ss:$20 sps:$4 sm:$0xff]  }
 0x469   : > { %9551 = vmatpush1.bf16.msra.mxu0 %v14547_v42  ;;  %10084 = vmatpush1.bf16.msra.mxu1 %v14550_v43  ;;  %v14625_v42 = vld [vmem:[%s17951_s11 + $0x1204] ss:$20 sps:$4 sm:$0xff]  }
 0x46a   : > { %9552 = vmatprep.subr.bf16.mxu0 %v14555_v44  ;;  %10085 = vmatprep.subr.bf16.mxu1 %v14558_v46  ;;  %v14620_v43 = vld [vmem:[%s17951_s11 + $0x11f8] ss:$20 sps:$4 sm:$0xff]   ;;  %v14623_v44 = vld [vmem:[%s17951_s11 + $0x1200] ss:$20 sps:$4 sm:$0xff]  }
 0x46b   : > { %v14628_v46 = vld [vmem:[%s17951_s11 + $0x1224] ss:$20 sps:$4 sm:$0xff]  }
 0x46d   : > { %9553 = vmatpush1.bf16.msra.mxu0 %v14553_v48  ;;  %10086 = vmatpush1.bf16.msra.mxu1 %v14556_v49  ;;  %v14631_v48 = vld [vmem:[%s17951_s11 + $0x122c] ss:$20 sps:$4 sm:$0xff]  }
 0x46e   : > { %9554 = vmatprep.subr.bf16.mxu0 %v14561_v50  ;;  %10087 = vmatprep.subr.bf16.mxu1 %v14564_v51  ;;  %v14626_v49 = vld [vmem:[%s17951_s11 + $0x1220] ss:$20 sps:$4 sm:$0xff]   ;;  %v14629_v50 = vld [vmem:[%s17951_s11 + $0x1228] ss:$20 sps:$4 sm:$0xff]  }
 0x46f   : > { %v14634_v51 = vld [vmem:[%s17951_s11 + $0x124c] ss:$20 sps:$4 sm:$0xff]  }
 0x471   : > { %9555 = vmatpush1.bf16.msra.mxu0 %v14559_v19  ;;  %10088 = vmatpush1.bf16.msra.mxu1 %v14562_v53  ;;  %v14637_v19 = vld [vmem:[%s17951_s11 + $0x1254] ss:$20 sps:$4 sm:$0xff]  }
 0x472   : > { %9556 = vmatprep.subr.bf16.mxu0 %v14567_v54  ;;  %10089 = vmatprep.subr.bf16.mxu1 %v14570_v55  ;;  %v14632_v53 = vld [vmem:[%s17951_s11 + $0x1248] ss:$20 sps:$4 sm:$0xff]   ;;  %v14635_v54 = vld [vmem:[%s17951_s11 + $0x1250] ss:$20 sps:$4 sm:$0xff]  }
 0x473   : > { %v14640_v55 = vld [vmem:[%s17951_s11 + $0x1274] ss:$20 sps:$4 sm:$0xff]  }
 0x475   : > { %9557 = vmatpush1.bf16.msra.mxu0 %v14565_v56  ;;  %10090 = vmatpush1.bf16.msra.mxu1 %v14568_v57  ;;  %v14643_v56 = vld [vmem:[%s17951_s11 + $0x127c] ss:$20 sps:$4 sm:$0xff]  }
 0x476   : > { %9558 = vmatprep.subr.bf16.mxu0 %v14573_v58  ;;  %10091 = vmatprep.subr.bf16.mxu1 %v14576_v60  ;;  %v14638_v57 = vld [vmem:[%s17951_s11 + $0x1270] ss:$20 sps:$4 sm:$0xff]   ;;  %v14641_v58 = vld [vmem:[%s17951_s11 + $0x1278] ss:$20 sps:$4 sm:$0xff]  }
 0x477   : > { %v14646_v60 = vld [vmem:[%s17951_s11 + $0x129c] ss:$20 sps:$4 sm:$0xff]  }
 0x479   : > { %9559 = vmatpush1.bf16.msra.mxu0 %v14571_v61  ;;  %10092 = vmatpush1.bf16.msra.mxu1 %v14574_v63  ;;  %v14649_v61 = vld [vmem:[%s17951_s11 + $0x12a4] ss:$20 sps:$4 sm:$0xff]  }
 0x47a   : > { %9560 = vmatprep.subr.bf16.mxu0 %v14579_v0  ;;  %10093 = vmatprep.subr.bf16.mxu1 %v14582_v3  ;;  %v14644_v63 = vld [vmem:[%s17951_s11 + $0x1298] ss:$20 sps:$4 sm:$0xff]   ;;  %v14647_v0 = vld [vmem:[%s17951_s11 + $0x12a0] ss:$20 sps:$4 sm:$0xff]  }
 0x47b   : > { %v14652_v3 = vld [vmem:[%s17951_s11 + $0x12c4] ss:$20 sps:$4 sm:$0xff]  }
 0x47d   : > { %9561 = vmatpush1.bf16.msra.mxu0 %v14577_v4  ;;  %10094 = vmatpush1.bf16.msra.mxu1 %v14580_v5  ;;  %v14655_v4 = vld [vmem:[%s17951_s11 + $0x12cc] ss:$20 sps:$4 sm:$0xff]  }
 0x47e   : > { %9562 = vmatprep.subr.bf16.mxu0 %v14585_v6  ;;  %10095 = vmatprep.subr.bf16.mxu1 %v14588_v7  ;;  %v14650_v5 = vld [vmem:[%s17951_s11 + $0x12c0] ss:$20 sps:$4 sm:$0xff]   ;;  %v14653_v6 = vld [vmem:[%s17951_s11 + $0x12c8] ss:$20 sps:$4 sm:$0xff]  }
 0x47f   : > { %v14658_v7 = vld [vmem:[%s17951_s11 + $0x12ec] ss:$20 sps:$4 sm:$0xff]  }
 0x481   : > { %9563 = vmatpush1.bf16.msra.mxu0 %v14583_v10  ;;  %10096 = vmatpush1.bf16.msra.mxu1 %v14586_v11  ;;  %v14661_v10 = vld [vmem:[%s17951_s11 + $0x12f4] ss:$20 sps:$4 sm:$0xff]  }
 0x482   : > { %9564 = vmatprep.subr.bf16.mxu0 %v14591_v13  ;;  %10097 = vmatprep.subr.bf16.mxu1 %v14594_v14  ;;  %v14656_v11 = vld [vmem:[%s17951_s11 + $0x12e8] ss:$20 sps:$4 sm:$0xff]   ;;  %v14659_v13 = vld [vmem:[%s17951_s11 + $0x12f0] ss:$20 sps:$4 sm:$0xff]  }
 0x483   : > { %v14664_v14 = vld [vmem:[%s17951_s11 + $0x1314] ss:$20 sps:$4 sm:$0xff]  }
 0x485   : > { %9565 = vmatpush1.bf16.msra.mxu0 %v14589_v15  ;;  %10098 = vmatpush1.bf16.msra.mxu1 %v14592_v16  ;;  %v14667_v15 = vld [vmem:[%s17951_s11 + $0x131c] ss:$20 sps:$4 sm:$0xff]  }
 0x486   : > { %9566 = vmatprep.subr.bf16.mxu0 %v14597_v17  ;;  %10099 = vmatprep.subr.bf16.mxu1 %v14600_v20  ;;  %v14662_v16 = vld [vmem:[%s17951_s11 + $0x1310] ss:$20 sps:$4 sm:$0xff]   ;;  %v14665_v17 = vld [vmem:[%s17951_s11 + $0x1318] ss:$20 sps:$4 sm:$0xff]  }
 0x487   : > { %v14670_v20 = vld [vmem:[%s17951_s11 + $0x133c] ss:$20 sps:$4 sm:$0xff]  }
 0x489   : > { %9567 = vmatpush1.bf16.msra.mxu0 %v14595_v21  ;;  %10100 = vmatpush1.bf16.msra.mxu1 %v14598_v1  ;;  %v14673_v21 = vld [vmem:[%s17951_s11 + $0x1344] ss:$20 sps:$4 sm:$0xff]  }
 0x48a   : > { %9577 = vmatprep.subr.bf16.mxu0 %v14604_v23  ;;  %10110 = vmatprep.subr.bf16.mxu1 %v14607_v24  ;;  %v14668_v1 = vld [vmem:[%s17951_s11 + $0x1338] ss:$20 sps:$4 sm:$0xff]   ;;  %v14671_v23 = vld [vmem:[%s17951_s11 + $0x1340] ss:$20 sps:$4 sm:$0xff]  }
 0x48b   : > { %v14676_v24 = vld [vmem:[%s17951_s11 + $0x1364] ss:$20 sps:$4 sm:$0xff]  }
 0x48c   : > { %9569 = vmatmul.mubr.bf16.vlgmr.msra.gmra.mrb[0].mxu0 %v18513_v25  ;;  %10102 = vmatmul.mubr.bf16.vlgmr.msra.gmra.mrb[0].mxu1 %v18513_v25 }
 0x48d   : > { %9578 = vmatpush1.bf16.msra.mxu0 %v14602_v26  ;;  %10111 = vmatpush1.bf16.msra.mxu1 %v14605_v27  ;;  %v14679_v26 = vld [vmem:[%s17951_s11 + $0x136c] ss:$20 sps:$4 sm:$0xff]  }
 0x48e   : > { %9579 = vmatprep.subr.bf16.mxu0 %v14610_v29  ;;  %10112 = vmatprep.subr.bf16.mxu1 %v14613_v31  ;;  %v14674_v27 = vld [vmem:[%s17951_s11 + $0x1360] ss:$20 sps:$4 sm:$0xff]   ;;  %v14677_v29 = vld [vmem:[%s17951_s11 + $0x1368] ss:$20 sps:$4 sm:$0xff]  }
 0x48f   : > { %9609 = vmatprep.mubr.bf16.mxu0 %v18521_v32  ;;  %10142 = vmatprep.mubr.bf16.mxu1 %v18521_v32  ;;  %v14682_v31 = vld [vmem:[%s17951_s11 + $0x138c] ss:$20 sps:$4 sm:$0xff]  }
 0x491   : > { %9580 = vmatpush1.bf16.msra.mxu0 %v14608_v59  ;;  %10113 = vmatpush1.bf16.msra.mxu1 %v14611_v33  ;;  %v14685_v59 = vld [vmem:[%s17951_s11 + $0x1394] ss:$20 sps:$4 sm:$0xff]  }
 0x492   : > { %9581 = vmatprep.subr.bf16.mxu0 %v14616_v35  ;;  %10114 = vmatprep.subr.bf16.mxu1 %v14619_v38  ;;  %v14680_v33 = vld [vmem:[%s17951_s11 + $0x1388] ss:$20 sps:$4 sm:$0xff]   ;;  %v14683_v35 = vld [vmem:[%s17951_s11 + $0x1390] ss:$20 sps:$4 sm:$0xff]  }
 0x493   : > { %v14688_v38 = vld [vmem:[%s17951_s11 + $0x13b4] ss:$20 sps:$4 sm:$0xff]  }
 0x495   : > { %9582 = vmatpush1.bf16.msra.mxu0 %v14614_v39  ;;  %10115 = vmatpush1.bf16.msra.mxu1 %v14617_v40  ;;  %v14691_v39 = vld [vmem:[%s17951_s11 + $0x13bc] ss:$20 sps:$4 sm:$0xff]   ;;  %v18580_v40 = vld.sshfl [vmem:[%s18004_s25 + $0x10] sm:$0xff pattern:$0x75316420] }
 0x496   : > { %9583 = vmatprep.subr.bf16.mxu0 %v14622_v41  ;;  %10116 = vmatprep.subr.bf16.mxu1 %v14625_v42  ;;  %v14686_v41 = vld [vmem:[%s17951_s11 + $0x13b0] ss:$20 sps:$4 sm:$0xff]   ;;  %v14689_v42 = vld [vmem:[%s17951_s11 + $0x13b8] ss:$20 sps:$4 sm:$0xff]  }
 0x499   : > { %9584 = vmatpush1.bf16.msra.mxu0 %v14620_v43  ;;  %10117 = vmatpush1.bf16.msra.mxu1 %v14623_v44  ;;  %v14694_v43 = vld [vmem:[%s17951_s11 + $0x13dc] ss:$20 sps:$4 sm:$0xff]   ;;  %v14697_v44 = vld [vmem:[%s17951_s11 + $0x13e4] ss:$20 sps:$4 sm:$0xff]  }
 0x49a   : > { %9585 = vmatprep.subr.bf16.mxu0 %v14628_v46  ;;  %10118 = vmatprep.subr.bf16.mxu1 %v14631_v48  ;;  %v14692_v46 = vld [vmem:[%s17951_s11 + $0x13d8] ss:$20 sps:$4 sm:$0xff]   ;;  %v14695_v48 = vld [vmem:[%s17951_s11 + $0x13e0] ss:$20 sps:$4 sm:$0xff]  }
 0x49d   : > { %9586 = vmatpush1.bf16.msra.mxu0 %v14626_v49  ;;  %10119 = vmatpush1.bf16.msra.mxu1 %v14629_v50  ;;  %v14700_v49 = vld [vmem:[%s17951_s11 + $0x1404] ss:$20 sps:$4 sm:$0xff]   ;;  %v14703_v50 = vld [vmem:[%s17951_s11 + $0x140c] ss:$20 sps:$4 sm:$0xff]  }
 0x49e   : > { %9587 = vmatprep.subr.bf16.mxu0 %v14634_v51  ;;  %10120 = vmatprep.subr.bf16.mxu1 %v14637_v19  ;;  %v4017_v51 = vcombine.high %v18580_v40, %v18580_v40  ;;  %v18594_v19 = vcombine.high %v18513_v25, %v18513_v25 }
 0x4a1   : > { %9588 = vmatpush1.bf16.msra.mxu0 %v14632_v53  ;;  %10121 = vmatpush1.bf16.msra.mxu1 %v14635_v54  ;;  %v14698_v53 = vld [vmem:[%s17951_s11 + $0x1400] ss:$20 sps:$4 sm:$0xff]   ;;  %v14701_v54 = vld [vmem:[%s17951_s11 + $0x1408] ss:$20 sps:$4 sm:$0xff]  }
 0x4a2   : > { %9589 = vmatprep.subr.bf16.mxu0 %v14640_v55  ;;  %10122 = vmatprep.subr.bf16.mxu1 %v14643_v56  ;;  %v14706_v55 = vld [vmem:[%s17951_s11 + $0x142c] ss:$20 sps:$4 sm:$0xff]   ;;  %v14709_v56 = vld [vmem:[%s17951_s11 + $0x1434] ss:$20 sps:$4 sm:$0xff]  }
 0x4a5   : > { %9590 = vmatpush1.bf16.msra.mxu0 %v14638_v57  ;;  %10123 = vmatpush1.bf16.msra.mxu1 %v14641_v58  ;;  %v18601_v57 = vrot.slane %v4017_v51, %v18007_v34  ;;  %v14704_v58 = vld [vmem:[%s17951_s11 + $0x1428] ss:$20 sps:$4 sm:$0xff]   ;;  %v14769_v51 = vld [vmem:[%s17951_s11 + $0x15c4] ss:$20 sps:$4 sm:$0xff]  }
 0x4a6   : > { %9591 = vmatprep.subr.bf16.mxu0 %v14646_v60  ;;  %10124 = vmatprep.subr.bf16.mxu1 %v14649_v61  ;;  %v14707_v60 = vld [vmem:[%s17951_s11 + $0x1430] ss:$20 sps:$4 sm:$0xff]   ;;  %v14712_v61 = vld [vmem:[%s17951_s11 + $0x1454] ss:$20 sps:$4 sm:$0xff]  }
 0x4a9   : > { %9592 = vmatpush1.bf16.msra.mxu0 %v14644_v63  ;;  %10125 = vmatpush1.bf16.msra.mxu1 %v14647_v0  ;;  %v14715_v63 = vld [vmem:[%s17951_s11 + $0x145c] ss:$20 sps:$4 sm:$0xff]  }
 0x4aa   : > { %9593 = vmatprep.subr.bf16.mxu0 %v14652_v3  ;;  %10126 = vmatprep.subr.bf16.mxu1 %v14655_v4  ;;  %v14710_v0 = vld [vmem:[%s17951_s11 + $0x1450] ss:$20 sps:$4 sm:$0xff]   ;;  %v14713_v3 = vld [vmem:[%s17951_s11 + $0x1458] ss:$20 sps:$4 sm:$0xff]  }
 0x4ab   : > { %v14718_v4 = vld [vmem:[%s17951_s11 + $0x147c] ss:$20 sps:$4 sm:$0xff]  }
 0x4ad   : > { %9594 = vmatpush1.bf16.msra.mxu0 %v14650_v5  ;;  %10127 = vmatpush1.bf16.msra.mxu1 %v14653_v6  ;;  %v14721_v5 = vld [vmem:[%s17951_s11 + $0x1484] ss:$20 sps:$4 sm:$0xff]  }
 0x4ae   : > { %9595 = vmatprep.subr.bf16.mxu0 %v14658_v7  ;;  %10128 = vmatprep.subr.bf16.mxu1 %v14661_v10  ;;  %v14716_v6 = vld [vmem:[%s17951_s11 + $0x1478] ss:$20 sps:$4 sm:$0xff]   ;;  %v14719_v7 = vld [vmem:[%s17951_s11 + $0x1480] ss:$20 sps:$4 sm:$0xff]  }
 0x4af   : > { %v14724_v10 = vld [vmem:[%s17951_s11 + $0x14a4] ss:$20 sps:$4 sm:$0xff]  }
 0x4b1   : > { %9596 = vmatpush1.bf16.msra.mxu0 %v14656_v11  ;;  %10129 = vmatpush1.bf16.msra.mxu1 %v14659_v13  ;;  %v14727_v11 = vld [vmem:[%s17951_s11 + $0x14ac] ss:$20 sps:$4 sm:$0xff]  }
 0x4b2   : > { %9597 = vmatprep.subr.bf16.mxu0 %v14664_v14  ;;  %10130 = vmatprep.subr.bf16.mxu1 %v14667_v15  ;;  %v14722_v13 = vld [vmem:[%s17951_s11 + $0x14a0] ss:$20 sps:$4 sm:$0xff]   ;;  %v14725_v14 = vld [vmem:[%s17951_s11 + $0x14a8] ss:$20 sps:$4 sm:$0xff]  }
 0x4b3   : > { %v14730_v15 = vld [vmem:[%s17951_s11 + $0x14cc] ss:$20 sps:$4 sm:$0xff]  }
 0x4b5   : > { %9598 = vmatpush1.bf16.msra.mxu0 %v14662_v16  ;;  %10131 = vmatpush1.bf16.msra.mxu1 %v14665_v17  ;;  %v14733_v16 = vld [vmem:[%s17951_s11 + $0x14d4] ss:$20 sps:$4 sm:$0xff]  }
 0x4b6   : > { %9599 = vmatprep.subr.bf16.mxu0 %v14670_v20  ;;  %10132 = vmatprep.subr.bf16.mxu1 %v14673_v21  ;;  %v14728_v17 = vld [vmem:[%s17951_s11 + $0x14c8] ss:$20 sps:$4 sm:$0xff]   ;;  %v14731_v20 = vld [vmem:[%s17951_s11 + $0x14d0] ss:$20 sps:$4 sm:$0xff]  }
 0x4b7   : > { %v14736_v21 = vld [vmem:[%s17951_s11 + $0x14f4] ss:$20 sps:$4 sm:$0xff]  }
 0x4b9   : > { %9600 = vmatpush1.bf16.msra.mxu0 %v14668_v1  ;;  %10133 = vmatpush1.bf16.msra.mxu1 %v14671_v23  ;;  %v14739_v1 = vld [vmem:[%s17951_s11 + $0x14fc] ss:$20 sps:$4 sm:$0xff]  }
 0x4ba   : > { %9601 = vmatprep.subr.bf16.mxu0 %v14676_v24  ;;  %10134 = vmatprep.subr.bf16.mxu1 %v14679_v26  ;;  %v14734_v23 = vld [vmem:[%s17951_s11 + $0x14f0] ss:$20 sps:$4 sm:$0xff]   ;;  %v14737_v24 = vld [vmem:[%s17951_s11 + $0x14f8] ss:$20 sps:$4 sm:$0xff]  }
 0x4bb   : > { %v14742_v26 = vld [vmem:[%s17951_s11 + $0x151c] ss:$20 sps:$4 sm:$0xff]  }
 0x4bd   : > { %9602 = vmatpush1.bf16.msra.mxu0 %v14674_v27  ;;  %10135 = vmatpush1.bf16.msra.mxu1 %v14677_v29  ;;  %v14745_v27 = vld [vmem:[%s17951_s11 + $0x1524] ss:$20 sps:$4 sm:$0xff]  }
 0x4be   : > { %9603 = vmatprep.subr.bf16.mxu0 %v14682_v31  ;;  %10136 = vmatprep.subr.bf16.mxu1 %v14685_v59  ;;  %v14740_v29 = vld [vmem:[%s17951_s11 + $0x1518] ss:$20 sps:$4 sm:$0xff]   ;;  %v14743_v31 = vld [vmem:[%s17951_s11 + $0x1520] ss:$20 sps:$4 sm:$0xff]  }
 0x4bf   : > { %v14748_v59 = vld [vmem:[%s17951_s11 + $0x1544] ss:$20 sps:$4 sm:$0xff]  }
 0x4c1   : > { %9604 = vmatpush1.bf16.msra.mxu0 %v14680_v33  ;;  %10137 = vmatpush1.bf16.msra.mxu1 %v14683_v35  ;;  %v14751_v33 = vld [vmem:[%s17951_s11 + $0x154c] ss:$20 sps:$4 sm:$0xff]  }
 0x4c2   : > { %9605 = vmatprep.subr.bf16.mxu0 %v14688_v38  ;;  %10138 = vmatprep.subr.bf16.mxu1 %v14691_v39  ;;  %v14746_v35 = vld [vmem:[%s17951_s11 + $0x1540] ss:$20 sps:$4 sm:$0xff]   ;;  %v14749_v38 = vld [vmem:[%s17951_s11 + $0x1548] ss:$20 sps:$4 sm:$0xff]  }
 0x4c3   : > { %v14754_v39 = vld [vmem:[%s17951_s11 + $0x156c] ss:$20 sps:$4 sm:$0xff]  }
 0x4c5   : > { %9606 = vmatpush1.bf16.msra.mxu0 %v14686_v41  ;;  %10139 = vmatpush1.bf16.msra.mxu1 %v14689_v42  ;;  %v14757_v41 = vld [vmem:[%s17951_s11 + $0x1574] ss:$20 sps:$4 sm:$0xff]  }
 0x4c6   : > { %9607 = vmatprep.subr.bf16.mxu0 %v14694_v43  ;;  %10140 = vmatprep.subr.bf16.mxu1 %v14697_v44  ;;  %v14752_v42 = vld [vmem:[%s17951_s11 + $0x1568] ss:$20 sps:$4 sm:$0xff]   ;;  %v14755_v43 = vld [vmem:[%s17951_s11 + $0x1570] ss:$20 sps:$4 sm:$0xff]  }
 0x4c7   : > { %v14760_v44 = vld [vmem:[%s17951_s11 + $0x1594] ss:$20 sps:$4 sm:$0xff]  }
 0x4c9   : > { %9608 = vmatpush1.bf16.msra.mxu0 %v14692_v46  ;;  %10141 = vmatpush1.bf16.msra.mxu1 %v14695_v48  ;;  %v14763_v46 = vld [vmem:[%s17951_s11 + $0x159c] ss:$20 sps:$4 sm:$0xff]  }
 0x4ca   : > { %9618 = vmatprep.subr.bf16.mxu0 %v14700_v49  ;;  %10151 = vmatprep.subr.bf16.mxu1 %v14703_v50  ;;  %v14758_v48 = vld [vmem:[%s17951_s11 + $0x1590] ss:$20 sps:$4 sm:$0xff]   ;;  %v14761_v49 = vld [vmem:[%s17951_s11 + $0x1598] ss:$20 sps:$4 sm:$0xff]  }
 0x4cb   : > { %v14766_v50 = vld [vmem:[%s17951_s11 + $0x15bc] ss:$20 sps:$4 sm:$0xff]  }
 0x4cc   : > { %9610 = vmatmul.mubr.bf16.vlgmr.msra.gmra.mrb[0].mxu0 %v18594_v19  ;;  %10143 = vmatmul.mubr.bf16.vlgmr.msra.gmra.mrb[0].mxu1 %v18594_v19 }
 0x4cd   : > { %9619 = vmatpush1.bf16.msra.mxu0 %v14698_v53  ;;  %10152 = vmatpush1.bf16.msra.mxu1 %v14701_v54  ;;  %v14764_v53 = vld [vmem:[%s17951_s11 + $0x15b8] ss:$20 sps:$4 sm:$0xff]   ;;  %v14767_v54 = vld [vmem:[%s17951_s11 + $0x15c0] ss:$20 sps:$4 sm:$0xff]  }
 0x4ce   : > { %9620 = vmatprep.subr.bf16.mxu0 %v14706_v55  ;;  %10153 = vmatprep.subr.bf16.mxu1 %v14709_v56  ;;  %v14772_v55 = vld [vmem:[%s17951_s11 + $0x15e4] ss:$20 sps:$4 sm:$0xff]   ;;  %v14775_v56 = vld [vmem:[%s17951_s11 + $0x15ec] ss:$20 sps:$4 sm:$0xff]  }
 0x4cf   : > { %9650 = vmatprep.mubr.bf16.mxu0 %v18601_v57  ;;  %10183 = vmatprep.mubr.bf16.mxu1 %v18601_v57 }
 0x4d1   : > { %9621 = vmatpush1.bf16.msra.mxu0 %v14704_v58  ;;  %10154 = vmatpush1.bf16.msra.mxu1 %v14707_v60  ;;  %v14770_v58 = vld [vmem:[%s17951_s11 + $0x15e0] ss:$20 sps:$4 sm:$0xff]   ;;  %v14773_v60 = vld [vmem:[%s17951_s11 + $0x15e8] ss:$20 sps:$4 sm:$0xff]  }
 0x4d2   : > { %9622 = vmatprep.subr.bf16.mxu0 %v14712_v61  ;;  %10155 = vmatprep.subr.bf16.mxu1 %v14715_v63  ;;  %v14778_v61 = vld [vmem:[%s17951_s11 + $0x160c] ss:$20 sps:$4 sm:$0xff]   ;;  %v14781_v63 = vld [vmem:[%s17951_s11 + $0x1614] ss:$20 sps:$4 sm:$0xff]  }
 0x4d5   : > { %9623 = vmatpush1.bf16.msra.mxu0 %v14710_v0  ;;  %10156 = vmatpush1.bf16.msra.mxu1 %v14713_v3  ;;  %v14776_v0 = vld [vmem:[%s17951_s11 + $0x1608] ss:$20 sps:$4 sm:$0xff]   ;;  %v14779_v3 = vld [vmem:[%s17951_s11 + $0x1610] ss:$20 sps:$4 sm:$0xff]  }
 0x4d6   : > { %9624 = vmatprep.subr.bf16.mxu0 %v14718_v4  ;;  %10157 = vmatprep.subr.bf16.mxu1 %v14721_v5  ;;  %v14784_v4 = vld [vmem:[%s17951_s11 + $0x1634] ss:$20 sps:$4 sm:$0xff]   ;;  %v14787_v5 = vld [vmem:[%s17951_s11 + $0x163c] ss:$20 sps:$4 sm:$0xff]  }
 0x4d9   : > { %9625 = vmatpush1.bf16.msra.mxu0 %v14716_v6  ;;  %10158 = vmatpush1.bf16.msra.mxu1 %v14719_v7  ;;  %v14782_v6 = vld [vmem:[%s17951_s11 + $0x1630] ss:$20 sps:$4 sm:$0xff]   ;;  %v14785_v7 = vld [vmem:[%s17951_s11 + $0x1638] ss:$20 sps:$4 sm:$0xff]  }
 0x4da   : > { %9626 = vmatprep.subr.bf16.mxu0 %v14724_v10  ;;  %10159 = vmatprep.subr.bf16.mxu1 %v14727_v11  ;;  %v14790_v10 = vld [vmem:[%s17951_s11 + $0x165c] ss:$20 sps:$4 sm:$0xff]   ;;  %v14793_v11 = vld [vmem:[%s17951_s11 + $0x1664] ss:$20 sps:$4 sm:$0xff]  }
 0x4dd   : > { %9627 = vmatpush1.bf16.msra.mxu0 %v14722_v13  ;;  %10160 = vmatpush1.bf16.msra.mxu1 %v14725_v14  ;;  %v14788_v13 = vld [vmem:[%s17951_s11 + $0x1658] ss:$20 sps:$4 sm:$0xff]   ;;  %v14791_v14 = vld [vmem:[%s17951_s11 + $0x1660] ss:$20 sps:$4 sm:$0xff]  }
 0x4de   : > { %9628 = vmatprep.subr.bf16.mxu0 %v14730_v15  ;;  %10161 = vmatprep.subr.bf16.mxu1 %v14733_v16  ;;  %v14796_v15 = vld [vmem:[%s17951_s11 + $0x1684] ss:$20 sps:$4 sm:$0xff]   ;;  %v14799_v16 = vld [vmem:[%s17951_s11 + $0x168c] ss:$20 sps:$4 sm:$0xff]  }
 0x4e1   : > { %9629 = vmatpush1.bf16.msra.mxu0 %v14728_v17  ;;  %10162 = vmatpush1.bf16.msra.mxu1 %v14731_v20  ;;  %v18669_v17 = vrot.slane %v18580_v40, %v18007_v34  ;;  %v14794_v20 = vld [vmem:[%s17951_s11 + $0x1680] ss:$20 sps:$4 sm:$0xff]   ;;  %v14800_v40 = vld [vmem:[%s17951_s11 + $0x16a8] ss:$20 sps:$4 sm:$0xff]  }
 0x4e2   : > { %9630 = vmatprep.subr.bf16.mxu0 %v14736_v21  ;;  %10163 = vmatprep.subr.bf16.mxu1 %v14739_v1  ;;  %v14797_v21 = vld [vmem:[%s17951_s11 + $0x1688] ss:$20 sps:$4 sm:$0xff]   ;;  %v14802_v1 = vld [vmem:[%s17951_s11 + $0x16ac] ss:$20 sps:$4 sm:$0xff]  }
 0x4e5   : > { %9631 = vmatpush1.bf16.msra.mxu0 %v14734_v23  ;;  %10164 = vmatpush1.bf16.msra.mxu1 %v14737_v24  ;;  %v14805_v23 = vld [vmem:[%s17951_s11 + $0x16b4] ss:$20 sps:$4 sm:$0xff]   ;;  %v18677_v24 = vcombine.high %v18601_v57, %v18601_v57 }
 0x4e6   : > { %9632 = vmatprep.subr.bf16.mxu0 %v14742_v26  ;;  %10165 = vmatprep.subr.bf16.mxu1 %v14745_v27  ;;  %v14803_v26 = vld [vmem:[%s17951_s11 + $0x16b0] ss:$20 sps:$4 sm:$0xff]   ;;  %v14808_v27 = vld [vmem:[%s17951_s11 + $0x16d4] ss:$20 sps:$4 sm:$0xff]  }
 0x4e9   : > { %9633 = vmatpush1.bf16.msra.mxu0 %v14740_v29  ;;  %10166 = vmatpush1.bf16.msra.mxu1 %v14743_v31  ;;  %v14811_v29 = vld [vmem:[%s17951_s11 + $0x16dc] ss:$20 sps:$4 sm:$0xff]  }
 0x4ea   : > { %9634 = vmatprep.subr.bf16.mxu0 %v14748_v59  ;;  %10167 = vmatprep.subr.bf16.mxu1 %v14751_v33  ;;  %v14806_v31 = vld [vmem:[%s17951_s11 + $0x16d0] ss:$20 sps:$4 sm:$0xff]   ;;  %v14809_v59 = vld [vmem:[%s17951_s11 + $0x16d8] ss:$20 sps:$4 sm:$0xff]  }
 0x4eb   : > { %v14814_v33 = vld [vmem:[%s17951_s11 + $0x16fc] ss:$20 sps:$4 sm:$0xff]  }
 0x4ed   : > { %9635 = vmatpush1.bf16.msra.mxu0 %v14746_v35  ;;  %10168 = vmatpush1.bf16.msra.mxu1 %v14749_v38  ;;  %v14817_v35 = vld [vmem:[%s17951_s11 + $0x1704] ss:$20 sps:$4 sm:$0xff]  }
 0x4ee   : > { %9636 = vmatprep.subr.bf16.mxu0 %v14754_v39  ;;  %10169 = vmatprep.subr.bf16.mxu1 %v14757_v41  ;;  %v14812_v38 = vld [vmem:[%s17951_s11 + $0x16f8] ss:$20 sps:$4 sm:$0xff]   ;;  %v14815_v39 = vld [vmem:[%s17951_s11 + $0x1700] ss:$20 sps:$4 sm:$0xff]  }
 0x4ef   : > { %v14820_v41 = vld [vmem:[%s17951_s11 + $0x1724] ss:$20 sps:$4 sm:$0xff]  }
 0x4f1   : > { %9637 = vmatpush1.bf16.msra.mxu0 %v14752_v42  ;;  %10170 = vmatpush1.bf16.msra.mxu1 %v14755_v43  ;;  %v14823_v42 = vld [vmem:[%s17951_s11 + $0x172c] ss:$20 sps:$4 sm:$0xff]  }
 0x4f2   : > { %9638 = vmatprep.subr.bf16.mxu0 %v14760_v44  ;;  %10171 = vmatprep.subr.bf16.mxu1 %v14763_v46  ;;  %v14818_v43 = vld [vmem:[%s17951_s11 + $0x1720] ss:$20 sps:$4 sm:$0xff]   ;;  %v14821_v44 = vld [vmem:[%s17951_s11 + $0x1728] ss:$20 sps:$4 sm:$0xff]  }
 0x4f3   : > { %v14826_v46 = vld [vmem:[%s17951_s11 + $0x174c] ss:$20 sps:$4 sm:$0xff]  }
 0x4f5   : > { %9639 = vmatpush1.bf16.msra.mxu0 %v14758_v48  ;;  %10172 = vmatpush1.bf16.msra.mxu1 %v14761_v49  ;;  %v14829_v48 = vld [vmem:[%s17951_s11 + $0x1754] ss:$20 sps:$4 sm:$0xff]  }
 0x4f6   : > { %9640 = vmatprep.subr.bf16.mxu0 %v14766_v50  ;;  %10173 = vmatprep.subr.bf16.mxu1 %v14769_v51  ;;  %v14824_v49 = vld [vmem:[%s17951_s11 + $0x1748] ss:$20 sps:$4 sm:$0xff]   ;;  %v14827_v50 = vld [vmem:[%s17951_s11 + $0x1750] ss:$20 sps:$4 sm:$0xff]  }
 0x4f7   : > { %v14832_v51 = vld [vmem:[%s17951_s11 + $0x1774] ss:$20 sps:$4 sm:$0xff]  }
 0x4f9   : > { %9641 = vmatpush1.bf16.msra.mxu0 %v14764_v53  ;;  %10174 = vmatpush1.bf16.msra.mxu1 %v14767_v54  ;;  %v14835_v53 = vld [vmem:[%s17951_s11 + $0x177c] ss:$20 sps:$4 sm:$0xff]  }
 0x4fa   : > { %9642 = vmatprep.subr.bf16.mxu0 %v14772_v55  ;;  %10175 = vmatprep.subr.bf16.mxu1 %v14775_v56  ;;  %v14830_v54 = vld [vmem:[%s17951_s11 + $0x1770] ss:$20 sps:$4 sm:$0xff]   ;;  %v14833_v55 = vld [vmem:[%s17951_s11 + $0x1778] ss:$20 sps:$4 sm:$0xff]  }
 0x4fb   : > { %v14838_v56 = vld [vmem:[%s17951_s11 + $0x179c] ss:$20 sps:$4 sm:$0xff]  }
 0x4fd   : > { %9643 = vmatpush1.bf16.msra.mxu0 %v14770_v58  ;;  %10176 = vmatpush1.bf16.msra.mxu1 %v14773_v60  ;;  %v14841_v58 = vld [vmem:[%s17951_s11 + $0x17a4] ss:$20 sps:$4 sm:$0xff]  }
 0x4fe   : > { %9644 = vmatprep.subr.bf16.mxu0 %v14778_v61  ;;  %10177 = vmatprep.subr.bf16.mxu1 %v14781_v63  ;;  %v14836_v60 = vld [vmem:[%s17951_s11 + $0x1798] ss:$20 sps:$4 sm:$0xff]   ;;  %v14839_v61 = vld [vmem:[%s17951_s11 + $0x17a0] ss:$20 sps:$4 sm:$0xff]  }
 0x4ff   : > { %v14844_v63 = vld [vmem:[%s17951_s11 + $0x17c4] ss:$20 sps:$4 sm:$0xff]  }
 0x501   : > { %9645 = vmatpush1.bf16.msra.mxu0 %v14776_v0  ;;  %10178 = vmatpush1.bf16.msra.mxu1 %v14779_v3  ;;  %v14847_v0 = vld [vmem:[%s17951_s11 + $0x17cc] ss:$20 sps:$4 sm:$0xff]  }
 0x502   : > { %9646 = vmatprep.subr.bf16.mxu0 %v14784_v4  ;;  %10179 = vmatprep.subr.bf16.mxu1 %v14787_v5  ;;  %v14842_v3 = vld [vmem:[%s17951_s11 + $0x17c0] ss:$20 sps:$4 sm:$0xff]   ;;  %v14845_v4 = vld [vmem:[%s17951_s11 + $0x17c8] ss:$20 sps:$4 sm:$0xff]  }
 0x503   : > { %v14850_v5 = vld [vmem:[%s17951_s11 + $0x17ec] ss:$20 sps:$4 sm:$0xff]  }
 0x505   : > { %9647 = vmatpush1.bf16.msra.mxu0 %v14782_v6  ;;  %10180 = vmatpush1.bf16.msra.mxu1 %v14785_v7  ;;  %v14853_v6 = vld [vmem:[%s17951_s11 + $0x17f4] ss:$20 sps:$4 sm:$0xff]  }
 0x506   : > { %9648 = vmatprep.subr.bf16.mxu0 %v14790_v10  ;;  %10181 = vmatprep.subr.bf16.mxu1 %v14793_v11  ;;  %v14848_v7 = vld [vmem:[%s17951_s11 + $0x17e8] ss:$20 sps:$4 sm:$0xff]   ;;  %v14851_v10 = vld [vmem:[%s17951_s11 + $0x17f0] ss:$20 sps:$4 sm:$0xff]  }
 0x507   : > { %v14856_v11 = vld [vmem:[%s17951_s11 + $0x1814] ss:$20 sps:$4 sm:$0xff]  }
 0x509   : > { %9649 = vmatpush1.bf16.msra.mxu0 %v14788_v13  ;;  %10182 = vmatpush1.bf16.msra.mxu1 %v14791_v14  ;;  %v14859_v13 = vld [vmem:[%s17951_s11 + $0x181c] ss:$20 sps:$4 sm:$0xff]  }
 0x50a   : > { %9659 = vmatprep.subr.bf16.mxu0 %v14796_v15  ;;  %10192 = vmatprep.subr.bf16.mxu1 %v14799_v16  ;;  %v14854_v14 = vld [vmem:[%s17951_s11 + $0x1810] ss:$20 sps:$4 sm:$0xff]   ;;  %v14857_v15 = vld [vmem:[%s17951_s11 + $0x1818] ss:$20 sps:$4 sm:$0xff]  }
 0x50b   : > { %v14862_v16 = vld [vmem:[%s17951_s11 + $0x183c] ss:$20 sps:$4 sm:$0xff]  }
 0x50c   : > { %9651 = vmatmul.mubr.bf16.vlgmr.msra.gmra.mrb[0].mxu0 %v18669_v17  ;;  %10184 = vmatmul.mubr.bf16.vlgmr.msra.gmra.mrb[0].mxu1 %v18669_v17 }
 0x50d   : > { %9660 = vmatpush1.bf16.msra.mxu0 %v14794_v20  ;;  %10193 = vmatpush1.bf16.msra.mxu1 %v14797_v21  ;;  %v14865_v20 = vld [vmem:[%s17951_s11 + $0x1844] ss:$20 sps:$4 sm:$0xff]  }
 0x50e   : > { %9661 = vmatprep.subr.bf16.mxu0 %v14802_v1  ;;  %10194 = vmatprep.subr.bf16.mxu1 %v14805_v23  ;;  %v14860_v21 = vld [vmem:[%s17951_s11 + $0x1838] ss:$20 sps:$4 sm:$0xff]   ;;  %v14863_v1 = vld [vmem:[%s17951_s11 + $0x1840] ss:$20 sps:$4 sm:$0xff]  }
 0x50f   : > { %9691 = vmatprep.mubr.bf16.mxu0 %v18677_v24  ;;  %10224 = vmatprep.mubr.bf16.mxu1 %v18677_v24  ;;  %v14868_v23 = vld [vmem:[%s17951_s11 + $0x1864] ss:$20 sps:$4 sm:$0xff]  }
 0x511   : > { %9662 = vmatpush1.bf16.msra.mxu0 %v14800_v40  ;;  %10195 = vmatpush1.bf16.msra.mxu1 %v14803_v26  ;;  %v14871_v40 = vld [vmem:[%s17951_s11 + $0x186c] ss:$20 sps:$4 sm:$0xff]  }
 0x512   : > { %9663 = vmatprep.subr.bf16.mxu0 %v14808_v27  ;;  %10196 = vmatprep.subr.bf16.mxu1 %v14811_v29  ;;  %v14866_v26 = vld [vmem:[%s17951_s11 + $0x1860] ss:$20 sps:$4 sm:$0xff]   ;;  %v14869_v27 = vld [vmem:[%s17951_s11 + $0x1868] ss:$20 sps:$4 sm:$0xff]  }
 0x513   : > { %v14874_v29 = vld [vmem:[%s17951_s11 + $0x188c] ss:$20 sps:$4 sm:$0xff]  }
 0x515   : > { %9664 = vmatpush1.bf16.msra.mxu0 %v14806_v31  ;;  %10197 = vmatpush1.bf16.msra.mxu1 %v14809_v59  ;;  %v14877_v31 = vld [vmem:[%s17951_s11 + $0x1894] ss:$20 sps:$4 sm:$0xff]  }
 0x516   : > { %9665 = vmatprep.subr.bf16.mxu0 %v14814_v33  ;;  %10198 = vmatprep.subr.bf16.mxu1 %v14817_v35  ;;  %v14872_v59 = vld [vmem:[%s17951_s11 + $0x1888] ss:$20 sps:$4 sm:$0xff]   ;;  %v14875_v33 = vld [vmem:[%s17951_s11 + $0x1890] ss:$20 sps:$4 sm:$0xff]  }
 0x517   : > { %v14880_v35 = vld [vmem:[%s17951_s11 + $0x18b4] ss:$20 sps:$4 sm:$0xff]  }
 0x519   : > { %9666 = vmatpush1.bf16.msra.mxu0 %v14812_v38  ;;  %10199 = vmatpush1.bf16.msra.mxu1 %v14815_v39  ;;  %v14883_v38 = vld [vmem:[%s17951_s11 + $0x18bc] ss:$20 sps:$4 sm:$0xff]   ;;  %v15332_v39 = vld [vmem:[%s18004_s25 + $0x10] sm:$0xff] }
 0x51a   : > { %9667 = vmatprep.subr.bf16.mxu0 %v14820_v41  ;;  %10200 = vmatprep.subr.bf16.mxu1 %v14823_v42  ;;  %v4002_v41 = vcombine.high %v15332_v39, %v15332_v39  ;;  %v14878_v42 = vld [vmem:[%s17951_s11 + $0x18b0] ss:$20 sps:$4 sm:$0xff]   ;;  %v14935_v39 = vld [vmem:[%s17951_s11 + $0x1a20] ss:$20 sps:$4 sm:$0xff]  }
 0x51d   : > { %9668 = vmatpush1.bf16.msra.mxu0 %v14818_v43  ;;  %10201 = vmatpush1.bf16.msra.mxu1 %v14821_v44  ;;  %v14881_v43 = vld [vmem:[%s17951_s11 + $0x18b8] ss:$20 sps:$4 sm:$0xff]   ;;  %v14886_v44 = vld [vmem:[%s17951_s11 + $0x18dc] ss:$20 sps:$4 sm:$0xff]  }
 0x51e   : > { %9669 = vmatprep.subr.bf16.mxu0 %v14826_v46  ;;  %10202 = vmatprep.subr.bf16.mxu1 %v14829_v48  ;;  %v14889_v46 = vld [vmem:[%s17951_s11 + $0x18e4] ss:$20 sps:$4 sm:$0xff]   ;;  %v18741_v48 = vrot.slane %v4002_v41, %v18007_v34 }
 0x51f   : > { %v14940_v41 = vld [vmem:[%s17951_s11 + $0x1a44] ss:$20 sps:$4 sm:$0xff]  }
 0x521   : > { %9670 = vmatpush1.bf16.msra.mxu0 %v14824_v49  ;;  %10203 = vmatpush1.bf16.msra.mxu1 %v14827_v50  ;;  %v14884_v49 = vld [vmem:[%s17951_s11 + $0x18d8] ss:$20 sps:$4 sm:$0xff]   ;;  %v14887_v50 = vld [vmem:[%s17951_s11 + $0x18e0] ss:$20 sps:$4 sm:$0xff]  }
 0x522   : > { %9671 = vmatprep.subr.bf16.mxu0 %v14832_v51  ;;  %10204 = vmatprep.subr.bf16.mxu1 %v14835_v53  ;;  %v14892_v51 = vld [vmem:[%s17951_s11 + $0x1904] ss:$20 sps:$4 sm:$0xff]   ;;  %v14895_v53 = vld [vmem:[%s17951_s11 + $0x190c] ss:$20 sps:$4 sm:$0xff]  }
 0x525   : > { %9672 = vmatpush1.bf16.msra.mxu0 %v14830_v54  ;;  %10205 = vmatpush1.bf16.msra.mxu1 %v14833_v55  ;;  %v4018_v54 = vcombine.high %v18741_v48, %v18741_v48  ;;  %v18751_v55 = vcombine.high %v18669_v17, %v18669_v17 }
 0x526   : > { %9673 = vmatprep.subr.bf16.mxu0 %v14838_v56  ;;  %10206 = vmatprep.subr.bf16.mxu1 %v14841_v58  ;;  %v14890_v56 = vld [vmem:[%s17951_s11 + $0x1900] ss:$20 sps:$4 sm:$0xff]   ;;  %v14893_v58 = vld [vmem:[%s17951_s11 + $0x1908] ss:$20 sps:$4 sm:$0xff]  }
 0x529   : > { %9674 = vmatpush1.bf16.msra.mxu0 %v14836_v60  ;;  %10207 = vmatpush1.bf16.msra.mxu1 %v14839_v61  ;;  %v14898_v60 = vld [vmem:[%s17951_s11 + $0x192c] ss:$20 sps:$4 sm:$0xff]   ;;  %v14901_v61 = vld [vmem:[%s17951_s11 + $0x1934] ss:$20 sps:$4 sm:$0xff]  }
 0x52a   : > { %9675 = vmatprep.subr.bf16.mxu0 %v14844_v63  ;;  %10208 = vmatprep.subr.bf16.mxu1 %v14847_v0  ;;  %v18758_v63 = vrot.slane %v4018_v54, %v18007_v34  ;;  %v14896_v0 = vld [vmem:[%s17951_s11 + $0x1928] ss:$20 sps:$4 sm:$0xff]  }
 0x52b   : > { %v14955_v54 = vld [vmem:[%s17951_s11 + $0x1a9c] ss:$20 sps:$4 sm:$0xff]  }
 0x52d   : > { %9676 = vmatpush1.bf16.msra.mxu0 %v14842_v3  ;;  %10209 = vmatpush1.bf16.msra.mxu1 %v14845_v4  ;;  %v14899_v3 = vld [vmem:[%s17951_s11 + $0x1930] ss:$20 sps:$4 sm:$0xff]   ;;  %v14904_v4 = vld [vmem:[%s17951_s11 + $0x1954] ss:$20 sps:$4 sm:$0xff]  }
 0x52e   : > { %9677 = vmatprep.subr.bf16.mxu0 %v14850_v5  ;;  %10210 = vmatprep.subr.bf16.mxu1 %v14853_v6  ;;  %v14907_v5 = vld [vmem:[%s17951_s11 + $0x195c] ss:$20 sps:$4 sm:$0xff]  }
 0x52f   : > { %v14902_v6 = vld [vmem:[%s17951_s11 + $0x1950] ss:$20 sps:$4 sm:$0xff]  }
 0x531   : > { %9678 = vmatpush1.bf16.msra.mxu0 %v14848_v7  ;;  %10211 = vmatpush1.bf16.msra.mxu1 %v14851_v10  ;;  %v14905_v7 = vld [vmem:[%s17951_s11 + $0x1958] ss:$20 sps:$4 sm:$0xff]   ;;  %v14910_v10 = vld [vmem:[%s17951_s11 + $0x197c] ss:$20 sps:$4 sm:$0xff]  }
 0x532   : > { %9679 = vmatprep.subr.bf16.mxu0 %v14856_v11  ;;  %10212 = vmatprep.subr.bf16.mxu1 %v14859_v13  ;;  %v14913_v11 = vld [vmem:[%s17951_s11 + $0x1984] ss:$20 sps:$4 sm:$0xff]  }
 0x533   : > { %v14908_v13 = vld [vmem:[%s17951_s11 + $0x1978] ss:$20 sps:$4 sm:$0xff]  }
 0x535   : > { %9680 = vmatpush1.bf16.msra.mxu0 %v14854_v14  ;;  %10213 = vmatpush1.bf16.msra.mxu1 %v14857_v15  ;;  %v14911_v14 = vld [vmem:[%s17951_s11 + $0x1980] ss:$20 sps:$4 sm:$0xff]   ;;  %v14916_v15 = vld [vmem:[%s17951_s11 + $0x19a4] ss:$20 sps:$4 sm:$0xff]  }
 0x536   : > { %9681 = vmatprep.subr.bf16.mxu0 %v14862_v16  ;;  %10214 = vmatprep.subr.bf16.mxu1 %v14865_v20  ;;  %v14919_v16 = vld [vmem:[%s17951_s11 + $0x19ac] ss:$20 sps:$4 sm:$0xff]  }
 0x537   : > { %v14914_v20 = vld [vmem:[%s17951_s11 + $0x19a0] ss:$20 sps:$4 sm:$0xff]  }
 0x539   : > { %9682 = vmatpush1.bf16.msra.mxu0 %v14860_v21  ;;  %10215 = vmatpush1.bf16.msra.mxu1 %v14863_v1  ;;  %v14917_v21 = vld [vmem:[%s17951_s11 + $0x19a8] ss:$20 sps:$4 sm:$0xff]   ;;  %v14922_v1 = vld [vmem:[%s17951_s11 + $0x19cc] ss:$20 sps:$4 sm:$0xff]  }
 0x53a   : > { %9683 = vmatprep.subr.bf16.mxu0 %v14868_v23  ;;  %10216 = vmatprep.subr.bf16.mxu1 %v14871_v40  ;;  %v14925_v23 = vld [vmem:[%s17951_s11 + $0x19d4] ss:$20 sps:$4 sm:$0xff]  }
 0x53b   : > { %v14920_v40 = vld [vmem:[%s17951_s11 + $0x19c8] ss:$20 sps:$4 sm:$0xff]  }
 0x53d   : > { %9684 = vmatpush1.bf16.msra.mxu0 %v14866_v26  ;;  %10217 = vmatpush1.bf16.msra.mxu1 %v14869_v27  ;;  %v14923_v26 = vld [vmem:[%s17951_s11 + $0x19d0] ss:$20 sps:$4 sm:$0xff]   ;;  %v14928_v27 = vld [vmem:[%s17951_s11 + $0x19f4] ss:$20 sps:$4 sm:$0xff]  }
 0x53e   : > { %9685 = vmatprep.subr.bf16.mxu0 %v14874_v29  ;;  %10218 = vmatprep.subr.bf16.mxu1 %v14877_v31  ;;  %v14931_v29 = vld [vmem:[%s17951_s11 + $0x19fc] ss:$20 sps:$4 sm:$0xff]  }
 0x53f   : > { %v14926_v31 = vld [vmem:[%s17951_s11 + $0x19f0] ss:$20 sps:$4 sm:$0xff]  }
 0x541   : > { %9686 = vmatpush1.bf16.msra.mxu0 %v14872_v59  ;;  %10219 = vmatpush1.bf16.msra.mxu1 %v14875_v33  ;;  %v14929_v59 = vld [vmem:[%s17951_s11 + $0x19f8] ss:$20 sps:$4 sm:$0xff]   ;;  %v14934_v33 = vld [vmem:[%s17951_s11 + $0x1a1c] ss:$20 sps:$4 sm:$0xff]  }
 0x542   : > { %9687 = vmatprep.subr.bf16.mxu0 %v14880_v35  ;;  %10220 = vmatprep.subr.bf16.mxu1 %v14883_v38  ;;  %v14937_v35 = vld [vmem:[%s17951_s11 + $0x1a24] ss:$20 sps:$4 sm:$0xff]  }
 0x543   : > { %v14932_v38 = vld [vmem:[%s17951_s11 + $0x1a18] ss:$20 sps:$4 sm:$0xff]  }
 0x545   : > { %9688 = vmatpush1.bf16.msra.mxu0 %v14878_v42  ;;  %10221 = vmatpush1.bf16.msra.mxu1 %v14881_v43  ;;  %v14943_v42 = vld [vmem:[%s17951_s11 + $0x1a4c] ss:$20 sps:$4 sm:$0xff]  }
 0x546   : > { %9689 = vmatprep.subr.bf16.mxu0 %v14886_v44  ;;  %10222 = vmatprep.subr.bf16.mxu1 %v14889_v46  ;;  %v14938_v43 = vld [vmem:[%s17951_s11 + $0x1a40] ss:$20 sps:$4 sm:$0xff]   ;;  %v14941_v44 = vld [vmem:[%s17951_s11 + $0x1a48] ss:$20 sps:$4 sm:$0xff]  }
 0x547   : > { %v14946_v46 = vld [vmem:[%s17951_s11 + $0x1a6c] ss:$20 sps:$4 sm:$0xff]  }
 0x549   : > { %9690 = vmatpush1.bf16.msra.mxu0 %v14884_v49  ;;  %10223 = vmatpush1.bf16.msra.mxu1 %v14887_v50  ;;  %v14949_v49 = vld [vmem:[%s17951_s11 + $0x1a74] ss:$20 sps:$4 sm:$0xff]  }
 0x54a   : > { %9700 = vmatprep.subr.bf16.mxu0 %v14892_v51  ;;  %10233 = vmatprep.subr.bf16.mxu1 %v14895_v53  ;;  %v14944_v50 = vld [vmem:[%s17951_s11 + $0x1a68] ss:$20 sps:$4 sm:$0xff]   ;;  %v14947_v51 = vld [vmem:[%s17951_s11 + $0x1a70] ss:$20 sps:$4 sm:$0xff]  }
 0x54b   : > { %v14952_v53 = vld [vmem:[%s17951_s11 + $0x1a94] ss:$20 sps:$4 sm:$0xff]  }
 0x54c   : > { %9692 = vmatmul.mubr.bf16.vlgmr.msra.gmra.mrb[0].mxu0 %v18751_v55  ;;  %10225 = vmatmul.mubr.bf16.vlgmr.msra.gmra.mrb[0].mxu1 %v18751_v55 }
 0x54d   : > { %9701 = vmatpush1.bf16.msra.mxu0 %v14890_v56  ;;  %10234 = vmatpush1.bf16.msra.mxu1 %v14893_v58  ;;  %v14950_v56 = vld [vmem:[%s17951_s11 + $0x1a90] ss:$20 sps:$4 sm:$0xff]   ;;  %v14953_v58 = vld [vmem:[%s17951_s11 + $0x1a98] ss:$20 sps:$4 sm:$0xff]  }
 0x54e   : > { %9702 = vmatprep.subr.bf16.mxu0 %v14898_v60  ;;  %10235 = vmatprep.subr.bf16.mxu1 %v14901_v61  ;;  %v14958_v60 = vld [vmem:[%s17951_s11 + $0x1abc] ss:$20 sps:$4 sm:$0xff]   ;;  %v14961_v61 = vld [vmem:[%s17951_s11 + $0x1ac4] ss:$20 sps:$4 sm:$0xff]  }
 0x54f   : > { %9732 = vmatprep.mubr.bf16.mxu0 %v18758_v63  ;;  %10265 = vmatprep.mubr.bf16.mxu1 %v18758_v63 }
 0x551   : > { %9703 = vmatpush1.bf16.msra.mxu0 %v14896_v0  ;;  %10236 = vmatpush1.bf16.msra.mxu1 %v14899_v3  ;;  %v14956_v0 = vld [vmem:[%s17951_s11 + $0x1ab8] ss:$20 sps:$4 sm:$0xff]   ;;  %v14959_v3 = vld [vmem:[%s17951_s11 + $0x1ac0] ss:$20 sps:$4 sm:$0xff]  }
 0x552   : > { %9704 = vmatprep.subr.bf16.mxu0 %v14904_v4  ;;  %10237 = vmatprep.subr.bf16.mxu1 %v14907_v5  ;;  %v14964_v4 = vld [vmem:[%s17951_s11 + $0x1ae4] ss:$20 sps:$4 sm:$0xff]   ;;  %v14967_v5 = vld [vmem:[%s17951_s11 + $0x1aec] ss:$20 sps:$4 sm:$0xff]  }
 0x555   : > { %9705 = vmatpush1.bf16.msra.mxu0 %v14902_v6  ;;  %10238 = vmatpush1.bf16.msra.mxu1 %v14905_v7  ;;  %v14962_v6 = vld [vmem:[%s17951_s11 + $0x1ae0] ss:$20 sps:$4 sm:$0xff]   ;;  %v14965_v7 = vld [vmem:[%s17951_s11 + $0x1ae8] ss:$20 sps:$4 sm:$0xff]  }
 0x556   : > { %9706 = vmatprep.subr.bf16.mxu0 %v14910_v10  ;;  %10239 = vmatprep.subr.bf16.mxu1 %v14913_v11  ;;  %v14970_v10 = vld [vmem:[%s17951_s11 + $0x1b0c] ss:$20 sps:$4 sm:$0xff]   ;;  %v14973_v11 = vld [vmem:[%s17951_s11 + $0x1b14] ss:$20 sps:$4 sm:$0xff]  }
 0x559   : > { %9707 = vmatpush1.bf16.msra.mxu0 %v14908_v13  ;;  %10240 = vmatpush1.bf16.msra.mxu1 %v14911_v14  ;;  %v14968_v13 = vld [vmem:[%s17951_s11 + $0x1b08] ss:$20 sps:$4 sm:$0xff]   ;;  %v14971_v14 = vld [vmem:[%s17951_s11 + $0x1b10] ss:$20 sps:$4 sm:$0xff]  }
 0x55a   : > { %9708 = vmatprep.subr.bf16.mxu0 %v14916_v15  ;;  %10241 = vmatprep.subr.bf16.mxu1 %v14919_v16  ;;  %v14976_v15 = vld [vmem:[%s17951_s11 + $0x1b34] ss:$20 sps:$4 sm:$0xff]   ;;  %v14979_v16 = vld [vmem:[%s17951_s11 + $0x1b3c] ss:$20 sps:$4 sm:$0xff]  }
 0x55d   : > { %9709 = vmatpush1.bf16.msra.mxu0 %v14914_v20  ;;  %10242 = vmatpush1.bf16.msra.mxu1 %v14917_v21  ;;  %v14974_v20 = vld [vmem:[%s17951_s11 + $0x1b30] ss:$20 sps:$4 sm:$0xff]   ;;  %v14977_v21 = vld [vmem:[%s17951_s11 + $0x1b38] ss:$20 sps:$4 sm:$0xff]  }
 0x55e   : > { %9710 = vmatprep.subr.bf16.mxu0 %v14922_v1  ;;  %10243 = vmatprep.subr.bf16.mxu1 %v14925_v23  ;;  %v14982_v1 = vld [vmem:[%s17951_s11 + $0x1b5c] ss:$20 sps:$4 sm:$0xff]   ;;  %v14985_v23 = vld [vmem:[%s17951_s11 + $0x1b64] ss:$20 sps:$4 sm:$0xff]  }
 0x561   : > { %9711 = vmatpush1.bf16.msra.mxu0 %v14920_v40  ;;  %10244 = vmatpush1.bf16.msra.mxu1 %v14923_v26  ;;  %v14980_v40 = vld [vmem:[%s17951_s11 + $0x1b58] ss:$20 sps:$4 sm:$0xff]   ;;  %v14983_v26 = vld [vmem:[%s17951_s11 + $0x1b60] ss:$20 sps:$4 sm:$0xff]  }
 0x562   : > { %9712 = vmatprep.subr.bf16.mxu0 %v14928_v27  ;;  %10245 = vmatprep.subr.bf16.mxu1 %v14931_v29  ;;  %v14989_v27 = vld [vmem:[%s17951_s11 + $0x1b84] ss:$20 sps:$4 sm:$0xff]   ;;  %v14992_v29 = vld [vmem:[%s17951_s11 + $0x1b8c] ss:$20 sps:$4 sm:$0xff]  }
 0x565   : > { %9713 = vmatpush1.bf16.msra.mxu0 %v14926_v31  ;;  %10246 = vmatpush1.bf16.msra.mxu1 %v14929_v59  ;;  %v18826_v31 = vrot.slane %v18741_v48, %v18007_v34  ;;  %v14987_v59 = vld [vmem:[%s17951_s11 + $0x1b80] ss:$20 sps:$4 sm:$0xff]   ;;  %v14993_v48 = vld [vmem:[%s17951_s11 + $0x1ba8] ss:$20 sps:$4 sm:$0xff]  }
 0x566   : > { %9714 = vmatprep.subr.bf16.mxu0 %v14934_v33  ;;  %10247 = vmatprep.subr.bf16.mxu1 %v14937_v35  ;;  %v14990_v33 = vld [vmem:[%s17951_s11 + $0x1b88] ss:$20 sps:$4 sm:$0xff]   ;;  %v14995_v35 = vld [vmem:[%s17951_s11 + $0x1bac] ss:$20 sps:$4 sm:$0xff]  }
 0x569   : > { %9715 = vmatpush1.bf16.msra.mxu0 %v14932_v38  ;;  %10248 = vmatpush1.bf16.msra.mxu1 %v14935_v39  ;;  %v14998_v38 = vld [vmem:[%s17951_s11 + $0x1bb4] ss:$20 sps:$4 sm:$0xff]   ;;  %v18834_v39 = vcombine.high %v18758_v63, %v18758_v63 }
 0x56a   : > { %9716 = vmatprep.subr.bf16.mxu0 %v14940_v41  ;;  %10249 = vmatprep.subr.bf16.mxu1 %v14943_v42  ;;  %v14996_v41 = vld [vmem:[%s17951_s11 + $0x1bb0] ss:$20 sps:$4 sm:$0xff]   ;;  %v15001_v42 = vld [vmem:[%s17951_s11 + $0x1bd4] ss:$20 sps:$4 sm:$0xff]  }
 0x56d   : > { %9717 = vmatpush1.bf16.msra.mxu0 %v14938_v43  ;;  %10250 = vmatpush1.bf16.msra.mxu1 %v14941_v44  ;;  %v15004_v43 = vld [vmem:[%s17951_s11 + $0x1bdc] ss:$20 sps:$4 sm:$0xff]  }
 0x56e   : > { %9718 = vmatprep.subr.bf16.mxu0 %v14946_v46  ;;  %10251 = vmatprep.subr.bf16.mxu1 %v14949_v49  ;;  %v14999_v44 = vld [vmem:[%s17951_s11 + $0x1bd0] ss:$20 sps:$4 sm:$0xff]   ;;  %v15002_v46 = vld [vmem:[%s17951_s11 + $0x1bd8] ss:$20 sps:$4 sm:$0xff]  }
 0x56f   : > { %v15007_v49 = vld [vmem:[%s17951_s11 + $0x1bfc] ss:$20 sps:$4 sm:$0xff]  }
 0x571   : > { %9719 = vmatpush1.bf16.msra.mxu0 %v14944_v50  ;;  %10252 = vmatpush1.bf16.msra.mxu1 %v14947_v51  ;;  %v15010_v50 = vld [vmem:[%s17951_s11 + $0x1c04] ss:$20 sps:$4 sm:$0xff]  }
 0x572   : > { %9720 = vmatprep.subr.bf16.mxu0 %v14952_v53  ;;  %10253 = vmatprep.subr.bf16.mxu1 %v14955_v54  ;;  %v15005_v51 = vld [vmem:[%s17951_s11 + $0x1bf8] ss:$20 sps:$4 sm:$0xff]   ;;  %v15008_v53 = vld [vmem:[%s17951_s11 + $0x1c00] ss:$20 sps:$4 sm:$0xff]  }
 0x573   : > { %v15013_v54 = vld [vmem:[%s17951_s11 + $0x1c24] ss:$20 sps:$4 sm:$0xff]  }
 0x575   : > { %9721 = vmatpush1.bf16.msra.mxu0 %v14950_v56  ;;  %10254 = vmatpush1.bf16.msra.mxu1 %v14953_v58  ;;  %v15016_v56 = vld [vmem:[%s17951_s11 + $0x1c2c] ss:$20 sps:$4 sm:$0xff]  }
 0x576   : > { %9722 = vmatprep.subr.bf16.mxu0 %v14958_v60  ;;  %10255 = vmatprep.subr.bf16.mxu1 %v14961_v61  ;;  %v15011_v58 = vld [vmem:[%s17951_s11 + $0x1c20] ss:$20 sps:$4 sm:$0xff]   ;;  %v15014_v60 = vld [vmem:[%s17951_s11 + $0x1c28] ss:$20 sps:$4 sm:$0xff]  }
 0x577   : > { %v15019_v61 = vld [vmem:[%s17951_s11 + $0x1c4c] ss:$20 sps:$4 sm:$0xff]  }
 0x579   : > { %9723 = vmatpush1.bf16.msra.mxu0 %v14956_v0  ;;  %10256 = vmatpush1.bf16.msra.mxu1 %v14959_v3  ;;  %v15022_v0 = vld [vmem:[%s17951_s11 + $0x1c54] ss:$20 sps:$4 sm:$0xff]  }
 0x57a   : > { %9724 = vmatprep.subr.bf16.mxu0 %v14964_v4  ;;  %10257 = vmatprep.subr.bf16.mxu1 %v14967_v5  ;;  %v15017_v3 = vld [vmem:[%s17951_s11 + $0x1c48] ss:$20 sps:$4 sm:$0xff]   ;;  %v15020_v4 = vld [vmem:[%s17951_s11 + $0x1c50] ss:$20 sps:$4 sm:$0xff]  }
 0x57b   : > { %v15025_v5 = vld [vmem:[%s17951_s11 + $0x1c74] ss:$20 sps:$4 sm:$0xff]  }
 0x57d   : > { %9725 = vmatpush1.bf16.msra.mxu0 %v14962_v6  ;;  %10258 = vmatpush1.bf16.msra.mxu1 %v14965_v7  ;;  %v15028_v6 = vld [vmem:[%s17951_s11 + $0x1c7c] ss:$20 sps:$4 sm:$0xff]  }
 0x57e   : > { %9726 = vmatprep.subr.bf16.mxu0 %v14970_v10  ;;  %10259 = vmatprep.subr.bf16.mxu1 %v14973_v11  ;;  %v15023_v7 = vld [vmem:[%s17951_s11 + $0x1c70] ss:$20 sps:$4 sm:$0xff]   ;;  %v15026_v10 = vld [vmem:[%s17951_s11 + $0x1c78] ss:$20 sps:$4 sm:$0xff]  }
 0x57f   : > { %v15031_v11 = vld [vmem:[%s17951_s11 + $0x1c9c] ss:$20 sps:$4 sm:$0xff]  }
 0x581   : > { %9727 = vmatpush1.bf16.msra.mxu0 %v14968_v13  ;;  %10260 = vmatpush1.bf16.msra.mxu1 %v14971_v14  ;;  %v15034_v13 = vld [vmem:[%s17951_s11 + $0x1ca4] ss:$20 sps:$4 sm:$0xff]  }
 0x582   : > { %9728 = vmatprep.subr.bf16.mxu0 %v14976_v15  ;;  %10261 = vmatprep.subr.bf16.mxu1 %v14979_v16  ;;  %v15029_v14 = vld [vmem:[%s17951_s11 + $0x1c98] ss:$20 sps:$4 sm:$0xff]   ;;  %v15032_v15 = vld [vmem:[%s17951_s11 + $0x1ca0] ss:$20 sps:$4 sm:$0xff]  }
 0x583   : > { %v15037_v16 = vld [vmem:[%s17951_s11 + $0x1cc4] ss:$20 sps:$4 sm:$0xff]  }
 0x585   : > { %9729 = vmatpush1.bf16.msra.mxu0 %v14974_v20  ;;  %10262 = vmatpush1.bf16.msra.mxu1 %v14977_v21  ;;  %v15040_v20 = vld [vmem:[%s17951_s11 + $0x1ccc] ss:$20 sps:$4 sm:$0xff]  }
 0x586   : > { %9730 = vmatprep.subr.bf16.mxu0 %v14982_v1  ;;  %10263 = vmatprep.subr.bf16.mxu1 %v14985_v23  ;;  %v15035_v21 = vld [vmem:[%s17951_s11 + $0x1cc0] ss:$20 sps:$4 sm:$0xff]   ;;  %v15038_v1 = vld [vmem:[%s17951_s11 + $0x1cc8] ss:$20 sps:$4 sm:$0xff]  }
 0x587   : > { %v15043_v23 = vld [vmem:[%s17951_s11 + $0x1cec] ss:$20 sps:$4 sm:$0xff]  }
 0x589   : > { %9731 = vmatpush1.bf16.msra.mxu0 %v14980_v40  ;;  %10264 = vmatpush1.bf16.msra.mxu1 %v14983_v26  ;;  %v15046_v40 = vld [vmem:[%s17951_s11 + $0x1cf4] ss:$20 sps:$4 sm:$0xff]  }
 0x58a   : > { %9741 = vmatprep.subr.bf16.mxu0 %v14989_v27  ;;  %10274 = vmatprep.subr.bf16.mxu1 %v14992_v29  ;;  %v15041_v26 = vld [vmem:[%s17951_s11 + $0x1ce8] ss:$20 sps:$4 sm:$0xff]   ;;  %v15044_v27 = vld [vmem:[%s17951_s11 + $0x1cf0] ss:$20 sps:$4 sm:$0xff]  }
 0x58b   : > { %v15049_v29 = vld [vmem:[%s17951_s11 + $0x1d14] ss:$20 sps:$4 sm:$0xff]  }
 0x58c   : > { %9733 = vmatmul.mubr.bf16.vlgmr.msra.gmra.mrb[0].mxu0 %v18826_v31  ;;  %10266 = vmatmul.mubr.bf16.vlgmr.msra.gmra.mrb[0].mxu1 %v18826_v31 }
 0x58d   : > { %9742 = vmatpush1.bf16.msra.mxu0 %v14987_v59  ;;  %10275 = vmatpush1.bf16.msra.mxu1 %v14990_v33  ;;  %v15052_v59 = vld [vmem:[%s17951_s11 + $0x1d1c] ss:$20 sps:$4 sm:$0xff]  }
 0x58e   : > { %9743 = vmatprep.subr.bf16.mxu0 %v14995_v35  ;;  %10276 = vmatprep.subr.bf16.mxu1 %v14998_v38  ;;  %v15047_v33 = vld [vmem:[%s17951_s11 + $0x1d10] ss:$20 sps:$4 sm:$0xff]   ;;  %v15050_v35 = vld [vmem:[%s17951_s11 + $0x1d18] ss:$20 sps:$4 sm:$0xff]  }
 0x58f   : > { %9773 = vmatprep.mubr.bf16.mxu0 %v18834_v39  ;;  %10306 = vmatprep.mubr.bf16.mxu1 %v18834_v39  ;;  %v15055_v38 = vld [vmem:[%s17951_s11 + $0x1d3c] ss:$20 sps:$4 sm:$0xff]  }
 0x591   : > { %9744 = vmatpush1.bf16.msra.mxu0 %v14993_v48  ;;  %10277 = vmatpush1.bf16.msra.mxu1 %v14996_v41  ;;  %v15058_v48 = vld [vmem:[%s17951_s11 + $0x1d44] ss:$20 sps:$4 sm:$0xff]  }
 0x592   : > { %9745 = vmatprep.subr.bf16.mxu0 %v15001_v42  ;;  %10278 = vmatprep.subr.bf16.mxu1 %v15004_v43  ;;  %v15053_v41 = vld [vmem:[%s17951_s11 + $0x1d38] ss:$20 sps:$4 sm:$0xff]   ;;  %v15056_v42 = vld [vmem:[%s17951_s11 + $0x1d40] ss:$20 sps:$4 sm:$0xff]  }
 0x593   : > { %v15061_v43 = vld [vmem:[%s17951_s11 + $0x1d64] ss:$20 sps:$4 sm:$0xff]  }
 0x595   : > { %9746 = vmatpush1.bf16.msra.mxu0 %v14999_v44  ;;  %10279 = vmatpush1.bf16.msra.mxu1 %v15002_v46  ;;  %v15064_v44 = vld [vmem:[%s17951_s11 + $0x1d6c] ss:$20 sps:$4 sm:$0xff]  }
 0x596   : > { %9747 = vmatprep.subr.bf16.mxu0 %v15007_v49  ;;  %10280 = vmatprep.subr.bf16.mxu1 %v15010_v50  ;;  %v15059_v46 = vld [vmem:[%s17951_s11 + $0x1d60] ss:$20 sps:$4 sm:$0xff]   ;;  %v15062_v49 = vld [vmem:[%s17951_s11 + $0x1d68] ss:$20 sps:$4 sm:$0xff]  }
 0x597   : > { %v15067_v50 = vld [vmem:[%s17951_s11 + $0x1d8c] ss:$20 sps:$4 sm:$0xff]  }
 0x599   : > { %9748 = vmatpush1.bf16.msra.mxu0 %v15005_v51  ;;  %10281 = vmatpush1.bf16.msra.mxu1 %v15008_v53  ;;  %v15070_v51 = vld [vmem:[%s17951_s11 + $0x1d94] ss:$20 sps:$4 sm:$0xff]  }
 0x59a   : > { %9749 = vmatprep.subr.bf16.mxu0 %v15013_v54  ;;  %10282 = vmatprep.subr.bf16.mxu1 %v15016_v56  ;;  %v15065_v53 = vld [vmem:[%s17951_s11 + $0x1d88] ss:$20 sps:$4 sm:$0xff]   ;;  %v15068_v54 = vld [vmem:[%s17951_s11 + $0x1d90] ss:$20 sps:$4 sm:$0xff]  }
 0x59b   : > { %v15073_v56 = vld [vmem:[%s17951_s11 + $0x1db4] ss:$20 sps:$4 sm:$0xff]  }
 0x59d   : > { %9750 = vmatpush1.bf16.msra.mxu0 %v15011_v58  ;;  %10283 = vmatpush1.bf16.msra.mxu1 %v15014_v60  ;;  %v15076_v58 = vld [vmem:[%s17951_s11 + $0x1dbc] ss:$20 sps:$4 sm:$0xff]  }
 0x59e   : > { %9751 = vmatprep.subr.bf16.mxu0 %v15019_v61  ;;  %10284 = vmatprep.subr.bf16.mxu1 %v15022_v0  ;;  %v15071_v60 = vld [vmem:[%s17951_s11 + $0x1db0] ss:$20 sps:$4 sm:$0xff]   ;;  %v15074_v61 = vld [vmem:[%s17951_s11 + $0x1db8] ss:$20 sps:$4 sm:$0xff]  }
 0x59f   : > { %v15079_v0 = vld [vmem:[%s17951_s11 + $0x1ddc] ss:$20 sps:$4 sm:$0xff]  }
 0x5a1   : > { %9752 = vmatpush1.bf16.msra.mxu0 %v15017_v3  ;;  %10285 = vmatpush1.bf16.msra.mxu1 %v15020_v4  ;;  %v15082_v3 = vld [vmem:[%s17951_s11 + $0x1de4] ss:$20 sps:$4 sm:$0xff]  }
 0x5a2   : > { %9753 = vmatprep.subr.bf16.mxu0 %v15025_v5  ;;  %10286 = vmatprep.subr.bf16.mxu1 %v15028_v6  ;;  %v15077_v4 = vld [vmem:[%s17951_s11 + $0x1dd8] ss:$20 sps:$4 sm:$0xff]   ;;  %v15080_v5 = vld [vmem:[%s17951_s11 + $0x1de0] ss:$20 sps:$4 sm:$0xff]  }
 0x5a3   : > { %v15085_v6 = vld [vmem:[%s17951_s11 + $0x1e04] ss:$20 sps:$4 sm:$0xff]  }
 0x5a5   : > { %9754 = vmatpush1.bf16.msra.mxu0 %v15023_v7  ;;  %10287 = vmatpush1.bf16.msra.mxu1 %v15026_v10  ;;  %v15088_v7 = vld [vmem:[%s17951_s11 + $0x1e0c] ss:$20 sps:$4 sm:$0xff]   ;;  %v18902_v10 = vcombine.high %v18826_v31, %v18826_v31 }
 0x5a6   : > { %9755 = vmatprep.subr.bf16.mxu0 %v15031_v11  ;;  %10288 = vmatprep.subr.bf16.mxu1 %v15034_v13  ;;  %v15083_v11 = vld [vmem:[%s17951_s11 + $0x1e00] ss:$20 sps:$4 sm:$0xff]   ;;  %v15086_v13 = vld [vmem:[%s17951_s11 + $0x1e08] ss:$20 sps:$4 sm:$0xff]  }
 0x5a9   : > { %9756 = vmatpush1.bf16.msra.mxu0 %v15029_v14  ;;  %10289 = vmatpush1.bf16.msra.mxu1 %v15032_v15  ;;  %v15091_v14 = vld [vmem:[%s17951_s11 + $0x1e2c] ss:$20 sps:$4 sm:$0xff]   ;;  %v15094_v15 = vld [vmem:[%s17951_s11 + $0x1e34] ss:$20 sps:$4 sm:$0xff]  }
 0x5aa   : > { %9757 = vmatprep.subr.bf16.mxu0 %v15037_v16  ;;  %10290 = vmatprep.subr.bf16.mxu1 %v15040_v20  ;;  %v15089_v16 = vld [vmem:[%s17951_s11 + $0x1e28] ss:$20 sps:$4 sm:$0xff]   ;;  %v15092_v20 = vld [vmem:[%s17951_s11 + $0x1e30] ss:$20 sps:$4 sm:$0xff]  }
 0x5ad   : > { %9758 = vmatpush1.bf16.msra.mxu0 %v15035_v21  ;;  %10291 = vmatpush1.bf16.msra.mxu1 %v15038_v1  ;;  %v15097_v21 = vld [vmem:[%s17951_s11 + $0x1e54] ss:$20 sps:$4 sm:$0xff]   ;;  %v15100_v1 = vld [vmem:[%s17951_s11 + $0x1e5c] ss:$20 sps:$4 sm:$0xff]  }
 0x5ae   : > { %9759 = vmatprep.subr.bf16.mxu0 %v15043_v23  ;;  %10292 = vmatprep.subr.bf16.mxu1 %v15046_v40  ;;  %v15433_v23 = vmov 0   ;;  %v15095_v40 = vld [vmem:[%s17951_s11 + $0x1e50] ss:$20 sps:$4 sm:$0xff]  }
 0x5b1   : > { %9760 = vmatpush1.bf16.msra.mxu0 %v15041_v26  ;;  %10293 = vmatpush1.bf16.msra.mxu1 %v15044_v27  ;;  %v15098_v26 = vld [vmem:[%s17951_s11 + $0x1e58] ss:$20 sps:$4 sm:$0xff]   ;;  %v15103_v27 = vld [vmem:[%s17951_s11 + $0x1e7c] ss:$20 sps:$4 sm:$0xff]  }
 0x5b2   : > { %9761 = vmatprep.subr.bf16.mxu0 %v15049_v29  ;;  %10294 = vmatprep.subr.bf16.mxu1 %v15052_v59  ;;  %v15106_v29 = vld [vmem:[%s17951_s11 + $0x1e84] ss:$20 sps:$4 sm:$0xff]  }
 0x5b3   : > { %v15101_v59 = vld [vmem:[%s17951_s11 + $0x1e78] ss:$20 sps:$4 sm:$0xff]  }
 0x5b5   : > { %9762 = vmatpush1.bf16.msra.mxu0 %v15047_v33  ;;  %10295 = vmatpush1.bf16.msra.mxu1 %v15050_v35  ;;  %v15104_v33 = vld [vmem:[%s17951_s11 + $0x1e80] ss:$20 sps:$4 sm:$0xff]   ;;  %v15109_v35 = vld [vmem:[%s17951_s11 + $0x1ea4] ss:$20 sps:$4 sm:$0xff]  }
 0x5b6   : > { %9763 = vmatprep.subr.bf16.mxu0 %v15055_v38  ;;  %10296 = vmatprep.subr.bf16.mxu1 %v15058_v48  ;;  %v15112_v38 = vld [vmem:[%s17951_s11 + $0x1eac] ss:$20 sps:$4 sm:$0xff]  }
 0x5b7   : > { %v15107_v48 = vld [vmem:[%s17951_s11 + $0x1ea0] ss:$20 sps:$4 sm:$0xff]  }
 0x5b9   : > { %9764 = vmatpush1.bf16.msra.mxu0 %v15053_v41  ;;  %10297 = vmatpush1.bf16.msra.mxu1 %v15056_v42  ;;  %v15110_v41 = vld [vmem:[%s17951_s11 + $0x1ea8] ss:$20 sps:$4 sm:$0xff]   ;;  %v15115_v42 = vld [vmem:[%s17951_s11 + $0x1ecc] ss:$20 sps:$4 sm:$0xff]  }
 0x5ba   : > { %9765 = vmatprep.subr.bf16.mxu0 %v15061_v43  ;;  %10298 = vmatprep.subr.bf16.mxu1 %v15064_v44  ;;  %v15118_v43 = vld [vmem:[%s17951_s11 + $0x1ed4] ss:$20 sps:$4 sm:$0xff]  }
 0x5bb   : > { %v15113_v44 = vld [vmem:[%s17951_s11 + $0x1ec8] ss:$20 sps:$4 sm:$0xff]  }
 0x5bd   : > { %9766 = vmatpush1.bf16.msra.mxu0 %v15059_v46  ;;  %10299 = vmatpush1.bf16.msra.mxu1 %v15062_v49  ;;  %v15116_v46 = vld [vmem:[%s17951_s11 + $0x1ed0] ss:$20 sps:$4 sm:$0xff]   ;;  %v15121_v49 = vld [vmem:[%s17951_s11 + $0x1ef4] ss:$20 sps:$4 sm:$0xff]  }
 0x5be   : > { %9767 = vmatprep.subr.bf16.mxu0 %v15067_v50  ;;  %10300 = vmatprep.subr.bf16.mxu1 %v15070_v51  ;;  %v15124_v50 = vld [vmem:[%s17951_s11 + $0x1efc] ss:$20 sps:$4 sm:$0xff]  }
 0x5bf   : > { %v15119_v51 = vld [vmem:[%s17951_s11 + $0x1ef0] ss:$20 sps:$4 sm:$0xff]  }
 0x5c1   : > { %9768 = vmatpush1.bf16.msra.mxu0 %v15065_v53  ;;  %10301 = vmatpush1.bf16.msra.mxu1 %v15068_v54  ;;  %v15122_v53 = vld [vmem:[%s17951_s11 + $0x1ef8] ss:$20 sps:$4 sm:$0xff]   ;;  %v15127_v54 = vld [vmem:[%s17951_s11 + $0x1f1c] ss:$20 sps:$4 sm:$0xff]  }
 0x5c2   : > { %9769 = vmatprep.subr.bf16.mxu0 %v15073_v56  ;;  %10302 = vmatprep.subr.bf16.mxu1 %v15076_v58  ;;  %v15130_v56 = vld [vmem:[%s17951_s11 + $0x1f24] ss:$20 sps:$4 sm:$0xff]  }
 0x5c3   : > { %v15125_v58 = vld [vmem:[%s17951_s11 + $0x1f18] ss:$20 sps:$4 sm:$0xff]  }
 0x5c5   : > { %9770 = vmatpush1.bf16.msra.mxu0 %v15071_v60  ;;  %10303 = vmatpush1.bf16.msra.mxu1 %v15074_v61  ;;  %v15128_v60 = vld [vmem:[%s17951_s11 + $0x1f20] ss:$20 sps:$4 sm:$0xff]   ;;  %v12354_v61 = vld.sshfl [vmem:[%s18004_s25 + $0x18] sm:$0x1 pattern:$0x75316420] }
 0x5c6   : > { %9771 = vmatprep.subr.bf16.mxu0 %v15079_v0  ;;  %10304 = vmatprep.subr.bf16.mxu1 %v15082_v3  ;;  %v15131_v0 = vld [vmem:[%s17951_s11 + $0x150] ss:$20 sps:$4 sm:$0xff]  }
 0x5c7   : > { %v15132_v3 = vld [vmem:[%s17951_s11 + $0x3d0] ss:$20 sps:$4 sm:$0xff]  }
 0x5c9   : > { %9772 = vmatpush1.bf16.msra.mxu0 %v15077_v4  ;;  %10305 = vmatpush1.bf16.msra.mxu1 %v15080_v5  ;;  %v18940_v4 = vrot.slane %v12354_v61, %v18007_v34  ;;  %v15133_v5 = vld [vmem:[%s17951_s11 + $0x10] ss:$20 sps:$4 sm:$0xff]   ;;  %v15137_v34 = vld [vmem:[%s17951_s11 + $0x38] ss:$20 sps:$4 sm:$0xff]  }
 0x5ca   : > { %9782 = vmatprep.subr.bf16.mxu0 %v15085_v6  ;;  %10315 = vmatprep.subr.bf16.mxu1 %v15088_v7  ;;  %v15134_v6 = vld [vmem:[%s17951_s11 + $0x290] ss:$20 sps:$4 sm:$0xff]   ;;  %v15135_v7 = vld [vmem:[%s17951_s11 + $0x178] ss:$20 sps:$4 sm:$0xff]  }
 0x5cb   : > { %v15170_v61 = vld [vmem:[%s17951_s11 + $0x7b8] ss:$20 sps:$4 sm:$0xff]  }
 0x5cc   : > { %9774 = vmatmul.mubr.bf16.vlgmr.msra.gmra.mrb[0].mxu0 %v18902_v10  ;;  %10307 = vmatmul.mubr.bf16.vlgmr.msra.gmra.mrb[0].mxu1 %v18902_v10 }
 0x5cd   : > { %9783 = vmatpush1.bf16.msra.mxu0 %v15083_v11  ;;  %10316 = vmatpush1.bf16.msra.mxu1 %v15086_v13  ;;  %v15136_v11 = vld [vmem:[%s17951_s11 + $0x3f8] ss:$20 sps:$4 sm:$0xff]  }
 0x5ce   : > { %9784 = vmatprep.subr.bf16.mxu0 %v15091_v14  ;;  %10317 = vmatprep.subr.bf16.mxu1 %v15094_v15  ;;  %v15138_v13 = vld [vmem:[%s17951_s11 + $0x2b8] ss:$20 sps:$4 sm:$0xff]   ;;  %v15139_v14 = vld [vmem:[%s17951_s11 + $0x1a0] ss:$20 sps:$4 sm:$0xff]  }
 0x5cf   : > { %9814 = vmatprep.mubr.bf16.mxu0 %v15433_v23  ;;  %10347 = vmatprep.mubr.bf16.mxu1 %v15433_v23  ;;  %v15140_v15 = vld [vmem:[%s17951_s11 + $0x420] ss:$20 sps:$4 sm:$0xff]   ;;  %v15145_v23 = vld [vmem:[%s17951_s11 + $0x88] ss:$20 sps:$4 sm:$0xff]  }
 0x5d1   : > { %9785 = vmatpush1.bf16.msra.mxu0 %v15089_v16  ;;  %10318 = vmatpush1.bf16.msra.mxu1 %v15092_v20  ;;  %v15141_v16 = vld [vmem:[%s17951_s11 + $0x60] ss:$20 sps:$4 sm:$0xff]  }
 0x5d2   : > { %9786 = vmatprep.subr.bf16.mxu0 %v15097_v21  ;;  %10319 = vmatprep.subr.bf16.mxu1 %v15100_v1  ;;  %v15142_v20 = vld [vmem:[%s17951_s11 + $0x2e0] ss:$20 sps:$4 sm:$0xff]   ;;  %v15143_v21 = vld [vmem:[%s17951_s11 + $0x1c8] ss:$20 sps:$4 sm:$0xff]  }
 0x5d3   : > { %v15144_v1 = vld [vmem:[%s17951_s11 + $0x448] ss:$20 sps:$4 sm:$0xff]  }
 0x5d5   : > { %9787 = vmatpush1.bf16.msra.mxu0 %v15095_v40  ;;  %10320 = vmatpush1.bf16.msra.mxu1 %v15098_v26  ;;  %v15148_v40 = vld [vmem:[%s17951_s11 + $0x470] ss:$20 sps:$4 sm:$0xff]  }
 0x5d6   : > { %9788 = vmatprep.subr.bf16.mxu0 %v15103_v27  ;;  %10321 = vmatprep.subr.bf16.mxu1 %v15106_v29  ;;  %v15149_v26 = vld [vmem:[%s17951_s11 + $0xb0] ss:$20 sps:$4 sm:$0xff]   ;;  %v15151_v29 = vld [vmem:[%s17951_s11 + $0x218] ss:$20 sps:$4 sm:$0xff]  }
 0x5d7   : > { %v15150_v27 = vld [vmem:[%s17951_s11 + $0x330] ss:$20 sps:$4 sm:$0xff]  }
 0x5d9   : > { %9789 = vmatpush1.bf16.msra.mxu0 %v15101_v59  ;;  %10322 = vmatpush1.bf16.msra.mxu1 %v15104_v33  ;;  %v15152_v59 = vld [vmem:[%s17951_s11 + $0x498] ss:$20 sps:$4 sm:$0xff]  }
 0x5da   : > { %9790 = vmatprep.subr.bf16.mxu0 %v15109_v35  ;;  %10323 = vmatprep.subr.bf16.mxu1 %v15112_v38  ;;  %v15153_v33 = vld [vmem:[%s17951_s11 + $0xd8] ss:$20 sps:$4 sm:$0xff]   ;;  %v15155_v38 = vld [vmem:[%s17951_s11 + $0x240] ss:$20 sps:$4 sm:$0xff]  }
 0x5db   : > { %v15154_v35 = vld [vmem:[%s17951_s11 + $0x358] ss:$20 sps:$4 sm:$0xff]  }
 0x5dd   : > { %9791 = vmatpush1.bf16.msra.mxu0 %v15107_v48  ;;  %10324 = vmatpush1.bf16.msra.mxu1 %v15110_v41  ;;  %v15156_v48 = vld [vmem:[%s17951_s11 + $0x4c0] ss:$20 sps:$4 sm:$0xff]  }
 0x5de   : > { %9792 = vmatprep.subr.bf16.mxu0 %v15115_v42  ;;  %10325 = vmatprep.subr.bf16.mxu1 %v15118_v43  ;;  %v15157_v41 = vld [vmem:[%s17951_s11 + $0x100] ss:$20 sps:$4 sm:$0xff]   ;;  %v15159_v43 = vld [vmem:[%s17951_s11 + $0x268] ss:$20 sps:$4 sm:$0xff]  }
 0x5df   : > { %v15158_v42 = vld [vmem:[%s17951_s11 + $0x380] ss:$20 sps:$4 sm:$0xff]  }
 0x5e1   : > { %9793 = vmatpush1.bf16.msra.mxu0 %v15113_v44  ;;  %10326 = vmatpush1.bf16.msra.mxu1 %v15116_v46  ;;  %v15160_v44 = vld [vmem:[%s17951_s11 + $0x4e8] ss:$20 sps:$4 sm:$0xff]  }
 0x5e2   : > { %9794 = vmatprep.subr.bf16.mxu0 %v15121_v49  ;;  %10327 = vmatprep.subr.bf16.mxu1 %v15124_v50  ;;  %v15161_v46 = vld [vmem:[%s17951_s11 + $0x128] ss:$20 sps:$4 sm:$0xff]   ;;  %v15163_v50 = vld [vmem:[%s17951_s11 + $0x650] ss:$20 sps:$4 sm:$0xff]  }
 0x5e3   : > { %v15162_v49 = vld [vmem:[%s17951_s11 + $0x3a8] ss:$20 sps:$4 sm:$0xff]  }
 0x5e5   : > { %9795 = vmatpush1.bf16.msra.mxu0 %v15119_v51  ;;  %10328 = vmatpush1.bf16.msra.mxu1 %v15122_v53  ;;  %v15165_v51 = vld [vmem:[%s17951_s11 + $0x8d0] ss:$20 sps:$4 sm:$0xff]  }
 0x5e6   : > { %9796 = vmatprep.subr.bf16.mxu0 %v15127_v54  ;;  %10329 = vmatprep.subr.bf16.mxu1 %v15130_v56  ;;  %v15164_v53 = vld [vmem:[%s17951_s11 + $0x510] ss:$20 sps:$4 sm:$0xff]   ;;  %v15167_v56 = vld [vmem:[%s17951_s11 + $0x678] ss:$20 sps:$4 sm:$0xff]  }
 0x5e7   : > { %v15166_v54 = vld [vmem:[%s17951_s11 + $0x790] ss:$20 sps:$4 sm:$0xff]  }
 0x5e9   : > { %9797 = vmatpush1.bf16.msra.mxu0 %v15125_v58  ;;  %10330 = vmatpush1.bf16.msra.mxu1 %v15128_v60  ;;  %v15169_v58 = vld [vmem:[%s17951_s11 + $0x8f8] ss:$20 sps:$4 sm:$0xff]  }
 0x5ea   : > { %13398 = vmatprep.subr.bf16.mxu0 %v15131_v0  ;;  %13420 = vmatprep.subr.bf16.mxu1 %v15132_v3  ;;  %v15168_v60 = vld [vmem:[%s17951_s11 + $0x538] ss:$20 sps:$4 sm:$0xff]   ;;  %v15171_v0 = vld [vmem:[%s17951_s11 + $0x6a0] ss:$20 sps:$4 sm:$0xff]  }
 0x5eb   : > { %v15173_v3 = vld [vmem:[%s17951_s11 + $0x920] ss:$20 sps:$4 sm:$0xff]  }
 0x5ec   : > { %9815 = vmatmul.mubr.bf16.vlgmr.msra.gmra.mrb[0].mxu0 %v18940_v4  ;;  %10348 = vmatmul.mubr.bf16.vlgmr.msra.gmra.mrb[0].mxu1 %v18940_v4 }
 0x5ed   : > { %13399 = vmatpush3.bf16.msra.mxu0 %v15133_v5  ;;  %13421 = vmatpush3.bf16.msra.mxu1 %v15134_v6  ;;  %v15175_v5 = vld [vmem:[%s17951_s11 + $0x6c8] ss:$20 sps:$4 sm:$0xff]  }
 0x5ee   : > { %13400 = vmatprep.subr.bf16.mxu0 %v15135_v7  ;;  %13422 = vmatprep.subr.bf16.mxu1 %v15136_v11  ;;  %v15177_v6 = vld [vmem:[%s17951_s11 + $0x948] ss:$20 sps:$4 sm:$0xff]   ;;  %v15181_v11 = vld [vmem:[%s17951_s11 + $0x970] ss:$20 sps:$4 sm:$0xff]  }
 0x5ef   : > { %10388 = vmatprep.mubr.bf16.mxu0 %v18022_v45  ;;  %10428 = vmatprep.mubr.bf16.mxu1 %v18050_v2  ;;  %v15146_v45 = vld [vmem:[%s17951_s11 + $0x308] ss:$20 sps:$4 sm:$0xff]   ;;  %v15147_v2 = vld [vmem:[%s17951_s11 + $0x1f0] ss:$20 sps:$4 sm:$0xff]  }
 0x5f0   : > { %v15176_v7 = vld [vmem:[%s17951_s11 + $0x588] ss:$20 sps:$4 sm:$0xff]  }
 0x5f1   : > { %13401 = vmatpush3.bf16.msra.mxu0 %v15137_v34  ;;  %13423 = vmatpush3.bf16.msra.mxu1 %v15138_v13  ;;  %v15180_v34 = vld [vmem:[%s17951_s11 + $0x5b0] ss:$20 sps:$4 sm:$0xff]  }
 0x5f2   : > { %13402 = vmatprep.subr.bf16.mxu0 %v15139_v14  ;;  %13424 = vmatprep.subr.bf16.mxu1 %v15140_v15  ;;  %v15182_v13 = vld [vmem:[%s17951_s11 + $0x830] ss:$20 sps:$4 sm:$0xff]   ;;  %v15183_v14 = vld [vmem:[%s17951_s11 + $0x718] ss:$20 sps:$4 sm:$0xff]  }
 0x5f3   : > { %v15185_v15 = vld [vmem:[%s17951_s11 + $0x998] ss:$20 sps:$4 sm:$0xff]  }
 0x5f5   : > { %13403 = vmatpush3.bf16.msra.mxu0 %v15141_v16  ;;  %13425 = vmatpush3.bf16.msra.mxu1 %v15142_v20  ;;  %v15184_v16 = vld [vmem:[%s17951_s11 + $0x5d8] ss:$20 sps:$4 sm:$0xff]  }
 0x5f6   : > { %13404 = vmatprep.subr.bf16.mxu0 %v15143_v21  ;;  %13426 = vmatprep.subr.bf16.mxu1 %v15144_v1  ;;  %v15186_v20 = vld [vmem:[%s17951_s11 + $0x858] ss:$20 sps:$4 sm:$0xff]   ;;  %v15187_v21 = vld [vmem:[%s17951_s11 + $0x740] ss:$20 sps:$4 sm:$0xff]  }
 0x5f7   : > { %v15189_v1 = vld [vmem:[%s17951_s11 + $0x9c0] ss:$20 sps:$4 sm:$0xff]  }
 0x5f9   : > { %13405 = vmatpush3.bf16.msra.mxu0 %v15145_v23  ;;  %13427 = vmatpush3.bf16.msra.mxu1 %v15146_v45  ;;  %v15188_v23 = vld [vmem:[%s17951_s11 + $0x600] ss:$20 sps:$4 sm:$0xff]  }
 0x5fa   : > { %13406 = vmatprep.subr.bf16.mxu0 %v15147_v2  ;;  %13428 = vmatprep.subr.bf16.mxu1 %v15148_v40  ;;  %v15190_v45 = vld [vmem:[%s17951_s11 + $0x880] ss:$20 sps:$4 sm:$0xff]   ;;  %v15191_v2 = vld [vmem:[%s17951_s11 + $0x768] ss:$20 sps:$4 sm:$0xff]  }
 0x5fb   : > { %v15193_v40 = vld [vmem:[%s17951_s11 + $0x9e8] ss:$20 sps:$4 sm:$0xff]  }
 0x5fd   : > { %13407 = vmatpush3.bf16.msra.mxu0 %v15149_v26  ;;  %13429 = vmatpush3.bf16.msra.mxu1 %v15150_v27  ;;  %v15192_v26 = vld [vmem:[%s17951_s11 + $0x628] ss:$20 sps:$4 sm:$0xff]  }
 0x5fe   : > { %13408 = vmatprep.subr.bf16.mxu0 %v15151_v29  ;;  %13430 = vmatprep.subr.bf16.mxu1 %v15152_v59  ;;  %v15194_v27 = vld [vmem:[%s17951_s11 + $0x8a8] ss:$20 sps:$4 sm:$0xff]   ;;  %v15195_v29 = vld [vmem:[%s17951_s11 + $0xb50] ss:$20 sps:$4 sm:$0xff]  }
 0x5ff   : > { %v15197_v59 = vld [vmem:[%s17951_s11 + $0xdd0] ss:$20 sps:$4 sm:$0xff]  }
 0x601   : > { %13409 = vmatpush3.bf16.msra.mxu0 %v15153_v33  ;;  %13431 = vmatpush3.bf16.msra.mxu1 %v15154_v35  ;;  %v15196_v33 = vld [vmem:[%s17951_s11 + $0xa10] ss:$20 sps:$4 sm:$0xff]  }
 0x602   : > { %13410 = vmatprep.subr.bf16.mxu0 %v15155_v38  ;;  %13432 = vmatprep.subr.bf16.mxu1 %v15156_v48  ;;  %v15198_v35 = vld [vmem:[%s17951_s11 + $0xc90] ss:$20 sps:$4 sm:$0xff]   ;;  %v15199_v38 = vld [vmem:[%s17951_s11 + $0xb78] ss:$20 sps:$4 sm:$0xff]  }
 0x603   : > { %v15201_v48 = vld [vmem:[%s17951_s11 + $0xdf8] ss:$20 sps:$4 sm:$0xff]  }
 0x605   : > { %13411 = vmatpush3.bf16.msra.mxu0 %v15157_v41  ;;  %13433 = vmatpush3.bf16.msra.mxu1 %v15158_v42  ;;  %v15200_v41 = vld [vmem:[%s17951_s11 + $0xa38] ss:$20 sps:$4 sm:$0xff]  }
 0x606   : > { %13412 = vmatprep.subr.bf16.mxu0 %v15159_v43  ;;  %13434 = vmatprep.subr.bf16.mxu1 %v15160_v44  ;;  %v15202_v42 = vld [vmem:[%s17951_s11 + $0xcb8] ss:$20 sps:$4 sm:$0xff]   ;;  %v15203_v43 = vld [vmem:[%s17951_s11 + $0xba0] ss:$20 sps:$4 sm:$0xff]  }
 0x607   : > { %v15205_v44 = vld [vmem:[%s17951_s11 + $0xe20] ss:$20 sps:$4 sm:$0xff]  }
 0x609   : > { %13413 = vmatpush3.bf16.msra.mxu0 %v15161_v46  ;;  %13435 = vmatpush3.bf16.msra.mxu1 %v15162_v49  ;;  %v15207_v46 = vld [vmem:[%s17951_s11 + $0xbc8] ss:$20 sps:$4 sm:$0xff]  }
 0x60a   : > { %13442 = vmatprep.subr.bf16.mxu0 %v15163_v50  ;;  %13464 = vmatprep.subr.bf16.mxu1 %v15165_v51  ;;  %v15209_v49 = vld [vmem:[%s17951_s11 + $0xe48] ss:$20 sps:$4 sm:$0xff]   ;;  %v15213_v51 = vld [vmem:[%s17951_s11 + $0xe70] ss:$20 sps:$4 sm:$0xff]  }
 0x60b   : > { %v15208_v50 = vld [vmem:[%s17951_s11 + $0xa88] ss:$20 sps:$4 sm:$0xff]  }
 0x60c   : > { %10389 = vmatmul.mubr.bf16.vlgmr.msra.gmra.mrb[4].mxu0 %v18043_v62  ;;  %10429 = vmatmul.mubr.bf16.vlgmr.msra.gmra.mrb[4].mxu1 %v18126_v8  ;;  %v15172_v62 = vld [vmem:[%s17951_s11 + $0x560] ss:$20 sps:$4 sm:$0xff]  }
 0x60d   : > { %13443 = vmatpush3.bf16.msra.mxu0 %v15164_v53  ;;  %13465 = vmatpush3.bf16.msra.mxu1 %v15166_v54  ;;  %v15174_v8 = vld [vmem:[%s17951_s11 + $0x7e0] ss:$20 sps:$4 sm:$0xff]   ;;  %v15212_v53 = vld [vmem:[%s17951_s11 + $0xab0] ss:$20 sps:$4 sm:$0xff]  }
 0x60e   : > { %13444 = vmatprep.subr.bf16.mxu0 %v15167_v56  ;;  %13466 = vmatprep.subr.bf16.mxu1 %v15169_v58  ;;  %v15214_v54 = vld [vmem:[%s17951_s11 + $0xd30] ss:$20 sps:$4 sm:$0xff]   ;;  %v15215_v56 = vld [vmem:[%s17951_s11 + $0xc18] ss:$20 sps:$4 sm:$0xff]  }
 0x60f   : > { %10468 = vmatprep.mubr.bf16.mxu0 %v18132_v12  ;;  %10508 = vmatprep.mubr.bf16.mxu1 %v18208_v22  ;;  %v15178_v12 = vld [vmem:[%s17951_s11 + $0x808] ss:$20 sps:$4 sm:$0xff]   ;;  %v15179_v22 = vld [vmem:[%s17951_s11 + $0x6f0] ss:$20 sps:$4 sm:$0xff]   ;;  %v15217_v58 = vld [vmem:[%s17951_s11 + $0xe98] ss:$20 sps:$4 sm:$0xff]  }
 0x611   : > { %13445 = vmatpush3.bf16.msra.mxu0 %v15168_v60  ;;  %13467 = vmatpush3.bf16.msra.mxu1 %v15170_v61  ;;  %v15216_v60 = vld [vmem:[%s17951_s11 + $0xad8] ss:$20 sps:$4 sm:$0xff]  }
 0x612   : > { %13446 = vmatprep.subr.bf16.mxu0 %v15171_v0  ;;  %13468 = vmatprep.subr.bf16.mxu1 %v15173_v3  ;;  %v15218_v61 = vld [vmem:[%s17951_s11 + $0xd58] ss:$20 sps:$4 sm:$0xff]   ;;  %v15219_v0 = vld [vmem:[%s17951_s11 + $0xc40] ss:$20 sps:$4 sm:$0xff]  }
 0x613   : > { %v15221_v3 = vld [vmem:[%s17951_s11 + $0xec0] ss:$20 sps:$4 sm:$0xff]  }
 0x615   : > { %13447 = vmatpush3.bf16.msra.mxu0 %v15172_v62  ;;  %13469 = vmatpush3.bf16.msra.mxu1 %v15174_v8  ;;  %v15220_v62 = vld [vmem:[%s17951_s11 + $0xb00] ss:$20 sps:$4 sm:$0xff]  }
 0x616   : > { %13448 = vmatprep.subr.bf16.mxu0 %v15175_v5  ;;  %13470 = vmatprep.subr.bf16.mxu1 %v15177_v6  ;;  %v15222_v8 = vld [vmem:[%s17951_s11 + $0xd80] ss:$20 sps:$4 sm:$0xff]   ;;  %v15223_v5 = vld [vmem:[%s17951_s11 + $0xc68] ss:$20 sps:$4 sm:$0xff]  }
 0x617   : > { %v15225_v6 = vld [vmem:[%s17951_s11 + $0xee8] ss:$20 sps:$4 sm:$0xff]  }
 0x619   : > { %13449 = vmatpush3.bf16.msra.mxu0 %v15176_v7  ;;  %13471 = vmatpush3.bf16.msra.mxu1 %v15178_v12  ;;  %v15224_v7 = vld [vmem:[%s17951_s11 + $0xb28] ss:$20 sps:$4 sm:$0xff]  }
 0x61a   : > { %13450 = vmatprep.subr.bf16.mxu0 %v15179_v22  ;;  %13472 = vmatprep.subr.bf16.mxu1 %v15181_v11  ;;  %v15226_v12 = vld [vmem:[%s17951_s11 + $0xda8] ss:$20 sps:$4 sm:$0xff]   ;;  %v15227_v22 = vld [vmem:[%s17951_s11 + $0x1050] ss:$20 sps:$4 sm:$0xff]  }
 0x61b   : > { %v15229_v11 = vld [vmem:[%s17951_s11 + $0x12d0] ss:$20 sps:$4 sm:$0xff]  }
 0x61d   : > { %13451 = vmatpush3.bf16.msra.mxu0 %v15180_v34  ;;  %13473 = vmatpush3.bf16.msra.mxu1 %v15182_v13  ;;  %v15228_v34 = vld [vmem:[%s17951_s11 + $0xf10] ss:$20 sps:$4 sm:$0xff]  }
 0x61e   : > { %13452 = vmatprep.subr.bf16.mxu0 %v15183_v14  ;;  %13474 = vmatprep.subr.bf16.mxu1 %v15185_v15  ;;  %v15230_v13 = vld [vmem:[%s17951_s11 + $0x1190] ss:$20 sps:$4 sm:$0xff]   ;;  %v15231_v14 = vld [vmem:[%s17951_s11 + $0x1078] ss:$20 sps:$4 sm:$0xff]  }
 0x61f   : > { %v15233_v15 = vld [vmem:[%s17951_s11 + $0x12f8] ss:$20 sps:$4 sm:$0xff]  }
 0x621   : > { %13453 = vmatpush3.bf16.msra.mxu0 %v15184_v16  ;;  %13475 = vmatpush3.bf16.msra.mxu1 %v15186_v20  ;;  %v15232_v16 = vld [vmem:[%s17951_s11 + $0xf38] ss:$20 sps:$4 sm:$0xff]  }
 0x622   : > { %13454 = vmatprep.subr.bf16.mxu0 %v15187_v21  ;;  %13476 = vmatprep.subr.bf16.mxu1 %v15189_v1  ;;  %v15234_v20 = vld [vmem:[%s17951_s11 + $0x11b8] ss:$20 sps:$4 sm:$0xff]   ;;  %v15235_v21 = vld [vmem:[%s17951_s11 + $0x10a0] ss:$20 sps:$4 sm:$0xff]  }
 0x623   : > { %v15237_v1 = vld [vmem:[%s17951_s11 + $0x1320] ss:$20 sps:$4 sm:$0xff]  }
 0x625   : > { %13455 = vmatpush3.bf16.msra.mxu0 %v15188_v23  ;;  %13477 = vmatpush3.bf16.msra.mxu1 %v15190_v45  ;;  %v15239_v23 = vld [vmem:[%s17951_s11 + $0x10c8] ss:$20 sps:$4 sm:$0xff]  }
 0x626   : > { %13456 = vmatprep.subr.bf16.mxu0 %v15191_v2  ;;  %13478 = vmatprep.subr.bf16.mxu1 %v15193_v40  ;;  %v15241_v45 = vld [vmem:[%s17951_s11 + $0x1348] ss:$20 sps:$4 sm:$0xff]   ;;  %v15245_v40 = vld [vmem:[%s17951_s11 + $0x1370] ss:$20 sps:$4 sm:$0xff]  }
 0x627   : > { %v15240_v2 = vld [vmem:[%s17951_s11 + $0xf88] ss:$20 sps:$4 sm:$0xff]  }
 0x629   : > { %13457 = vmatpush3.bf16.msra.mxu0 %v15192_v26  ;;  %13479 = vmatpush3.bf16.msra.mxu1 %v15194_v27  ;;  %v15244_v26 = vld [vmem:[%s17951_s11 + $0xfb0] ss:$20 sps:$4 sm:$0xff]  }
 0x62a   : > { %13486 = vmatprep.subr.bf16.mxu0 %v15195_v29  ;;  %13508 = vmatprep.subr.bf16.mxu1 %v15197_v59  ;;  %v15246_v27 = vld [vmem:[%s17951_s11 + $0x1230] ss:$20 sps:$4 sm:$0xff]   ;;  %v15247_v29 = vld [vmem:[%s17951_s11 + $0x1118] ss:$20 sps:$4 sm:$0xff]  }
 0x62b   : > { %v15249_v59 = vld [vmem:[%s17951_s11 + $0x1398] ss:$20 sps:$4 sm:$0xff]  }
 0x62c   : > { %10469 = vmatmul.mubr.bf16.vlgmr.msra.gmra.mrb[8].mxu0 %v18201_v18  ;;  %10509 = vmatmul.mubr.bf16.vlgmr.msra.gmra.mrb[8].mxu1 %v18281_v30  ;;  %v15204_v18 = vld [vmem:[%s17951_s11 + $0xa60] ss:$20 sps:$4 sm:$0xff]  }
 0x62d   : > { %13487 = vmatpush3.bf16.msra.mxu0 %v15196_v33  ;;  %13509 = vmatpush3.bf16.msra.mxu1 %v15198_v35  ;;  %v15206_v30 = vld [vmem:[%s17951_s11 + $0xce0] ss:$20 sps:$4 sm:$0xff]   ;;  %v15248_v33 = vld [vmem:[%s17951_s11 + $0xfd8] ss:$20 sps:$4 sm:$0xff]  }
 0x62e   : > { %13488 = vmatprep.subr.bf16.mxu0 %v15199_v38  ;;  %13510 = vmatprep.subr.bf16.mxu1 %v15201_v48  ;;  %v15250_v35 = vld [vmem:[%s17951_s11 + $0x1258] ss:$20 sps:$4 sm:$0xff]   ;;  %v15251_v38 = vld [vmem:[%s17951_s11 + $0x1140] ss:$20 sps:$4 sm:$0xff]  }
 0x62f   : > { %10548 = vmatprep.mubr.bf16.mxu0 %v18288_v36  ;;  %10588 = vmatprep.mubr.bf16.mxu1 %v18364_v52  ;;  %v15210_v36 = vld [vmem:[%s17951_s11 + $0xd08] ss:$20 sps:$4 sm:$0xff]   ;;  %v15211_v52 = vld [vmem:[%s17951_s11 + $0xbf0] ss:$20 sps:$4 sm:$0xff]   ;;  %v15253_v48 = vld [vmem:[%s17951_s11 + $0x13c0] ss:$20 sps:$4 sm:$0xff]  }
 0x631   : > { %13489 = vmatpush3.bf16.msra.mxu0 %v15200_v41  ;;  %13511 = vmatpush3.bf16.msra.mxu1 %v15202_v42  ;;  %v15252_v41 = vld [vmem:[%s17951_s11 + $0x1000] ss:$20 sps:$4 sm:$0xff]  }
 0x632   : > { %13490 = vmatprep.subr.bf16.mxu0 %v15203_v43  ;;  %13512 = vmatprep.subr.bf16.mxu1 %v15205_v44  ;;  %v15254_v42 = vld [vmem:[%s17951_s11 + $0x1280] ss:$20 sps:$4 sm:$0xff]   ;;  %v15255_v43 = vld [vmem:[%s17951_s11 + $0x1168] ss:$20 sps:$4 sm:$0xff]  }
 0x633   : > { %v15257_v44 = vld [vmem:[%s17951_s11 + $0x13e8] ss:$20 sps:$4 sm:$0xff]  }
 0x635   : > { %13491 = vmatpush3.bf16.msra.mxu0 %v15204_v18  ;;  %13513 = vmatpush3.bf16.msra.mxu1 %v15206_v30  ;;  %v15256_v18 = vld [vmem:[%s17951_s11 + $0x1028] ss:$20 sps:$4 sm:$0xff]  }
 0x636   : > { %13492 = vmatprep.subr.bf16.mxu0 %v15207_v46  ;;  %13514 = vmatprep.subr.bf16.mxu1 %v15209_v49  ;;  %v15258_v30 = vld [vmem:[%s17951_s11 + $0x12a8] ss:$20 sps:$4 sm:$0xff]   ;;  %v15259_v46 = vld [vmem:[%s17951_s11 + $0x1550] ss:$20 sps:$4 sm:$0xff]  }
 0x637   : > { %v15261_v49 = vld [vmem:[%s17951_s11 + $0x17d0] ss:$20 sps:$4 sm:$0xff]  }
 0x639   : > { %13493 = vmatpush3.bf16.msra.mxu0 %v15208_v50  ;;  %13515 = vmatpush3.bf16.msra.mxu1 %v15210_v36  ;;  %v15260_v50 = vld [vmem:[%s17951_s11 + $0x1410] ss:$20 sps:$4 sm:$0xff]  }
 0x63a   : > { %13494 = vmatprep.subr.bf16.mxu0 %v15211_v52  ;;  %13516 = vmatprep.subr.bf16.mxu1 %v15213_v51  ;;  %v15262_v36 = vld [vmem:[%s17951_s11 + $0x1690] ss:$20 sps:$4 sm:$0xff]   ;;  %v15263_v52 = vld [vmem:[%s17951_s11 + $0x1578] ss:$20 sps:$4 sm:$0xff]  }
 0x63b   : > { %v15265_v51 = vld [vmem:[%s17951_s11 + $0x17f8] ss:$20 sps:$4 sm:$0xff]  }
 0x63d   : > { %13495 = vmatpush3.bf16.msra.mxu0 %v15212_v53  ;;  %13517 = vmatpush3.bf16.msra.mxu1 %v15214_v54  ;;  %v15264_v53 = vld [vmem:[%s17951_s11 + $0x1438] ss:$20 sps:$4 sm:$0xff]  }
 0x63e   : > { %13496 = vmatprep.subr.bf16.mxu0 %v15215_v56  ;;  %13518 = vmatprep.subr.bf16.mxu1 %v15217_v58  ;;  %v15266_v54 = vld [vmem:[%s17951_s11 + $0x16b8] ss:$20 sps:$4 sm:$0xff]   ;;  %v15267_v56 = vld [vmem:[%s17951_s11 + $0x15a0] ss:$20 sps:$4 sm:$0xff]  }
 0x63f   : > { %v15269_v58 = vld [vmem:[%s17951_s11 + $0x1820] ss:$20 sps:$4 sm:$0xff]  }
 0x641   : > { %13497 = vmatpush3.bf16.msra.mxu0 %v15216_v60  ;;  %13519 = vmatpush3.bf16.msra.mxu1 %v15218_v61  ;;  %v15271_v60 = vld [vmem:[%s17951_s11 + $0x15c8] ss:$20 sps:$4 sm:$0xff]  }
 0x642   : > { %13498 = vmatprep.subr.bf16.mxu0 %v15219_v0  ;;  %13520 = vmatprep.subr.bf16.mxu1 %v15221_v3  ;;  %v15273_v61 = vld [vmem:[%s17951_s11 + $0x1848] ss:$20 sps:$4 sm:$0xff]   ;;  %v15277_v3 = vld [vmem:[%s17951_s11 + $0x1870] ss:$20 sps:$4 sm:$0xff]  }
 0x643   : > { %v15272_v0 = vld [vmem:[%s17951_s11 + $0x1488] ss:$20 sps:$4 sm:$0xff]  }
 0x645   : > { %13499 = vmatpush3.bf16.msra.mxu0 %v15220_v62  ;;  %13521 = vmatpush3.bf16.msra.mxu1 %v15222_v8  ;;  %v15276_v62 = vld [vmem:[%s17951_s11 + $0x14b0] ss:$20 sps:$4 sm:$0xff]  }
 0x646   : > { %13500 = vmatprep.subr.bf16.mxu0 %v15223_v5  ;;  %13522 = vmatprep.subr.bf16.mxu1 %v15225_v6  ;;  %v15278_v8 = vld [vmem:[%s17951_s11 + $0x1730] ss:$20 sps:$4 sm:$0xff]   ;;  %v15279_v5 = vld [vmem:[%s17951_s11 + $0x1618] ss:$20 sps:$4 sm:$0xff]  }
 0x647   : > { %v15281_v6 = vld [vmem:[%s17951_s11 + $0x1898] ss:$20 sps:$4 sm:$0xff]  }
 0x649   : > { %13501 = vmatpush3.bf16.msra.mxu0 %v15224_v7  ;;  %13523 = vmatpush3.bf16.msra.mxu1 %v15226_v12  ;;  %v15280_v7 = vld [vmem:[%s17951_s11 + $0x14d8] ss:$20 sps:$4 sm:$0xff]  }
 0x64a   : > { %13530 = vmatprep.subr.bf16.mxu0 %v15227_v22  ;;  %13552 = vmatprep.subr.bf16.mxu1 %v15229_v11  ;;  %v15282_v12 = vld [vmem:[%s17951_s11 + $0x1758] ss:$20 sps:$4 sm:$0xff]   ;;  %v15283_v22 = vld [vmem:[%s17951_s11 + $0x1640] ss:$20 sps:$4 sm:$0xff]  }
 0x64b   : > { %v15285_v11 = vld [vmem:[%s17951_s11 + $0x18c0] ss:$20 sps:$4 sm:$0xff]  }
 0x64c   : > { %10549 = vmatmul.mubr.bf16.vlgmr.msra.gmra.mrb[12].mxu0 %v18356_v47  ;;  %10589 = vmatmul.mubr.bf16.vlgmr.msra.gmra.mrb[12].mxu1 %v18438_v37  ;;  %v15236_v47 = vld [vmem:[%s17951_s11 + $0xf60] ss:$20 sps:$4 sm:$0xff]  }
 0x64d   : > { %13531 = vmatpush3.bf16.msra.mxu0 %v15228_v34  ;;  %13553 = vmatpush3.bf16.msra.mxu1 %v15230_v13  ;;  %v15238_v37 = vld [vmem:[%s17951_s11 + $0x11e0] ss:$20 sps:$4 sm:$0xff]  }
 0x64e   : > { %13532 = vmatprep.subr.bf16.mxu0 %v15231_v14  ;;  %13554 = vmatprep.subr.bf16.mxu1 %v15233_v15  ;;  %v15284_v34 = vld [vmem:[%s17951_s11 + $0x1500] ss:$20 sps:$4 sm:$0xff]   ;;  %v15287_v14 = vld [vmem:[%s17951_s11 + $0x1668] ss:$20 sps:$4 sm:$0xff]  }
 0x64f   : > { %10628 = vmatprep.mubr.bf16.mxu0 %v18445_v9  ;;  %10668 = vmatprep.mubr.bf16.mxu1 %v18521_v32  ;;  %v15242_v9 = vld [vmem:[%s17951_s11 + $0x1208] ss:$20 sps:$4 sm:$0xff]   ;;  %v15243_v32 = vld [vmem:[%s17951_s11 + $0x10f0] ss:$20 sps:$4 sm:$0xff]   ;;  %v15286_v13 = vld [vmem:[%s17951_s11 + $0x1780] ss:$20 sps:$4 sm:$0xff]  }
 0x650   : > { %v15289_v15 = vld [vmem:[%s17951_s11 + $0x18e8] ss:$20 sps:$4 sm:$0xff]  }
 0x651   : > { %13533 = vmatpush3.bf16.msra.mxu0 %v15232_v16  ;;  %13555 = vmatpush3.bf16.msra.mxu1 %v15234_v20  ;;  %v15288_v16 = vld [vmem:[%s17951_s11 + $0x1528] ss:$20 sps:$4 sm:$0xff]  }
 0x652   : > { %13534 = vmatprep.subr.bf16.mxu0 %v15235_v21  ;;  %13556 = vmatprep.subr.bf16.mxu1 %v15237_v1  ;;  %v15290_v20 = vld [vmem:[%s17951_s11 + $0x17a8] ss:$20 sps:$4 sm:$0xff]   ;;  %v15291_v21 = vld [vmem:[%s17951_s11 + $0x1a50] ss:$20 sps:$4 sm:$0xff]  }
 0x653   : > { %v15293_v1 = vld [vmem:[%s17951_s11 + $0x1cd0] ss:$20 sps:$4 sm:$0xff]  }
 0x655   : > { %13535 = vmatpush3.bf16.msra.mxu0 %v15236_v47  ;;  %13557 = vmatpush3.bf16.msra.mxu1 %v15238_v37  ;;  %v15292_v47 = vld [vmem:[%s17951_s11 + $0x1910] ss:$20 sps:$4 sm:$0xff]  }
 0x656   : > { %13536 = vmatprep.subr.bf16.mxu0 %v15239_v23  ;;  %13558 = vmatprep.subr.bf16.mxu1 %v15241_v45  ;;  %v15294_v37 = vld [vmem:[%s17951_s11 + $0x1b90] ss:$20 sps:$4 sm:$0xff]   ;;  %v15295_v23 = vld [vmem:[%s17951_s11 + $0x1a78] ss:$20 sps:$4 sm:$0xff]  }
 0x657   : > { %v15297_v45 = vld [vmem:[%s17951_s11 + $0x1cf8] ss:$20 sps:$4 sm:$0xff]  }
 0x659   : > { %13537 = vmatpush3.bf16.msra.mxu0 %v15240_v2  ;;  %13559 = vmatpush3.bf16.msra.mxu1 %v15242_v9  ;;  %v15296_v2 = vld [vmem:[%s17951_s11 + $0x1938] ss:$20 sps:$4 sm:$0xff]  }
 0x65a   : > { %13538 = vmatprep.subr.bf16.mxu0 %v15243_v32  ;;  %13560 = vmatprep.subr.bf16.mxu1 %v15245_v40  ;;  %v15298_v9 = vld [vmem:[%s17951_s11 + $0x1bb8] ss:$20 sps:$4 sm:$0xff]   ;;  %v15299_v32 = vld [vmem:[%s17951_s11 + $0x1aa0] ss:$20 sps:$4 sm:$0xff]  }
 0x65b   : > { %v15301_v40 = vld [vmem:[%s17951_s11 + $0x1d20] ss:$20 sps:$4 sm:$0xff]  }
 0x65d   : > { %13539 = vmatpush3.bf16.msra.mxu0 %v15244_v26  ;;  %13561 = vmatpush3.bf16.msra.mxu1 %v15246_v27  ;;  %v15303_v26 = vld [vmem:[%s17951_s11 + $0x1ac8] ss:$20 sps:$4 sm:$0xff]  }
 0x65e   : > { %13540 = vmatprep.subr.bf16.mxu0 %v15247_v29  ;;  %13562 = vmatprep.subr.bf16.mxu1 %v15249_v59  ;;  %v15305_v27 = vld [vmem:[%s17951_s11 + $0x1d48] ss:$20 sps:$4 sm:$0xff]   ;;  %v15309_v59 = vld [vmem:[%s17951_s11 + $0x1d70] ss:$20 sps:$4 sm:$0xff]  }
 0x65f   : > { %v15304_v29 = vld [vmem:[%s17951_s11 + $0x1988] ss:$20 sps:$4 sm:$0xff]  }
 0x661   : > { %13541 = vmatpush3.bf16.msra.mxu0 %v15248_v33  ;;  %13563 = vmatpush3.bf16.msra.mxu1 %v15250_v35  ;;  %v15308_v33 = vld [vmem:[%s17951_s11 + $0x19b0] ss:$20 sps:$4 sm:$0xff]  }
 0x662   : > { %13542 = vmatprep.subr.bf16.mxu0 %v15251_v38  ;;  %13564 = vmatprep.subr.bf16.mxu1 %v15253_v48  ;;  %v15310_v35 = vld [vmem:[%s17951_s11 + $0x1c30] ss:$20 sps:$4 sm:$0xff]   ;;  %v15311_v38 = vld [vmem:[%s17951_s11 + $0x1b18] ss:$20 sps:$4 sm:$0xff]  }
 0x663   : > { %v15313_v48 = vld [vmem:[%s17951_s11 + $0x1d98] ss:$20 sps:$4 sm:$0xff]  }
 0x665   : > { %13543 = vmatpush3.bf16.msra.mxu0 %v15252_v41  ;;  %13565 = vmatpush3.bf16.msra.mxu1 %v15254_v42  ;;  %v15312_v41 = vld [vmem:[%s17951_s11 + $0x19d8] ss:$20 sps:$4 sm:$0xff]  }
 0x666   : > { %13544 = vmatprep.subr.bf16.mxu0 %v15255_v43  ;;  %13566 = vmatprep.subr.bf16.mxu1 %v15257_v44  ;;  %v15314_v42 = vld [vmem:[%s17951_s11 + $0x1c58] ss:$20 sps:$4 sm:$0xff]   ;;  %v15315_v43 = vld [vmem:[%s17951_s11 + $0x1b40] ss:$20 sps:$4 sm:$0xff]  }
 0x667   : > { %v15317_v44 = vld [vmem:[%s17951_s11 + $0x1dc0] ss:$20 sps:$4 sm:$0xff]  }
 0x669   : > { %13545 = vmatpush3.bf16.msra.mxu0 %v15256_v18  ;;  %13567 = vmatpush3.bf16.msra.mxu1 %v15258_v30  ;;  %v15316_v18 = vld [vmem:[%s17951_s11 + $0x1a00] ss:$20 sps:$4 sm:$0xff]  }
 0x66a   : > { %13574 = vmatprep.subr.bf16.mxu0 %v15259_v46  ;;  %13596 = vmatprep.subr.bf16.mxu1 %v15261_v49  ;;  %v15318_v30 = vld [vmem:[%s17951_s11 + $0x1c80] ss:$20 sps:$4 sm:$0xff]   ;;  %v15319_v46 = vld [vmem:[%s17951_s11 + $0x1b68] ss:$20 sps:$4 sm:$0xff]  }
 0x66b   : > { %v15321_v49 = vld [vmem:[%s17951_s11 + $0x1de8] ss:$20 sps:$4 sm:$0xff]  }
 0x66c   : > { %10629 = vmatmul.mubr.bf16.vlgmr.msra.gmra.mrb[16].mxu0 %v18513_v25  ;;  %10669 = vmatmul.mubr.bf16.vlgmr.msra.gmra.mrb[16].mxu1 %v18594_v19  ;;  %v15268_v25 = vld [vmem:[%s17951_s11 + $0x1460] ss:$20 sps:$4 sm:$0xff]  }
 0x66d   : > { %13575 = vmatpush3.bf16.msra.mxu0 %v15260_v50  ;;  %13597 = vmatpush3.bf16.msra.mxu1 %v15262_v36  ;;  %v15270_v19 = vld [vmem:[%s17951_s11 + $0x16e0] ss:$20 sps:$4 sm:$0xff]   ;;  %v15320_v50 = vld [vmem:[%s17951_s11 + $0x1a28] ss:$20 sps:$4 sm:$0xff]  }
 0x66e   : > { %13576 = vmatprep.subr.bf16.mxu0 %v15263_v52  ;;  %13598 = vmatprep.subr.bf16.mxu1 %v15265_v51  ;;  %v15322_v36 = vld [vmem:[%s17951_s11 + $0x1ca8] ss:$20 sps:$4 sm:$0xff]   ;;  %v15323_v52 = vld [vmem:[%s17951_s11 + $0x1e10] ss:$20 sps:$4 sm:$0xff]   ;;  %v15434_v51 = vmov 0.0  }
 0x66f   : > { %10708 = vmatprep.mubr.bf16.mxu0 %v18601_v57  ;;  %10748 = vmatprep.mubr.bf16.mxu1 %v18677_v24  ;;  %v15274_v57 = vld [vmem:[%s17951_s11 + $0x1708] ss:$20 sps:$4 sm:$0xff]   ;;  %v15275_v24 = vld [vmem:[%s17951_s11 + $0x15f0] ss:$20 sps:$4 sm:$0xff]  }
 0x671   : > { %13577 = vmatpush3.bf16.msra.mxu0 %v15264_v53  ;;  %13599 = vmatpush3.bf16.msra.mxu1 %v15266_v54  ;;  %v15324_v53 = vld [vmem:[%s17951_s11 + $0x1e38] ss:$20 sps:$4 sm:$0xff]   ;;  %v15325_v54 = vld [vmem:[%s17951_s11 + $0x1e60] ss:$20 sps:$4 sm:$0xff]  }
 0x672   : > { %13578 = vmatprep.subr.bf16.mxu0 %v15267_v56  ;;  %13600 = vmatprep.subr.bf16.mxu1 %v15269_v58  ;;  %v15326_v56 = vld [vmem:[%s17951_s11 + $0x1e88] ss:$20 sps:$4 sm:$0xff]   ;;  %v15436_v58 = vmov 1983009808  }
 0x675   : > { %13579 = vmatpush3.bf16.msra.mxu0 %v15268_v25  ;;  %13601 = vmatpush3.bf16.msra.mxu1 %v15270_v19  ;;  %v10884_v25 = vunpack.c.l.s4 %v15436_v58  ;;  %v15327_v19 = vld [vmem:[%s17951_s11 + $0x1eb0] ss:$20 sps:$4 sm:$0xff]  }
 0x676   : > { %13580 = vmatprep.subr.bf16.mxu0 %v15271_v60  ;;  %13602 = vmatprep.subr.bf16.mxu1 %v15273_v61 }
 0x679   : > { %13581 = vmatpush3.bf16.msra.mxu0 %v15272_v0  ;;  %13603 = vmatpush3.bf16.msra.mxu1 %v15274_v57 }
 0x67a   : > { %13582 = vmatprep.subr.bf16.mxu0 %v15275_v24  ;;  %13604 = vmatprep.subr.bf16.mxu1 %v15277_v3 }
 0x67d   : > { %13583 = vmatpush3.bf16.msra.mxu0 %v15276_v62  ;;  %13605 = vmatpush3.bf16.msra.mxu1 %v15278_v8 }
 0x67e   : > { %13584 = vmatprep.subr.bf16.mxu0 %v15279_v5  ;;  %13606 = vmatprep.subr.bf16.mxu1 %v15281_v6  ;;  %v15329_v6 = vld [vmem:[%s17951_s11 + $0x1f00] ss:$20 sps:$4 sm:$0xff]  }
 0x681   : > { %13585 = vmatpush3.bf16.msra.mxu0 %v15280_v7  ;;  %13607 = vmatpush3.bf16.msra.mxu1 %v15282_v12 }
 0x682   : > { %13586 = vmatprep.subr.bf16.mxu0 %v15283_v22  ;;  %13608 = vmatprep.subr.bf16.mxu1 %v15285_v11 }
 0x685   : > { %13587 = vmatpush3.bf16.msra.mxu0 %v15284_v34  ;;  %13609 = vmatpush3.bf16.msra.mxu1 %v15286_v13  ;;  %v2691_v34 = vld [vmem:[#allocation2] sm:$0xff] }
 0x686   : > { %13588 = vmatprep.subr.bf16.mxu0 %v15287_v14  ;;  %13610 = vmatprep.subr.bf16.mxu1 %v15289_v15  ;;  %v15330_v14 = vld [vmem:[%s17951_s11 + $0x1f28] ss:$20 sps:$4 sm:$0xff]  }
 0x689   : > { %13589 = vmatpush3.bf16.msra.mxu0 %v15288_v16  ;;  %13611 = vmatpush3.bf16.msra.mxu1 %v15290_v20 }
 0x68a   : > { %13618 = vmatprep.subr.bf16.mxu0 %v15291_v21  ;;  %13640 = vmatprep.subr.bf16.mxu1 %v15293_v1 }
 0x68c   : > { %10709 = vmatmul.mubr.bf16.vlgmr.msra.gmra.mrb[20].mxu0 %v18669_v17  ;;  %10749 = vmatmul.mubr.bf16.vlgmr.msra.gmra.mrb[20].mxu1 %v18751_v55  ;;  %v15300_v17 = vld [vmem:[%s17951_s11 + $0x1960] ss:$20 sps:$4 sm:$0xff]  }
 0x68d   : > { %13619 = vmatpush3.bf16.msra.mxu0 %v15292_v47  ;;  %13641 = vmatpush3.bf16.msra.mxu1 %v15294_v37  ;;  %v15302_v55 = vld [vmem:[%s17951_s11 + $0x1be0] ss:$20 sps:$4 sm:$0xff]  }
 0x68e   : > { %13620 = vmatprep.subr.bf16.mxu0 %v15295_v23  ;;  %13642 = vmatprep.subr.bf16.mxu1 %v15297_v45 }
 0x68f   : > { %10788 = vmatprep.mubr.bf16.mxu0 %v18758_v63  ;;  %10828 = vmatprep.mubr.bf16.mxu1 %v18834_v39  ;;  %v15306_v63 = vld [vmem:[%s17951_s11 + $0x1c08] ss:$20 sps:$4 sm:$0xff]   ;;  %v15307_v39 = vld [vmem:[%s17951_s11 + $0x1af0] ss:$20 sps:$4 sm:$0xff]  }
 0x691   : > { %13621 = vmatpush3.bf16.msra.mxu0 %v15296_v2  ;;  %13643 = vmatpush3.bf16.msra.mxu1 %v15298_v9 }
 0x692   : > { %13622 = vmatprep.subr.bf16.mxu0 %v15299_v32  ;;  %13644 = vmatprep.subr.bf16.mxu1 %v15301_v40 }
 0x695   : > { %13623 = vmatpush3.bf16.msra.mxu0 %v15300_v17  ;;  %13645 = vmatpush3.bf16.msra.mxu1 %v15302_v55 }
 0x696   : > { %13624 = vmatprep.subr.bf16.mxu0 %v15303_v26  ;;  %13646 = vmatprep.subr.bf16.mxu1 %v15305_v27 }
 0x699   : > { %13625 = vmatpush3.bf16.msra.mxu0 %v15304_v29  ;;  %13647 = vmatpush3.bf16.msra.mxu1 %v15306_v63 }
 0x69a   : > { %13626 = vmatprep.subr.bf16.mxu0 %v15307_v39  ;;  %13648 = vmatprep.subr.bf16.mxu1 %v15309_v59 }
 0x69d   : > { %13627 = vmatpush3.bf16.msra.mxu0 %v15308_v33  ;;  %13649 = vmatpush3.bf16.msra.mxu1 %v15310_v35 }
 0x69e   : > { %13628 = vmatprep.subr.bf16.mxu0 %v15311_v38  ;;  %13650 = vmatprep.subr.bf16.mxu1 %v15313_v48 }
 0x6a1   : > { %13629 = vmatpush3.bf16.msra.mxu0 %v15312_v41  ;;  %13651 = vmatpush3.bf16.msra.mxu1 %v15314_v42 }
 0x6a2   : > { %13630 = vmatprep.subr.bf16.mxu0 %v15315_v43  ;;  %13652 = vmatprep.subr.bf16.mxu1 %v15317_v44 }
 0x6a5   : > { %13631 = vmatpush3.bf16.msra.mxu0 %v15316_v18  ;;  %13653 = vmatpush3.bf16.msra.mxu1 %v15318_v30 }
 0x6a6   : > { %13632 = vmatprep.subr.bf16.mxu0 %v15319_v46  ;;  %13654 = vmatprep.subr.bf16.mxu1 %v15321_v49 }
 0x6a9   : > { %13633 = vmatpush3.bf16.msra.mxu0 %v15320_v50  ;;  %13655 = vmatpush3.bf16.msra.mxu1 %v15322_v36 }
 0x6aa   : > { %13724 = vmatprep.subr.bf16.mxu0 %v15434_v51 }
 0x6ac   : > { %10789 = vmatmul.mubr.bf16.vlgmr.msra.gmra.mrb[24].mxu0 %v18826_v31  ;;  %10829 = vmatmul.mubr.bf16.vlgmr.msra.gmra.mrb[24].mxu1 %v18902_v10  ;;  %v10885_v31 = vunpack.c.0.s8 %v10884_v25  ;;  %v15328_v10 = vld [vmem:[%s17951_s11 + $0x1ed8] ss:$20 sps:$4 sm:$0xff]  }
 0x6ad   : > { %13725 = vmatpush3.bf16.msra.mxu0 %v15323_v52  ;;  %13740 = vmatprep.mubr.msk.bf16.mxu0 %vm15435_vm0, %v15434_v51 }
 0x6ae   : > { %13726 = vmatprep.subr.bf16.mxu0 %v15434_v51  ;;  %v19165_v0 = vsub.s32 %v10885_v31, %v17994_v28 }
 0x6b1   : > { %13727 = vmatpush3.bf16.msra.mxu0 %v15324_v53 }
 0x6b2   : > { %13728 = vmatprep.subr.bf16.mxu0 %v15434_v51 }
 0x6b5   : > { %13729 = vmatpush3.bf16.msra.mxu0 %v15325_v54 }
 0x6b6   : > { %13730 = vmatprep.subr.bf16.mxu0 %v15434_v51 }
 0x6b9   : > { %13731 = vmatpush3.bf16.msra.mxu0 %v15326_v56 }
 0x6ba   : > { %13732 = vmatprep.subr.bf16.mxu0 %v15434_v51 }
 0x6bd   : > { %13733 = vmatpush3.bf16.msra.mxu0 %v15327_v19 }
 0x6be   : > { %13734 = vmatprep.subr.bf16.mxu0 %v15434_v51 }
 0x6bf   : > { %v9816_v60 = vpop.f32.mrb[0].mxu0  ;;  %v10349_v61 = vpop.f32.mrb[0].mxu1 }
 0x6c0   : > { %v9818_v57 = vpop.f32.mrb[1].mxu0  ;;  %v10351_v24 = vpop.f32.mrb[1].mxu1 }
 0x6c1   : > { %v10881_v3 = vcombine.low %v9816_v60, %v9818_v57  ;;  %v10882_v62 = vcombine.low %v10349_v61, %v10351_v24  ;;  %v9820_v8 = vpop.f32.mrb[2].mxu0  ;;  %v10353_v5 = vpop.f32.mrb[2].mxu1  ;;  %13735 = vmatpush3.bf16.msra.mxu0 %v15328_v10 }
 0x6c2   : > { %v9821_v7 = vpop.f32.mrb[3].mxu0  ;;  %v10354_v12 = vpop.f32.mrb[3].mxu1  ;;  %13736 = vmatprep.subr.bf16.mxu0 %v15434_v51 }
 0x6c3   : > { %v10889_v22 = vrot.slane %v10881_v3, %v19165_v0  ;;  %v10896_v11 = vrot.slane %v10882_v62, %v19165_v0 }
 0x6c5   : > { %v10897_v13 = vcombine.low %v10889_v22, %v10896_v11  ;;  %13737 = vmatpush3.bf16.msra.mxu0 %v15329_v6 }
 0x6c6   : > { %13738 = vmatprep.subr.bf16.mxu0 %v15434_v51 }
 0x6c7   : > { %v10907_v15 = vadd.f32 %v10897_v13, %v2691_v34 }
 0x6c9   : > { %10909 = vst [vmem:[#allocation2] sm:$0xff] %v10907_v15  ;;  %13739 = vmatpush3.bf16.msra.mxu0 %v15330_v14 }
 0x6cc   : > { %13741 = vmatmul.mubr.bf16.vlgmr.msra.gmra.mrb[28].mxu0 %v18940_v4 }
 0x6df   : > { %v13414_v16 = vpop.f32.mrb[4].mxu0  ;;  %v13436_v20 = vpop.f32.mrb[4].mxu1 }
 0x6e0   : > { %v13415_v21 = vpop.f32.mrb[5].mxu0  ;;  %v13437_v1 = vpop.f32.mrb[5].mxu1 }
 0x6e1   : > { %v13416_v47 = vadd.f32 %v13415_v21, %v13414_v16  ;;  %v13438_v37 = vadd.f32 %v13437_v1, %v13436_v20  ;;  %v13417_v23 = vpop.f32.mrb[6].mxu0  ;;  %v13439_v45 = vpop.f32.mrb[6].mxu1 }
 0x6e2   : > { %v13418_v2 = vpop.f32.mrb[7].mxu0  ;;  %v13440_v9 = vpop.f32.mrb[7].mxu1 }
 0x6e3   : > { %v10431_v32 = vadd.f32 %v13438_v37, %v13416_v47 }
 0x6ff   : > { %v13458_v40 = vpop.f32.mrb[8].mxu0  ;;  %v13480_v17 = vpop.f32.mrb[8].mxu1 }
 0x700   : > { %v13459_v55 = vpop.f32.mrb[9].mxu0  ;;  %v13481_v26 = vpop.f32.mrb[9].mxu1 }
 0x701   : > { %v13460_v27 = vadd.f32 %v13459_v55, %v13458_v40  ;;  %v13461_v29 = vpop.f32.mrb[10].mxu0  ;;  %v13482_v63 = vadd.f32 %v13481_v26, %v13480_v17  ;;  %v13483_v39 = vpop.f32.mrb[10].mxu1  ;;  %v2692_v17 = vld [vmem:[#allocation2 + $0x8] sm:$0x3] }
 0x702   : > { %v13462_v4 = vpop.f32.mrb[11].mxu0  ;;  %v13484_v59 = vpop.f32.mrb[11].mxu1  ;;  %v15334_v39 = vld [vmem:[%s17944_s15 + $0xc0] sm:$0xff] (!%p13355_p0)  }
 0x703   : > { %v10471_v33 = vadd.f32 %v13460_v27, %v10431_v32  ;;  %v15335_v4 = vld [vmem:[%s17944_s15] sm:$0xff] (!%p13355_p0)   ;;  %13693 = vmatprep.subr.bf16.mxu1 (!%p13355_p0), %v15334_v39 }
 0x704   : > { %v15336_v59 = vld [vmem:[%s17944_s15 + $0x80] sm:$0xff] (!%p13355_p0)  }
 0x705   : > { %v10511_v35 = vadd.f32 %v13482_v63, %v10471_v33  ;;  %v15333_v63 = vld [vmem:[%s17944_s15 + $0x40] sm:$0xff] (!%p13355_p0)   ;;  %v15337_v33 = vld [vmem:[%s17944_s15 + $0x48] sm:$0xff] (!%p13355_p0)   ;;  %13694 = vmatpush3.bf16.msra.mxu1 (!%p13355_p0), %v15336_v59 }
 0x706   : > { %13671 = vmatprep.subr.bf16.mxu0 (!%p13355_p0), %v15333_v63  ;;  %v15367_v63 = vld [vmem:[%s17944_s15 + $0x110] sm:$0xff] (!%p13355_p0)  }
 0x707   : > { %13672 = vmatpush3.bf16.msra.mxu0 (!%p13355_p0), %v15335_v4  ;;  %v15368_v4 = vld [vmem:[%s17944_s15 + $0x118] sm:$0xff] (!%p13355_p0)  }
 0x708   : > { %13673 = vmatprep.subr.bf16.mxu0 (!%p13355_p0), %v15337_v33  ;;  %v15369_v33 = vld [vmem:[%s17944_s15 + $0x120] sm:$0xff] (!%p13355_p0)  }
 0x71f   : > { %v13502_v38 = vpop.f32.mrb[12].mxu0  ;;  %v13524_v48 = vpop.f32.mrb[12].mxu1 }
 0x720   : > { %v13503_v41 = vpop.f32.mrb[13].mxu0  ;;  %v13525_v42 = vpop.f32.mrb[13].mxu1 }
 0x721   : > { %v13504_v43 = vadd.f32 %v13503_v41, %v13502_v38  ;;  %v13505_v44 = vpop.f32.mrb[14].mxu0  ;;  %v13526_v18 = vadd.f32 %v13525_v42, %v13524_v48  ;;  %v13527_v30 = vpop.f32.mrb[14].mxu1  ;;  %v15339_v38 = vld [vmem:[%s17944_s15 + $0x8] sm:$0xff] (!%p13355_p0)   ;;  %v15341_v41 = vld [vmem:[%s17944_s15 + $0x50] sm:$0xff] (!%p13355_p0)  }
 0x722   : > { %v13506_v46 = vpop.f32.mrb[15].mxu0  ;;  %v13528_v49 = vpop.f32.mrb[15].mxu1  ;;  %v15340_v48 = vld [vmem:[%s17944_s15 + $0x88] sm:$0xff] (!%p13355_p0)   ;;  %13674 = vmatpush3.bf16.msra.mxu0 (!%p13355_p0), %v15339_v38  ;;  %v15342_v42 = vld [vmem:[%s17944_s15 + $0xd0] sm:$0xff] (!%p13355_p0)   ;;  %v15346_v30 = vld [vmem:[%s17944_s15 + $0xd8] sm:$0xff] (!%p13355_p0)  }
 0x723   : > { %v10551_v50 = vadd.f32 %v13504_v43, %v10511_v35  ;;  %v15338_v35 = vld [vmem:[%s17944_s15 + $0xc8] sm:$0xff] (!%p13355_p0)   ;;  %13675 = vmatprep.subr.bf16.mxu0 (!%p13355_p0), %v15341_v41  ;;  %v15343_v43 = vld [vmem:[%s17944_s15 + $0x10] sm:$0xff] (!%p13355_p0)   ;;  %v15347_v46 = vld [vmem:[%s17944_s15 + $0x18] sm:$0xff] (!%p13355_p0)  }
 0x724   : > { %13695 = vmatprep.subr.bf16.mxu1 (!%p13355_p0), %v15338_v35  ;;  %v15344_v44 = vld [vmem:[%s17944_s15 + $0x90] sm:$0xff] (!%p13355_p0)   ;;  %v15348_v49 = vld [vmem:[%s17944_s15 + $0x98] sm:$0xff] (!%p13355_p0)  }
 0x725   : > { %v10591_v36 = vadd.f32 %v13526_v18, %v10551_v50  ;;  %13696 = vmatpush3.bf16.msra.mxu1 (!%p13355_p0), %v15340_v48  ;;  %v15345_v18 = vld [vmem:[%s17944_s15 + $0x58] sm:$0xff] (!%p13355_p0)   ;;  %v15349_v50 = vld [vmem:[%s17944_s15 + $0x60] sm:$0xff] (!%p13355_p0)   ;;  %v15370_v48 = vld [vmem:[%s17944_s15 + $0x128] sm:$0xff] (!%p13355_p0)  }
 0x726   : > { %13697 = vmatprep.subr.bf16.mxu1 (!%p13355_p0), %v15342_v42  ;;  %13676 = vmatpush3.bf16.msra.mxu0 (!%p13355_p0), %v15343_v43  ;;  %v15371_v41 = vld [vmem:[%s17944_s15 + $0x130] sm:$0xff] (!%p13355_p0)   ;;  %v15372_v43 = vld [vmem:[%s17944_s15 + $0x138] sm:$0xff] (!%p13355_p0)  }
 0x727   : > { %13677 = vmatprep.subr.bf16.mxu0 (!%p13355_p0), %v15345_v18 }
 0x729   : > { %13698 = vmatpush3.bf16.msra.mxu1 (!%p13355_p0), %v15344_v44 }
 0x72a   : > { %13699 = vmatprep.subr.bf16.mxu1 (!%p13355_p0), %v15346_v30  ;;  %13678 = vmatpush3.bf16.msra.mxu0 (!%p13355_p0), %v15347_v46 }
 0x72b   : > { %13679 = vmatprep.subr.bf16.mxu0 (!%p13355_p0), %v15349_v50 }
 0x72d   : > { %13700 = vmatpush3.bf16.msra.mxu1 (!%p13355_p0), %v15348_v49 }
 0x73f   : > { %v13546_v52 = vpop.f32.mrb[16].mxu0  ;;  %v13568_v51 = vpop.f32.mrb[16].mxu1 }
 0x740   : > { %v13547_v53 = vpop.f32.mrb[17].mxu0  ;;  %v13569_v54 = vpop.f32.mrb[17].mxu1 }
 0x741   : > { %v13548_v56 = vadd.f32 %v13547_v53, %v13546_v52  ;;  %v13549_v58 = vpop.f32.mrb[18].mxu0  ;;  %v13570_v25 = vadd.f32 %v13569_v54, %v13568_v51  ;;  %v13571_v19 = vpop.f32.mrb[18].mxu1  ;;  %v15351_v52 = vld [vmem:[%s17944_s15 + $0x20] sm:$0xff] (!%p13355_p0)   ;;  %v15353_v53 = vld [vmem:[%s17944_s15 + $0x68] sm:$0xff] (!%p13355_p0)  }
 0x742   : > { %v13550_v31 = vpop.f32.mrb[19].mxu0  ;;  %v13572_v10 = vpop.f32.mrb[19].mxu1  ;;  %v15352_v51 = vld [vmem:[%s17944_s15 + $0xa0] sm:$0xff] (!%p13355_p0)   ;;  %13680 = vmatpush3.bf16.msra.mxu0 (!%p13355_p0), %v15351_v52  ;;  %v15354_v54 = vld [vmem:[%s17944_s15 + $0xe8] sm:$0xff] (!%p13355_p0)   ;;  %v15358_v19 = vld [vmem:[%s17944_s15 + $0xf0] sm:$0xff] (!%p13355_p0)  }
 0x743   : > { %v10631_v60 = vadd.f32 %v13548_v56, %v10591_v36  ;;  %v15350_v36 = vld [vmem:[%s17944_s15 + $0xe0] sm:$0xff] (!%p13355_p0)   ;;  %13681 = vmatprep.subr.bf16.mxu0 (!%p13355_p0), %v15353_v53  ;;  %v15355_v56 = vld [vmem:[%s17944_s15 + $0x28] sm:$0xff] (!%p13355_p0)   ;;  %v15359_v31 = vld [vmem:[%s17944_s15 + $0x30] sm:$0xff] (!%p13355_p0)   ;;  %v10921_v10 = vsub.s32 (!%p13355_p0), 0, %v17994_v28 }
 0x744   : > { %13701 = vmatprep.subr.bf16.mxu1 (!%p13355_p0), %v15350_v36  ;;  %v15356_v58 = vld [vmem:[%s17944_s15 + $0xa8] sm:$0xff] (!%p13355_p0)  }
 0x745   : > { %v10671_v61 = vadd.f32 %v13570_v25, %v10631_v60  ;;  %13702 = vmatpush3.bf16.msra.mxu1 (!%p13355_p0), %v15352_v51  ;;  %v15357_v25 = vld [vmem:[%s17944_s15 + $0x70] sm:$0xff] (!%p13355_p0)  }
 0x746   : > { %13703 = vmatprep.subr.bf16.mxu1 (!%p13355_p0), %v15354_v54  ;;  %13682 = vmatpush3.bf16.msra.mxu0 (!%p13355_p0), %v15355_v56  ;;  %v15360_v60 = vld [vmem:[%s17944_s15 + $0xb0] sm:$0xff] (!%p13355_p0)  }
 0x747   : > { %13683 = vmatprep.subr.bf16.mxu0 (!%p13355_p0), %v15357_v25 }
 0x749   : > { %13704 = vmatpush3.bf16.msra.mxu1 (!%p13355_p0), %v15356_v58 }
 0x74a   : > { %13705 = vmatprep.subr.bf16.mxu1 (!%p13355_p0), %v15358_v19  ;;  %13684 = vmatpush3.bf16.msra.mxu0 (!%p13355_p0), %v15359_v31 }
 0x74d   : > { %13706 = vmatpush3.bf16.msra.mxu1 (!%p13355_p0), %v15360_v60 }
 0x75f   : > { %v13590_v57 = vpop.f32.mrb[20].mxu0  ;;  %v13612_v24 = vpop.f32.mrb[20].mxu1 }
 0x760   : > { %v13591_v3 = vpop.f32.mrb[21].mxu0  ;;  %v13613_v62 = vpop.f32.mrb[21].mxu1 }
 0x761   : > { %v13592_v8 = vadd.f32 %v13591_v3, %v13590_v57  ;;  %v13593_v5 = vpop.f32.mrb[22].mxu0  ;;  %v13614_v6 = vadd.f32 %v13613_v62, %v13612_v24  ;;  %v13615_v7 = vpop.f32.mrb[22].mxu1  ;;  %v15361_v57 = vld [vmem:[%s17944_s15 + $0x78] sm:$0xff] (!%p13355_p0)   ;;  %v10929_v24 = vsub.s32 (!%p13355_p0), 2, %v17994_v28  ;;  %v10933_v62 = vsub.s32 (!%p13355_p0), 3, %v17994_v28 }
 0x762   : > { %v13594_v12 = vpop.f32.mrb[23].mxu0  ;;  %v13616_v22 = vpop.f32.mrb[23].mxu1  ;;  %v15362_v3 = vld [vmem:[%s17944_s15 + $0xf8] sm:$0xff] (!%p13355_p0)   ;;  %13685 = vmatprep.subr.bf16.mxu0 (!%p13355_p0), %v15361_v57 }
 0x763   : > { %v10711_v11 = vadd.f32 %v13592_v8, %v10671_v61  ;;  %v10925_v61 = vsub.s32 (!%p13355_p0), 1, %v17994_v28  ;;  %v15363_v8 = vld [vmem:[%s17944_s15 + $0x38] sm:$0xff] (!%p13355_p0)   ;;  %13707 = vmatprep.subr.bf16.mxu1 (!%p13355_p0), %v15362_v3 }
 0x764   : > { %v15364_v5 = vld [vmem:[%s17944_s15 + $0xb8] sm:$0xff] (!%p13355_p0)   ;;  %13686 = vmatpush3.bf16.msra.mxu0 (!%p13355_p0), %v15363_v8 }
 0x765   : > { %v10751_v34 = vadd.f32 %v13614_v6, %v10711_v11  ;;  %v10917_v6 = vld [vmem:[%s2671_s29] sm:$0x1f] (!%p13355_p0)  ;;  %13708 = vmatpush3.bf16.msra.mxu1 (!%p13355_p0), %v15364_v5 }
 0x766   : > { %v10922_v7 = vrot.slane (!%p13355_p0), %v10917_v6, %v10921_v10  ;;  %v10926_v12 = vrot.slane (!%p13355_p0), %v10917_v6, %v10925_v61  ;;  %v10930_v22 = vrot.slane (!%p13355_p0), %v10917_v6, %v10929_v24  ;;  %v10934_v11 = vrot.slane (!%p13355_p0), %v10917_v6, %v10933_v62 }
 0x77f   : > { %v13634_v13 = vpop.f32.mrb[24].mxu0  ;;  %v13656_v14 = vpop.f32.mrb[24].mxu1 }
 0x780   : > { %v13635_v15 = vpop.f32.mrb[25].mxu0  ;;  %v13657_v16 = vpop.f32.mrb[25].mxu1 }
 0x781   : > { %v13636_v20 = vadd.f32 %v13635_v15, %v13634_v13  ;;  %v13637_v21 = vpop.f32.mrb[26].mxu0  ;;  %v13658_v1 = vadd.f32 %v13657_v16, %v13656_v14  ;;  %v13659_v47 = vpop.f32.mrb[26].mxu1  ;;  %v10939_v13 = vcombine.low (!%p13355_p0), %v10922_v7, %v10926_v12  ;;  %v10940_v14 = vcombine.low (!%p13355_p0), %v10930_v22, %v10934_v11 }
 0x782   : > { %v13638_v37 = vpop.f32.mrb[27].mxu0  ;;  %v13660_v23 = vpop.f32.mrb[27].mxu1 }
 0x783   : > { %v10791_v45 = vadd.f32 %v13636_v20, %v10751_v34  ;;  %v15437_v34 = vmov (!%p13355_p0), 0.0   ;;  %v10947_v15 = vrot.slane (!%p13355_p0), %v10939_v13, %v19165_v0  ;;  %v10954_v16 = vrot.slane (!%p13355_p0), %v10940_v14, %v19165_v0  ;;  %v10915_v20 = vld [vmem:[#allocation2] sm:$0xff] (!%p13355_p0) }
 0x784   : > { %13744 = vmatprep.subr.bf16.mxu0 (!%p13355_p0), %v15437_v34 }
 0x785   : > { %v10831_v2 = vadd.f32 %v13658_v1, %v10791_v45  ;;  %v10955_v21 = vcombine.low (!%p13355_p0), %v10947_v15, %v10954_v16 }
 0x787   : > { %v10965_v1 = vadd.f32 (!%p13355_p0), %v10955_v21, %v10915_v20 }
 0x789   : > { %v10967_v47 = vmax.f32 (!%p13355_p0), %v10965_v1, 0.0 }
 0x78b   : > { %v10978_v37 = vrot.slane (!%p13355_p0), %v10967_v47, %v19165_v0  ;;  %v10971_v23 = vcombine.high (!%p13355_p0), %v10967_v47, %v10967_v47 }
 0x78d   : > { %v10986_v45 = vcombine.high (!%p13355_p0), %v10978_v37, %v10978_v37 }
 0x79f   : > { %v10870_v9 = vpop.f32.mrb[28].mxu0 }
 0x7a0   : > { %v10871_v32 = vadd.f32 %v10870_v9, %v10831_v2  ;;  %v13742_v40 = vpop.f32.mrb[29].mxu0  ;;  %10914 = sbr.rel (%p13355_p0) target bundleno = 2204 (0x89c), region = 70  ;;  %v10985_v2 = vrot.slane (!%p13355_p0), %v10971_v23, %v19165_v0  ;;  %v11000_v9 = vpack.c.bf16 (!%p13355_p0), %v10978_v37, %v10978_v37 }
 0x7a1   : > { %v10873_v55 = vpop.f32.mrb[30].mxu0 }
 0x7a2   : > { %v10904_v26 = vrot.slane %v10871_v32, %v19165_v0  ;;  %v13743_v27 = vpop.f32.mrb[31].mxu0  ;;  %v11001_v32 = vpack.c.bf16 (!%p13355_p0), %v10986_v45, %v10986_v45  ;;  %v10987_v40 = vcombine.high (!%p13355_p0), %v10985_v2, %v10985_v2  ;;  %v11002_v55 = vpack.c.bf16 (!%p13355_p0), %v10985_v2, %v10985_v2 }
 0x7a3   : > { %v15366_v27 = vld [vmem:[%s17944_s15 + $0x108] sm:$0xff] (!%p13355_p0)  }
 0x7a4   : > { %v10908_v29 = vadd.f32 %v10904_v26, %v2692_v17  ;;  %v15365_v17 = vld [vmem:[%s17944_s15 + $0x100] sm:$0xff] (!%p13355_p0)   ;;  %11357 = vmatprep.mubr.bf16.mxu0 (!%p13355_p0), %v11001_v32  ;;  %v11003_v26 = vpack.c.bf16 (!%p13355_p0), %v10987_v40, %v10987_v40 }
 0x7a5   : > { %11358 = vmatmul.mubr.bf16.vlgmr.msra.gmra.mrb[0].mxu0 (!%p13355_p0), %v11000_v9 }
 0x7a6   : > { %10910 = vst [vmem:[#allocation2 + $0x8] sm:$0x3] %v10908_v29  ;;  %11397 = vmatprep.mubr.bf16.mxu1 (!%p13355_p0), %v11003_v26  ;;  %13745 = vmatpush3.bf16.msra.mxu0 (!%p13355_p0), %v15365_v17  ;;  %v10937_v29 = vsub.s32 (!%p13355_p0), 4, %v17994_v28 }
 0x7a7   : > { %11398 = vmatmul.mubr.bf16.vlgmr.msra.gmra.mrb[0].mxu1 %v11002_v55  ;;  %13746 = vmatprep.subr.bf16.mxu0 %v15437_v34 }
 0x7a8   : > { %13760 = vmatprep.mubr.msk.bf16.mxu0 %vm15438_vm1, %v15437_v34  ;;  %v10938_v39 = vrot.slane %v10917_v6, %v10937_v29 }
 0x7aa   : > { %13747 = vmatpush3.bf16.msra.mxu0 %v15366_v27  ;;  %v10962_v59 = vrot.slane %v10938_v39, %v19165_v0 }
 0x7ab   : > { %13748 = vmatprep.subr.bf16.mxu0 %v15437_v34 }
 0x7ad   : > { %v10916_v35 = vld [vmem:[#allocation2 + $0x8] sm:$0x3] }
 0x7ae   : > { %13749 = vmatpush3.bf16.msra.mxu0 %v15367_v63  ;;  %v10966_v38 = vadd.f32 %v10962_v59, %v10916_v35 }
 0x7af   : > { %13750 = vmatprep.subr.bf16.mxu0 %v15437_v34 }
 0x7b0   : > { %v10968_v28 = vmax.f32 %v10966_v38, 0.0 }
 0x7b2   : > { %13751 = vmatpush3.bf16.msra.mxu0 %v15368_v4  ;;  %v10994_v42 = vrot.slane %v10968_v28, %v19165_v0 }
 0x7b3   : > { %13752 = vmatprep.subr.bf16.mxu0 %v15437_v34 }
 0x7b4   : > { %v11004_v44 = vpack.c.bf16 %v10994_v42, %v10994_v42 }
 0x7b6   : > { %13753 = vmatpush3.bf16.msra.mxu0 %v15369_v33 }
 0x7b7   : > { %13754 = vmatprep.subr.bf16.mxu0 %v15437_v34 }
 0x7ba   : > { %13755 = vmatpush3.bf16.msra.mxu0 %v15370_v48 }
 0x7bb   : > { %13756 = vmatprep.subr.bf16.mxu0 %v15437_v34 }
 0x7be   : > { %13757 = vmatpush3.bf16.msra.mxu0 %v15371_v41 }
 0x7bf   : > { %13758 = vmatprep.subr.bf16.mxu0 %v15437_v34 }
 0x7c2   : > { %13759 = vmatpush3.bf16.msra.mxu0 %v15372_v43 }
 0x7c5   : > { %13761 = vmatmul.mubr.bf16.vlgmr.msra.gmra.mrb[4].mxu0 %v11004_v44 }
 0x878   : > { %v13687_v18 = vpop.f32.mrb[0].mxu0 }
 0x879   : > { %v13688_v30 = vpop.f32.mrb[1].mxu0 }
 0x87a   : > { %v13709_v46 = vpop.f32.mrb[0].mxu1  ;;  %v13689_v49 = vadd.f32 %v13688_v30, %v13687_v18  ;;  %v13690_v50 = vpop.f32.mrb[2].mxu0 }
 0x87b   : > { %v13710_v36 = vpop.f32.mrb[1].mxu1  ;;  %v13691_v52 = vpop.f32.mrb[3].mxu0 }
 0x87c   : > { %v13711_v51 = vadd.f32 %v13710_v36, %v13709_v46  ;;  %v13712_v53 = vpop.f32.mrb[2].mxu1 }
 0x87d   : > { %v13713_v54 = vpop.f32.mrb[3].mxu1 }
 0x87e   : > { %v11400_v56 = vadd.f32 %v13711_v51, %v13689_v49 }
 0x898   : > { %v11439_v58 = vpop.f32.mrb[4].mxu0 }
 0x899   : > { %v11440_v0 = vadd.f32 %v11439_v58, %v11400_v56  ;;  %v13762_v25 = vpop.f32.mrb[5].mxu0 }
 0x89a   : > { %v11442_v19 = vpop.f32.mrb[6].mxu0 }
 0x89b   : > { %11445 = vst [vmem:[%s17949_s10] sm:$0x3] %v11440_v0  ;;  %v13763_v31 = vpop.f32.mrb[7].mxu0 }
 0x89c PF: > { %s14_s21 = sadd.s32 1, %s15429_s21   ;;  %s19257_s15 = smov %s15409_s16 }
 0x89d   : > { %p11_p1 = scmp.ge.s32.totalorder %s14_s21, 6   ;;  %s19258_s16 = smov %s15515_s28 }
 0x89e   : > { %s19259_s17 = smov %s15421_s19  ;;  %s19260_s18 = smov %s15425_s20 }
 0x89f   : > { %s19261_s19 = smov %s19264_s22  ;;  %s19262_s20 = smov %s19268_s23 }
 0x8a0   :  { %13 = sbr.rel (!%p11_p1) target bundleno = 4 (0x4), region = 118 }

</bundles_post_ra>
